<compile_context>
chip_gen: v7x
topology: tpu7x:2x2x1
jax: 0.10.0
libtpu: 0.0.40
codegen_flags: <defaults>
</compile_context>

<pallas_src>
import jax
import jax.numpy as jnp
from jax.experimental import pallas as pl
from jax.experimental.pallas import tpu as pltpu

ROW_CHUNK = 8  # one f32 sublane group per inner iteration


def aeg_kernel(data_ref, diff_ref, out_ref):
    # data_ref: (TN, I)   diff_ref: (O, I)   out_ref: (TN, O)
    diff = diff_ref[...]                                        # (O, I) f32
    n_chunks = data_ref.shape[0] // ROW_CHUNK

    def body(c, carry):
        r0 = pl.multiple_of(c * ROW_CHUNK, ROW_CHUNK)
        d = data_ref[pl.ds(r0, ROW_CHUNK), :].astype(jnp.float32)   # (RC, I)
        sig = jax.nn.sigmoid(d)                                     # (RC, I)
        err = diff[None, :, :] * sig[:, None, :]                    # (RC, O, I)
        z = jax.lax.rsqrt(err * err + 1e-7)                         # one EUP pass

        # numerically-stable softmax over the O axis with the normalisation
        # folded into a 2-D weight (no 3-D divide, no `expect` tensor).
        m = jnp.max(z, axis=1, keepdims=True)                       # (RC, 1, I)
        e = jnp.exp(z - m)                                          # (RC, O, I)
        s = jnp.sum(e, axis=1)                                      # (RC, I)
        w = d / s                                                   # exact recip, 2-D only
        out = jnp.sum(e * w[:, None, :], axis=2)                    # (RC, O)
        out_ref[pl.ds(r0, ROW_CHUNK), :] = out.astype(out_ref.dtype)
        return carry

    jax.lax.fori_loop(0, n_chunks, body, 0, unroll=True)


def aeg_forward(data, params, input_size, output_size, tn=64):
    """Pallas implementation of AEGNet.forward."""
    shape = data.shape
    x = data.reshape(-1, input_size)                                # (N, I)
    n = x.shape[0]

    # Hoist the grid-invariant parameter algebra (IEEE-exact ops, identical
    # numerics to computing it in-kernel).  Each param is (1, O, I).
    ix, iy, ox, oy, la, lm = [
        p.reshape(output_size, input_size).astype(jnp.float32) for p in params
    ]
    diff = (ix / iy + la) * (1.0 + lm) - ox / oy                    # (O, I)

    # Row tile: multiple of ROW_CHUNK, clamped to the (8-padded) row count.
    n_pad8 = -(-n // ROW_CHUNK) * ROW_CHUNK
    tn = max(ROW_CHUNK, min(-(-tn // ROW_CHUNK) * ROW_CHUNK, n_pad8))
    n_pad = -(-n // tn) * tn
    if n_pad != n:                                                  # remainder handling
        x = jnp.pad(x, ((0, n_pad - n), (0, 0)))

    data_spec = pl.BlockSpec((tn, input_size), lambda i: (i, 0))
    diff_spec = pl.BlockSpec((output_size, input_size), lambda i: (0, 0))
    out_spec = pl.BlockSpec((tn, output_size), lambda i: (i, 0))

    out = pl.pallas_call(
        aeg_kernel,
        out_shape=jax.ShapeDtypeStruct((n_pad, output_size), data.dtype),
        grid_spec=pl.GridSpec(
            grid=(n_pad // tn,),
            in_specs=[data_spec, diff_spec],
            out_specs=out_spec,
        ),
        compiler_params=pltpu.CompilerParams(
            dimension_semantics=("parallel",)),
    )(x, diff)

    # Sum over I gives (N, O); view back to the original shape (requires
    # output_size == input_size, exactly as the PyTorch `view(*shape)`).
    return out[:n].reshape(shape)


def aeg_ref(data, params, input_size, output_size):
    """Pure-JAX reference mirroring the PyTorch forward.

    lax.rsqrt(x) is mathematically identical to PyTorch's 1/sqrt(x).
    """
    shape = data.shape
    d = data.reshape(-1, 1, input_size)
    ix, iy, ox, oy, la, lm = params                                 # each (1, O, I)
    inp = ix / iy
    outp = ox / oy
    tests = (inp + la) * (1.0 + lm)
    error = (tests - outp) * jax.nn.sigmoid(d)
    z = jax.lax.rsqrt(error * error + 1e-7)
    soft = jax.nn.softmax(z, axis=1)
    expect = d * soft
    return jnp.sum(expect, axis=2).reshape(shape)


def init_params(key, input_size, output_size):
    """Deterministic init matching the PyTorch __init__ distributions."""
    k1, k2, k3, k4, k5 = jax.random.split(key, 5)
    shp = (1, output_size, input_size)
    input_x = 2.0 * jax.random.uniform(k1, shp, jnp.float32) - 1.0
    input_y = jax.random.uniform(k2, shp, jnp.float32) + 0.1
    output_x = 2.0 * jax.random.uniform(k3, shp, jnp.float32) - 1.0
    output_y = jnp.ones(shp, jnp.float32) + 0.1
    linkage_add = jax.random.uniform(k4, shp, jnp.float32)
    linkage_mul = jax.random.uniform(k5, shp, jnp.float32)
    return (input_x, input_y, output_x, output_y, linkage_add, linkage_mul)


if __name__ == "__main__":
    INPUT_SIZE = 128
    OUTPUT_SIZE = 128   # must equal INPUT_SIZE for the final view(*shape)

    key = jax.random.PRNGKey(0)
    kp, kd = jax.random.split(key)
    params = init_params(kp, INPUT_SIZE, OUTPUT_SIZE)

    # data shape (3, 8, 128) -> N = 24 rows; tn=16 exercises both the padded
    # remainder tile (24 -> 32 rows) and a multi-step grid (2 steps).
    data = jax.random.normal(kd, (3, 8, INPUT_SIZE), jnp.float32)

    out = aeg_forward(data, params, INPUT_SIZE, OUTPUT_SIZE, tn=16)
    out = jax.block_until_ready(out)

    ref = aeg_ref(data, params, INPUT_SIZE, OUTPUT_SIZE)
    ref = jax.block_until_ready(ref)

    assert out.shape == data.shape
    # Tolerance accounts for Mosaic-vs-XLA transcendental lowering differences
    # (rsqrt / sigmoid / exp) amplified through the softmax; any structural bug
    # produces errors orders of magnitude larger.
    assert jnp.allclose(out, ref, atol=1e-3, rtol=1e-3), "mismatch vs reference"
    print("KERNEL_OK")
</pallas_src>

<mosaic_0001>
module attributes {stable_mosaic.version = 11 : i64} {
  func.func @aeg_kernel(%arg0: i32, %arg1: memref<16x128xf32, #tpu.memory_space<vmem>>, %arg2: memref<128x128xf32, #tpu.memory_space<vmem>>, %arg3: memref<16x128xf32, #tpu.memory_space<vmem>>) attributes {dimension_semantics = [#tpu.dimension_semantics<parallel>], iteration_bounds = array<i64: 2>, scalar_prefetch = 0 : i64, scratch_operands = 0 : i64, tpu.core_type = #tpu.core_type<tc>, window_params = [{transform_indices = @transform_0, window_bounds = array<i64: 16, 128>}, {pipeline_mode = #tpu.pipeline_mode<synchronous>, transform_indices = @transform_1, window_bounds = array<i64: 128, 128>}, {transform_indices = @transform_2, window_bounds = array<i64: 16, 128>}]} {
    %c0 = arith.constant 0 : index
    %c0_0 = arith.constant 0 : index
    %0 = vector.load %arg2[%c0, %c0_0] : memref<128x128xf32, #tpu.memory_space<vmem>>, vector<128x128xf32>
    %c0_i32 = arith.constant 0 : i32
    %c8_i32 = arith.constant 8 : i32
    %1 = arith.muli %c0_i32, %c8_i32 : i32
    %2 = tpu.assume_multiple %1, 8 : i32
    %3 = arith.index_cast %2 : i32 to index
    %c0_1 = arith.constant 0 : index
    %4 = vector.load %arg1[%3, %c0_1] : memref<16x128xf32, #tpu.memory_space<vmem>>, vector<8x128xf32>
    %5 = arith.negf %4 : vector<8x128xf32>
    %6 = math.exp %5 : vector<8x128xf32>
    %cst = arith.constant 1.000000e+00 : f32
    %7 = vector.broadcast %cst : f32 to vector<8x128xf32>
    %8 = arith.addf %7, %6 : vector<8x128xf32>
    %9 = arith.divf %7, %8 : vector<8x128xf32>
    %10 = vector.shape_cast %0 : vector<128x128xf32> to vector<1x128x128xf32>
    %11 = vector.shape_cast %9 : vector<8x128xf32> to vector<8x1x128xf32>
    %12 = vector.broadcast %10 : vector<1x128x128xf32> to vector<8x128x128xf32>
    %13 = vector.broadcast %11 : vector<8x1x128xf32> to vector<8x128x128xf32>
    %14 = arith.mulf %12, %13 : vector<8x128x128xf32>
    %15 = arith.mulf %14, %14 : vector<8x128x128xf32>
    %cst_2 = arith.constant 1.000000e-07 : f32
    %16 = vector.broadcast %cst_2 : f32 to vector<8x128x128xf32>
    %17 = arith.addf %15, %16 : vector<8x128x128xf32>
    %18 = math.rsqrt %17 : vector<8x128x128xf32>
    %cst_3 = arith.constant dense<0xFF800000> : vector<8x128xf32>
    %19 = vector.multi_reduction <maximumf>, %18, %cst_3 [1] : vector<8x128x128xf32> to vector<8x128xf32>
    %20 = vector.shape_cast %19 : vector<8x128xf32> to vector<8x1x128xf32>
    %21 = vector.broadcast %20 : vector<8x1x128xf32> to vector<8x128x128xf32>
    %22 = arith.subf %18, %21 : vector<8x128x128xf32>
    %23 = math.exp %22 : vector<8x128x128xf32>
    %cst_4 = arith.constant dense<0.000000e+00> : vector<8x128xf32>
    %24 = vector.multi_reduction <add>, %23, %cst_4 [1] : vector<8x128x128xf32> to vector<8x128xf32>
    %25 = arith.divf %4, %24 : vector<8x128xf32>
    %26 = vector.shape_cast %25 : vector<8x128xf32> to vector<8x1x128xf32>
    %27 = vector.broadcast %26 : vector<8x1x128xf32> to vector<8x128x128xf32>
    %28 = arith.mulf %23, %27 : vector<8x128x128xf32>
    %cst_5 = arith.constant dense<0.000000e+00> : vector<8x128xf32>
    %29 = vector.multi_reduction <add>, %28, %cst_5 [2] : vector<8x128x128xf32> to vector<8x128xf32>
    %30 = arith.index_cast %2 : i32 to index
    %c0_6 = arith.constant 0 : index
    %31 = vector.load %arg3[%30, %c0_6] : memref<16x128xf32, #tpu.memory_space<vmem>>, vector<8x128xf32>
    tpu.vector_store %arg3[%30, %c0_6], %29 {strides = array<i32>} : memref<16x128xf32, #tpu.memory_space<vmem>>, vector<8x128xf32>,
    %c1_i32 = arith.constant 1 : i32
    %c8_i32_7 = arith.constant 8 : i32
    %32 = arith.muli %c1_i32, %c8_i32_7 : i32
    %33 = tpu.assume_multiple %32, 8 : i32
    %34 = arith.index_cast %33 : i32 to index
    %c0_8 = arith.constant 0 : index
    %35 = vector.load %arg1[%34, %c0_8] : memref<16x128xf32, #tpu.memory_space<vmem>>, vector<8x128xf32>
    %36 = arith.negf %35 : vector<8x128xf32>
    %37 = math.exp %36 : vector<8x128xf32>
    %cst_9 = arith.constant 1.000000e+00 : f32
    %38 = vector.broadcast %cst_9 : f32 to vector<8x128xf32>
    %39 = arith.addf %38, %37 : vector<8x128xf32>
    %40 = arith.divf %38, %39 : vector<8x128xf32>
    %41 = vector.shape_cast %0 : vector<128x128xf32> to vector<1x128x128xf32>
    %42 = vector.shape_cast %40 : vector<8x128xf32> to vector<8x1x128xf32>
    %43 = vector.broadcast %41 : vector<1x128x128xf32> to vector<8x128x128xf32>
    %44 = vector.broadcast %42 : vector<8x1x128xf32> to vector<8x128x128xf32>
    %45 = arith.mulf %43, %44 : vector<8x128x128xf32>
    %46 = arith.mulf %45, %45 : vector<8x128x128xf32>
    %cst_10 = arith.constant 1.000000e-07 : f32
    %47 = vector.broadcast %cst_10 : f32 to vector<8x128x128xf32>
    %48 = arith.addf %46, %47 : vector<8x128x128xf32>
    %49 = math.rsqrt %48 : vector<8x128x128xf32>
    %cst_11 = arith.constant dense<0xFF800000> : vector<8x128xf32>
    %50 = vector.multi_reduction <maximumf>, %49, %cst_11 [1] : vector<8x128x128xf32> to vector<8x128xf32>
    %51 = vector.shape_cast %50 : vector<8x128xf32> to vector<8x1x128xf32>
    %52 = vector.broadcast %51 : vector<8x1x128xf32> to vector<8x128x128xf32>
    %53 = arith.subf %49, %52 : vector<8x128x128xf32>
    %54 = math.exp %53 : vector<8x128x128xf32>
    %cst_12 = arith.constant dense<0.000000e+00> : vector<8x128xf32>
    %55 = vector.multi_reduction <add>, %54, %cst_12 [1] : vector<8x128x128xf32> to vector<8x128xf32>
    %56 = arith.divf %35, %55 : vector<8x128xf32>
    %57 = vector.shape_cast %56 : vector<8x128xf32> to vector<8x1x128xf32>
    %58 = vector.broadcast %57 : vector<8x1x128xf32> to vector<8x128x128xf32>
    %59 = arith.mulf %54, %58 : vector<8x128x128xf32>
    %cst_13 = arith.constant dense<0.000000e+00> : vector<8x128xf32>
    %60 = vector.multi_reduction <add>, %59, %cst_13 [2] : vector<8x128x128xf32> to vector<8x128xf32>
    %61 = arith.index_cast %33 : i32 to index
    %c0_14 = arith.constant 0 : index
    %62 = vector.load %arg3[%61, %c0_14] : memref<16x128xf32, #tpu.memory_space<vmem>>, vector<8x128xf32>
    tpu.vector_store %arg3[%61, %c0_14], %60 {strides = array<i32>} : memref<16x128xf32, #tpu.memory_space<vmem>>, vector<8x128xf32>,
    %c2_i32 = arith.constant 2 : i32
    return
  }
  func.func @transform_0(%arg0: i32) -> (i32, i32) {
    %c0_i32 = arith.constant 0 : i32
    %c0_i32_0 = arith.constant 0 : i32
    return %arg0, %c0_i32 : i32, i32
  }
  func.func @transform_1(%arg0: i32) -> (i32, i32) {
    %c0_i32 = arith.constant 0 : i32
    %c0_i32_0 = arith.constant 0 : i32
    %c0_i32_1 = arith.constant 0 : i32
    return %c0_i32, %c0_i32_0 : i32, i32
  }
  func.func @transform_2(%arg0: i32) -> (i32, i32) {
    %c0_i32 = arith.constant 0 : i32
    %c0_i32_0 = arith.constant 0 : i32
    return %arg0, %c0_i32 : i32, i32
  }
}

</mosaic_0001>

<bundles_post_ra>
// kernel: tpu_custom_call.1
= control target key start
LH: loop header
LB: loop body
LE: loop exit
PB: predicated region body
PF: predicated region fallthrough
CT: control target
= control target key end

     0   :  { %7 = vsyncpa [#allocation3], 0  ;;  %s14096_s0 = inlined_call_operand.hbm [shape: f32[32,128], index: 0, kind: input, shape index: {}]   ;;  %s14097_s1 = inlined_call_operand.hbm [shape: f32[128,128], index: 1, kind: input, shape index: {}]   ;;  %s14098_s2 = inlined_call_operand.hbm [shape: f32[32,128], index: 2, kind: output, shape index: {}]  }
   0x1   :  { %9 = vsyncpa [#allocation3 + $0x1], 0 }
   0x2   :  { %10 = vsyncpa [#allocation6], 0 }
   0x3   :  { %11 = vsyncpa [#allocation4], 0 }
   0x4   :  { %13 = vsyncpa [#allocation4 + $0x1], 0  ;;  %s6804_s9 = smov 0   ;;  %s6806_s10 = smov 0  }
   0x5   :  { %s6808_s11 = smov 0   ;;  %s6810_s12 = smov 0  }
   0x6 LB: > { %s6825_s13 = sadd.s32 4294967295, %s6779_s12   ;;  %s5513_s14 = sadd.s32 4294967294, %s6779_s12   ;;  %s6779_s12 = sphi %s6810_s12, %s17017_s12   ;;  %s6775_s11 = sphi %s6808_s11, %s17016_s11   ;;  %s6771_s10 = sphi %s6806_s10, %s17015_s10   ;;  %s6767_s9 = sphi %s6804_s9, %s17014_s9  }
   0x7   : > { %p39_p0 = scmp.ne.s32.totalorder %s6771_s10, %s6767_s9  ;;  %p14099_p1 = scmp.eq.s32.totalorder %s6825_s13, 0 }
   0x8   : > { %p90_p3 = scmp.eq.s32.totalorder %s5513_s14, 1  ;;  %p5514_p5 = scmp.ge.s32.totalorder %s6779_s12, 1 }
   0x9   : > { %p6834_p4 = por %p14099_p1, %p39_p0  ;;  %p97_p7 = scmp.lt.s32.totalorder %s6779_s12, 3 }
   0xa   : > { %p6839_p6 = por %p90_p3, %p39_p0  ;;  %s6781_s18 = smov [#allocation5]  }
   0xb   : > { %s14781_s15 = scalar_select %p6834_p4, 1, 0 }
   0xc   : > { %s14782_s16 = scalar_select %p6839_p6, 1, 0 }
   0xd   : > { %p6844_p8 = pnand %p5514_p5, %p97_p7  ;;  %s109_s19 = sshll.u32 %s6781_s18, 4  ;;  %s6848_s19 = int_to_ptr.vmem [resolvable:$true] %s109_s19 }
   0xe   : > { %s6860_s21 = sadd.s32 1, %s6779_s12   ;;  %s26_s22 = sadd.s32 1, %s6775_s11 }
   0xf   : > { %s14783_s17 = scalar_select %p6844_p8, 1, 0 }
  0x10   : > { %p5543_p9 = pneg %p6844_p8  ;;  %s23_s23 = ssub.s32 %s6779_s12, %s6860_s21 }
  0x11   : > { %s6651_s26 = scalar_lea.hbm %s14097_s1, 2048 }
  0x12   : > { %p6855_p11 = pnand %p5543_p9, %p14099_p1  ;;  %p6652_p12 = scmp.ne.s32.totalorder %s14097_s1, %s6651_s26 }
  0x13   : > { %p6658_p5 = scmp.lt.u32.totalorder %s6651_s26, %s14097_s1 }
  0x14   : > { %p6653_p13 = pneg %p6855_p11 }
  0x16   : > { %p6654_p0 = pnand %p6653_p13, %p6652_p12 }
  0x18   : > { %p6655_p3 = pneg %p6654_p0 }
  0x1a   : > { %p6660_p7 = pnand %p6658_p5, %p6655_p3 }
  0x1c   : > { %6663 = shalt.err (!%p6660_p7)
}
  0x1d   : > { %s6664_s3 = scalar_lea.vmem %s6848_s19, 2048  ;;  %p6672_p2 = scmp.lt.s32.totalorder %s6848_s19, %s6848_s19 }
  0x1e   : > { %p6665_p9 = scmp.ne.s32.totalorder %s6848_s19, %s6664_s3  ;;  %p6673_p6 = scmp.lt.s32.totalorder %s6664_s3, %s6664_s3 }
  0x20   : > { %p6667_p10 = pnand %p6665_p9, %p6653_p13  ;;  %p6674_p4 = por %p6673_p6, %p6672_p2 }
  0x22   : > { %p6668_p1 = pneg %p6667_p10 }
  0x24   : > { %p6675_p8 = pnand %p6674_p4, %p6668_p1 }
  0x26   : > { %6678 = shalt.err (!%p6675_p8)
}
  0x27   : > { %s6782_s4 = smov 128   ;;  %s6783_s5 = smov 8  }
  0x28   : > { %5546 = dma.hbm_to_vmem [thread:$0]  (!%p6855_p11), %s14097_s1, 2048, %s6848_s19, [#allocation6], %s6782_s4, %s6782_s4, %s6783_s5  }
  0x29   : > { %p24_p1 = scmp.eq.s32.totalorder %s23_s23, 0  ;;  %p33_p2 = scmp.ne.s32.totalorder %s6775_s11, %s6771_s10 }
  0x2a   : > { %p34_p4 = scmp.eq.s32.totalorder %s6779_s12, 0  ;;  %p5556_p6 = scmp.lt.s32.totalorder %s6779_s12, 2 }
  0x2b   : > { %s6894_s8 = scalar_select %p24_p1, %s6775_s11, %s26_s22  }
  0x2c   : > { %p35_p8 = por %p34_p4, %p33_p2  ;;  %p14785_p10 = scmp.eq.s32.totalorder %s6825_s13, 1 }
  0x2d   : > { %s123_s18 = sand.u32 1, %s6775_s11   ;;  %s5533_s20 = sshll.u32 %s6779_s12, 8 }
  0x2e   : > { %p6898_p12 = por %p14785_p10, %p33_p2  ;;  %s5517_s24 = sshll.u32 %s123_s18, 4 }
  0x2f   : > { %s6907_s27 = scalar_lea.hbm %s14096_s0, %s5533_s20  ;;  %s127_s19 = scalar_lea.vmem [#allocation2], %s5517_s24 }
  0x30   : > { %s134_s22 = sshll.u32 %s127_s19, 4  ;;  %p6909_p11 = pnand %p5556_p6, %p35_p8  ;;  %s6913_s22 = int_to_ptr.vmem [resolvable:$true] %s134_s22 }
  0x31   : > { %s6915_s28 = scalar_lea.sflag [#allocation3], %s123_s18  ;;  %s6679_s29 = scalar_lea.hbm %s6907_s27, 256 }
  0x32   : > { %p6680_p13 = scmp.ne.s32.totalorder %s6907_s27, %s6679_s29  ;;  %p6681_p0 = pneg %p6909_p11 }
  0x33   : > { %s6684_s6 = scalar_lea.hbm %s14096_s0, 512  ;;  %p6685_p7 = scmp.lt.u32.totalorder %s6907_s27, %s14096_s0 }
  0x34   : > { %p6682_p3 = pnand %p6681_p0, %p6680_p13  ;;  %p6686_p9 = scmp.lt.u32.totalorder %s6684_s6, %s6679_s29 }
  0x35   : > { %p6688_p2 = scmp.lt.u32.totalorder %s6679_s29, %s6907_s27 }
  0x36   : > { %p6683_p5 = pneg %p6682_p3  ;;  %p6687_p1 = por %p6686_p9, %p6685_p7 }
  0x38   : > { %p6689_p4 = por %p6688_p2, %p6687_p1 }
  0x3a   : > { %p6690_p6 = pnand %p6689_p4, %p6683_p5 }
  0x3c   : > { %6693 = shalt.err (!%p6690_p6)
}
  0x3d   : > { %s6694_s18 = scalar_lea.vmem %s6913_s22, 256  ;;  %s6784_s24 = smov [#allocation2]  }
  0x3e   : > { %p6695_p8 = scmp.ne.s32.totalorder %s6913_s22, %s6694_s18  ;;  %s6699_s25 = sshll.u32 %s6784_s24, 4  ;;  %s6700_s25 = int_to_ptr.vmem [resolvable:$false] %s6699_s25 }
  0x3f   : > { %s6701_s26 = scalar_lea.vmem %s6700_s25, 512  ;;  %p6702_p3 = scmp.lt.s32.totalorder %s6913_s22, %s6700_s25 }
  0x40   : > { %p6697_p10 = pnand %p6695_p8, %p6681_p0  ;;  %p6703_p7 = scmp.lt.s32.totalorder %s6701_s26, %s6694_s18 }
  0x42   : > { %p6698_p13 = pneg %p6697_p10  ;;  %p6704_p9 = por %p6703_p7, %p6702_p3 }
  0x44   : > { %p6705_p1 = pnand %p6704_p9, %p6698_p13 }
  0x46   : > { %6708 = shalt.err (!%p6705_p1)
}
  0x47   : > { %5550 = dma.hbm_to_vmem [thread:$0]  (!%p6909_p11), %s6907_s27, 256, %s6913_s22, %s6915_s28, %s6782_s4, %s6782_s4, %s6783_s5  }
  0x48   : > { %p14788_p0 = scmp.ne.s32.totalorder %s14783_s17, 0 }
  0x4a   : > { %146 = sbr.rel (%p14788_p0) target bundleno = 1416 (0x588), region = 28 }
  0x51   : > { %s6949_s19 = sand.u32 1, %s6771_s10   ;;  %p14789_p5 = scmp.ne.s32.totalorder %s14781_s15, 0 }
  0x52   : > { %s5521_s29 = sshll.u32 %s6949_s19, 4  ;;  %s149_s30 = scalar_lea.sflag [#allocation3], %s6949_s19 }
  0x53   : > { %s6955_s23 = scalar_lea.vmem [#allocation2], %s5521_s29 }
  0x54   : > { %6754 = dma.done.wait (%p14789_p5), %s149_s30, 256  }
  0x55   : > { %6756 = vsyncadd (%p14789_p5), %s149_s30, 4294967040  ;;  %p14790_p11 = scmp.eq.s32.totalorder %s6825_s13, 0 }
  0x57   : > { %6758 = dma.done.wait (%p14790_p11), [#allocation6], 2048   ;;  %p14791_p2 = pmov %p14790_p11 }
  0x58   : > { %v195_v0 = vld [vmem:[%s6955_s23] sm:$0xff]  ;;  %v6785_v4 = vmov 1966171168   ;;  %v14102_v6 = vlaneseq  ;;  %v6983_v24 = vld [vmem:[#allocation5 + $0x8] sm:$0xff]  ;;  %v6988_v28 = vld [vmem:[#allocation5 + $0x18] sm:$0xff]  ;;  %vm14776_vm0 = vcmask 1041409  }
  0x59   : > { %6760 = vsyncadd (%p14791_p2), [#allocation6], 4294965248  ;;  %v5524_v1 = vmul.f32 -1.442695, %v195_v0  ;;  %v205_v5 = vunpack.c.l.s4 %v6785_v4  ;;  %v6981_v23 = vld [vmem:[#allocation5] sm:$0xff]  ;;  %v6985_v25 = vld [vmem:[#allocation5 + $0x10] sm:$0xff] }
  0x5a   : > { %v6967_v8 = vshrl.u32 %v14102_v6, 7  ;;  %v6990_v29 = vld [vmem:[#allocation5 + $0x20] sm:$0xff]  ;;  %v6992_v30 = vld [vmem:[#allocation5 + $0x28] sm:$0xff]  ;;  %v6994_v32 = vld [vmem:[#allocation5 + $0x30] sm:$0xff]  ;;  %vm14423_vm1 = vcmask 1042434   ;;  %vm14422_vm2 = vcmask 1043459  }
  0x5b   : > { %5597 = vpow2.f32 %v5524_v1  ;;  %v206_v7 = vunpack.c.0.s8 %v205_v5  ;;  %v6996_v33 = vld [vmem:[#allocation5 + $0x38] sm:$0xff]  ;;  %v6998_v34 = vld [vmem:[#allocation5 + $0x40] sm:$0xff]  ;;  %v7002_v37 = vld [vmem:[#allocation5 + $0x48] sm:$0xff]  ;;  %vm14421_vm3 = vcmask 1044484   ;;  %vm14420_vm4 = vcmask 1045509   ;;  %s13557_s15 = scalar_lea.vmem [#allocation7], %s5521_s29 }
  0x5c   : > { %14792 = vst [vmem:[#allocation11_spill] sm:$0xff] %v6967_v8  ;;  %v6978_v19 = vsub.s32 0, %v6967_v8  ;;  %v7004_v38 = vld [vmem:[#allocation5 + $0x50] sm:$0xff]  ;;  %v7006_v39 = vld [vmem:[#allocation5 + $0x58] sm:$0xff]  ;;  %v7020_v44 = vld [vmem:[#allocation5 + $0x60] sm:$0xff]  ;;  %vm14419_vm5 = vcmask 1046534  }
  0x5d   : > { %v6970_v9 = vsub.s32 %v206_v7, %v6967_v8  ;;  %v7022_v45 = vld [vmem:[#allocation5 + $0x68] sm:$0xff]  ;;  %v7024_v46 = vld [vmem:[#allocation5 + $0x70] sm:$0xff]  ;;  %v7038_v51 = vld [vmem:[#allocation5 + $0x78] sm:$0xff]  ;;  %vm14418_vm6 = vcmask 1047559   ;;  %vm2162_vm7 = vcmask 130112   ;;  %vm2169_vm8 = vcmask 195712  }
  0x5e   : > { %14794 = vst [vmem:[#allocation13_spill] sm:$0xff] %v6978_v19  ;;  %vm2176_vm9 = vcmask 261312   ;;  %vm2183_vm10 = vcmask 326912   ;;  %vm2190_vm11 = vcmask 392512   ;;  %vm2197_vm12 = vcmask 458112   ;;  %s5430_s17 = sshll.u32 %s13557_s15, 4  ;;  %s14043_s17 = int_to_ptr.vmem [resolvable:$true] %s5430_s17 }
  0x5f   : > { %14793 = vst [vmem:[#allocation12_spill] sm:$0xff] %v6970_v9  ;;  %vm2204_vm13 = vcmask 523712   ;;  %vm14780_vm14 = vcmask 589312   ;;  %vm14779_vm15 = vcmask 654912   ;;  %s5534_s4 = sshll.u32 %s6825_s13, 8  ;;  %s5417_s13 = scalar_lea.sflag [#allocation4], %s6949_s19 }
  0x60   : > { %s14049_s22 = scalar_lea.hbm %s14098_s2, %s5534_s4  ;;  %s6709_s28 = scalar_lea.vmem %s14043_s17, 256 }
  0x61   : > { %p6710_p4 = scmp.ne.s32.totalorder %s14043_s17, %s6709_s28  ;;  %s6786_s3 = smov [#allocation7]  }
  0x62   : > { %s6713_s6 = sshll.u32 %s6786_s3, 4  ;;  %s6714_s6 = int_to_ptr.vmem [resolvable:$false] %s6713_s6 }
  0x63   : > { %p6711_p6 = pnand %p6710_p4, %p6898_p12  ;;  %s6715_s7 = scalar_lea.vmem %s6714_s6, 512 }
  0x64   : > { %p6716_p10 = scmp.lt.s32.totalorder %s14043_s17, %s6714_s6  ;;  %p6717_p13 = scmp.lt.s32.totalorder %s6715_s7, %s6709_s28 }
  0x65   : > { %v5598_v2 = vpop.eup %5597  ;;  %p6712_p8 = pneg %p6711_p6 }
  0x66   : > { %v199_v3 = vadd.f32 1.0, %v5598_v2  ;;  %p6718_p3 = por %p6717_p13, %p6716_p10 }
  0x68   : > { %5599 = vrcp.f32 %v199_v3  ;;  %p6719_p7 = pnand %p6718_p3, %p6712_p8 }
  0x72   : > { %v5600_v10 = vpop.eup %5599 }
  0x73   : > { %v203_v11 = vcombine.high %v5600_v10, %v5600_v10  ;;  %v210_v12 = vrot.slane %v5600_v10, %v6970_v9 }
  0x75   : > { %v217_v13 = vrot.slane %v203_v11, %v6970_v9  ;;  %v218_v14 = vcombine.high %v210_v12, %v210_v12  ;;  %v226_v16 = vrot.slane %v210_v12, %v6970_v9 }
  0x77   : > { %v219_v15 = vcombine.high %v217_v13, %v217_v13  ;;  %v240_v17 = vrot.slane %v218_v14, %v6970_v9  ;;  %v233_v18 = vrot.slane %v217_v13, %v6970_v9  ;;  %v248_v21 = vcombine.high %v226_v16, %v226_v16 }
  0x78   : > { %v255_v27 = vrot.slane %v226_v16, %v6978_v19 }
  0x79   : > { %v247_v20 = vrot.slane %v219_v15, %v6970_v9  ;;  %v250_v22 = vcombine.high %v240_v17, %v240_v17  ;;  %v249_v26 = vcombine.high %v233_v18, %v233_v18  ;;  %v259_v35 = vrot.slane %v240_v17, %v6978_v19 }
  0x7a   : > { %v263_v36 = vrot.slane %v248_v21, %v6978_v19  ;;  %v7012_v41 = vrot.slane %v233_v18, %v6978_v19  ;;  %v7015_v42 = vmul.f32 %v255_v27, %v6981_v23  ;;  %v7018_v43 = vmul.f32 %v255_v27, %v6983_v24 }
  0x7b   : > { %v251_v31 = vcombine.high %v247_v20, %v247_v20  ;;  %v7009_v40 = vrot.slane %v250_v22, %v6978_v19  ;;  %v7027_v47 = vrot.slane %v247_v20, %v6978_v19  ;;  %v7030_v48 = vrot.slane %v249_v26, %v6978_v19 }
  0x7c   : > { %v7033_v49 = vmul.f32 %v255_v27, %v6985_v25  ;;  %v7036_v50 = vmul.f32 %v255_v27, %v6988_v28  ;;  %v7044_v53 = vmul.f32 %v255_v27, %v6990_v29  ;;  %v7047_v54 = vmul.f32 %v255_v27, %v6992_v30 }
  0x7d   : > { %v7041_v52 = vrot.slane %v251_v31, %v6978_v19  ;;  %v7050_v55 = vmul.f32 %v255_v27, %v6994_v32  ;;  %v7053_v56 = vmul.f32 %v255_v27, %v6996_v33  ;;  %v7056_v57 = vmul.f32 %v255_v27, %v6998_v34 }
  0x7e   : > { %v7059_v58 = vmul.f32 %v255_v27, %v7002_v37  ;;  %v7062_v59 = vmul.f32 %v255_v27, %v7004_v38  ;;  %v7065_v60 = vmul.f32 %v255_v27, %v7006_v39  ;;  %v7068_v61 = vmul.f32 %v255_v27, %v7020_v44 }
  0x7f   : > { %v7071_v62 = vmul.f32 %v255_v27, %v7022_v45  ;;  %v7074_v63 = vmul.f32 %v255_v27, %v7024_v46  ;;  %v7077_v0 = vmul.f32 %v255_v27, %v7038_v51  ;;  %v7080_v1 = vmul.f32 %v259_v35, %v6981_v23 }
  0x80   : > { %v7083_v2 = vmul.f32 %v259_v35, %v6983_v24  ;;  %v7086_v3 = vmul.f32 %v259_v35, %v6985_v25  ;;  %v7089_v4 = vmul.f32 %v259_v35, %v6988_v28  ;;  %v7092_v5 = vmul.f32 %v259_v35, %v6990_v29 }
  0x81   : > { %v7095_v7 = vmul.f32 %v259_v35, %v6992_v30  ;;  %v7098_v10 = vmul.f32 %v259_v35, %v6994_v32  ;;  %v7101_v11 = vmul.f32 %v259_v35, %v6996_v33  ;;  %v7104_v12 = vmul.f32 %v259_v35, %v6998_v34 }
  0x82   : > { %v7107_v13 = vmul.f32 %v259_v35, %v7002_v37  ;;  %v7110_v14 = vmul.f32 %v259_v35, %v7004_v38  ;;  %v7113_v15 = vmul.f32 %v259_v35, %v7006_v39  ;;  %v7116_v16 = vmul.f32 %v259_v35, %v7020_v44 }
  0x83   : > { %v7119_v17 = vmul.f32 %v259_v35, %v7022_v45  ;;  %v7122_v18 = vmul.f32 %v259_v35, %v7024_v46  ;;  %v7125_v20 = vmul.f32 %v259_v35, %v7038_v51  ;;  %v7128_v21 = vmul.f32 %v263_v36, %v6981_v23 }
  0x84   : > { %v7131_v22 = vmul.f32 %v263_v36, %v6983_v24  ;;  %v7134_v26 = vmul.f32 %v263_v36, %v6985_v25  ;;  %v7137_v27 = vmul.f32 %v263_v36, %v6988_v28  ;;  %v7140_v31 = vmul.f32 %v263_v36, %v6990_v29 }
  0x85   : > { %v7143_v6 = vmul.f32 %v263_v36, %v6992_v30  ;;  %v7146_v35 = vmul.f32 %v263_v36, %v6994_v32  ;;  %v7149_v8 = vmul.f32 %v263_v36, %v6996_v33  ;;  %v7152_v19 = vmul.f32 %v263_v36, %v6998_v34 }
  0x86   : > { %14795 = vst [vmem:[#allocation14_spill] sm:$0xff] %v7137_v27  ;;  %14796 = vst [vmem:[#allocation15_spill] sm:$0xff] %v7140_v31  ;;  %v7155_v9 = vmul.f32 %v263_v36, %v7002_v37  ;;  %v7158_v27 = vmul.f32 %v263_v36, %v7004_v38  ;;  %v7161_v31 = vmul.f32 %v263_v36, %v7006_v39 }
  0x87   : > { %14797 = vst [vmem:[#allocation16_spill] sm:$0xff] %v7143_v6  ;;  %14798 = vst [vmem:[#allocation17_spill] sm:$0xff] %v7146_v35  ;;  %v7164_v6 = vmul.f32 %v263_v36, %v7020_v44  ;;  %v7167_v35 = vmul.f32 %v263_v36, %v7022_v45 }
  0x88   : > { %14799 = vst [vmem:[#allocation18_spill] sm:$0xff] %v7149_v8  ;;  %14800 = vst [vmem:[#allocation19_spill] sm:$0xff] %v7152_v19  ;;  %v7170_v8 = vmul.f32 %v263_v36, %v7024_v46  ;;  %v7173_v19 = vmul.f32 %v263_v36, %v7038_v51  ;;  %v7193_v36 = vmul.f32 %v7009_v40, %v6990_v29 }
  0x89   : > { %14801 = vst [vmem:[#allocation20_spill] sm:$0xff] %v7155_v9  ;;  %14802 = vst [vmem:[#allocation21_spill] sm:$0xff] %v7158_v27  ;;  %v7177_v9 = vmul.f32 %v7009_v40, %v6981_v23  ;;  %v7181_v27 = vmul.f32 %v7009_v40, %v6983_v24 }
  0x8a   : > { %14803 = vst [vmem:[#allocation22_spill] sm:$0xff] %v7164_v6  ;;  %14804 = vst [vmem:[#allocation23_spill] sm:$0xff] %v7167_v35  ;;  %v7185_v6 = vmul.f32 %v7009_v40, %v6985_v25  ;;  %v7189_v35 = vmul.f32 %v7009_v40, %v6988_v28 }
  0x8b   : > { %14805 = vst [vmem:[#allocation24_spill] sm:$0xff] %v7173_v19  ;;  %14806 = vst [vmem:[#allocation25_spill] sm:$0xff] %v7177_v9  ;;  %v7197_v19 = vmul.f32 %v7009_v40, %v6992_v30  ;;  %v7201_v9 = vmul.f32 %v7009_v40, %v6994_v32 }
  0x8c   : > { %14807 = vst [vmem:[#allocation26_spill] sm:$0xff] %v7181_v27  ;;  %14808 = vst [vmem:[#allocation27_spill] sm:$0xff] %v7185_v6  ;;  %v7205_v27 = vmul.f32 %v7009_v40, %v6996_v33  ;;  %v7209_v6 = vmul.f32 %v7009_v40, %v6998_v34 }
  0x8d   : > { %14809 = vst [vmem:[#allocation28_spill] sm:$0xff] %v7189_v35  ;;  %14810 = vst [vmem:[#allocation29_spill] sm:$0xff] %v7193_v36  ;;  %v7213_v35 = vmul.f32 %v7009_v40, %v7002_v37  ;;  %v7217_v36 = vmul.f32 %v7009_v40, %v7004_v38 }
  0x8e   : > { %14811 = vst [vmem:[#allocation30_spill] sm:$0xff] %v7197_v19  ;;  %14812 = vst [vmem:[#allocation31_spill] sm:$0xff] %v7201_v9  ;;  %v7221_v19 = vmul.f32 %v7009_v40, %v7006_v39  ;;  %v7225_v9 = vmul.f32 %v7009_v40, %v7020_v44 }
  0x8f   : > { %14813 = vst [vmem:[#allocation32_spill] sm:$0xff] %v7205_v27  ;;  %14814 = vst [vmem:[#allocation33_spill] sm:$0xff] %v7209_v6  ;;  %v7229_v27 = vmul.f32 %v7009_v40, %v7022_v45  ;;  %v7233_v6 = vmul.f32 %v7009_v40, %v7024_v46 }
  0x90   : > { %14815 = vst [vmem:[#allocation34_spill] sm:$0xff] %v7213_v35  ;;  %14816 = vst [vmem:[#allocation35_spill] sm:$0xff] %v7217_v36  ;;  %v7237_v35 = vmul.f32 %v7009_v40, %v7038_v51  ;;  %v7241_v36 = vmul.f32 %v7012_v41, %v6981_v23  ;;  %v7257_v40 = vmul.f32 %v7012_v41, %v6990_v29 }
  0x91   : > { %14817 = vst [vmem:[#allocation36_spill] sm:$0xff] %v7221_v19  ;;  %14818 = vst [vmem:[#allocation37_spill] sm:$0xff] %v7225_v9  ;;  %v7245_v19 = vmul.f32 %v7012_v41, %v6983_v24  ;;  %v7249_v9 = vmul.f32 %v7012_v41, %v6985_v25 }
  0x92   : > { %14819 = vst [vmem:[#allocation38_spill] sm:$0xff] %v7229_v27  ;;  %14820 = vst [vmem:[#allocation39_spill] sm:$0xff] %v7237_v35  ;;  %v7253_v27 = vmul.f32 %v7012_v41, %v6988_v28  ;;  %v7261_v35 = vmul.f32 %v7012_v41, %v6992_v30 }
  0x93   : > { %14821 = vst [vmem:[#allocation40_spill] sm:$0xff] %v7241_v36  ;;  %14822 = vst [vmem:[#allocation41_spill] sm:$0xff] %v7245_v19  ;;  %v7265_v36 = vmul.f32 %v7012_v41, %v6994_v32  ;;  %v7269_v19 = vmul.f32 %v7012_v41, %v6996_v33 }
  0x94   : > { %14823 = vst [vmem:[#allocation42_spill] sm:$0xff] %v7249_v9  ;;  %14824 = vst [vmem:[#allocation43_spill] sm:$0xff] %v7253_v27  ;;  %v7273_v9 = vmul.f32 %v7012_v41, %v6998_v34  ;;  %v7277_v27 = vmul.f32 %v7012_v41, %v7002_v37 }
  0x95   : > { %14825 = vst [vmem:[#allocation44_spill] sm:$0xff] %v7257_v40  ;;  %14826 = vst [vmem:[#allocation45_spill] sm:$0xff] %v7261_v35  ;;  %v7281_v40 = vmul.f32 %v7012_v41, %v7004_v38  ;;  %v7285_v35 = vmul.f32 %v7012_v41, %v7006_v39 }
  0x96   : > { %14827 = vst [vmem:[#allocation46_spill] sm:$0xff] %v7265_v36  ;;  %14828 = vst [vmem:[#allocation47_spill] sm:$0xff] %v7269_v19  ;;  %v7289_v36 = vmul.f32 %v7012_v41, %v7020_v44  ;;  %v7293_v19 = vmul.f32 %v7012_v41, %v7022_v45 }
  0x97   : > { %14829 = vst [vmem:[#allocation48_spill] sm:$0xff] %v7273_v9  ;;  %14830 = vst [vmem:[#allocation49_spill] sm:$0xff] %v7277_v27  ;;  %v7297_v9 = vmul.f32 %v7012_v41, %v7024_v46  ;;  %v7301_v27 = vmul.f32 %v7012_v41, %v7038_v51  ;;  %v7321_v41 = vmul.f32 %v7027_v47, %v6990_v29 }
  0x98   : > { %14831 = vst [vmem:[#allocation50_spill] sm:$0xff] %v7281_v40  ;;  %14832 = vst [vmem:[#allocation51_spill] sm:$0xff] %v7285_v35  ;;  %v7305_v40 = vmul.f32 %v7027_v47, %v6981_v23  ;;  %v7309_v35 = vmul.f32 %v7027_v47, %v6983_v24 }
  0x99   : > { %14833 = vst [vmem:[#allocation52_spill] sm:$0xff] %v7289_v36  ;;  %14834 = vst [vmem:[#allocation53_spill] sm:$0xff] %v7293_v19  ;;  %v7313_v36 = vmul.f32 %v7027_v47, %v6985_v25  ;;  %v7317_v19 = vmul.f32 %v7027_v47, %v6988_v28 }
  0x9a   : > { %14835 = vst [vmem:[#allocation54_spill] sm:$0xff] %v7301_v27  ;;  %14836 = vst [vmem:[#allocation55_spill] sm:$0xff] %v7305_v40  ;;  %v7325_v27 = vmul.f32 %v7027_v47, %v6992_v30  ;;  %v7329_v40 = vmul.f32 %v7027_v47, %v6994_v32 }
  0x9b   : > { %14837 = vst [vmem:[#allocation56_spill] sm:$0xff] %v7309_v35  ;;  %14838 = vst [vmem:[#allocation57_spill] sm:$0xff] %v7313_v36  ;;  %v7333_v35 = vmul.f32 %v7027_v47, %v6996_v33  ;;  %v7337_v36 = vmul.f32 %v7027_v47, %v6998_v34 }
  0x9c   : > { %14839 = vst [vmem:[#allocation58_spill] sm:$0xff] %v7317_v19  ;;  %14840 = vst [vmem:[#allocation59_spill] sm:$0xff] %v7321_v41  ;;  %v7341_v19 = vmul.f32 %v7027_v47, %v7002_v37  ;;  %v7345_v41 = vmul.f32 %v7027_v47, %v7004_v38 }
  0x9d   : > { %14841 = vst [vmem:[#allocation60_spill] sm:$0xff] %v7325_v27  ;;  %14842 = vst [vmem:[#allocation61_spill] sm:$0xff] %v7329_v40  ;;  %v7349_v27 = vmul.f32 %v7027_v47, %v7006_v39  ;;  %v7353_v40 = vmul.f32 %v7027_v47, %v7020_v44 }
  0x9e   : > { %14843 = vst [vmem:[#allocation62_spill] sm:$0xff] %v7333_v35  ;;  %14844 = vst [vmem:[#allocation63_spill] sm:$0xff] %v7337_v36  ;;  %v7357_v35 = vmul.f32 %v7027_v47, %v7022_v45  ;;  %v7361_v36 = vmul.f32 %v7027_v47, %v7024_v46 }
  0x9f   : > { %14845 = vst [vmem:[#allocation64_spill] sm:$0xff] %v7341_v19  ;;  %14846 = vst [vmem:[#allocation65_spill] sm:$0xff] %v7345_v41  ;;  %v7365_v19 = vmul.f32 %v7027_v47, %v7038_v51  ;;  %v7369_v41 = vmul.f32 %v7030_v48, %v6981_v23  ;;  %v7385_v47 = vmul.f32 %v7030_v48, %v6990_v29 }
  0xa0   : > { %14847 = vst [vmem:[#allocation66_spill] sm:$0xff] %v7349_v27  ;;  %14848 = vst [vmem:[#allocation67_spill] sm:$0xff] %v7353_v40  ;;  %v7373_v27 = vmul.f32 %v7030_v48, %v6983_v24  ;;  %v7377_v40 = vmul.f32 %v7030_v48, %v6985_v25 }
  0xa1   : > { %14849 = vst [vmem:[#allocation68_spill] sm:$0xff] %v7357_v35  ;;  %14850 = vst [vmem:[#allocation69_spill] sm:$0xff] %v7365_v19  ;;  %v7381_v35 = vmul.f32 %v7030_v48, %v6988_v28  ;;  %v7389_v19 = vmul.f32 %v7030_v48, %v6992_v30 }
  0xa2   : > { %14851 = vst [vmem:[#allocation70_spill] sm:$0xff] %v7369_v41  ;;  %14852 = vst [vmem:[#allocation71_spill] sm:$0xff] %v7373_v27  ;;  %v7393_v41 = vmul.f32 %v7030_v48, %v6994_v32  ;;  %v7397_v27 = vmul.f32 %v7030_v48, %v6996_v33 }
  0xa3   : > { %14853 = vst [vmem:[#allocation72_spill] sm:$0xff] %v7377_v40  ;;  %14854 = vst [vmem:[#allocation73_spill] sm:$0xff] %v7381_v35  ;;  %v7401_v40 = vmul.f32 %v7030_v48, %v6998_v34  ;;  %v7405_v35 = vmul.f32 %v7030_v48, %v7002_v37 }
  0xa4   : > { %14855 = vst [vmem:[#allocation74_spill] sm:$0xff] %v7385_v47  ;;  %14856 = vst [vmem:[#allocation75_spill] sm:$0xff] %v7389_v19  ;;  %v7409_v47 = vmul.f32 %v7030_v48, %v7004_v38  ;;  %v7413_v19 = vmul.f32 %v7030_v48, %v7006_v39 }
  0xa5   : > { %14857 = vst [vmem:[#allocation76_spill] sm:$0xff] %v7393_v41  ;;  %14858 = vst [vmem:[#allocation77_spill] sm:$0xff] %v7397_v27  ;;  %v7417_v41 = vmul.f32 %v7030_v48, %v7020_v44  ;;  %v7421_v27 = vmul.f32 %v7030_v48, %v7022_v45 }
  0xa6   : > { %14859 = vst [vmem:[#allocation78_spill] sm:$0xff] %v7401_v40  ;;  %14860 = vst [vmem:[#allocation79_spill] sm:$0xff] %v7405_v35  ;;  %v7425_v40 = vmul.f32 %v7030_v48, %v7024_v46  ;;  %v7429_v35 = vmul.f32 %v7030_v48, %v7038_v51  ;;  %v7449_v48 = vmul.f32 %v7041_v52, %v6990_v29 }
  0xa7   : > { %14861 = vst [vmem:[#allocation80_spill] sm:$0xff] %v7409_v47  ;;  %14862 = vst [vmem:[#allocation81_spill] sm:$0xff] %v7413_v19  ;;  %v7433_v47 = vmul.f32 %v7041_v52, %v6981_v23  ;;  %v7437_v19 = vmul.f32 %v7041_v52, %v6983_v24  ;;  %v7453_v23 = vmul.f32 %v7041_v52, %v6992_v30 }
  0xa8   : > { %14863 = vst [vmem:[#allocation82_spill] sm:$0xff] %v7417_v41  ;;  %14864 = vst [vmem:[#allocation83_spill] sm:$0xff] %v7421_v27  ;;  %v7441_v41 = vmul.f32 %v7041_v52, %v6985_v25  ;;  %v7445_v27 = vmul.f32 %v7041_v52, %v6988_v28  ;;  %v420_v24 = vmul.f32 %v7015_v42, %v7015_v42 }
  0xa9   : > { %14865 = vst [vmem:[#allocation84_spill] sm:$0xff] %v7437_v19  ;;  %14867 = vst [vmem:[#allocation86_spill] sm:$0xff] %v7449_v48  ;;  %v7459_v19 = vmul.f32 %v7041_v52, %v6994_v32  ;;  %v7463_v25 = vmul.f32 %v7041_v52, %v6996_v33  ;;  %v7467_v28 = vmul.f32 %v7041_v52, %v6998_v34 }
  0xaa   : > { %14866 = vst [vmem:[#allocation85_spill] sm:$0xff] %v7445_v27  ;;  %14868 = vst [vmem:[#allocation87_spill] sm:$0xff] %v7453_v23  ;;  %v421_v29 = vmul.f32 %v7018_v43, %v7018_v43  ;;  %v7473_v30 = vmul.f32 %v7041_v52, %v7002_v37  ;;  %v7477_v42 = vmul.f32 %v7041_v52, %v7004_v38  ;;  %v14918_v27 = vld [vmem:[#allocation38_spill] sm:$0xff] }
  0xab   : > { %14869 = vst [vmem:[#allocation88_spill] sm:$0xff] %v7459_v19  ;;  %14870 = vst [vmem:[#allocation89_spill] sm:$0xff] %v7463_v25  ;;  %v7481_v32 = vmul.f32 %v7041_v52, %v7006_v39  ;;  %v422_v33 = vmul.f32 %v7033_v49, %v7033_v49  ;;  %v7487_v34 = vmul.f32 %v7041_v52, %v7020_v44 }
  0xac   : > { %14871 = vst [vmem:[#allocation90_spill] sm:$0xff] %v7467_v28  ;;  %14872 = vst [vmem:[#allocation91_spill] sm:$0xff] %v7473_v30  ;;  %v7491_v43 = vmul.f32 %v7041_v52, %v7022_v45  ;;  %v7495_v37 = vmul.f32 %v7041_v52, %v7024_v46  ;;  %v423_v38 = vmul.f32 %v7036_v50, %v7036_v50  ;;  %v14907_v30 = vld [vmem:[#allocation31_spill] sm:$0xff] }
  0xad   : > { %14873 = vst [vmem:[#allocation92_spill] sm:$0xff] %v7477_v42  ;;  %14874 = vst [vmem:[#allocation93_spill] sm:$0xff] %v7481_v32  ;;  %v7501_v39 = vmul.f32 %v7041_v52, %v7038_v51  ;;  %v424_v49 = vmul.f32 %v7044_v53, %v7044_v53  ;;  %v425_v44 = vmul.f32 %v7047_v54, %v7047_v54  ;;  %v550_v54 = vadd.f32 1e-07, %v422_v33 }
  0xae   : > { %14875 = vst [vmem:[#allocation94_spill] sm:$0xff] %v7487_v34  ;;  %14876 = vst [vmem:[#allocation95_spill] sm:$0xff] %v7491_v43  ;;  %v548_v34 = vadd.f32 1e-07, %v420_v24  ;;  %v426_v45 = vmul.f32 %v7050_v55, %v7050_v55  ;;  %v427_v46 = vmul.f32 %v7053_v56, %v7053_v56  ;;  %v428_v50 = vmul.f32 %v7056_v57, %v7056_v57 }
  0xaf   : > { %14877 = vst [vmem:[#allocation96_spill] sm:$0xff] %v7495_v37  ;;  %14878 = vst [vmem:[#allocation97_spill] sm:$0xff] %v7501_v39  ;;  %v549_v37 = vadd.f32 1e-07, %v421_v29  ;;  %v429_v51 = vmul.f32 %v7059_v58, %v7059_v58  ;;  %v430_v52 = vmul.f32 %v7062_v59, %v7062_v59  ;;  %v431_v53 = vmul.f32 %v7065_v60, %v7065_v60 }
  0xb0   : > { %v432_v55 = vmul.f32 %v7068_v61, %v7068_v61  ;;  %v433_v56 = vmul.f32 %v7071_v62, %v7071_v62  ;;  %v434_v57 = vmul.f32 %v7074_v63, %v7074_v63  ;;  %v551_v24 = vadd.f32 1e-07, %v423_v38 }
  0xb1   : > { %v435_v58 = vmul.f32 %v7077_v0, %v7077_v0  ;;  %v436_v59 = vmul.f32 %v7080_v1, %v7080_v1  ;;  %v552_v29 = vadd.f32 1e-07, %v424_v49  ;;  %5601 = vrsqrt.f32 %v548_v34 }
  0xb2   : > { %v437_v60 = vmul.f32 %v7083_v2, %v7083_v2  ;;  %v438_v61 = vmul.f32 %v7086_v3, %v7086_v3  ;;  %v553_v33 = vadd.f32 1e-07, %v425_v44  ;;  %5603 = vrsqrt.f32 %v549_v37 }
  0xb3   : > { %v439_v62 = vmul.f32 %v7089_v4, %v7089_v4  ;;  %v7537_v63 = vmul.f32 %v7092_v5, %v7092_v5  ;;  %v554_v0 = vadd.f32 1e-07, %v426_v45  ;;  %5605 = vrsqrt.f32 %v550_v54  ;;  %v14884_v54 = vld [vmem:[#allocation17_spill] sm:$0xff] }
  0xb4   : > { %v7541_v1 = vmul.f32 %v7095_v7, %v7095_v7  ;;  %v7545_v2 = vmul.f32 %v7098_v10, %v7098_v10  ;;  %v555_v3 = vadd.f32 1e-07, %v427_v46  ;;  %5607 = vrsqrt.f32 %v551_v24 }
  0xb5   : > { %v7549_v34 = vmul.f32 %v7101_v11, %v7101_v11  ;;  %v7553_v4 = vmul.f32 %v7104_v12, %v7104_v12  ;;  %v556_v5 = vadd.f32 1e-07, %v428_v50  ;;  %5609 = vrsqrt.f32 %v552_v29  ;;  %v14886_v29 = vld [vmem:[#allocation18_spill] sm:$0xff] }
  0xb6   : > { %v7557_v7 = vmul.f32 %v7107_v13, %v7107_v13  ;;  %v7561_v10 = vmul.f32 %v7110_v14, %v7110_v14  ;;  %v557_v37 = vadd.f32 1e-07, %v429_v51  ;;  %5611 = vrsqrt.f32 %v553_v33 }
  0xb7   : > { %v7565_v11 = vmul.f32 %v7113_v15, %v7113_v15  ;;  %v7569_v12 = vmul.f32 %v7116_v16, %v7116_v16  ;;  %v558_v38 = vadd.f32 1e-07, %v430_v52  ;;  %5613 = vrsqrt.f32 %v554_v0 }
  0xb8   : > { %v7573_v13 = vmul.f32 %v7119_v17, %v7119_v17  ;;  %v7577_v14 = vmul.f32 %v7122_v18, %v7122_v18  ;;  %v559_v49 = vadd.f32 1e-07, %v431_v53  ;;  %5615 = vrsqrt.f32 %v555_v3  ;;  %v14883_v53 = vld [vmem:[#allocation16_spill] sm:$0xff] }
  0xb9   : > { %v7581_v15 = vmul.f32 %v7125_v20, %v7125_v20  ;;  %v7585_v16 = vmul.f32 %v7128_v21, %v7128_v21  ;;  %v560_v44 = vadd.f32 1e-07, %v432_v55  ;;  %5617 = vrsqrt.f32 %v556_v5  ;;  %v14880_v20 = vld [vmem:[#allocation14_spill] sm:$0xff]  ;;  %v14881_v21 = vld [vmem:[#allocation15_spill] sm:$0xff] }
  0xba   : > { %v7589_v17 = vmul.f32 %v7131_v22, %v7131_v22  ;;  %v7593_v18 = vmul.f32 %v7134_v26, %v7134_v26  ;;  %v561_v45 = vadd.f32 1e-07, %v433_v56  ;;  %5619 = vrsqrt.f32 %v557_v37  ;;  %v14889_v37 = vld [vmem:[#allocation20_spill] sm:$0xff] }
  0xbb   : > { %v7595_v46 = vpop.eup %5601  ;;  %v7599_v50 = vmul.f32 %v14880_v20, %v14880_v20  ;;  %v7603_v51 = vmul.f32 %v14881_v21, %v14881_v21  ;;  %v562_v52 = vadd.f32 1e-07, %v434_v57  ;;  %5621 = vrsqrt.f32 %v558_v38  ;;  %v14887_v57 = vld [vmem:[#allocation19_spill] sm:$0xff] }
  0xbc   : > { %14879 = vst [vmem:[#allocation98_spill] sm:$0xff] %v7595_v46  ;;  %v7605_v22 = vpop.eup %5603  ;;  %v7609_v26 = vmul.f32 %v14883_v53, %v14883_v53  ;;  %v7613_v55 = vmul.f32 %v14884_v54, %v14884_v54  ;;  %v563_v56 = vadd.f32 1e-07, %v435_v58  ;;  %5623 = vrsqrt.f32 %v559_v49  ;;  %v14890_v58 = vld [vmem:[#allocation21_spill] sm:$0xff]  ;;  %v14899_v46 = vld [vmem:[#allocation26_spill] sm:$0xff] }
  0xbd   : > { %14882 = vst [vmem:[#allocation14_spill] sm:$0xff] %v7605_v22  ;;  %v7615_v24 = vpop.eup %5605  ;;  %v7619_v33 = vmul.f32 %v14886_v29, %v14886_v29  ;;  %v7623_v0 = vmul.f32 %v14887_v57, %v14887_v57  ;;  %v564_v3 = vadd.f32 1e-07, %v436_v59  ;;  %5625 = vrsqrt.f32 %v560_v44  ;;  %v14892_v59 = vld [vmem:[#allocation22_spill] sm:$0xff]  ;;  %v14894_v57 = vld [vmem:[#allocation23_spill] sm:$0xff] }
  0xbe   : > { %14885 = vst [vmem:[#allocation15_spill] sm:$0xff] %v7615_v24  ;;  %v7625_v5 = vpop.eup %5607  ;;  %v7629_v38 = vmul.f32 %v14889_v37, %v14889_v37  ;;  %v7633_v49 = vmul.f32 %v14890_v58, %v14890_v58  ;;  %v565_v20 = vadd.f32 1e-07, %v437_v60  ;;  %5627 = vrsqrt.f32 %v561_v45  ;;  %v14896_v58 = vld [vmem:[#allocation24_spill] sm:$0xff] }
  0xbf   : > { %14888 = vst [vmem:[#allocation16_spill] sm:$0xff] %v7625_v5  ;;  %v7635_v21 = vpop.eup %5609  ;;  %v7639_v53 = vmul.f32 %v7161_v31, %v7161_v31  ;;  %v7643_v44 = vmul.f32 %v14892_v59, %v14892_v59  ;;  %v566_v54 = vadd.f32 1e-07, %v438_v61  ;;  %5629 = vrsqrt.f32 %v562_v52  ;;  %v14897_v61 = vld [vmem:[#allocation25_spill] sm:$0xff] }
  0xc0   : > { %14891 = vst [vmem:[#allocation17_spill] sm:$0xff] %v7635_v21  ;;  %v7645_v29 = vpop.eup %5611  ;;  %v7649_v37 = vmul.f32 %v14894_v57, %v14894_v57  ;;  %v7653_v60 = vmul.f32 %v7170_v8, %v7170_v8  ;;  %v567_v45 = vadd.f32 1e-07, %v439_v62  ;;  %5631 = vrsqrt.f32 %v563_v56  ;;  %v14900_v62 = vld [vmem:[#allocation27_spill] sm:$0xff] }
  0xc1   : > { %14893 = vst [vmem:[#allocation18_spill] sm:$0xff] %v7645_v29  ;;  %v7655_v31 = vpop.eup %5613  ;;  %v7659_v59 = vmul.f32 %v14896_v58, %v14896_v58  ;;  %v7663_v52 = vmul.f32 %v14897_v61, %v14897_v61  ;;  %v568_v39 = vadd.f32 1e-07, %v7537_v63  ;;  %5633 = vrsqrt.f32 %v564_v3  ;;  %v14902_v61 = vld [vmem:[#allocation28_spill] sm:$0xff]  ;;  %v14903_v63 = vld [vmem:[#allocation29_spill] sm:$0xff] }
  0xc2   : > { %14895 = vst [vmem:[#allocation19_spill] sm:$0xff] %v7655_v31  ;;  %v7666_v57 = vpop.eup %5615  ;;  %v7670_v8 = vmul.f32 %v14899_v46, %v14899_v46  ;;  %v7674_v56 = vmul.f32 %v14900_v62, %v14900_v62  ;;  %v569_v58 = vadd.f32 1e-07, %v7541_v1  ;;  %5635 = vrsqrt.f32 %v565_v20  ;;  %v14905_v62 = vld [vmem:[#allocation30_spill] sm:$0xff] }
  0xc3   : > { %14898 = vst [vmem:[#allocation20_spill] sm:$0xff] %v7666_v57  ;;  %v7677_v22 = vpop.eup %5617  ;;  %v7681_v43 = vmul.f32 %v14902_v61, %v14902_v61  ;;  %v7685_v3 = vmul.f32 %v14903_v63, %v14903_v63  ;;  %v570_v46 = vadd.f32 1e-07, %v7545_v2  ;;  %5637 = vrsqrt.f32 %v566_v54  ;;  %v14908_v2 = vld [vmem:[#allocation32_spill] sm:$0xff] }
  0xc4   : > { %14901 = vst [vmem:[#allocation21_spill] sm:$0xff] %v7677_v22  ;;  %v7688_v32 = vpop.eup %5619  ;;  %v7692_v42 = vmul.f32 %v14905_v62, %v14905_v62  ;;  %v571_v1 = vadd.f32 1e-07, %v7549_v34  ;;  %v805_v20 = vmax.f32 %v7625_v5, %v7615_v24  ;;  %5639 = vrsqrt.f32 %v567_v45  ;;  %v14910_v34 = vld [vmem:[#allocation33_spill] sm:$0xff]  ;;  %v14911_v45 = vld [vmem:[#allocation34_spill] sm:$0xff] }
  0xc5   : > { %14904 = vst [vmem:[#allocation22_spill] sm:$0xff] %v7688_v32  ;;  %v7697_v61 = vpop.eup %5621  ;;  %v7701_v63 = vmul.f32 %v14907_v30, %v14907_v30  ;;  %v7705_v54 = vmul.f32 %v14908_v2, %v14908_v2  ;;  %v572_v28 = vadd.f32 1e-07, %v7553_v4  ;;  %5641 = vrsqrt.f32 %v568_v39  ;;  %v14913_v2 = vld [vmem:[#allocation35_spill] sm:$0xff]  ;;  %v14914_v39 = vld [vmem:[#allocation36_spill] sm:$0xff] }
  0xc6   : > { %14906 = vst [vmem:[#allocation23_spill] sm:$0xff] %v7697_v61  ;;  %v7708_v62 = vpop.eup %5623  ;;  %v7712_v25 = vmul.f32 %v14910_v34, %v14910_v34  ;;  %v7716_v5 = vmul.f32 %v14911_v45, %v14911_v45  ;;  %v573_v30 = vadd.f32 1e-07, %v7557_v7  ;;  %5643 = vrsqrt.f32 %v569_v58  ;;  %v14916_v45 = vld [vmem:[#allocation37_spill] sm:$0xff] }
  0xc7   : > { %14909 = vst [vmem:[#allocation24_spill] sm:$0xff] %v7708_v62  ;;  %v7719_v24 = vpop.eup %5625  ;;  %v7723_v19 = vmul.f32 %v14913_v2, %v14913_v2  ;;  %v7727_v4 = vmul.f32 %v14914_v39, %v14914_v39  ;;  %v574_v34 = vadd.f32 1e-07, %v7561_v10  ;;  %5645 = vrsqrt.f32 %v570_v46 }
  0xc8   : > { %14912 = vst [vmem:[#allocation25_spill] sm:$0xff] %v7719_v24  ;;  %v7730_v23 = vpop.eup %5627  ;;  %v7734_v48 = vmul.f32 %v14916_v45, %v14916_v45  ;;  %v575_v7 = vadd.f32 1e-07, %v7565_v11  ;;  %v806_v58 = vmax.f32 %v805_v20, %v7635_v21  ;;  %5647 = vrsqrt.f32 %v571_v1  ;;  %v14921_v1 = vld [vmem:[#allocation40_spill] sm:$0xff] }
  0xc9   : > { %14915 = vst [vmem:[#allocation26_spill] sm:$0xff] %v7730_v23  ;;  %v7738_v2 = vpop.eup %5629  ;;  %v7742_v39 = vmul.f32 %v14918_v27, %v14918_v27  ;;  %v7746_v10 = vmul.f32 %v7233_v6, %v7233_v6  ;;  %v576_v46 = vadd.f32 1e-07, %v7569_v12  ;;  %5649 = vrsqrt.f32 %v572_v28  ;;  %v14920_v23 = vld [vmem:[#allocation39_spill] sm:$0xff]  ;;  %v14924_v6 = vld [vmem:[#allocation41_spill] sm:$0xff]  ;;  %v14925_v28 = vld [vmem:[#allocation42_spill] sm:$0xff] }
  0xca   : > { %14917 = vst [vmem:[#allocation27_spill] sm:$0xff] %v7738_v2  ;;  %v7749_v45 = vpop.eup %5631  ;;  %v7753_v11 = vmul.f32 %v14920_v23, %v14920_v23  ;;  %v7757_v20 = vmul.f32 %v14921_v1, %v14921_v1  ;;  %v577_v27 = vadd.f32 1e-07, %v7573_v13  ;;  %5651 = vrsqrt.f32 %v573_v30  ;;  %v14928_v1 = vld [vmem:[#allocation43_spill] sm:$0xff] }
  0xcb   : > { %14919 = vst [vmem:[#allocation28_spill] sm:$0xff] %v7749_v45  ;;  %v7760_v21 = vpop.eup %5633  ;;  %v7764_v2 = vmul.f32 %v14924_v6, %v14924_v6  ;;  %v7768_v12 = vmul.f32 %v14925_v28, %v14925_v28  ;;  %v578_v23 = vadd.f32 1e-07, %v7577_v14  ;;  %5653 = vrsqrt.f32 %v574_v34 }
  0xcc   : > { %14922 = vst [vmem:[#allocation29_spill] sm:$0xff] %v7757_v20  ;;  %14923 = vst [vmem:[#allocation30_spill] sm:$0xff] %v7760_v21  ;;  %v7771_v45 = vpop.eup %5635  ;;  %v7775_v20 = vmul.f32 %v14928_v1, %v14928_v1  ;;  %v579_v13 = vadd.f32 1e-07, %v7581_v15  ;;  %v807_v30 = vmax.f32 %v806_v58, %v7645_v29  ;;  %5655 = vrsqrt.f32 %v575_v7  ;;  %v14930_v21 = vld [vmem:[#allocation44_spill] sm:$0xff]  ;;  %v14936_v7 = vld [vmem:[#allocation47_spill] sm:$0xff] }
  0xcd   : > { %14926 = vst [vmem:[#allocation31_spill] sm:$0xff] %v7768_v12  ;;  %14927 = vst [vmem:[#allocation32_spill] sm:$0xff] %v7771_v45  ;;  %v7779_v6 = vpop.eup %5637  ;;  %v7783_v28 = vmul.f32 %v14930_v21, %v14930_v21  ;;  %v14931_v12 = vld [vmem:[#allocation45_spill] sm:$0xff]  ;;  %v580_v34 = vadd.f32 1e-07, %v7585_v16  ;;  %5657 = vrsqrt.f32 %v576_v46  ;;  %v14934_v45 = vld [vmem:[#allocation46_spill] sm:$0xff]  ;;  %v7798_v58 = vmul.f32 %v14936_v7, %v14936_v7 }
  0xce   : > { %14929 = vst [vmem:[#allocation33_spill] sm:$0xff] %v7779_v6  ;;  %v7787_v14 = vmul.f32 %v14931_v12, %v14931_v12  ;;  %v7790_v1 = vpop.eup %5639  ;;  %v7794_v15 = vmul.f32 %v14934_v45, %v14934_v45  ;;  %v581_v21 = vadd.f32 1e-07, %v7589_v17  ;;  %5659 = vrsqrt.f32 %v577_v27  ;;  %v14939_v12 = vld [vmem:[#allocation48_spill] sm:$0xff]  ;;  %v14941_v16 = vld [vmem:[#allocation49_spill] sm:$0xff]  ;;  %v14944_v7 = vld [vmem:[#allocation50_spill] sm:$0xff] }
  0xcf   : > { %14933 = vst [vmem:[#allocation35_spill] sm:$0xff] %v7790_v1  ;;  %14937 = vst [vmem:[#allocation37_spill] sm:$0xff] %v7798_v58  ;;  %v7801_v29 = vpop.eup %5641  ;;  %v7809_v46 = vmul.f32 %v14941_v16, %v14941_v16  ;;  %v582_v45 = vadd.f32 1e-07, %v7593_v18  ;;  %5661 = vrsqrt.f32 %v578_v23  ;;  %v7816_v58 = vmul.f32 %v14944_v7, %v14944_v7 }
  0xd0   : > { %14932 = vst [vmem:[#allocation34_spill] sm:$0xff] %v7787_v14  ;;  %14935 = vst [vmem:[#allocation36_spill] sm:$0xff] %v7794_v15  ;;  %v7805_v14 = vmul.f32 %v14939_v12, %v14939_v12  ;;  %v7812_v15 = vpop.eup %5643  ;;  %v583_v17 = vadd.f32 1e-07, %v7599_v50  ;;  %v808_v27 = vmax.f32 %v807_v30, %v7655_v31  ;;  %5663 = vrsqrt.f32 %v579_v13 }
  0xd1   : > { %14938 = vst [vmem:[#allocation38_spill] sm:$0xff] %v7801_v29  ;;  %14942 = vst [vmem:[#allocation40_spill] sm:$0xff] %v7809_v46  ;;  %v7820_v12 = vpop.eup %5645  ;;  %v14948_v46 = vld [vmem:[#allocation52_spill] sm:$0xff]  ;;  %v584_v23 = vadd.f32 1e-07, %v7603_v51  ;;  %5665 = vrsqrt.f32 %v580_v34  ;;  %v7839_v13 = vmul.f32 %v7297_v9, %v7297_v9  ;;  %v14956_v51 = vld [vmem:[#allocation55_spill] sm:$0xff] }
  0xd2   : > { %14940 = vst [vmem:[#allocation39_spill] sm:$0xff] %v7805_v14  ;;  %14943 = vst [vmem:[#allocation41_spill] sm:$0xff] %v7812_v15  ;;  %v14947_v14 = vld [vmem:[#allocation51_spill] sm:$0xff]  ;;  %v7828_v18 = vmul.f32 %v14948_v46, %v14948_v46  ;;  %v7831_v7 = vpop.eup %5647  ;;  %v585_v30 = vadd.f32 1e-07, %v7609_v26  ;;  %5667 = vrsqrt.f32 %v581_v21  ;;  %v14954_v46 = vld [vmem:[#allocation54_spill] sm:$0xff]  ;;  %v7850_v34 = vmul.f32 %v14956_v51, %v14956_v51 }
  0xd3   : > { %14945 = vst [vmem:[#allocation42_spill] sm:$0xff] %v7816_v58  ;;  %14946 = vst [vmem:[#allocation43_spill] sm:$0xff] %v7820_v12  ;;  %v7824_v16 = vmul.f32 %v14947_v14, %v14947_v14  ;;  %v14950_v58 = vld [vmem:[#allocation53_spill] sm:$0xff]  ;;  %v7842_v14 = vpop.eup %5649  ;;  %v7846_v31 = vmul.f32 %v14954_v46, %v14954_v46  ;;  %5669 = vrsqrt.f32 %v582_v45  ;;  %v14959_v9 = vld [vmem:[#allocation56_spill] sm:$0xff]  ;;  %v587_v26 = vadd.f32 1e-07, %v7619_v33 }
  0xd4   : > { %14949 = vst [vmem:[#allocation44_spill] sm:$0xff] %v7831_v7  ;;  %v7835_v50 = vmul.f32 %v14950_v58, %v14950_v58  ;;  %14952 = vst [vmem:[#allocation46_spill] sm:$0xff] %v7839_v13  ;;  %v586_v58 = vadd.f32 1e-07, %v7613_v55  ;;  %v7857_v13 = vmul.f32 %v14959_v9, %v14959_v9  ;;  %v809_v21 = vmax.f32 %v808_v27, %v7666_v57 }
  0xd5   : > { %14953 = vst [vmem:[#allocation47_spill] sm:$0xff] %v7842_v14  ;;  %14955 = vst [vmem:[#allocation48_spill] sm:$0xff] %v7846_v31  ;;  %5671 = vrsqrt.f32 %v583_v17  ;;  %v14962_v31 = vld [vmem:[#allocation57_spill] sm:$0xff]  ;;  %v588_v45 = vadd.f32 1e-07, %v7623_v0  ;;  %v14968_v17 = vld [vmem:[#allocation60_spill] sm:$0xff] }
  0xd6   : > { %14951 = vst [vmem:[#allocation45_spill] sm:$0xff] %v7835_v50  ;;  %14957 = vst [vmem:[#allocation49_spill] sm:$0xff] %v7850_v34  ;;  %v7853_v50 = vpop.eup %5651  ;;  %v7865_v51 = vmul.f32 %v14962_v31, %v14962_v31  ;;  %v14963_v34 = vld [vmem:[#allocation58_spill] sm:$0xff]  ;;  %5673 = vrsqrt.f32 %v584_v23  ;;  %v7880_v27 = vmul.f32 %v14968_v17, %v14968_v17  ;;  %v589_v31 = vadd.f32 1e-07, %v7629_v38 }
  0xd7   : > { %14958 = vst [vmem:[#allocation50_spill] sm:$0xff] %v7853_v50  ;;  %14960 = vst [vmem:[#allocation51_spill] sm:$0xff] %v7857_v13  ;;  %v7861_v46 = vpop.eup %5653  ;;  %v7869_v55 = vmul.f32 %v14963_v34, %v14963_v34  ;;  %v14966_v13 = vld [vmem:[#allocation59_spill] sm:$0xff]  ;;  %5675 = vrsqrt.f32 %v585_v30  ;;  %v14970_v34 = vld [vmem:[#allocation61_spill] sm:$0xff]  ;;  %v591_v17 = vadd.f32 1e-07, %v7639_v53  ;;  %v810_v38 = vmax.f32 %v809_v21, %v7677_v22 }
  0xd8   : > { %14961 = vst [vmem:[#allocation52_spill] sm:$0xff] %v7861_v46  ;;  %v7872_v9 = vpop.eup %5655  ;;  %v7876_v33 = vmul.f32 %v14966_v13, %v14966_v13  ;;  %v14972_v0 = vld [vmem:[#allocation62_spill] sm:$0xff]  ;;  %v590_v13 = vadd.f32 1e-07, %v7633_v49  ;;  %5677 = vrsqrt.f32 %v586_v58  ;;  %v826_v30 = vmax.f32 %v7790_v1, %v7779_v6  ;;  %v14978_v21 = vld [vmem:[#allocation65_spill] sm:$0xff] }
  0xd9   : > { %14964 = vst [vmem:[#allocation53_spill] sm:$0xff] %v7869_v55  ;;  %14965 = vst [vmem:[#allocation54_spill] sm:$0xff] %v7872_v9  ;;  %v7883_v57 = vpop.eup %5657  ;;  %v7887_v55 = vmul.f32 %v14970_v34, %v14970_v34  ;;  %v7891_v23 = vmul.f32 %v14972_v0, %v14972_v0  ;;  %5679 = vrsqrt.f32 %v587_v26  ;;  %v14975_v34 = vld [vmem:[#allocation63_spill] sm:$0xff]  ;;  %v14976_v0 = vld [vmem:[#allocation64_spill] sm:$0xff]  ;;  %v592_v58 = vadd.f32 1e-07, %v7643_v44 }
  0xda   : > { %14967 = vst [vmem:[#allocation55_spill] sm:$0xff] %v7876_v33  ;;  %14969 = vst [vmem:[#allocation56_spill] sm:$0xff] %v7883_v57  ;;  %v7894_v33 = vpop.eup %5659  ;;  %v7908_v49 = vmul.f32 %v14976_v0, %v14976_v0  ;;  %5681 = vrsqrt.f32 %v588_v45  ;;  %v7915_v22 = vmul.f32 %v14978_v21, %v14978_v21  ;;  %v14979_v26 = vld [vmem:[#allocation66_spill] sm:$0xff]  ;;  %v14981_v0 = vld [vmem:[#allocation67_spill] sm:$0xff]  ;;  %v594_v21 = vadd.f32 1e-07, %v7653_v60 }
  0xdb   : > { %14971 = vst [vmem:[#allocation57_spill] sm:$0xff] %v7887_v55  ;;  %14973 = vst [vmem:[#allocation58_spill] sm:$0xff] %v7894_v33  ;;  %v7900_v57 = vpop.eup %5661  ;;  %v7904_v55 = vmul.f32 %v14975_v34, %v14975_v34  ;;  %v7919_v1 = vmul.f32 %v14979_v26, %v14979_v26  ;;  %v593_v34 = vadd.f32 1e-07, %v7649_v37  ;;  %5683 = vrsqrt.f32 %v589_v31  ;;  %v14982_v44 = vld [vmem:[#allocation68_spill] sm:$0xff] }
  0xdc   : > { %14974 = vst [vmem:[#allocation59_spill] sm:$0xff] %v7900_v57  ;;  %v7911_v53 = vpop.eup %5663  ;;  %v7926_v57 = vmul.f32 %v14981_v0, %v14981_v0  ;;  %v7930_v45 = vmul.f32 %v14982_v44, %v14982_v44  ;;  %5685 = vrsqrt.f32 %v590_v13  ;;  %v595_v26 = vadd.f32 1e-07, %v7659_v59  ;;  %v14985_v44 = vld [vmem:[#allocation69_spill] sm:$0xff]  ;;  %v14987_v59 = vld [vmem:[#allocation70_spill] sm:$0xff] }
  0xdd   : > { %14977 = vst [vmem:[#allocation60_spill] sm:$0xff] %v7911_v53  ;;  %v7922_v6 = vpop.eup %5665  ;;  %v811_v37 = vmax.f32 %v810_v38, %v7688_v32  ;;  %v827_v31 = vmax.f32 %v826_v30, %v7801_v29  ;;  %5687 = vrsqrt.f32 %v591_v17  ;;  %v7942_v0 = vmul.f32 %v7361_v36, %v7361_v36  ;;  %v14988_v17 = vld [vmem:[#allocation71_spill] sm:$0xff] }
  0xde   : > { %14980 = vst [vmem:[#allocation61_spill] sm:$0xff] %v7922_v6  ;;  %v7933_v53 = vpop.eup %5667  ;;  %v7946_v33 = vmul.f32 %v14985_v44, %v14985_v44  ;;  %v596_v60 = vadd.f32 1e-07, %v7663_v52  ;;  %5689 = vrsqrt.f32 %v592_v58  ;;  %v7953_v38 = vmul.f32 %v14987_v59, %v14987_v59  ;;  %v14991_v44 = vld [vmem:[#allocation72_spill] sm:$0xff]  ;;  %v14993_v52 = vld [vmem:[#allocation73_spill] sm:$0xff] }
  0xdf   : > { %14983 = vst [vmem:[#allocation62_spill] sm:$0xff] %v7933_v53  ;;  %v7938_v6 = vpop.eup %5669  ;;  %v7957_v30 = vmul.f32 %v14988_v17, %v14988_v17  ;;  %v597_v36 = vadd.f32 1e-07, %v7670_v8  ;;  %5691 = vrsqrt.f32 %v593_v34  ;;  %v7964_v32 = vmul.f32 %v14991_v44, %v14991_v44  ;;  %v14997_v44 = vld [vmem:[#allocation74_spill] sm:$0xff] }
  0xe0   : > { %14984 = vst [vmem:[#allocation63_spill] sm:$0xff] %v7938_v6  ;;  %v7949_v13 = vpop.eup %5671  ;;  %v7968_v58 = vmul.f32 %v14993_v52, %v14993_v52  ;;  %v598_v59 = vadd.f32 1e-07, %v7674_v56  ;;  %5693 = vrsqrt.f32 %v594_v21  ;;  %v599_v17 = vadd.f32 1e-07, %v7681_v43  ;;  %v14998_v52 = vld [vmem:[#allocation75_spill] sm:$0xff] }
  0xe1   : > { %14986 = vst [vmem:[#allocation64_spill] sm:$0xff] %v7949_v13  ;;  %14989 = vst [vmem:[#allocation65_spill] sm:$0xff] %v7957_v30  ;;  %v7960_v29 = vpop.eup %5673  ;;  %v812_v8 = vmax.f32 %v811_v37, %v7697_v61  ;;  %v828_v34 = vmax.f32 %v827_v31, %v7812_v15  ;;  %5695 = vrsqrt.f32 %v595_v26  ;;  %v600_v56 = vadd.f32 1e-07, %v7685_v3  ;;  %v15000_v43 = vld [vmem:[#allocation76_spill] sm:$0xff]  ;;  %v15002_v26 = vld [vmem:[#allocation77_spill] sm:$0xff] }
  0xe2   : > { %14990 = vst [vmem:[#allocation66_spill] sm:$0xff] %v7960_v29  ;;  %14992 = vst [vmem:[#allocation67_spill] sm:$0xff] %v7964_v32  ;;  %v7971_v53 = vpop.eup %5675  ;;  %v7980_v32 = vmul.f32 %v14997_v44, %v14997_v44  ;;  %5697 = vrsqrt.f32 %v596_v60  ;;  %v7991_v37 = vmul.f32 %v15000_v43, %v15000_v43  ;;  %v7995_v31 = vmul.f32 %v15002_v26, %v15002_v26  ;;  %v15007_v3 = vld [vmem:[#allocation79_spill] sm:$0xff] }
  0xe3   : > { %14994 = vst [vmem:[#allocation68_spill] sm:$0xff] %v7968_v58  ;;  %14995 = vst [vmem:[#allocation69_spill] sm:$0xff] %v7971_v53  ;;  %v7976_v30 = vpop.eup %5677  ;;  %v7984_v58 = vmul.f32 %v14998_v52, %v14998_v52  ;;  %v601_v44 = vadd.f32 1e-07, %v7692_v42  ;;  %5699 = vrsqrt.f32 %v597_v36  ;;  %v15005_v52 = vld [vmem:[#allocation78_spill] sm:$0xff]  ;;  %v8006_v60 = vmul.f32 %v15007_v3, %v15007_v3  ;;  %v15012_v3 = vld [vmem:[#allocation81_spill] sm:$0xff] }
  0xe4   : > { %14996 = vst [vmem:[#allocation70_spill] sm:$0xff] %v7976_v30  ;;  %v7987_v21 = vpop.eup %5679  ;;  %15001 = vst [vmem:[#allocation72_spill] sm:$0xff] %v7991_v37  ;;  %v8002_v61 = vmul.f32 %v15005_v52, %v15005_v52  ;;  %v602_v43 = vadd.f32 1e-07, %v7701_v63  ;;  %5701 = vrsqrt.f32 %v598_v59  ;;  %v603_v26 = vadd.f32 1e-07, %v7705_v54 }
  0xe5   : > { %14999 = vst [vmem:[#allocation71_spill] sm:$0xff] %v7987_v21  ;;  %15003 = vst [vmem:[#allocation73_spill] sm:$0xff] %v7995_v31  ;;  %v7998_v15 = vpop.eup %5681  ;;  %v813_v42 = vmax.f32 %v812_v8, %v7708_v62  ;;  %v829_v36 = vmax.f32 %v828_v34, %v7820_v12  ;;  %5703 = vrsqrt.f32 %v599_v17  ;;  %v15011_v52 = vld [vmem:[#allocation80_spill] sm:$0xff]  ;;  %v604_v63 = vadd.f32 1e-07, %v7712_v25  ;;  %v15014_v54 = vld [vmem:[#allocation82_spill] sm:$0xff] }
  0xe6   : > { %15004 = vst [vmem:[#allocation74_spill] sm:$0xff] %v7998_v15  ;;  %15006 = vst [vmem:[#allocation75_spill] sm:$0xff] %v8002_v61  ;;  %v8009_v37 = vpop.eup %5683  ;;  %v8018_v61 = vmul.f32 %v15011_v52, %v15011_v52  ;;  %5705 = vrsqrt.f32 %v600_v56  ;;  %v8029_v8 = vmul.f32 %v15014_v54, %v15014_v54  ;;  %v15015_v17 = vld [vmem:[#allocation83_spill] sm:$0xff]  ;;  %v605_v52 = vadd.f32 1e-07, %v7716_v5 }
  0xe7   : > { %15008 = vst [vmem:[#allocation76_spill] sm:$0xff] %v8006_v60  ;;  %15009 = vst [vmem:[#allocation77_spill] sm:$0xff] %v8009_v37  ;;  %v8014_v31 = vpop.eup %5685  ;;  %v8022_v60 = vmul.f32 %v15012_v3, %v15012_v3  ;;  %v8033_v34 = vmul.f32 %v15015_v17, %v15015_v17  ;;  %5707 = vrsqrt.f32 %v601_v44  ;;  %v8040_v3 = vmul.f32 %v7425_v40, %v7425_v40 }
  0xe8   : > { %15010 = vst [vmem:[#allocation78_spill] sm:$0xff] %v8014_v31  ;;  %v8025_v59 = vpop.eup %5687  ;;  %v8044_v25 = vmul.f32 %v7429_v35, %v7429_v35  ;;  %v606_v56 = vadd.f32 1e-07, %v7723_v19  ;;  %5709 = vrsqrt.f32 %v602_v43  ;;  %v607_v17 = vadd.f32 1e-07, %v7727_v4  ;;  %v15019_v35 = vld [vmem:[#allocation84_spill] sm:$0xff] }
  0xe9   : > { %15013 = vst [vmem:[#allocation79_spill] sm:$0xff] %v8025_v59  ;;  %v8036_v12 = vpop.eup %5689  ;;  %v814_v5 = vmax.f32 %v813_v42, %v7719_v24  ;;  %v830_v44 = vmax.f32 %v829_v36, %v7831_v7  ;;  %5711 = vrsqrt.f32 %v603_v26  ;;  %v8056_v40 = vmul.f32 %v7433_v47, %v7433_v47  ;;  %v15022_v36 = vld [vmem:[#allocation85_spill] sm:$0xff]  ;;  %v15025_v24 = vld [vmem:[#allocation26_spill] sm:$0xff] }
  0xea   : > { %15016 = vst [vmem:[#allocation80_spill] sm:$0xff] %v8036_v12  ;;  %v8047_v54 = vpop.eup %5691  ;;  %v8060_v12 = vmul.f32 %v15019_v35, %v15019_v35  ;;  %v608_v19 = vadd.f32 1e-07, %v7734_v48  ;;  %5713 = vrsqrt.f32 %v604_v63  ;;  %v8067_v4 = vmul.f32 %v7441_v41, %v7441_v41  ;;  %v15023_v48 = vld [vmem:[#allocation86_spill] sm:$0xff] }
  0xeb   : > { %15017 = vst [vmem:[#allocation81_spill] sm:$0xff] %v8047_v54  ;;  %v8052_v62 = vpop.eup %5693  ;;  %v609_v26 = vadd.f32 1e-07, %v7742_v39  ;;  %v847_v42 = vmax.f32 %v7949_v13, %v7938_v6  ;;  %5715 = vrsqrt.f32 %v605_v52  ;;  %v8076_v35 = vmul.f32 %v15022_v36, %v15022_v36  ;;  %v15027_v36 = vld [vmem:[#allocation87_spill] sm:$0xff] }
  0xec   : > { %15018 = vst [vmem:[#allocation82_spill] sm:$0xff] %v8052_v62  ;;  %v8063_v43 = vpop.eup %5695  ;;  %v8080_v63 = vmul.f32 %v15023_v48, %v15023_v48  ;;  %v610_v7 = vadd.f32 1e-07, %v7746_v10  ;;  %5717 = vrsqrt.f32 %v606_v56  ;;  %v611_v39 = vadd.f32 1e-07, %v7753_v11  ;;  %v15028_v48 = vld [vmem:[#allocation88_spill] sm:$0xff] }
  0xed   : > { %15020 = vst [vmem:[#allocation83_spill] sm:$0xff] %v8063_v43  ;;  %v8072_v47 = vpop.eup %5697  ;;  %v815_v13 = vmax.f32 %v814_v5, %v15025_v24  ;;  %v831_v52 = vmax.f32 %v830_v44, %v7842_v14  ;;  %5719 = vrsqrt.f32 %v607_v17  ;;  %v8096_v43 = vmul.f32 %v15028_v48, %v15028_v48  ;;  %v15030_v10 = vld [vmem:[#allocation29_spill] sm:$0xff]  ;;  %v15035_v14 = vld [vmem:[#allocation90_spill] sm:$0xff]  ;;  %v15037_v24 = vld [vmem:[#allocation91_spill] sm:$0xff] }
  0xee   : > { %15021 = vst [vmem:[#allocation84_spill] sm:$0xff] %v8072_v47  ;;  %v8083_v41 = vpop.eup %5699  ;;  %v8092_v47 = vmul.f32 %v15027_v36, %v15027_v36  ;;  %v612_v56 = vadd.f32 1e-07, %v15030_v10  ;;  %5721 = vrsqrt.f32 %v608_v19  ;;  %v15032_v11 = vld [vmem:[#allocation89_spill] sm:$0xff]  ;;  %v613_v17 = vadd.f32 1e-07, %v7764_v2 }
  0xef   : > { %15024 = vst [vmem:[#allocation85_spill] sm:$0xff] %v8083_v41  ;;  %v8088_v6 = vpop.eup %5701  ;;  %15029 = vst [vmem:[#allocation87_spill] sm:$0xff] %v8096_v43  ;;  %v8103_v5 = vmul.f32 %v15032_v11, %v15032_v11  ;;  %v848_v44 = vmax.f32 %v847_v42, %v7960_v29  ;;  %5723 = vrsqrt.f32 %v609_v26  ;;  %v8111_v48 = vmul.f32 %v15035_v14, %v15035_v14  ;;  %v15039_v10 = vld [vmem:[#allocation31_spill] sm:$0xff]  ;;  %v15043_v14 = vld [vmem:[#allocation92_spill] sm:$0xff] }
  0xf0   : > { %15026 = vst [vmem:[#allocation86_spill] sm:$0xff] %v8088_v6  ;;  %v8099_v41 = vpop.eup %5703  ;;  %v8115_v19 = vmul.f32 %v15037_v24, %v15037_v24  ;;  %v614_v62 = vadd.f32 1e-07, %v15039_v10  ;;  %5725 = vrsqrt.f32 %v610_v7  ;;  %v615_v2 = vadd.f32 1e-07, %v7775_v20  ;;  %v15041_v54 = vld [vmem:[#allocation27_spill] sm:$0xff] }
  0xf1   : > { %15031 = vst [vmem:[#allocation88_spill] sm:$0xff] %v8099_v41  ;;  %15033 = vst [vmem:[#allocation29_spill] sm:$0xff] %v8103_v5  ;;  %v8107_v36 = vpop.eup %5705  ;;  %v816_v42 = vmax.f32 %v815_v13, %v15041_v54  ;;  %v832_v26 = vmax.f32 %v831_v52, %v7853_v50  ;;  %5727 = vrsqrt.f32 %v611_v39  ;;  %v15045_v24 = vld [vmem:[#allocation93_spill] sm:$0xff]  ;;  %v616_v7 = vadd.f32 1e-07, %v7783_v28  ;;  %v15048_v20 = vld [vmem:[#allocation94_spill] sm:$0xff] }
  0xf2   : > { %15034 = vst [vmem:[#allocation89_spill] sm:$0xff] %v8107_v36  ;;  %15036 = vst [vmem:[#allocation90_spill] sm:$0xff] %v8111_v48  ;;  %v8118_v11 = vpop.eup %5707  ;;  %v8127_v48 = vmul.f32 %v15043_v14, %v15043_v14  ;;  %5729 = vrsqrt.f32 %v612_v56  ;;  %v8138_v13 = vmul.f32 %v15048_v20, %v15048_v20  ;;  %v15050_v39 = vld [vmem:[#allocation34_spill] sm:$0xff]  ;;  %v849_v50 = vmax.f32 %v848_v44, %v7971_v53  ;;  %v15052_v54 = vld [vmem:[#allocation95_spill] sm:$0xff] }
  0xf3   : > { %15038 = vst [vmem:[#allocation91_spill] sm:$0xff] %v8115_v19  ;;  %15040 = vst [vmem:[#allocation31_spill] sm:$0xff] %v8118_v11  ;;  %v8123_v29 = vpop.eup %5709  ;;  %v8131_v19 = vmul.f32 %v15045_v24, %v15045_v24  ;;  %v617_v52 = vadd.f32 1e-07, %v15050_v39  ;;  %5731 = vrsqrt.f32 %v613_v17  ;;  %v8146_v24 = vmul.f32 %v15052_v54, %v15052_v54  ;;  %v15055_v56 = vld [vmem:[#allocation37_spill] sm:$0xff]  ;;  %v15057_v20 = vld [vmem:[#allocation28_spill] sm:$0xff] }
  0xf4   : > { %15042 = vst [vmem:[#allocation99_spill] sm:$0xff] %v8123_v29  ;;  %15044 = vst [vmem:[#allocation92_spill] sm:$0xff] %v8127_v48  ;;  %v8134_v10 = vpop.eup %5711  ;;  %v619_v48 = vadd.f32 1e-07, %v15055_v56  ;;  %5733 = vrsqrt.f32 %v614_v62  ;;  %v833_v39 = vmax.f32 %v832_v26, %v7861_v46  ;;  %v15058_v44 = vld [vmem:[#allocation14_spill] sm:$0xff]  ;;  %v15065_v62 = vld [vmem:[#allocation39_spill] sm:$0xff] }
  0xf5   : > { %15046 = vst [vmem:[#allocation93_spill] sm:$0xff] %v8131_v19  ;;  %15047 = vst [vmem:[#allocation100_spill] sm:$0xff] %v8134_v10  ;;  %v8142_v14 = vpop.eup %5713  ;;  %v15054_v19 = vld [vmem:[#allocation36_spill] sm:$0xff]  ;;  %5735 = vrsqrt.f32 %v615_v2  ;;  %v15059_v17 = vld [vmem:[#allocation98_spill] sm:$0xff] }
  0xf6   : > { %15049 = vst [vmem:[#allocation94_spill] sm:$0xff] %v8138_v13  ;;  %15051 = vst [vmem:[#allocation34_spill] sm:$0xff] %v8142_v14  ;;  %v618_v28 = vadd.f32 1e-07, %v15054_v19  ;;  %v8150_v5 = vpop.eup %5715  ;;  %v817_v13 = vmax.f32 %v816_v42, %v15057_v20  ;;  %v804_v53 = vmax.f32 %v15059_v17, %v15058_v44  ;;  %v15061_v14 = vld [vmem:[#allocation96_spill] sm:$0xff]  ;;  %v15063_v19 = vld [vmem:[#allocation97_spill] sm:$0xff]  ;;  %5737 = vrsqrt.f32 %v616_v7 }
  0xf7   : > { %15053 = vst [vmem:[#allocation95_spill] sm:$0xff] %v8146_v24  ;;  %15056 = vst [vmem:[#allocation36_spill] sm:$0xff] %v8150_v5  ;;  %v8156_v43 = vpop.eup %5717  ;;  %v8160_v54 = vmul.f32 %v15061_v14, %v15061_v14  ;;  %v8164_v56 = vmul.f32 %v15063_v19, %v15063_v19  ;;  %v620_v24 = vadd.f32 1e-07, %v15065_v62  ;;  %v15067_v26 = vld [vmem:[#allocation40_spill] sm:$0xff]  ;;  %v15068_v46 = vld [vmem:[#allocation42_spill] sm:$0xff]  ;;  %v850_v44 = vmax.f32 %v849_v50, %v7976_v30 }
  0xf8   : > { %15060 = vst [vmem:[#allocation37_spill] sm:$0xff] %v8156_v43  ;;  %v8167_v42 = vpop.eup %5719  ;;  %v621_v2 = vadd.f32 1e-07, %v15067_v26  ;;  %v622_v20 = vadd.f32 1e-07, %v15068_v46  ;;  %5739 = vrsqrt.f32 %v617_v52  ;;  %v15070_v19 = vld [vmem:[#allocation45_spill] sm:$0xff]  ;;  %v834_v26 = vmax.f32 %v833_v39, %v7872_v9 }
  0xf9   : > { %15062 = vst [vmem:[#allocation96_spill] sm:$0xff] %v8160_v54  ;;  %15064 = vst [vmem:[#allocation97_spill] sm:$0xff] %v8164_v56  ;;  %v8172_v43 = vpop.eup %5721  ;;  %v623_v14 = vadd.f32 1e-07, %v7824_v16  ;;  %v624_v17 = vadd.f32 1e-07, %v7828_v18  ;;  %5741 = vrsqrt.f32 %v618_v28  ;;  %v818_v46 = vmax.f32 %v817_v13, %v804_v53 }
  0xfa   : > { %15066 = vst [vmem:[#allocation39_spill] sm:$0xff] %v8167_v42  ;;  %15069 = vst [vmem:[#allocation40_spill] sm:$0xff] %v8172_v43  ;;  %v625_v56 = vadd.f32 1e-07, %v15070_v19  ;;  %v8177_v62 = vpop.eup %5723  ;;  %v15072_v7 = vld [vmem:[#allocation46_spill] sm:$0xff]  ;;  %5743 = vrsqrt.f32 %v619_v48  ;;  %v15074_v50 = vld [vmem:[#allocation48_spill] sm:$0xff]  ;;  %v868_v16 = vmax.f32 %v8099_v41, %v8088_v6  ;;  %v851_v39 = vmax.f32 %v850_v44, %v7987_v21 }
  0xfb   : > { %15071 = vst [vmem:[#allocation42_spill] sm:$0xff] %v8177_v62  ;;  %v626_v42 = vadd.f32 1e-07, %v15072_v7  ;;  %v8181_v54 = vpop.eup %5725  ;;  %v627_v52 = vadd.f32 1e-07, %v15074_v50  ;;  %v15075_v30 = vld [vmem:[#allocation49_spill] sm:$0xff]  ;;  %5745 = vrsqrt.f32 %v620_v24 }
  0xfc   : > { %15073 = vst [vmem:[#allocation45_spill] sm:$0xff] %v8181_v54  ;;  %v628_v43 = vadd.f32 1e-07, %v15075_v30  ;;  %v8187_v18 = vpop.eup %5727  ;;  %v15077_v28 = vld [vmem:[#allocation51_spill] sm:$0xff]  ;;  %v630_v7 = vadd.f32 1e-07, %v7865_v51  ;;  %5747 = vrsqrt.f32 %v621_v2 }
  0xfd   : > { %15076 = vst [vmem:[#allocation46_spill] sm:$0xff] %v8187_v18  ;;  %v629_v19 = vadd.f32 1e-07, %v15077_v28  ;;  %v8192_v53 = vpop.eup %5729  ;;  %v15079_v48 = vld [vmem:[#allocation53_spill] sm:$0xff]  ;;  %v15080_v50 = vld [vmem:[#allocation55_spill] sm:$0xff]  ;;  %5749 = vrsqrt.f32 %v622_v20  ;;  %v15083_v18 = vld [vmem:[#allocation56_spill] sm:$0xff] }
  0xfe   : > { %15078 = vst [vmem:[#allocation48_spill] sm:$0xff] %v8192_v53  ;;  %v631_v13 = vadd.f32 1e-07, %v15079_v48  ;;  %v632_v9 = vadd.f32 1e-07, %v15080_v50  ;;  %v8197_v41 = vpop.eup %5731  ;;  %v15082_v24 = vld [vmem:[#allocation57_spill] sm:$0xff]  ;;  %v835_v28 = vmax.f32 %v834_v26, %v15083_v18  ;;  %5751 = vrsqrt.f32 %v623_v14 }
  0xff   : > { %v633_v30 = vadd.f32 1e-07, %v7880_v27  ;;  %15081 = vst [vmem:[#allocation49_spill] sm:$0xff] %v8197_v41  ;;  %v634_v6 = vadd.f32 1e-07, %v15082_v24  ;;  %v819_v51 = vrot.slane %v818_v46, 4  ;;  %v8201_v54 = vpop.eup %5733  ;;  %v869_v48 = vmax.f32 %v868_v16, %v8107_v36 }
 0x100   : > { %15084 = vst [vmem:[#allocation51_spill] sm:$0xff] %v8201_v54  ;;  %v635_v44 = vadd.f32 1e-07, %v7891_v23  ;;  %v636_v2 = vadd.f32 1e-07, %v7904_v55  ;;  %5753 = vrsqrt.f32 %v624_v17  ;;  %v8206_v50 = vpop.eup %5735  ;;  %v852_v14 = vmax.f32 %v851_v39, %v7998_v15  ;;  %v15088_v16 = vld [vmem:[#allocation58_spill] sm:$0xff] }
 0x101   : > { %15085 = vst [vmem:[#allocation53_spill] sm:$0xff] %v8206_v50  ;;  %v8209_v27 = vadd.f32 1e-07, %v7908_v49  ;;  %v8212_v20 = vadd.f32 1e-07, %v7915_v22  ;;  %5755 = vrsqrt.f32 %v625_v56  ;;  %v8215_v26 = vpop.eup %5737  ;;  %v836_v39 = vmax.f32 %v835_v28, %v15088_v16  ;;  %v15091_v36 = vld [vmem:[#allocation65_spill] sm:$0xff] }
 0x102   : > { %15086 = vst [vmem:[#allocation55_spill] sm:$0xff] %v8215_v26  ;;  %v8218_v23 = vadd.f32 1e-07, %v7919_v1  ;;  %v8221_v55 = vadd.f32 1e-07, %v7926_v57  ;;  %5757 = vrsqrt.f32 %v626_v42  ;;  %v8226_v49 = vpop.eup %5739  ;;  %v820_v56 = vmax.f32 %v818_v46, %v819_v51  ;;  %v15092_v15 = vld [vmem:[#allocation67_spill] sm:$0xff] }
 0x103   : > { %v8224_v17 = vadd.f32 1e-07, %v7930_v45  ;;  %15087 = vst [vmem:[#allocation57_spill] sm:$0xff] %v8226_v49  ;;  %v8229_v22 = vadd.f32 1e-07, %v7942_v0  ;;  %5759 = vrsqrt.f32 %v627_v52  ;;  %v8232_v24 = vpop.eup %5741  ;;  %v870_v45 = vmax.f32 %v869_v48, %v8118_v11  ;;  %v15096_v48 = vld [vmem:[#allocation72_spill] sm:$0xff] }
 0x104   : > { %15089 = vst [vmem:[#allocation101_spill] sm:$0xff] %v8232_v24  ;;  %v8235_v1 = vadd.f32 1e-07, %v7946_v33  ;;  %v8238_v57 = vadd.f32 1e-07, %v7953_v38  ;;  %5761 = vrsqrt.f32 %v628_v43  ;;  %v8241_v42 = vpop.eup %5743  ;;  %v853_v46 = vmax.f32 %v852_v14, %v8009_v37  ;;  %v15094_v33 = vld [vmem:[#allocation68_spill] sm:$0xff] }
 0x105   : > { %15090 = vst [vmem:[#allocation102_spill] sm:$0xff] %v8241_v42  ;;  %v8244_v0 = vadd.f32 1e-07, %v15091_v36  ;;  %v8247_v28 = vadd.f32 1e-07, %v15092_v15  ;;  %5763 = vrsqrt.f32 %v629_v19  ;;  %v8250_v52 = vpop.eup %5745  ;;  %v15097_v11 = vld [vmem:[#allocation59_spill] sm:$0xff] }
 0x106   : > { %15093 = vst [vmem:[#allocation65_spill] sm:$0xff] %v8250_v52  ;;  %v8253_v51 = vadd.f32 1e-07, %v15094_v33  ;;  %v8256_v38 = vadd.f32 1e-07, %v7980_v32  ;;  %5765 = vrsqrt.f32 %v630_v7  ;;  %v8261_v36 = vpop.eup %5747  ;;  %v837_v14 = vmax.f32 %v836_v39, %v15097_v11  ;;  %v15099_v33 = vld [vmem:[#allocation73_spill] sm:$0xff] }
 0x107   : > { %v8259_v43 = vadd.f32 1e-07, %v7984_v58  ;;  %15095 = vst [vmem:[#allocation67_spill] sm:$0xff] %v8261_v36  ;;  %v8264_v15 = vadd.f32 1e-07, %v15096_v48  ;;  %5767 = vrsqrt.f32 %v631_v13  ;;  %v821_v19 = vrot.slane %v820_v56, 2  ;;  %v8267_v37 = vpop.eup %5749 }
 0x108   : > { %15098 = vst [vmem:[#allocation68_spill] sm:$0xff] %v8267_v37  ;;  %v8270_v21 = vadd.f32 1e-07, %v15099_v33  ;;  %v15100_v32 = vld [vmem:[#allocation75_spill] sm:$0xff]  ;;  %v871_v58 = vmax.f32 %v870_v45, %v8123_v29  ;;  %5769 = vrsqrt.f32 %v632_v9  ;;  %v8276_v7 = vpop.eup %5751  ;;  %v15102_v41 = vld [vmem:[#allocation76_spill] sm:$0xff]  ;;  %v854_v39 = vmax.f32 %v853_v46, %v8014_v31  ;;  %v15132_v16 = vld [vmem:[#allocation97_spill] sm:$0xff] }
 0x109   : > { %v8273_v53 = vadd.f32 1e-07, %v15100_v32  ;;  %15101 = vst [vmem:[#allocation72_spill] sm:$0xff] %v8276_v7  ;;  %v8279_v48 = vadd.f32 1e-07, %v15102_v41  ;;  %v889_v13 = vmax.f32 %v8206_v50, %v8201_v54  ;;  %5771 = vrsqrt.f32 %v633_v30  ;;  %v15105_v45 = vld [vmem:[#allocation60_spill] sm:$0xff] }
 0x10a   : > { %v8284_v11 = vpop.eup %5753  ;;  %v8287_v33 = vadd.f32 1e-07, %v8018_v61  ;;  %v8290_v32 = vadd.f32 1e-07, %v8022_v60  ;;  %v8293_v9 = vadd.f32 1e-07, %v8029_v8  ;;  %5773 = vrsqrt.f32 %v634_v6 }
 0x10b   : > { %15103 = vst [vmem:[#allocation73_spill] sm:$0xff] %v8284_v11  ;;  %v8295_v41 = vpop.eup %5755  ;;  %v838_v46 = vmax.f32 %v837_v14, %v15105_v45  ;;  %5775 = vrsqrt.f32 %v635_v44  ;;  %v822_v29 = vmax.f32 %v820_v56, %v821_v19  ;;  %v15106_v50 = vld [vmem:[#allocation32_spill] sm:$0xff]  ;;  %v15107_v30 = vld [vmem:[#allocation30_spill] sm:$0xff]  ;;  %v8303_v61 = vadd.f32 1e-07, %v8033_v34 }
 0x10c   : > { %15104 = vst [vmem:[#allocation75_spill] sm:$0xff] %v8295_v41  ;;  %v825_v54 = vmax.f32 %v15107_v30, %v15106_v50  ;;  %v8300_v31 = vpop.eup %5757  ;;  %v8306_v60 = vadd.f32 1e-07, %v8040_v3  ;;  %v872_v8 = vmax.f32 %v871_v58, %v8134_v10  ;;  %5777 = vrsqrt.f32 %v636_v2  ;;  %v15130_v45 = vld [vmem:[#allocation96_spill] sm:$0xff] }
 0x10d   : > { %15108 = vst [vmem:[#allocation76_spill] sm:$0xff] %v8300_v31  ;;  %v8309_v6 = vpop.eup %5759  ;;  %v8312_v14 = vadd.f32 1e-07, %v8044_v25  ;;  %v855_v44 = vmax.f32 %v854_v39, %v8025_v59  ;;  %v890_v56 = vmax.f32 %v889_v13, %v8215_v26  ;;  %5779 = vrsqrt.f32 %v8209_v27 }
 0x10e   : > { %15109 = vst [vmem:[#allocation32_spill] sm:$0xff] %v8309_v6  ;;  %v8317_v19 = vpop.eup %5761  ;;  %v8320_v34 = vadd.f32 1e-07, %v8056_v40  ;;  %v8323_v3 = vadd.f32 1e-07, %v8060_v12  ;;  %5781 = vrsqrt.f32 %v8212_v20  ;;  %v823_v27 = vrot.slane %v822_v29, 1 }
 0x10f   : > { %15110 = vst [vmem:[#allocation30_spill] sm:$0xff] %v8317_v19  ;;  %v8326_v2 = vadd.f32 1e-07, %v8067_v4  ;;  %v8329_v25 = vpop.eup %5763  ;;  %v8332_v58 = vadd.f32 1e-07, %v8076_v35  ;;  %5783 = vrsqrt.f32 %v8218_v23  ;;  %v839_v39 = vmax.f32 %v838_v46, %v825_v54  ;;  %v15113_v4 = vld [vmem:[#allocation34_spill] sm:$0xff] }
 0x110   : > { %15111 = vst [vmem:[#allocation103_spill] sm:$0xff] %v8329_v25  ;;  %v8335_v13 = vpop.eup %5765  ;;  %v8338_v40 = vadd.f32 1e-07, %v8080_v63  ;;  %v8341_v12 = vadd.f32 1e-07, %v8092_v47  ;;  %v873_v26 = vmax.f32 %v872_v8, %v15113_v4  ;;  %5785 = vrsqrt.f32 %v8221_v55  ;;  %v15115_v35 = vld [vmem:[#allocation87_spill] sm:$0xff] }
 0x111   : > { %15112 = vst [vmem:[#allocation104_spill] sm:$0xff] %v8335_v13  ;;  %v8345_v20 = vpop.eup %5767  ;;  %v8348_v10 = vadd.f32 1e-07, %v15115_v35  ;;  %v15116_v23 = vld [vmem:[#allocation80_spill] sm:$0xff]  ;;  %v891_v54 = vmax.f32 %v890_v56, %v8226_v49  ;;  %5787 = vrsqrt.f32 %v8224_v17  ;;  %v15118_v46 = vld [vmem:[#allocation29_spill] sm:$0xff]  ;;  %v15119_v19 = vld [vmem:[#allocation90_spill] sm:$0xff]  ;;  %v8371_v17 = vmax.f32 %v822_v29, %v823_v27 }
 0x112   : > { %15114 = vst [vmem:[#allocation105_spill] sm:$0xff] %v8345_v20  ;;  %v856_v59 = vmax.f32 %v855_v44, %v15116_v23  ;;  %v8353_v63 = vpop.eup %5769  ;;  %v8356_v47 = vadd.f32 1e-07, %v15118_v46  ;;  %v8359_v8 = vadd.f32 1e-07, %v15119_v19  ;;  %v15120_v55 = vld [vmem:[#allocation91_spill] sm:$0xff]  ;;  %5789 = vrsqrt.f32 %v8229_v22 }
 0x113   : > { %15117 = vst [vmem:[#allocation87_spill] sm:$0xff] %v8353_v63  ;;  %v8362_v4 = vadd.f32 1e-07, %v15120_v55  ;;  %v8365_v35 = vpop.eup %5771  ;;  %v15122_v44 = vld [vmem:[#allocation92_spill] sm:$0xff]  ;;  %5791 = vrsqrt.f32 %v8235_v1  ;;  %v840_v56 = vrot.slane %v839_v39, 4  ;;  %v15124_v49 = vld [vmem:[#allocation93_spill] sm:$0xff]  ;;  %v874_v22 = vmax.f32 %v873_v26, %v8150_v5 }
 0x114   : > { %15121 = vst [vmem:[#allocation29_spill] sm:$0xff] %v8365_v35  ;;  %v8368_v23 = vadd.f32 1e-07, %v15122_v44  ;;  %v8373_v46 = vpop.eup %5773  ;;  %v8376_v19 = vadd.f32 1e-07, %v15124_v49  ;;  %v15125_v25 = vld [vmem:[#allocation94_spill] sm:$0xff]  ;;  %5793 = vrsqrt.f32 %v8238_v57  ;;  %v892_v27 = vmax.f32 %v891_v54, %v8232_v24 }
 0x115   : > { %15123 = vst [vmem:[#allocation90_spill] sm:$0xff] %v8373_v46  ;;  %v8379_v55 = vadd.f32 1e-07, %v15125_v25  ;;  %v8383_v6 = vpop.eup %5775  ;;  %v15127_v44 = vld [vmem:[#allocation95_spill] sm:$0xff]  ;;  %v15128_v29 = vld [vmem:[#allocation81_spill] sm:$0xff]  ;;  %5795 = vrsqrt.f32 %v8244_v0  ;;  %v910_v57 = vmax.f32 %v8345_v20, %v8335_v13  ;;  %v15135_v0 = vld [vmem:[#allocation98_spill] sm:$0xff] }
 0x116   : > { %15126 = vst [vmem:[#allocation91_spill] sm:$0xff] %v8383_v6  ;;  %v8386_v31 = vadd.f32 1e-07, %v15127_v44  ;;  %v857_v1 = vmax.f32 %v856_v59, %v15128_v29  ;;  %v8391_v49 = vpop.eup %5777  ;;  %v8394_v25 = vadd.f32 1e-07, %v15130_v45  ;;  %5797 = vrsqrt.f32 %v8247_v28  ;;  %v15136_v24 = vld [vmem:[#allocation14_spill] sm:$0xff] }
 0x117   : > { %15129 = vst [vmem:[#allocation92_spill] sm:$0xff] %v8391_v49  ;;  %v8397_v26 = vadd.f32 1e-07, %v15132_v16  ;;  %v8402_v44 = vpop.eup %5779  ;;  %5799 = vrsqrt.f32 %v8253_v51  ;;  %v841_v59 = vmax.f32 %v839_v39, %v840_v56  ;;  %v972_v54 = vsub.f32 %v15135_v0, %v8371_v17  ;;  %v15138_v16 = vld [vmem:[#allocation37_spill] sm:$0xff]  ;;  %v15139_v20 = vld [vmem:[#allocation15_spill] sm:$0xff]  ;;  %v15140_v13 = vld [vmem:[#allocation16_spill] sm:$0xff] }
 0x118   : > { %15131 = vst [vmem:[#allocation93_spill] sm:$0xff] %v8394_v25  ;;  %15134 = vst [vmem:[#allocation95_spill] sm:$0xff] %v8402_v44  ;;  %v973_v45 = vsub.f32 %v15136_v24, %v8371_v17  ;;  %v8409_v5 = vpop.eup %5781  ;;  %v875_v29 = vmax.f32 %v874_v22, %v15138_v16  ;;  %5801 = vrsqrt.f32 %v8256_v38  ;;  %v974_v28 = vsub.f32 %v15139_v20, %v8371_v17  ;;  %v15142_v39 = vld [vmem:[#allocation82_spill] sm:$0xff]  ;;  %v15143_v24 = vld [vmem:[#allocation17_spill] sm:$0xff] }
 0x119   : > { %15133 = vst [vmem:[#allocation94_spill] sm:$0xff] %v8397_v26  ;;  %15137 = vst [vmem:[#allocation96_spill] sm:$0xff] %v8409_v5  ;;  %v975_v26 = vsub.f32 %v15140_v13, %v8371_v17  ;;  %v8417_v51 = vpop.eup %5783  ;;  %v858_v56 = vmax.f32 %v857_v1, %v15142_v39  ;;  %v893_v0 = vmax.f32 %v892_v27, %v8241_v42  ;;  %5803 = vrsqrt.f32 %v8259_v43  ;;  %v15145_v20 = vld [vmem:[#allocation62_spill] sm:$0xff]  ;;  %v15146_v16 = vld [vmem:[#allocation61_spill] sm:$0xff] }
 0x11a   : > { %15141 = vst [vmem:[#allocation97_spill] sm:$0xff] %v8417_v51  ;;  %v976_v18 = vsub.f32 %v15143_v24, %v8371_v17  ;;  %v8424_v22 = vpop.eup %5785  ;;  %v911_v38 = vmax.f32 %v910_v57, %v8353_v63  ;;  %5805 = vrsqrt.f32 %v8264_v15  ;;  %v846_v13 = vmax.f32 %v15146_v16, %v15145_v20  ;;  %v15147_v51 = vld [vmem:[#allocation18_spill] sm:$0xff]  ;;  %v15149_v27 = vld [vmem:[#allocation19_spill] sm:$0xff]  ;;  %v15150_v42 = vld [vmem:[#allocation20_spill] sm:$0xff] }
 0x11b   : > { %15144 = vst [vmem:[#allocation98_spill] sm:$0xff] %v8424_v22  ;;  %v977_v25 = vsub.f32 %v15147_v51, %v8371_v17  ;;  %v8432_v1 = vpop.eup %5787  ;;  %5807 = vrsqrt.f32 %v8270_v21  ;;  %v842_v43 = vrot.slane %v841_v59, 2  ;;  %v978_v24 = vsub.f32 %v15149_v27, %v8371_v17  ;;  %v15152_v15 = vld [vmem:[#allocation39_spill] sm:$0xff]  ;;  %v15153_v20 = vld [vmem:[#allocation21_spill] sm:$0xff] }
 0x11c   : > { %15148 = vst [vmem:[#allocation14_spill] sm:$0xff] %v8432_v1  ;;  %v979_v39 = vsub.f32 %v15150_v42, %v8371_v17  ;;  %v8439_v57 = vpop.eup %5789  ;;  %v876_v63 = vmax.f32 %v875_v29, %v15152_v15  ;;  %5809 = vrsqrt.f32 %v8273_v53  ;;  %v980_v51 = vsub.f32 %v15153_v20, %v8371_v17  ;;  %v15154_v1 = vld [vmem:[#allocation22_spill] sm:$0xff]  ;;  %v15156_v22 = vld [vmem:[#allocation83_spill] sm:$0xff]  ;;  %v15159_v20 = vld [vmem:[#allocation24_spill] sm:$0xff] }
 0x11d   : > { %15151 = vst [vmem:[#allocation15_spill] sm:$0xff] %v8439_v57  ;;  %v981_v16 = vsub.f32 %v15154_v1, %v8371_v17  ;;  %v8447_v21 = vpop.eup %5791  ;;  %v859_v5 = vmax.f32 %v858_v56, %v15156_v22  ;;  %v894_v27 = vmax.f32 %v893_v0, %v8250_v52  ;;  %5811 = vrsqrt.f32 %v8279_v48  ;;  %v15157_v42 = vld [vmem:[#allocation23_spill] sm:$0xff]  ;;  %v15160_v15 = vld [vmem:[#allocation25_spill] sm:$0xff]  ;;  %v15162_v0 = vld [vmem:[#allocation26_spill] sm:$0xff] }
 0x11e   : > { %15155 = vst [vmem:[#allocation16_spill] sm:$0xff] %v8447_v21  ;;  %v982_v57 = vsub.f32 %v15157_v42, %v8371_v17  ;;  %v8454_v29 = vpop.eup %5793  ;;  %v912_v53 = vmax.f32 %v911_v38, %v8365_v35  ;;  %5813 = vrsqrt.f32 %v8287_v33  ;;  %v983_v1 = vsub.f32 %v15159_v20, %v8371_v17  ;;  %v15163_v52 = vld [vmem:[#allocation27_spill] sm:$0xff]  ;;  %v15165_v33 = vld [vmem:[#allocation40_spill] sm:$0xff] }
 0x11f   : > { %15158 = vst [vmem:[#allocation17_spill] sm:$0xff] %v8454_v29  ;;  %v984_v21 = vsub.f32 %v15160_v15, %v8371_v17  ;;  %v8462_v56 = vpop.eup %5795  ;;  %5815 = vrsqrt.f32 %v8290_v32  ;;  %v843_v48 = vmax.f32 %v841_v59, %v842_v43  ;;  %v985_v42 = vsub.f32 %v15162_v0, %v8371_v17  ;;  %v15166_v20 = vld [vmem:[#allocation28_spill] sm:$0xff] }
 0x120   : > { %15161 = vst [vmem:[#allocation18_spill] sm:$0xff] %v8462_v56  ;;  %v986_v29 = vsub.f32 %v15163_v52, %v8371_v17  ;;  %v8469_v38 = vpop.eup %5797  ;;  %v877_v35 = vmax.f32 %v876_v63, %v15165_v33  ;;  %5817 = vrsqrt.f32 %v8293_v9  ;;  %v987_v15 = vsub.f32 %v15166_v20, %v8371_v17 }
 0x121   : > { %15164 = vst [vmem:[#allocation19_spill] sm:$0xff] %v8469_v38  ;;  %v8475_v22 = vmul.f32 1.442695, %v972_v54  ;;  %v8477_v56 = vpop.eup %5799  ;;  %v895_v32 = vmax.f32 %v894_v27, %v8261_v36  ;;  %5819 = vrsqrt.f32 %v8303_v61  ;;  %v860_v59 = vmax.f32 %v859_v5, %v846_v13  ;;  %v15197_v36 = vld [vmem:[#allocation54_spill] sm:$0xff] }
 0x122   : > { %15167 = vst [vmem:[#allocation20_spill] sm:$0xff] %v8477_v56  ;;  %v8481_v43 = vmul.f32 1.442695, %v973_v45  ;;  %v8483_v52 = vpop.eup %5801  ;;  %v913_v63 = vmax.f32 %v912_v53, %v8373_v46  ;;  %5821 = vrsqrt.f32 %v8306_v60  ;;  %v8487_v9 = vmul.f32 1.442695, %v974_v28 }
 0x123   : > { %15168 = vst [vmem:[#allocation21_spill] sm:$0xff] %v8483_v52  ;;  %v8489_v17 = vmul.f32 1.442695, %v975_v26  ;;  %v8491_v54 = vpop.eup %5803  ;;  %5823 = vrsqrt.f32 %v8312_v14  ;;  %v844_v27 = vrot.slane %v843_v48, 1  ;;  %v8494_v0 = vmul.f32 1.442695, %v976_v18 }
 0x124   : > { %15169 = vst [vmem:[#allocation22_spill] sm:$0xff] %v8491_v54  ;;  %v8496_v5 = vmul.f32 1.442695, %v977_v25  ;;  %v8498_v61 = vpop.eup %5805  ;;  %v878_v45 = vmax.f32 %v877_v35, %v8177_v62  ;;  %5825 = vrsqrt.f32 %v8320_v34  ;;  %v8502_v60 = vmul.f32 1.442695, %v978_v24 }
 0x125   : > { %15170 = vst [vmem:[#allocation23_spill] sm:$0xff] %v8498_v61  ;;  %v8504_v28 = vmul.f32 1.442695, %v979_v39  ;;  %v8506_v26 = vpop.eup %5807  ;;  %v896_v13 = vmax.f32 %v895_v32, %v8267_v37  ;;  %5827 = vrsqrt.f32 %v8323_v3  ;;  %v861_v18 = vrot.slane %v860_v59, 4  ;;  %v15175_v32 = vld [vmem:[#allocation45_spill] sm:$0xff] }
 0x126   : > { %15171 = vst [vmem:[#allocation24_spill] sm:$0xff] %v8506_v26  ;;  %v8510_v14 = vmul.f32 1.442695, %v980_v51  ;;  %v8512_v25 = vpop.eup %5809  ;;  %v914_v53 = vmax.f32 %v913_v63, %v8383_v6  ;;  %5829 = vrsqrt.f32 %v8326_v2  ;;  %v8516_v34 = vmul.f32 1.442695, %v981_v16 }
 0x127   : > { %15172 = vst [vmem:[#allocation25_spill] sm:$0xff] %v8512_v25  ;;  %v8518_v35 = vmul.f32 1.442695, %v982_v57  ;;  %v8520_v39 = vpop.eup %5811  ;;  %5831 = vrsqrt.f32 %v8332_v58  ;;  %v8523_v24 = vmax.f32 %v843_v48, %v844_v27  ;;  %v8525_v3 = vmul.f32 1.442695, %v983_v1 }
 0x128   : > { %15173 = vst [vmem:[#allocation26_spill] sm:$0xff] %v8520_v39  ;;  %v8527_v51 = vmul.f32 1.442695, %v984_v21  ;;  %v8529_v20 = vpop.eup %5813  ;;  %v879_v63 = vmax.f32 %v878_v45, %v15175_v32  ;;  %v931_v2 = vmax.f32 %v8477_v56, %v8469_v38  ;;  %5833 = vrsqrt.f32 %v8338_v40  ;;  %v15178_v45 = vld [vmem:[#allocation85_spill] sm:$0xff]  ;;  %v15179_v56 = vld [vmem:[#allocation84_spill] sm:$0xff] }
 0x129   : > { %15174 = vst [vmem:[#allocation27_spill] sm:$0xff] %v8529_v20  ;;  %v8535_v16 = vmul.f32 1.442695, %v985_v42  ;;  %v8537_v57 = vpop.eup %5815  ;;  %v897_v58 = vmax.f32 %v896_v13, %v8276_v7  ;;  %5835 = vrsqrt.f32 %v8341_v12  ;;  %v862_v1 = vmax.f32 %v860_v59, %v861_v18  ;;  %v15181_v59 = vld [vmem:[#allocation33_spill] sm:$0xff] }
 0x12a   : > { %15176 = vst [vmem:[#allocation40_spill] sm:$0xff] %v8537_v57  ;;  %v8541_v21 = vmul.f32 1.442695, %v986_v29  ;;  %v8543_v48 = vpop.eup %5817  ;;  %v915_v27 = vmax.f32 %v914_v53, %v8391_v49  ;;  %5837 = vrsqrt.f32 %v8348_v10  ;;  %v867_v40 = vmax.f32 %v15179_v56, %v15178_v45  ;;  %v15183_v10 = vld [vmem:[#allocation46_spill] sm:$0xff]  ;;  %v15184_v49 = vld [vmem:[#allocation35_spill] sm:$0xff] }
 0x12b   : > { %15177 = vst [vmem:[#allocation28_spill] sm:$0xff] %v8543_v48  ;;  %v8549_v42 = vmul.f32 1.442695, %v987_v15  ;;  %v8551_v38 = vpop.eup %5819  ;;  %5839 = vrsqrt.f32 %v8356_v47  ;;  %v988_v12 = vsub.f32 %v15107_v30, %v8523_v24  ;;  %v989_v29 = vsub.f32 %v15106_v50, %v8523_v24 }
 0x12c   : > { %15180 = vst [vmem:[#allocation85_spill] sm:$0xff] %v8551_v38  ;;  %v990_v13 = vsub.f32 %v15181_v59, %v8523_v24  ;;  %v8560_v18 = vpop.eup %5821  ;;  %v880_v53 = vmax.f32 %v879_v63, %v15183_v10  ;;  %v932_v15 = vmax.f32 %v931_v2, %v8483_v52  ;;  %5841 = vrsqrt.f32 %v8359_v8  ;;  %v15186_v59 = vld [vmem:[#allocation38_spill] sm:$0xff]  ;;  %v15188_v8 = vld [vmem:[#allocation41_spill] sm:$0xff]  ;;  %v15199_v10 = vld [vmem:[#allocation96_spill] sm:$0xff] }
 0x12d   : > { %15182 = vst [vmem:[#allocation84_spill] sm:$0xff] %v8560_v18  ;;  %v991_v47 = vsub.f32 %v15184_v49, %v8523_v24  ;;  %v8567_v6 = vpop.eup %5823  ;;  %v898_v30 = vmax.f32 %v897_v58, %v8284_v11  ;;  %5843 = vrsqrt.f32 %v8362_v4  ;;  %v863_v50 = vrot.slane %v862_v1, 2  ;;  %v15189_v49 = vld [vmem:[#allocation43_spill] sm:$0xff]  ;;  %v15191_v4 = vld [vmem:[#allocation44_spill] sm:$0xff] }
 0x12e   : > { %15185 = vst [vmem:[#allocation33_spill] sm:$0xff] %v8567_v6  ;;  %v992_v46 = vsub.f32 %v15186_v59, %v8523_v24  ;;  %v8573_v7 = vpop.eup %5825  ;;  %v916_v63 = vmax.f32 %v915_v27, %v8402_v44  ;;  %5845 = vrsqrt.f32 %v8368_v23  ;;  %v993_v2 = vsub.f32 %v15188_v8, %v8523_v24  ;;  %v15192_v59 = vld [vmem:[#allocation47_spill] sm:$0xff]  ;;  %v15193_v27 = vld [vmem:[#allocation50_spill] sm:$0xff] }
 0x12f   : > { %15187 = vst [vmem:[#allocation35_spill] sm:$0xff] %v8573_v7  ;;  %v994_v52 = vsub.f32 %v15189_v49, %v8523_v24  ;;  %v8581_v37 = vpop.eup %5827  ;;  %5847 = vrsqrt.f32 %v8376_v19  ;;  %v995_v58 = vsub.f32 %v15191_v4, %v8523_v24  ;;  %v996_v11 = vsub.f32 %v15192_v59, %v8523_v24  ;;  %v15195_v7 = vld [vmem:[#allocation52_spill] sm:$0xff] }
 0x130   : > { %15190 = vst [vmem:[#allocation38_spill] sm:$0xff] %v8581_v37  ;;  %v997_v44 = vsub.f32 %v15193_v27, %v8523_v24  ;;  %v8590_v23 = vpop.eup %5829  ;;  %v933_v8 = vmax.f32 %v932_v15, %v8491_v54  ;;  %5849 = vrsqrt.f32 %v8379_v55  ;;  %v881_v49 = vmax.f32 %v880_v53, %v867_v40  ;;  %v15200_v54 = vld [vmem:[#allocation93_spill] sm:$0xff]  ;;  %v15201_v55 = vld [vmem:[#allocation56_spill] sm:$0xff] }
 0x131   : > { %15194 = vst [vmem:[#allocation41_spill] sm:$0xff] %v8590_v23  ;;  %v998_v37 = vsub.f32 %v15195_v7, %v8523_v24  ;;  %v8596_v19 = vpop.eup %5831  ;;  %v899_v4 = vmax.f32 %v898_v30, %v8295_v41  ;;  %5851 = vrsqrt.f32 %v8386_v31  ;;  %v864_v59 = vmax.f32 %v862_v1, %v863_v50  ;;  %v15202_v7 = vld [vmem:[#allocation58_spill] sm:$0xff]  ;;  %v15205_v31 = vld [vmem:[#allocation59_spill] sm:$0xff] }
 0x132   : > { %15196 = vst [vmem:[#allocation43_spill] sm:$0xff] %v8596_v19  ;;  %v999_v27 = vsub.f32 %v15197_v36, %v8523_v24  ;;  %v8602_v6 = vpop.eup %5833  ;;  %v917_v15 = vmax.f32 %v916_v63, %v15199_v10  ;;  %5853 = vrsqrt.f32 %v15200_v54  ;;  %v1000_v40 = vsub.f32 %v15201_v55, %v8523_v24  ;;  %v15204_v30 = vld [vmem:[#allocation94_spill] sm:$0xff]  ;;  %v15206_v36 = vld [vmem:[#allocation60_spill] sm:$0xff] }
 0x133   : > { %15198 = vst [vmem:[#allocation44_spill] sm:$0xff] %v8602_v6  ;;  %v1001_v53 = vsub.f32 %v15202_v7, %v8523_v24  ;;  %v8610_v18 = vpop.eup %5835  ;;  %5855 = vrsqrt.f32 %v15204_v30  ;;  %v1002_v1 = vsub.f32 %v15205_v31, %v8523_v24  ;;  %v1003_v50 = vsub.f32 %v15206_v36, %v8523_v24  ;;  %v15209_v30 = vld [vmem:[#allocation76_spill] sm:$0xff] }
 0x134   : > { %15203 = vst [vmem:[#allocation47_spill] sm:$0xff] %v8610_v18  ;;  %v8617_v41 = vmul.f32 1.442695, %v988_v12  ;;  %v8619_v63 = vpop.eup %5837  ;;  %v934_v54 = vmax.f32 %v933_v8, %v8498_v61  ;;  %v882_v55 = vrot.slane %v881_v49, 4  ;;  %5857 = vpow2.f32 %v8475_v22  ;;  %v15211_v12 = vld [vmem:[#allocation97_spill] sm:$0xff] }
 0x135   : > { %15207 = vst [vmem:[#allocation50_spill] sm:$0xff] %v8619_v63  ;;  %v8623_v7 = vmul.f32 1.442695, %v989_v29  ;;  %v8625_v10 = vpop.eup %5839  ;;  %v900_v32 = vmax.f32 %v899_v4, %v15209_v30  ;;  %v865_v62 = vrot.slane %v864_v59, 1  ;;  %5859 = vpow2.f32 %v8481_v43 }
 0x136   : > { %15208 = vst [vmem:[#allocation52_spill] sm:$0xff] %v8625_v10  ;;  %v8629_v31 = vmul.f32 1.442695, %v990_v13  ;;  %v8631_v24 = vpop.eup %5841  ;;  %v918_v36 = vmax.f32 %v917_v15, %v15211_v12  ;;  %5861 = vpow2.f32 %v8487_v9  ;;  %v8635_v8 = vmul.f32 1.442695, %v991_v47  ;;  %v15214_v9 = vld [vmem:[#allocation49_spill] sm:$0xff] }
 0x137   : > { %15210 = vst [vmem:[#allocation54_spill] sm:$0xff] %v8631_v24  ;;  %v8637_v22 = vmul.f32 1.442695, %v992_v46  ;;  %v8639_v29 = vpop.eup %5843  ;;  %5863 = vpow2.f32 %v8489_v17  ;;  %v8642_v4 = vmul.f32 1.442695, %v993_v2  ;;  %v935_v15 = vmax.f32 %v934_v54, %v8506_v26  ;;  %v15215_v47 = vld [vmem:[#allocation48_spill] sm:$0xff] }
 0x138   : > { %15212 = vst [vmem:[#allocation93_spill] sm:$0xff] %v8639_v29  ;;  %v8644_v61 = vmul.f32 1.442695, %v994_v52  ;;  %v8646_v43 = vmul.f32 1.442695, %v995_v58  ;;  %v8648_v13 = vpop.eup %5845  ;;  %v883_v12 = vmax.f32 %v881_v49, %v882_v55  ;;  %v888_v30 = vmax.f32 %v15215_v47, %v15214_v9  ;;  %v15217_v29 = vld [vmem:[#allocation32_spill] sm:$0xff] }
 0x139   : > { %15213 = vst [vmem:[#allocation56_spill] sm:$0xff] %v8648_v13  ;;  %5865 = vpow2.f32 %v8494_v0  ;;  %v8654_v46 = vpop.eup %5847  ;;  %v901_v17 = vmax.f32 %v900_v32, %v15217_v29  ;;  %v8657_v2 = vmax.f32 %v864_v59, %v865_v62  ;;  %v8660_v52 = vmul.f32 1.442695, %v996_v11  ;;  %v15219_v13 = vld [vmem:[#allocation98_spill] sm:$0xff] }
 0x13a   : > { %15216 = vst [vmem:[#allocation58_spill] sm:$0xff] %v8654_v46  ;;  %5867 = vpow2.f32 %v8496_v5  ;;  %v8662_v58 = vpop.eup %5849  ;;  %v919_v54 = vmax.f32 %v918_v36, %v15219_v13  ;;  %v8666_v49 = vmul.f32 1.442695, %v997_v44  ;;  %v8668_v55 = vmul.f32 1.442695, %v998_v37  ;;  %v15225_v26 = vld [vmem:[#allocation14_spill] sm:$0xff] }
 0x13b   : > { %15218 = vst [vmem:[#allocation94_spill] sm:$0xff] %v8662_v58  ;;  %5869 = vpow2.f32 %v8502_v60  ;;  %v8670_v0 = vpop.eup %5851  ;;  %v8673_v62 = vmul.f32 1.442695, %v999_v27  ;;  %v8675_v32 = vmul.f32 1.442695, %v1000_v40  ;;  %v936_v59 = vmax.f32 %v935_v15, %v8512_v25  ;;  %v15226_v15 = vld [vmem:[#allocation62_spill] sm:$0xff] }
 0x13c   : > { %15220 = vst [vmem:[#allocation59_spill] sm:$0xff] %v8670_v0  ;;  %5871 = vpow2.f32 %v8504_v28  ;;  %v8677_v11 = vmul.f32 1.442695, %v1001_v53  ;;  %v8679_v5 = vpop.eup %5853  ;;  %v884_v36 = vrot.slane %v883_v12, 2  ;;  %v8683_v44 = vmul.f32 1.442695, %v1002_v1 }
 0x13d   : > { %15221 = vst [vmem:[#allocation60_spill] sm:$0xff] %v8679_v5  ;;  %5873 = vpow2.f32 %v8510_v14  ;;  %v8685_v37 = vpop.eup %5855  ;;  %v902_v60 = vmax.f32 %v901_v17, %v888_v30  ;;  %v15223_v28 = vld [vmem:[#allocation61_spill] sm:$0xff]  ;;  %v8690_v40 = vmul.f32 1.442695, %v1003_v50  ;;  %v920_v5 = vmax.f32 %v919_v54, %v15225_v26  ;;  %v15227_v14 = vld [vmem:[#allocation63_spill] sm:$0xff]  ;;  %v15229_v17 = vld [vmem:[#allocation64_spill] sm:$0xff] }
 0x13e   : > { %15222 = vst [vmem:[#allocation49_spill] sm:$0xff] %v8685_v37  ;;  %v1004_v27 = vsub.f32 %v15223_v28, %v8657_v2  ;;  %5875 = vpow2.f32 %v8516_v34  ;;  %v8692_v53 = vpop.eup %5857  ;;  %v1005_v25 = vsub.f32 %v15226_v15, %v8657_v2  ;;  %v1006_v1 = vsub.f32 %v15227_v14, %v8657_v2  ;;  %v15230_v34 = vld [vmem:[#allocation66_spill] sm:$0xff]  ;;  %v15231_v37 = vld [vmem:[#allocation69_spill] sm:$0xff]  ;;  %v15250_v46 = vld [vmem:[#allocation83_spill] sm:$0xff] }
 0x13f   : > { %15224 = vst [vmem:[#allocation48_spill] sm:$0xff] %v8692_v53  ;;  %5877 = vpow2.f32 %v8518_v35  ;;  %v8700_v30 = vpop.eup %5859  ;;  %v1007_v28 = vsub.f32 %v15229_v17, %v8657_v2  ;;  %v1008_v50 = vsub.f32 %v15230_v34, %v8657_v2  ;;  %v1009_v53 = vsub.f32 %v15231_v37, %v8657_v2  ;;  %v15233_v35 = vld [vmem:[#allocation70_spill] sm:$0xff]  ;;  %v15235_v34 = vld [vmem:[#allocation71_spill] sm:$0xff] }
 0x140   : > { %15228 = vst [vmem:[#allocation61_spill] sm:$0xff] %v8700_v30  ;;  %5879 = vpow2.f32 %v8525_v3  ;;  %v8709_v54 = vpop.eup %5861  ;;  %v937_v15 = vmax.f32 %v936_v59, %v8520_v39  ;;  %v885_v14 = vmax.f32 %v883_v12, %v884_v36  ;;  %v1010_v0 = vsub.f32 %v15233_v35, %v8657_v2  ;;  %v15236_v37 = vld [vmem:[#allocation74_spill] sm:$0xff]  ;;  %v15238_v59 = vld [vmem:[#allocation15_spill] sm:$0xff]  ;;  %v15239_v36 = vld [vmem:[#allocation77_spill] sm:$0xff] }
 0x141   : > { %15232 = vst [vmem:[#allocation62_spill] sm:$0xff] %v8709_v54  ;;  %5881 = vpow2.f32 %v8527_v51  ;;  %v8715_v30 = vpop.eup %5863  ;;  %v903_v17 = vrot.slane %v902_v60, 4  ;;  %v1011_v26 = vsub.f32 %v15235_v34, %v8657_v2  ;;  %v1012_v13 = vsub.f32 %v15236_v37, %v8657_v2  ;;  %v15240_v51 = vld [vmem:[#allocation78_spill] sm:$0xff]  ;;  %v15242_v34 = vld [vmem:[#allocation103_spill] sm:$0xff] }
 0x142   : > { %15234 = vst [vmem:[#allocation63_spill] sm:$0xff] %v8715_v30  ;;  %5883 = vpow2.f32 %v8535_v16  ;;  %v921_v12 = vmax.f32 %v920_v5, %v15238_v59  ;;  %v1013_v35 = vsub.f32 %v15239_v36, %v8657_v2  ;;  %v1014_v39 = vsub.f32 %v15240_v51, %v8657_v2  ;;  %v15243_v54 = vld [vmem:[#allocation30_spill] sm:$0xff]  ;;  %v15244_v37 = vld [vmem:[#allocation79_spill] sm:$0xff] }
 0x143   : > { %v8722_v3 = vpop.eup %5865  ;;  %5885 = vpow2.f32 %v8541_v21  ;;  %v909_v58 = vmax.f32 %v15243_v54, %v15242_v34  ;;  %v938_v36 = vmax.f32 %v937_v15, %v8529_v20  ;;  %v886_v51 = vrot.slane %v885_v14, 1  ;;  %v15247_v21 = vld [vmem:[#allocation81_spill] sm:$0xff]  ;;  %v15249_v16 = vld [vmem:[#allocation82_spill] sm:$0xff]  ;;  %v15252_v15 = vld [vmem:[#allocation16_spill] sm:$0xff] }
 0x144   : > { %15237 = vst [vmem:[#allocation64_spill] sm:$0xff] %v8722_v3  ;;  %v8730_v30 = vpop.eup %5867  ;;  %v15245_v3 = vld [vmem:[#allocation80_spill] sm:$0xff]  ;;  %5887 = vpow2.f32 %v8549_v42  ;;  %v904_v34 = vmax.f32 %v902_v60, %v903_v17  ;;  %v952_v59 = vmax.f32 %v8596_v19, %v8590_v23  ;;  %v8763_v17 = vmul.f32 1.442695, %v1005_v25 }
 0x145   : > { %15241 = vst [vmem:[#allocation66_spill] sm:$0xff] %v8730_v30  ;;  %v8739_v5 = vpop.eup %5869  ;;  %5889 = vpow2.f32 %v8617_v41  ;;  %v8758_v41 = vmul.f32 1.442695, %v1004_v27  ;;  %v8765_v29 = vmul.f32 1.442695, %v1006_v1 }
 0x146   : > { %15246 = vst [vmem:[#allocation69_spill] sm:$0xff] %v8739_v5  ;;  %v8745_v30 = vpop.eup %5871  ;;  %5891 = vpow2.f32 %v8623_v7  ;;  %v922_v5 = vmax.f32 %v921_v12, %v15252_v15  ;;  %v8767_v7 = vmul.f32 1.442695, %v1007_v28  ;;  %v939_v12 = vmax.f32 %v938_v36, %v8537_v57 }
 0x147   : > { %15248 = vst [vmem:[#allocation70_spill] sm:$0xff] %v8745_v30  ;;  %v8752_v42 = vpop.eup %5873  ;;  %5893 = vpow2.f32 %v8629_v31  ;;  %v8775_v31 = vmul.f32 1.442695, %v1008_v50  ;;  %v905_v19 = vrot.slane %v904_v34, 2  ;;  %v8780_v25 = vmul.f32 1.442695, %v1009_v53 }
 0x148   : > { %15251 = vst [vmem:[#allocation71_spill] sm:$0xff] %v8752_v42  ;;  %v8760_v60 = vpop.eup %5875  ;;  %5895 = vpow2.f32 %v8635_v8  ;;  %v8772_v42 = vmax.f32 %v885_v14, %v886_v51  ;;  %v8782_v8 = vmul.f32 1.442695, %v1010_v0  ;;  %v953_v28 = vmax.f32 %v952_v59, %v8602_v6  ;;  %v15272_v6 = vld [vmem:[#allocation37_spill] sm:$0xff]  ;;  %v15278_v30 = vld [vmem:[#allocation42_spill] sm:$0xff] }
 0x149   : > { %15253 = vst [vmem:[#allocation74_spill] sm:$0xff] %v8760_v60  ;;  %v8769_v54 = vpop.eup %5877  ;;  %5897 = vpow2.f32 %v8637_v22  ;;  %v923_v36 = vmax.f32 %v922_v5, %v909_v58  ;;  %v8788_v14 = vmul.f32 1.442695, %v1011_v26  ;;  %v8793_v50 = vmul.f32 1.442695, %v1012_v13  ;;  %v15260_v13 = vld [vmem:[#allocation86_spill] sm:$0xff] }
 0x14a   : > { %15254 = vst [vmem:[#allocation77_spill] sm:$0xff] %v8769_v54  ;;  %v8777_v27 = vpop.eup %5879  ;;  %5899 = vpow2.f32 %v8642_v4  ;;  %v8795_v4 = vmul.f32 1.442695, %v1013_v35  ;;  %v8797_v53 = vmul.f32 1.442695, %v1014_v39  ;;  %v940_v51 = vmax.f32 %v939_v12, %v8543_v48  ;;  %v15261_v39 = vld [vmem:[#allocation88_spill] sm:$0xff] }
 0x14b   : > { %15255 = vst [vmem:[#allocation78_spill] sm:$0xff] %v8777_v27  ;;  %v8784_v1 = vpop.eup %5881  ;;  %5901 = vpow2.f32 %v8644_v61  ;;  %v1020_v58 = vsub.f32 %v15179_v56, %v8772_v42  ;;  %v1021_v61 = vsub.f32 %v15178_v45, %v8772_v42  ;;  %v1022_v59 = vsub.f32 %v15260_v13, %v8772_v42  ;;  %v15263_v45 = vld [vmem:[#allocation89_spill] sm:$0xff]  ;;  %v15266_v13 = vld [vmem:[#allocation99_spill] sm:$0xff]  ;;  %v15275_v54 = vld [vmem:[#allocation18_spill] sm:$0xff] }
 0x14c   : > { %15256 = vst [vmem:[#allocation79_spill] sm:$0xff] %v8784_v1  ;;  %v8790_v22 = vpop.eup %5883  ;;  %5903 = vpow2.f32 %v8646_v43  ;;  %v906_v43 = vmax.f32 %v904_v34, %v905_v19  ;;  %v1023_v35 = vsub.f32 %v15261_v39, %v8772_v42  ;;  %v954_v56 = vmax.f32 %v953_v28, %v8610_v18  ;;  %v15265_v19 = vld [vmem:[#allocation31_spill] sm:$0xff]  ;;  %v15270_v18 = vld [vmem:[#allocation36_spill] sm:$0xff]  ;;  %v15276_v1 = vld [vmem:[#allocation17_spill] sm:$0xff] }
 0x14d   : > { %15257 = vst [vmem:[#allocation80_spill] sm:$0xff] %v8790_v22  ;;  %v8799_v0 = vpop.eup %5885  ;;  %5905 = vpow2.f32 %v8660_v52  ;;  %v924_v12 = vrot.slane %v923_v36, 4  ;;  %v1025_v34 = vsub.f32 %v15265_v19, %v8772_v42  ;;  %v941_v22 = vmax.f32 %v940_v51, %v8551_v38 }
 0x14e   : > { %15258 = vst [vmem:[#allocation81_spill] sm:$0xff] %v8799_v0  ;;  %v8807_v26 = vpop.eup %5887  ;;  %5907 = vpow2.f32 %v8666_v49  ;;  %v1024_v0 = vsub.f32 %v15263_v45, %v8772_v42  ;;  %v15267_v49 = vld [vmem:[#allocation100_spill] sm:$0xff]  ;;  %v15269_v45 = vld [vmem:[#allocation34_spill] sm:$0xff]  ;;  %v907_v39 = vrot.slane %v906_v43, 1  ;;  %v930_v60 = vmax.f32 %v15276_v1, %v15275_v54 }
 0x14f   : > { %15259 = vst [vmem:[#allocation82_spill] sm:$0xff] %v8807_v26  ;;  %v8814_v5 = vpop.eup %5889  ;;  %5909 = vpow2.f32 %v8668_v55  ;;  %v955_v55 = vmax.f32 %v954_v56, %v8619_v63  ;;  %v925_v27 = vmax.f32 %v923_v36, %v924_v12  ;;  %v15281_v36 = vld [vmem:[#allocation84_spill] sm:$0xff]  ;;  %v15282_v63 = vld [vmem:[#allocation46_spill] sm:$0xff]  ;;  %v15283_v26 = vsub.f32 %v15244_v37, %v8657_v2 }
 0x150   : > { %15262 = vst [vmem:[#allocation83_spill] sm:$0xff] %v8814_v5  ;;  %v8820_v52 = vpop.eup %5891  ;;  %5911 = vpow2.f32 %v8673_v62  ;;  %v15273_v62 = vld [vmem:[#allocation39_spill] sm:$0xff]  ;;  %v942_v12 = vmax.f32 %v941_v22, %v15281_v36  ;;  %v8870_v23 = vmax.f32 %v906_v43, %v907_v39  ;;  %v15286_v22 = vsub.f32 %v15247_v21, %v8657_v2 }
 0x151   : > { %15264 = vst [vmem:[#allocation16_spill] sm:$0xff] %v8820_v52  ;;  %v8829_v28 = vpop.eup %5893  ;;  %5913 = vpow2.f32 %v8675_v32  ;;  %v926_v37 = vrot.slane %v925_v27, 2  ;;  %v8892_v39 = vmul.f32 1.442695, %v1020_v58 }
 0x152   : > { %15268 = vst [vmem:[#allocation86_spill] sm:$0xff] %v8829_v28  ;;  %v8837_v19 = vpop.eup %5895  ;;  %5915 = vpow2.f32 %v8677_v11  ;;  %v15279_v11 = vld [vmem:[#allocation45_spill] sm:$0xff] }
 0x153   : > { %15271 = vst [vmem:[#allocation88_spill] sm:$0xff] %v8837_v19  ;;  %v8844_v51 = vpop.eup %5897  ;;  %5917 = vpow2.f32 %v8683_v44  ;;  %v1190_v44 = vmul.f32 1.442695, %v15286_v22  ;;  %v15292_v22 = vld [vmem:[#allocation33_spill] sm:$0xff] }
 0x154   : > { %15274 = vst [vmem:[#allocation89_spill] sm:$0xff] %v8844_v51  ;;  %v8850_v32 = vpop.eup %5899  ;;  %5919 = vpow2.f32 %v8690_v40  ;;  %v15285_v40 = vsub.f32 %v15245_v3, %v8657_v2  ;;  %v15290_v3 = vsub.f32 %v15250_v46, %v8657_v2  ;;  %v1036_v46 = vsub.f32 %v15215_v47, %v8870_v23  ;;  %v15296_v47 = vld [vmem:[#allocation51_spill] sm:$0xff] }
 0x155   : > { %15277 = vst [vmem:[#allocation31_spill] sm:$0xff] %v8850_v32  ;;  %v8859_v56 = vpop.eup %5901  ;;  %5921 = vpow2.f32 %v8758_v41  ;;  %v1186_v32 = vmul.f32 1.442695, %v15283_v26  ;;  %v956_v41 = vmax.f32 %v955_v55, %v8625_v10  ;;  %v15288_v26 = vsub.f32 %v15249_v16, %v8657_v2 }
 0x156   : > { %15280 = vst [vmem:[#allocation99_spill] sm:$0xff] %v8859_v56  ;;  %v8868_v48 = vpop.eup %5903  ;;  %5923 = vpow2.f32 %v8763_v17  ;;  %v1188_v38 = vmul.f32 1.442695, %v15285_v40  ;;  %v1194_v21 = vmul.f32 1.442695, %v15290_v3  ;;  %v15304_v3 = vld [vmem:[#allocation65_spill] sm:$0xff] }
 0x157   : > { %15284 = vst [vmem:[#allocation100_spill] sm:$0xff] %v8868_v48  ;;  %v8879_v56 = vpop.eup %5905  ;;  %5925 = vpow2.f32 %v8765_v29  ;;  %v1192_v43 = vmul.f32 1.442695, %v15288_v26  ;;  %v8894_v40 = vmul.f32 1.442695, %v1021_v61  ;;  %v943_v29 = vmax.f32 %v942_v12, %v15292_v22 }
 0x158   : > { %15287 = vst [vmem:[#allocation34_spill] sm:$0xff] %v8879_v56  ;;  %v8886_v17 = vpop.eup %5907  ;;  %5927 = vpow2.f32 %v8767_v7  ;;  %v8900_v16 = vmul.f32 1.442695, %v1022_v59  ;;  %v8902_v26 = vmul.f32 1.442695, %v1023_v35  ;;  %v957_v61 = vmax.f32 %v956_v41, %v8631_v24 }
 0x159   : > { %15289 = vst [vmem:[#allocation36_spill] sm:$0xff] %v8886_v17  ;;  %v8896_v55 = vpop.eup %5909  ;;  %5929 = vpow2.f32 %v8775_v31  ;;  %v8909_v2 = vmul.f32 1.442695, %v1024_v0  ;;  %v8911_v7 = vmul.f32 1.442695, %v1025_v34  ;;  %v927_v31 = vmax.f32 %v925_v27, %v926_v37  ;;  %v15298_v34 = vld [vmem:[#allocation55_spill] sm:$0xff] }
 0x15a   : > { %15291 = vst [vmem:[#allocation37_spill] sm:$0xff] %v8896_v55  ;;  %v8904_v10 = vpop.eup %5911  ;;  %5931 = vpow2.f32 %v8780_v25  ;;  %v15297_v25 = vld [vmem:[#allocation53_spill] sm:$0xff]  ;;  %v944_v27 = vmax.f32 %v943_v29, %v930_v60  ;;  %v15303_v0 = vld [vmem:[#allocation102_spill] sm:$0xff]  ;;  %v15311_v55 = vld [vmem:[#allocation35_spill] sm:$0xff]  ;;  %v15319_v56 = vsub.f32 %v15266_v13, %v8772_v42  ;;  %v15325_v13 = vsub.f32 %v15270_v18, %v8772_v42 }
 0x15b   : > { %15293 = vst [vmem:[#allocation39_spill] sm:$0xff] %v8904_v10  ;;  %v8913_v58 = vpop.eup %5913  ;;  %5933 = vpow2.f32 %v8782_v8  ;;  %v15300_v37 = vld [vmem:[#allocation57_spill] sm:$0xff]  ;;  %v928_v24 = vrot.slane %v927_v31, 1  ;;  %v15312_v17 = vld [vmem:[#allocation72_spill] sm:$0xff]  ;;  %v15330_v18 = vsub.f32 %v15278_v30, %v8772_v42  ;;  %v15335_v30 = vld [vmem:[#allocation58_spill] sm:$0xff] }
 0x15c   : > { %15294 = vst [vmem:[#allocation18_spill] sm:$0xff] %v8913_v58  ;;  %v8919_v35 = vpop.eup %5915  ;;  %5935 = vpow2.f32 %v8788_v14  ;;  %v15301_v8 = vld [vmem:[#allocation101_spill] sm:$0xff]  ;;  %v15305_v14 = vld [vmem:[#allocation67_spill] sm:$0xff]  ;;  %v15318_v58 = vld [vmem:[#allocation32_spill] sm:$0xff] }
 0x15d   : > { %15295 = vst [vmem:[#allocation17_spill] sm:$0xff] %v8919_v35  ;;  %v8928_v41 = vpop.eup %5917  ;;  %5937 = vpow2.f32 %v8793_v50  ;;  %v15307_v29 = vld [vmem:[#allocation93_spill] sm:$0xff]  ;;  %v15308_v50 = vld [vmem:[#allocation68_spill] sm:$0xff]  ;;  %v8977_v22 = vmax.f32 %v927_v31, %v928_v24  ;;  %v15327_v24 = vsub.f32 %v15273_v62, %v8772_v42  ;;  %v15332_v62 = vsub.f32 %v15279_v11, %v8772_v42 }
 0x15e   : > { %15299 = vst [vmem:[#allocation42_spill] sm:$0xff] %v8928_v41  ;;  %v8935_v12 = vpop.eup %5919  ;;  %5939 = vpow2.f32 %v8795_v4  ;;  %v958_v59 = vmax.f32 %v957_v61, %v15307_v29  ;;  %v15313_v4 = vld [vmem:[#allocation73_spill] sm:$0xff]  ;;  %v945_v61 = vrot.slane %v944_v27, 4  ;;  %v15315_v29 = vld [vmem:[#allocation75_spill] sm:$0xff]  ;;  %v15320_v41 = vsub.f32 %v15267_v49, %v8772_v42  ;;  %v15322_v10 = vld [vmem:[#allocation56_spill] sm:$0xff] }
 0x15f   : > { %15302 = vst [vmem:[#allocation45_spill] sm:$0xff] %v8935_v12  ;;  %v8944_v60 = vpop.eup %5921  ;;  %5941 = vpow2.f32 %v8797_v53  ;;  %v15316_v53 = vld [vmem:[#allocation76_spill] sm:$0xff]  ;;  %v15326_v49 = vsub.f32 %v15272_v6, %v8772_v42  ;;  %v1218_v31 = vmul.f32 1.442695, %v15327_v24  ;;  %v15336_v24 = vld [vmem:[#allocation30_spill] sm:$0xff] }
 0x160   : > { %15306 = vst [vmem:[#allocation46_spill] sm:$0xff] %v8944_v60  ;;  %v8950_v12 = vpop.eup %5923  ;;  %5943 = vpow2.f32 %v1186_v32  ;;  %v1208_v32 = vmul.f32 1.442695, %v15319_v56  ;;  %v1210_v20 = vmul.f32 1.442695, %v15320_v41  ;;  %v959_v35 = vmax.f32 %v958_v59, %v15322_v10 }
 0x161   : > { %15309 = vst [vmem:[#allocation51_spill] sm:$0xff] %v8950_v12  ;;  %v8958_v48 = vpop.eup %5925  ;;  %5945 = vpow2.f32 %v1188_v38  ;;  %v15323_v38 = vsub.f32 %v15269_v45, %v8772_v42  ;;  %v1214_v56 = vmul.f32 1.442695, %v15325_v13  ;;  %v1216_v41 = vmul.f32 1.442695, %v15326_v49 }
 0x162   : > { %15314 = vst [vmem:[#allocation53_spill] sm:$0xff] %v8958_v48  ;;  %v8964_v36 = vpop.eup %5927  ;;  %5947 = vpow2.f32 %v1190_v44  ;;  %v946_v59 = vmax.f32 %v944_v27, %v945_v61  ;;  %v15329_v45 = vsub.f32 %v15165_v33, %v8772_v42  ;;  %v9012_v27 = vmul.f32 1.442695, %v15332_v62  ;;  %v15339_v62 = vld [vmem:[#allocation104_spill] sm:$0xff] }
 0x163   : > { %15317 = vst [vmem:[#allocation55_spill] sm:$0xff] %v8964_v36  ;;  %v8974_v51 = vpop.eup %5929  ;;  %5949 = vpow2.f32 %v1192_v43  ;;  %v1212_v57 = vmul.f32 1.442695, %v15323_v38  ;;  %v9004_v38 = vmul.f32 1.442695, %v15330_v18  ;;  %v960_v49 = vmax.f32 %v959_v35, %v15335_v30  ;;  %v15343_v18 = vld [vmem:[#allocation29_spill] sm:$0xff] }
 0x164   : > { %15321 = vst [vmem:[#allocation57_spill] sm:$0xff] %v8974_v51  ;;  %v8982_v44 = vpop.eup %5931  ;;  %5951 = vpow2.f32 %v1194_v21  ;;  %v8999_v21 = vmul.f32 1.442695, %v15329_v45  ;;  %v1228_v61 = vmul.f32 1.442695, %v1036_v46  ;;  %v947_v45 = vrot.slane %v946_v59, 2 }
 0x165   : > { %15324 = vst [vmem:[#allocation101_spill] sm:$0xff] %v8982_v44  ;;  %v8993_v43 = vpop.eup %5933  ;;  %5953 = vpow2.f32 %v8892_v39  ;;  %v15333_v39 = vsub.f32 %v15282_v63, %v8772_v42  ;;  %v15340_v42 = vld [vmem:[#allocation105_spill] sm:$0xff]  ;;  %v15346_v46 = vld [vmem:[#allocation91_spill] sm:$0xff]  ;;  %v15350_v30 = vld [vmem:[#allocation94_spill] sm:$0xff] }
 0x166   : > { %15328 = vst [vmem:[#allocation102_spill] sm:$0xff] %v8993_v43  ;;  %v9006_v6 = vpop.eup %5935  ;;  %5955 = vpow2.f32 %v8894_v40  ;;  %v15337_v40 = vld [vmem:[#allocation103_spill] sm:$0xff]  ;;  %v961_v44 = vmax.f32 %v960_v49, %v15350_v30  ;;  %v948_v30 = vmax.f32 %v946_v59, %v947_v45  ;;  %v15362_v59 = vsub.f32 %v15298_v34, %v8870_v23 }
 0x167   : > { %15331 = vst [vmem:[#allocation65_spill] sm:$0xff] %v9006_v6  ;;  %v9017_v33 = vmul.f32 1.442695, %v15333_v39  ;;  %v9019_v13 = vpop.eup %5937  ;;  %5957 = vpow2.f32 %v8900_v16  ;;  %v15341_v39 = vld [vmem:[#allocation87_spill] sm:$0xff]  ;;  %v15354_v6 = vld [vmem:[#allocation98_spill] sm:$0xff] }
 0x168   : > { %15334 = vst [vmem:[#allocation67_spill] sm:$0xff] %v9019_v13  ;;  %v9027_v11 = vpop.eup %5939  ;;  %5959 = vpow2.f32 %v8902_v26  ;;  %v15360_v26 = vsub.f32 %v15296_v47, %v8870_v23  ;;  %v1236_v45 = vmul.f32 1.442695, %v15362_v59  ;;  %v15366_v47 = vsub.f32 %v15301_v8, %v8870_v23  ;;  %v15371_v59 = vld [vmem:[#allocation61_spill] sm:$0xff] }
 0x169   : > { %15338 = vst [vmem:[#allocation68_spill] sm:$0xff] %v9027_v11  ;;  %v9036_v35 = vpop.eup %5941  ;;  %5961 = vpow2.f32 %v8909_v2  ;;  %v15351_v11 = vld [vmem:[#allocation96_spill] sm:$0xff]  ;;  %v15364_v2 = vld [vmem:[#allocation59_spill] sm:$0xff]  ;;  %v15373_v8 = vsub.f32 %v15305_v14, %v8870_v23  ;;  %v15377_v14 = vsub.f32 %v15313_v4, %v8870_v23  ;;  %v15383_v4 = vsub.f32 %v15318_v58, %v8870_v23 }
 0x16a   : > { %15342 = vst [vmem:[#allocation35_spill] sm:$0xff] %v9036_v35  ;;  %v9043_v63 = vpop.eup %5943  ;;  %5963 = vpow2.f32 %v8911_v7  ;;  %v15355_v35 = vld [vmem:[#allocation14_spill] sm:$0xff]  ;;  %v15356_v7 = vld [vmem:[#allocation15_spill] sm:$0xff]  ;;  %v1232_v10 = vmul.f32 1.442695, %v15360_v26 }
 0x16b   : > { %15345 = vst [vmem:[#allocation72_spill] sm:$0xff] %v9043_v63  ;;  %v9052_v43 = vpop.eup %5945  ;;  %v15352_v63 = vld [vmem:[#allocation97_spill] sm:$0xff]  ;;  %5965 = vpow2.f32 %v1208_v32  ;;  %v15358_v32 = vsub.f32 %v15214_v9, %v8870_v23  ;;  %v962_v9 = vmax.f32 %v961_v44, %v15364_v2  ;;  %v1240_v26 = vmul.f32 1.442695, %v15366_v47 }
 0x16c   : > { %15349 = vst [vmem:[#allocation73_spill] sm:$0xff] %v9052_v43  ;;  %v9059_v13 = vpop.eup %5947  ;;  %5967 = vpow2.f32 %v1210_v20  ;;  %v15361_v20 = vsub.f32 %v15297_v25, %v8870_v23  ;;  %v15368_v25 = vsub.f32 %v15303_v0, %v8870_v23  ;;  %v949_v2 = vrot.slane %v948_v30, 1 }
 0x16d   : > { %15353 = vst [vmem:[#allocation75_spill] sm:$0xff] %v9059_v13  ;;  %v9067_v49 = vpop.eup %5949  ;;  %5969 = vpow2.f32 %v1212_v57  ;;  %v1230_v16 = vmul.f32 1.442695, %v15358_v32  ;;  %v1377_v0 = vadd.f32 %v8820_v52, %v8814_v5  ;;  %v15379_v5 = vld [vmem:[#allocation60_spill] sm:$0xff] }
 0x16e   : > { %15357 = vst [vmem:[#allocation76_spill] sm:$0xff] %v9067_v49  ;;  %v9074_v13 = vpop.eup %5951  ;;  %5971 = vpow2.f32 %v1214_v56  ;;  %v1234_v43 = vmul.f32 1.442695, %v15361_v20  ;;  %v15365_v56 = vsub.f32 %v15300_v37, %v8870_v23  ;;  %v1242_v34 = vmul.f32 1.442695, %v15368_v25  ;;  %v15421_v49 = vld [vmem:[#allocation28_spill] sm:$0xff] }
 0x16f   : > { %15359 = vst [vmem:[#allocation32_spill] sm:$0xff] %v9074_v13  ;;  %v9085_v57 = vpop.eup %5953  ;;  %5973 = vpow2.f32 %v1216_v41  ;;  %v15369_v20 = vsub.f32 %v15304_v3, %v8870_v23  ;;  %v15370_v41 = vld [vmem:[#allocation48_spill] sm:$0xff]  ;;  %v15375_v3 = vsub.f32 %v15308_v50, %v8870_v23  ;;  %v963_v52 = vmax.f32 %v962_v9, %v15379_v5 }
 0x170   : > { %15363 = vst [vmem:[#allocation30_spill] sm:$0xff] %v9085_v57  ;;  %v1238_v32 = vmul.f32 1.442695, %v15365_v56  ;;  %v9094_v13 = vpop.eup %5955  ;;  %5975 = vpow2.f32 %v1218_v31  ;;  %v1356_v37 = vadd.f32 %v15371_v59, %v15370_v41  ;;  %v9111_v31 = vmul.f32 1.442695, %v15373_v8 }
 0x171   : > { %15367 = vst [vmem:[#allocation103_spill] sm:$0xff] %v9094_v13  ;;  %v9102_v44 = vmul.f32 1.442695, %v15369_v20  ;;  %v9106_v56 = vpop.eup %5957  ;;  %5977 = vpow2.f32 %v1228_v61  ;;  %v9120_v25 = vmul.f32 1.442695, %v15375_v3  ;;  %v15376_v20 = vsub.f32 %v15312_v17, %v8870_v23 }
 0x172   : > { %15372 = vst [vmem:[#allocation104_spill] sm:$0xff] %v9106_v56  ;;  %v9115_v47 = vpop.eup %5959  ;;  %5979 = vpow2.f32 %v1230_v16  ;;  %v9130_v8 = vmul.f32 1.442695, %v15377_v14  ;;  %v15380_v50 = vsub.f32 %v15315_v29, %v8870_v23  ;;  %v15381_v17 = vsub.f32 %v15316_v53, %v8870_v23 }
 0x173   : > { %15374 = vst [vmem:[#allocation105_spill] sm:$0xff] %v9115_v47  ;;  %v9125_v61 = vmul.f32 1.442695, %v15376_v20  ;;  %v9132_v59 = vpop.eup %5961  ;;  %5981 = vpow2.f32 %v1232_v10  ;;  %v9151_v14 = vmul.f32 1.442695, %v15383_v4  ;;  %v15384_v10 = vld [vmem:[#allocation62_spill] sm:$0xff]  ;;  %v1398_v29 = vadd.f32 %v8950_v12, %v8944_v60 }
 0x174   : > { %15378 = vst [vmem:[#allocation87_spill] sm:$0xff] %v9132_v59  ;;  %v9138_v16 = vmul.f32 1.442695, %v15380_v50  ;;  %v9143_v3 = vmul.f32 1.442695, %v15381_v17  ;;  %v9145_v20 = vpop.eup %5963  ;;  %5983 = vpow2.f32 %v8999_v21  ;;  %v1357_v9 = vadd.f32 %v15384_v10, %v1356_v37 }
 0x175   : > { %15382 = vst [vmem:[#allocation29_spill] sm:$0xff] %v9145_v20  ;;  %v9156_v50 = vpop.eup %5965  ;;  %v9158_v41 = vmax.f32 %v948_v30, %v949_v2  ;;  %5985 = vpow2.f32 %v1234_v43  ;;  %v15386_v53 = vsub.f32 %v15336_v24, %v8977_v22  ;;  %v1378_v21 = vadd.f32 %v8829_v28, %v1377_v0  ;;  %v15392_v0 = vld [vmem:[#allocation49_spill] sm:$0xff] }
 0x176   : > { %15385 = vst [vmem:[#allocation91_spill] sm:$0xff] %v9156_v50  ;;  %v9164_v5 = vpop.eup %5967  ;;  %5987 = vpow2.f32 %v9004_v38  ;;  %v15388_v23 = vsub.f32 %v15337_v40, %v8977_v22  ;;  %v15389_v37 = vsub.f32 %v15339_v62, %v8977_v22  ;;  %v15390_v43 = vsub.f32 %v15340_v42, %v8977_v22 }
 0x177   : > { %v1260_v17 = vmul.f32 1.442695, %v15386_v53  ;;  %15387 = vst [vmem:[#allocation96_spill] sm:$0xff] %v9164_v5  ;;  %v9180_v2 = vpop.eup %5969  ;;  %v964_v4 = vmax.f32 %v963_v52, %v15392_v0  ;;  %5989 = vpow2.f32 %v9012_v27  ;;  %v15393_v38 = vsub.f32 %v15341_v39, %v8977_v22  ;;  %v15396_v52 = vld [vmem:[#allocation63_spill] sm:$0xff]  ;;  %v15403_v39 = vld [vmem:[#allocation38_spill] sm:$0xff] }
 0x178   : > { %v1262_v58 = vmul.f32 1.442695, %v15388_v23  ;;  %v9173_v30 = vmul.f32 1.442695, %v15389_v37  ;;  %v9178_v24 = vmul.f32 1.442695, %v15390_v43  ;;  %v1419_v62 = vadd.f32 %v9094_v13, %v9085_v57  ;;  %v9191_v53 = vpop.eup %5971 }
 0x179   : > { %15391 = vst [vmem:[#allocation97_spill] sm:$0xff] %v9180_v2  ;;  %v9187_v40 = vmul.f32 1.442695, %v15393_v38  ;;  %15394 = vst [vmem:[#allocation98_spill] sm:$0xff] %v9191_v53  ;;  %5991 = vpow2.f32 %v9017_v33  ;;  %v15395_v42 = vsub.f32 %v15343_v18, %v8977_v22  ;;  %v1358_v37 = vadd.f32 %v15396_v52, %v1357_v9  ;;  %v9201_v43 = vpop.eup %5973  ;;  %v15399_v18 = vld [vmem:[#allocation19_spill] sm:$0xff]  ;;  %v15400_v9 = vld [vmem:[#allocation20_spill] sm:$0xff] }
 0x17a   : > { %v1399_v27 = vadd.f32 %v8958_v48, %v1398_v29  ;;  %15397 = vst [vmem:[#allocation14_spill] sm:$0xff] %v9201_v43  ;;  %5993 = vpow2.f32 %v1236_v45  ;;  %v1379_v33 = vadd.f32 %v8837_v19, %v1378_v21  ;;  %v9208_v57 = vpop.eup %5975  ;;  %v15401_v29 = vld [vmem:[#allocation21_spill] sm:$0xff]  ;;  %v15404_v38 = vmax.f32 %v15311_v55, %v15403_v39  ;;  %v15405_v21 = vld [vmem:[#allocation22_spill] sm:$0xff]  ;;  %v15407_v13 = vld [vmem:[#allocation23_spill] sm:$0xff] }
 0x17b   : > { %v9197_v23 = vmul.f32 1.442695, %v15395_v42  ;;  %15398 = vst [vmem:[#allocation15_spill] sm:$0xff] %v9208_v57  ;;  %5995 = vpow2.f32 %v1238_v32  ;;  %v9216_v60 = vpop.eup %5977  ;;  %v1420_v28 = vadd.f32 %v9106_v56, %v1419_v62  ;;  %v15408_v48 = vld [vmem:[#allocation64_spill] sm:$0xff] }
 0x17c   : > { %15402 = vst [vmem:[#allocation19_spill] sm:$0xff] %v9216_v60  ;;  %v965_v45 = vmax.f32 %v964_v4, %v15404_v38  ;;  %5997 = vpow2.f32 %v1240_v26  ;;  %v9224_v42 = vpop.eup %5979  ;;  %v1359_v32 = vadd.f32 %v15408_v48, %v1358_v37  ;;  %v1400_v52 = vadd.f32 %v8964_v36, %v1399_v27  ;;  %v15410_v4 = vld [vmem:[#allocation24_spill] sm:$0xff]  ;;  %v15411_v26 = vld [vmem:[#allocation89_spill] sm:$0xff]  ;;  %v15414_v37 = vld [vmem:[#allocation26_spill] sm:$0xff] }
 0x17d   : > { %15406 = vst [vmem:[#allocation20_spill] sm:$0xff] %v9224_v42  ;;  %5999 = vpow2.f32 %v1242_v34  ;;  %v9230_v10 = vpop.eup %5981  ;;  %v1380_v12 = vadd.f32 %v15411_v26, %v1379_v33  ;;  %v1440_v62 = vadd.f32 %v9224_v42, %v9216_v60  ;;  %v15413_v34 = vld [vmem:[#allocation25_spill] sm:$0xff]  ;;  %v15415_v36 = vld [vmem:[#allocation27_spill] sm:$0xff]  ;;  %v1421_v33 = vadd.f32 %v9115_v47, %v1420_v28  ;;  %v15418_v19 = vld [vmem:[#allocation40_spill] sm:$0xff] }
 0x17e   : > { %15409 = vst [vmem:[#allocation21_spill] sm:$0xff] %v9230_v10  ;;  %6001 = vpow2.f32 %v9102_v44  ;;  %v9238_v56 = vpop.eup %5983  ;;  %v966_v44 = vrot.slane %v965_v45, 4  ;;  %v15419_v27 = vld [vmem:[#allocation66_spill] sm:$0xff]  ;;  %v15422_v28 = vld [vmem:[#allocation85_spill] sm:$0xff]  ;;  %v15425_v26 = vld [vmem:[#allocation84_spill] sm:$0xff] }
 0x17f   : > { %15412 = vst [vmem:[#allocation38_spill] sm:$0xff] %v9238_v56  ;;  %6003 = vpow2.f32 %v9111_v31  ;;  %v9247_v38 = vpop.eup %5985  ;;  %v1441_v60 = vadd.f32 %v9230_v10, %v1440_v62  ;;  %v1360_v48 = vadd.f32 %v15419_v27, %v1359_v32  ;;  %v1401_v31 = vadd.f32 %v8974_v51, %v1400_v52  ;;  %v15423_v62 = vld [vmem:[#allocation31_spill] sm:$0xff]  ;;  %v15426_v32 = vld [vmem:[#allocation33_spill] sm:$0xff]  ;;  %v15428_v47 = vld [vmem:[#allocation90_spill] sm:$0xff] }
 0x180   : > { %15416 = vst [vmem:[#allocation22_spill] sm:$0xff] %v9247_v38  ;;  %6005 = vpow2.f32 %v9120_v25  ;;  %v9252_v42 = vpop.eup %5987  ;;  %v1381_v10 = vadd.f32 %v15423_v62, %v1380_v12  ;;  %v967_v25 = vmax.f32 %v965_v45, %v966_v44  ;;  %v1422_v62 = vadd.f32 %v9132_v59, %v1421_v33 }
 0x181   : > { %15417 = vst [vmem:[#allocation23_spill] sm:$0xff] %v9252_v42  ;;  %6007 = vpow2.f32 %v9125_v61  ;;  %v9259_v0 = vpop.eup %5989  ;;  %v1442_v52 = vadd.f32 %v9247_v38, %v1441_v60  ;;  %v15432_v60 = vld [vmem:[#allocation69_spill] sm:$0xff] }
 0x182   : > { %15420 = vst [vmem:[#allocation24_spill] sm:$0xff] %v9259_v0  ;;  %6009 = vpow2.f32 %v1260_v17  ;;  %v15429_v17 = vsub.f32 %v15428_v47, %v8977_v22  ;;  %v1361_v61 = vadd.f32 %v15432_v60, %v1360_v48  ;;  %v15433_v38 = vld [vmem:[#allocation101_spill] sm:$0xff]  ;;  %v15435_v47 = vld [vmem:[#allocation92_spill] sm:$0xff]  ;;  %v15439_v0 = vld [vmem:[#allocation99_spill] sm:$0xff]  ;;  %v15441_v48 = vsub.f32 %v15351_v11, %v8977_v22 }
 0x183   : > { %v9266_v42 = vpop.eup %5991  ;;  %6011 = vpow2.f32 %v1262_v58  ;;  %v15431_v58 = vsub.f32 %v15346_v46, %v8977_v22  ;;  %v1402_v45 = vadd.f32 %v15433_v38, %v1401_v31  ;;  %v1382_v56 = vadd.f32 %v15439_v0, %v1381_v10 }
 0x184   : > { %15424 = vst [vmem:[#allocation25_spill] sm:$0xff] %v9266_v42  ;;  %v9273_v51 = vpop.eup %5993  ;;  %6013 = vpow2.f32 %v9173_v30  ;;  %v1272_v12 = vmul.f32 1.442695, %v15429_v17  ;;  %v15436_v30 = vsub.f32 %v15435_v47, %v8977_v22  ;;  %v15437_v17 = vld [vmem:[#allocation95_spill] sm:$0xff]  ;;  %v1280_v31 = vmul.f32 1.442695, %v15441_v48 }
 0x185   : > { %15427 = vst [vmem:[#allocation26_spill] sm:$0xff] %v9273_v51  ;;  %v9280_v42 = vpop.eup %5995  ;;  %6015 = vpow2.f32 %v9178_v24  ;;  %v1274_v27 = vmul.f32 1.442695, %v15431_v58  ;;  %v15438_v59 = vsub.f32 %v15437_v17, %v8977_v22  ;;  %v1443_v47 = vadd.f32 %v9273_v51, %v1442_v52  ;;  %v15447_v48 = vld [vmem:[#allocation70_spill] sm:$0xff] }
 0x186   : > { %15430 = vst [vmem:[#allocation27_spill] sm:$0xff] %v9280_v42  ;;  %v9288_v44 = vpop.eup %5997  ;;  %6017 = vpow2.f32 %v9130_v8  ;;  %v1276_v33 = vmul.f32 1.442695, %v15436_v30  ;;  %v15442_v8 = vsub.f32 %v15352_v63, %v8977_v22  ;;  %v968_v17 = vrot.slane %v967_v25, 2  ;;  %v15448_v51 = vld [vmem:[#allocation102_spill] sm:$0xff] }
 0x187   : > { %15434 = vst [vmem:[#allocation40_spill] sm:$0xff] %v9288_v44  ;;  %v1278_v24 = vmul.f32 1.442695, %v15438_v59  ;;  %v9298_v46 = vpop.eup %5999  ;;  %6019 = vpow2.f32 %v9187_v40  ;;  %v15444_v59 = vsub.f32 %v15354_v6, %v8977_v22  ;;  %v1423_v40 = vadd.f32 %v9145_v20, %v1422_v62 }
 0x188   : > { %15440 = vst [vmem:[#allocation28_spill] sm:$0xff] %v9298_v46  ;;  %v1282_v58 = vmul.f32 1.442695, %v15442_v8  ;;  %v9308_v30 = vpop.eup %6001  ;;  %6021 = vpow2.f32 %v9138_v16  ;;  %v15446_v63 = vsub.f32 %v15355_v35, %v8977_v22  ;;  %v1362_v8 = vadd.f32 %v15447_v48, %v1361_v61  ;;  %v15452_v35 = vld [vmem:[#allocation100_spill] sm:$0xff] }
 0x189   : > { %15443 = vst [vmem:[#allocation85_spill] sm:$0xff] %v9308_v30  ;;  %v9314_v10 = vmul.f32 1.442695, %v15444_v59  ;;  %v9317_v11 = vpop.eup %6003  ;;  %6023 = vpow2.f32 %v9197_v23  ;;  %v1403_v16 = vadd.f32 %v15448_v51, %v1402_v45  ;;  %v15450_v6 = vsub.f32 %v15356_v7, %v8977_v22 }
 0x18a   : > { %15445 = vst [vmem:[#allocation84_spill] sm:$0xff] %v9317_v11  ;;  %v9323_v52 = vmul.f32 1.442695, %v15446_v63  ;;  %v9327_v38 = vpop.eup %6005  ;;  %6025 = vpow2.f32 %v9143_v3  ;;  %v15451_v23 = vsub.f32 %v15252_v15, %v8977_v22  ;;  %v1383_v63 = vadd.f32 %v15452_v35, %v1382_v56 }
 0x18b   : > { %15449 = vst [vmem:[#allocation33_spill] sm:$0xff] %v9327_v38  ;;  %v9333_v62 = vmul.f32 1.442695, %v15450_v6  ;;  %v9341_v20 = vpop.eup %6007  ;;  %6027 = vpow2.f32 %v1272_v12  ;;  %v15454_v61 = vsub.f32 %v15276_v1, %v9158_v41  ;;  %v15455_v3 = vsub.f32 %v15275_v54, %v9158_v41 }
 0x18c   : > { %v9338_v59 = vmul.f32 1.442695, %v15451_v23  ;;  %15453 = vst [vmem:[#allocation90_spill] sm:$0xff] %v9341_v20  ;;  %v1444_v6 = vadd.f32 %v9280_v42, %v1443_v47  ;;  %v9350_v51 = vpop.eup %6009  ;;  %v969_v15 = vmax.f32 %v967_v25, %v968_v17  ;;  %6029 = vpow2.f32 %v9151_v14  ;;  %v15464_v17 = vld [vmem:[#allocation34_spill] sm:$0xff] }
 0x18d   : > { %v1292_v45 = vmul.f32 1.442695, %v15454_v61  ;;  %v1294_v7 = vmul.f32 1.442695, %v15455_v3  ;;  %15456 = vst [vmem:[#allocation69_spill] sm:$0xff] %v9350_v51  ;;  %v15457_v22 = vsub.f32 %v15399_v18, %v9158_v41  ;;  %v1424_v12 = vadd.f32 %v9156_v50, %v1423_v40  ;;  %v9357_v23 = vpop.eup %6011  ;;  %v15460_v61 = vld [vmem:[#allocation71_spill] sm:$0xff] }
 0x18e   : > { %15458 = vst [vmem:[#allocation92_spill] sm:$0xff] %v9357_v23  ;;  %6031 = vpow2.f32 %v1274_v27  ;;  %v15459_v54 = vsub.f32 %v15400_v9, %v9158_v41  ;;  %v1363_v47 = vadd.f32 %v15460_v61, %v1362_v8  ;;  %v15461_v3 = vld [vmem:[#allocation65_spill] sm:$0xff]  ;;  %v9364_v25 = vpop.eup %6013  ;;  %v15463_v14 = vsub.f32 %v15401_v29, %v9158_v41 }
 0x18f   : > { %v1296_v56 = vmul.f32 1.442695, %v15457_v22  ;;  %v1404_v42 = vadd.f32 %v15461_v3, %v1403_v16  ;;  %15462 = vst [vmem:[#allocation95_spill] sm:$0xff] %v9364_v25  ;;  %6033 = vpow2.f32 %v1276_v33  ;;  %v1384_v40 = vadd.f32 %v15464_v17, %v1383_v63  ;;  %v9372_v22 = vpop.eup %6015 }
 0x190   : > { %v1298_v1 = vmul.f32 1.442695, %v15459_v54  ;;  %v1300_v18 = vmul.f32 1.442695, %v15463_v14  ;;  %v1461_v27 = vadd.f32 %v9357_v23, %v9350_v51  ;;  %15465 = vst [vmem:[#allocation99_spill] sm:$0xff] %v9372_v22  ;;  %6035 = vpow2.f32 %v1278_v24  ;;  %v9381_v29 = vpop.eup %6017  ;;  %v15472_v23 = vld [vmem:[#allocation67_spill] sm:$0xff] }
 0x191   : > { %v15466_v9 = vsub.f32 %v15405_v21, %v9158_v41  ;;  %v15467_v16 = vsub.f32 %v15407_v13, %v9158_v41  ;;  %v1445_v54 = vadd.f32 %v9288_v44, %v1444_v6  ;;  %15468 = vst [vmem:[#allocation70_spill] sm:$0xff] %v9381_v29  ;;  %6037 = vpow2.f32 %v1280_v31  ;;  %v9390_v21 = vpop.eup %6019  ;;  %v15471_v13 = vld [vmem:[#allocation74_spill] sm:$0xff] }
 0x192   : > { %v15469_v63 = vsub.f32 %v15410_v4, %v9158_v41  ;;  %v1425_v24 = vadd.f32 %v9164_v5, %v1424_v12  ;;  %v1462_v51 = vadd.f32 %v9364_v25, %v1461_v27  ;;  %15470 = vst [vmem:[#allocation100_spill] sm:$0xff] %v9390_v21  ;;  %6039 = vpow2.f32 %v1282_v58  ;;  %v9394_v50 = vpop.eup %6021 }
 0x193   : > { %v1302_v8 = vmul.f32 1.442695, %v15466_v9  ;;  %v1304_v33 = vmul.f32 1.442695, %v15467_v16  ;;  %v970_v9 = vrot.slane %v969_v15, 1  ;;  %v1364_v16 = vadd.f32 %v15471_v13, %v1363_v47  ;;  %15473 = vst [vmem:[#allocation71_spill] sm:$0xff] %v9394_v50  ;;  %v9401_v27 = vpop.eup %6023 }
 0x194   : > { %v9386_v14 = vmul.f32 1.442695, %v15469_v63  ;;  %v1405_v6 = vadd.f32 %v15472_v23, %v1404_v42  ;;  %6041 = vpow2.f32 %v1292_v45  ;;  %v15474_v4 = vsub.f32 %v15413_v34, %v9158_v41  ;;  %v15475_v63 = vld [vmem:[#allocation36_spill] sm:$0xff]  ;;  %15476 = vst [vmem:[#allocation65_spill] sm:$0xff] %v9401_v27  ;;  %v9410_v5 = vpop.eup %6025 }
 0x195   : > { %v1385_v44 = vadd.f32 %v15475_v63, %v1384_v40  ;;  %v1463_v12 = vadd.f32 %v9372_v22, %v1462_v51  ;;  %6043 = vpow2.f32 %v1294_v7  ;;  %v15477_v58 = vsub.f32 %v15414_v37, %v9158_v41  ;;  %15479 = vst [vmem:[#allocation34_spill] sm:$0xff] %v9410_v5  ;;  %v9419_v37 = vpop.eup %6027 }
 0x196   : > { %v1308_v31 = vmul.f32 1.442695, %v15474_v4  ;;  %v15478_v42 = vsub.f32 %v15415_v36, %v9158_v41  ;;  %v1446_v45 = vadd.f32 %v9298_v46, %v1445_v54  ;;  %6045 = vpow2.f32 %v1296_v56  ;;  %15481 = vst [vmem:[#allocation74_spill] sm:$0xff] %v9419_v37  ;;  %v15482_v36 = vld [vmem:[#allocation77_spill] sm:$0xff]  ;;  %v15483_v54 = vld [vmem:[#allocation68_spill] sm:$0xff]  ;;  %v9425_v22 = vpop.eup %6029 }
 0x197   : > { %v1310_v47 = vmul.f32 1.442695, %v15477_v58  ;;  %v15480_v34 = vsub.f32 %v15418_v19, %v9158_v41  ;;  %v1426_v7 = vadd.f32 %v9180_v2, %v1425_v24  ;;  %v1464_v40 = vadd.f32 %v9390_v21, %v1463_v12  ;;  %v15485_v24 = vld [vmem:[#allocation37_spill] sm:$0xff]  ;;  %v15503_v2 = vld [vmem:[#allocation72_spill] sm:$0xff] }
 0x198   : > { %v1312_v25 = vmul.f32 1.442695, %v15478_v42  ;;  %v9421_v4 = vmax.f32 %v969_v15, %v970_v9  ;;  %6047 = vpow2.f32 %v1298_v1  ;;  %v1365_v58 = vadd.f32 %v15482_v36, %v1364_v16  ;;  %v9435_v15 = vpop.eup %6031 }
 0x199   : > { %v9415_v51 = vmul.f32 1.442695, %v15480_v34  ;;  %v1406_v42 = vadd.f32 %v15483_v54, %v1405_v6  ;;  %6049 = vpow2.f32 %v9314_v10  ;;  %v15484_v19 = vsub.f32 %v15421_v49, %v9158_v41  ;;  %15486 = vst [vmem:[#allocation67_spill] sm:$0xff] %v9435_v15  ;;  %v9448_v6 = vpop.eup %6033 }
 0x19a   : > { %v1386_v12 = vadd.f32 %v15485_v24, %v1385_v44  ;;  %v1465_v34 = vadd.f32 %v9401_v27, %v1464_v40  ;;  %6051 = vpow2.f32 %v1300_v18  ;;  %v15487_v1 = vsub.f32 %v15422_v28, %v9158_v41  ;;  %15489 = vst [vmem:[#allocation36_spill] sm:$0xff] %v9448_v6 }
 0x19b   : > { %v9431_v56 = vmul.f32 1.442695, %v15484_v19  ;;  %v15488_v10 = vsub.f32 %v15425_v26, %v9158_v41  ;;  %v1447_v49 = vadd.f32 %v9308_v30, %v1446_v45  ;;  %6053 = vpow2.f32 %v9323_v52  ;;  %v9458_v19 = vpop.eup %6035  ;;  %v15492_v45 = vld [vmem:[#allocation78_spill] sm:$0xff] }
 0x19c   : > { %v9440_v9 = vmul.f32 1.442695, %v15487_v1  ;;  %v15490_v44 = vsub.f32 %v15426_v32, %v9158_v41  ;;  %v1427_v28 = vadd.f32 %v9191_v53, %v1426_v7  ;;  %v1466_v40 = vadd.f32 %v9419_v37, %v1465_v34  ;;  %15491 = vst [vmem:[#allocation77_spill] sm:$0xff] %v9458_v19  ;;  %v9464_v52 = vpop.eup %6037  ;;  %v15495_v32 = vld [vmem:[#allocation39_spill] sm:$0xff]  ;;  %v15505_v30 = vld [vmem:[#allocation18_spill] sm:$0xff] }
 0x19d   : > { %v9445_v16 = vmul.f32 1.442695, %v15488_v10  ;;  %v1084_v26 = vsub.f32 %v15311_v55, %v9421_v4  ;;  %6055 = vpow2.f32 %v1302_v8  ;;  %v1366_v1 = vadd.f32 %v15492_v45, %v1365_v58  ;;  %v15493_v10 = vld [vmem:[#allocation35_spill] sm:$0xff]  ;;  %15494 = vst [vmem:[#allocation68_spill] sm:$0xff] %v9464_v52  ;;  %v15497_v55 = vld [vmem:[#allocation41_spill] sm:$0xff] }
 0x19e   : > { %v9454_v18 = vmul.f32 1.442695, %v15490_v44  ;;  %v1407_v21 = vadd.f32 %v15493_v10, %v1406_v42  ;;  %v1085_v41 = vsub.f32 %v15403_v39, %v9421_v4  ;;  %6057 = vpow2.f32 %v9333_v62  ;;  %v9471_v44 = vpop.eup %6039  ;;  %v15498_v58 = vld [vmem:[#allocation43_spill] sm:$0xff]  ;;  %v15500_v39 = vld [vmem:[#allocation44_spill] sm:$0xff] }
 0x19f   : > { %v1387_v7 = vadd.f32 %v15495_v32, %v1386_v12  ;;  %v1467_v34 = vadd.f32 %v9435_v15, %v1466_v40  ;;  %15496 = vst [vmem:[#allocation37_spill] sm:$0xff] %v9471_v44  ;;  %v1086_v8 = vsub.f32 %v15497_v55, %v9421_v4  ;;  %v1087_v37 = vsub.f32 %v15498_v58, %v9421_v4  ;;  %v9478_v27 = vpop.eup %6041  ;;  %v15502_v58 = vld [vmem:[#allocation79_spill] sm:$0xff] }
 0x1a0   : > { %6059 = vpow2.f32 %v1304_v33  ;;  %v1448_v42 = vadd.f32 %v9317_v11, %v1447_v49  ;;  %15499 = vst [vmem:[#allocation78_spill] sm:$0xff] %v9478_v27  ;;  %v1088_v62 = vsub.f32 %v15500_v39, %v9421_v4  ;;  %v1428_v12 = vadd.f32 %v9201_v43, %v1427_v28  ;;  %v9485_v15 = vpop.eup %6043 }
 0x1a1   : > { %6061 = vpow2.f32 %v9338_v59  ;;  %v1468_v40 = vadd.f32 %v9448_v6, %v1467_v34  ;;  %15501 = vst [vmem:[#allocation35_spill] sm:$0xff] %v9485_v15  ;;  %v1324_v55 = vmul.f32 1.442695, %v1084_v26  ;;  %v1367_v33 = vadd.f32 %v15502_v58, %v1366_v1  ;;  %v9490_v53 = vpop.eup %6045  ;;  %v15507_v6 = vld [vmem:[#allocation47_spill] sm:$0xff] }
 0x1a2   : > { %6063 = vpow2.f32 %v9386_v14  ;;  %v1408_v49 = vadd.f32 %v15503_v2, %v1407_v21  ;;  %15504 = vst [vmem:[#allocation39_spill] sm:$0xff] %v9490_v53  ;;  %v1388_v39 = vadd.f32 %v15505_v30, %v1387_v7  ;;  %v1482_v28 = vadd.f32 %v9485_v15, %v9478_v27  ;;  %v9496_v34 = vpop.eup %6047  ;;  %v15510_v15 = vld [vmem:[#allocation80_spill] sm:$0xff] }
 0x1a3   : > { %6065 = vpow2.f32 %v1308_v31  ;;  %v1469_v59 = vadd.f32 %v9458_v19, %v1468_v40  ;;  %15506 = vst [vmem:[#allocation41_spill] sm:$0xff] %v9496_v34  ;;  %v1089_v14 = vsub.f32 %v15507_v6, %v9421_v4  ;;  %v1326_v26 = vmul.f32 1.442695, %v1085_v41  ;;  %v9501_v21 = vpop.eup %6049  ;;  %v15511_v6 = vld [vmem:[#allocation73_spill] sm:$0xff] }
 0x1a4   : > { %6067 = vpow2.f32 %v1310_v47  ;;  %v1449_v1 = vadd.f32 %v9327_v38, %v1448_v42  ;;  %15508 = vst [vmem:[#allocation43_spill] sm:$0xff] %v9501_v21  ;;  %v1328_v31 = vmul.f32 1.442695, %v1086_v8  ;;  %v1429_v7 = vadd.f32 %v9208_v57, %v1428_v12  ;;  %v9505_v19 = vpop.eup %6051  ;;  %v15513_v42 = vld [vmem:[#allocation17_spill] sm:$0xff] }
 0x1a5   : > { %6069 = vpow2.f32 %v1312_v25  ;;  %v1483_v40 = vadd.f32 %v9490_v53, %v1482_v28  ;;  %15509 = vst [vmem:[#allocation44_spill] sm:$0xff] %v9505_v19  ;;  %v1330_v27 = vmul.f32 1.442695, %v1087_v37  ;;  %v1368_v43 = vadd.f32 %v15510_v15, %v1367_v33  ;;  %v9510_v41 = vpop.eup %6053  ;;  %v15515_v28 = vld [vmem:[#allocation50_spill] sm:$0xff] }
 0x1a6   : > { %6071 = vpow2.f32 %v9415_v51  ;;  %v1409_v47 = vadd.f32 %v15511_v6, %v1408_v49  ;;  %15512 = vst [vmem:[#allocation79_spill] sm:$0xff] %v9510_v41  ;;  %v1389_v38 = vadd.f32 %v15513_v42, %v1388_v39  ;;  %v1470_v25 = vadd.f32 %v9464_v52, %v1469_v59  ;;  %v15516_v49 = vld [vmem:[#allocation52_spill] sm:$0xff]  ;;  %v15517_v39 = vld [vmem:[#allocation38_spill] sm:$0xff]  ;;  %v15519_v52 = vld [vmem:[#allocation81_spill] sm:$0xff] }
 0x1a7   : > { %6073 = vpow2.f32 %v1324_v55  ;;  %v1484_v8 = vadd.f32 %v9496_v34, %v1483_v40  ;;  %v9515_v12 = vpop.eup %6055  ;;  %v1090_v53 = vsub.f32 %v15515_v28, %v9421_v4  ;;  %v1332_v51 = vmul.f32 1.442695, %v1088_v62 }
 0x1a8   : > { %15514 = vst [vmem:[#allocation72_spill] sm:$0xff] %v9515_v12  ;;  %6075 = vpow2.f32 %v1326_v26  ;;  %v1450_v37 = vadd.f32 %v9341_v20, %v1449_v1  ;;  %v9520_v33 = vpop.eup %6057  ;;  %v1091_v55 = vsub.f32 %v15516_v49, %v9421_v4  ;;  %v1430_v57 = vadd.f32 %v15517_v39, %v1429_v7  ;;  %v15520_v26 = vld [vmem:[#allocation75_spill] sm:$0xff]  ;;  %v15521_v1 = vld [vmem:[#allocation42_spill] sm:$0xff] }
 0x1a9   : > { %6077 = vpow2.f32 %v1328_v31  ;;  %v1485_v59 = vadd.f32 %v9505_v19, %v1484_v8  ;;  %v1334_v34 = vmul.f32 1.442695, %v1089_v14  ;;  %v1369_v28 = vadd.f32 %v15519_v52, %v1368_v43  ;;  %v15523_v8 = vld [vmem:[#allocation54_spill] sm:$0xff]  ;;  %v15525_v19 = vld [vmem:[#allocation93_spill] sm:$0xff] }
 0x1aa   : > { %v9526_v40 = vpop.eup %6059  ;;  %6079 = vpow2.f32 %v1330_v27  ;;  %v1410_v62 = vadd.f32 %v15520_v26, %v1409_v47  ;;  %v1390_v20 = vadd.f32 %v15521_v1, %v1389_v38  ;;  %v1471_v31 = vadd.f32 %v9471_v44, %v1470_v25  ;;  %v15526_v38 = vld [vmem:[#allocation23_spill] sm:$0xff] }
 0x1ab   : > { %15518 = vst [vmem:[#allocation18_spill] sm:$0xff] %v9526_v40  ;;  %v9530_v11 = vpop.eup %6061  ;;  %6081 = vpow2.f32 %v9431_v56  ;;  %v1486_v7 = vadd.f32 %v9515_v12, %v1485_v59  ;;  %v1092_v27 = vsub.f32 %v15523_v8, %v9421_v4  ;;  %v1336_v14 = vmul.f32 1.442695, %v1090_v53  ;;  %v15528_v8 = vld [vmem:[#allocation82_spill] sm:$0xff]  ;;  %v15529_v53 = vld [vmem:[#allocation76_spill] sm:$0xff] }
 0x1ac   : > { %v9536_v49 = vpop.eup %6063  ;;  %6083 = vpow2.f32 %v1332_v51  ;;  %v1451_v43 = vadd.f32 %v9381_v29, %v1450_v37  ;;  %v1093_v56 = vsub.f32 %v15525_v19, %v9421_v4  ;;  %v1431_v25 = vadd.f32 %v15526_v38, %v1430_v57  ;;  %v15531_v29 = vld [vmem:[#allocation45_spill] sm:$0xff] }
 0x1ad   : > { %15522 = vst [vmem:[#allocation47_spill] sm:$0xff] %v9536_v49  ;;  %v9541_v47 = vpop.eup %6065  ;;  %6085 = vpow2.f32 %v9440_v9  ;;  %v1487_v59 = vadd.f32 %v9526_v40, %v1486_v7  ;;  %v1338_v44 = vmul.f32 1.442695, %v1091_v55  ;;  %v1370_v51 = vadd.f32 %v15528_v8, %v1369_v28  ;;  %v15533_v7 = vld [vmem:[#allocation56_spill] sm:$0xff]  ;;  %v15535_v40 = vld [vmem:[#allocation58_spill] sm:$0xff] }
 0x1ae   : > { %15524 = vst [vmem:[#allocation80_spill] sm:$0xff] %v9541_v47  ;;  %v9548_v12 = vpop.eup %6067  ;;  %6087 = vpow2.f32 %v1334_v34  ;;  %v1411_v39 = vadd.f32 %v15529_v53, %v1410_v62  ;;  %v1391_v19 = vadd.f32 %v15531_v29, %v1390_v20  ;;  %v1472_v9 = vadd.f32 %v9501_v21, %v1471_v31  ;;  %v15536_v20 = vld [vmem:[#allocation24_spill] sm:$0xff] }
 0x1af   : > { %15527 = vst [vmem:[#allocation73_spill] sm:$0xff] %v9548_v12  ;;  %v9552_v37 = vpop.eup %6069  ;;  %6089 = vpow2.f32 %v9445_v16  ;;  %v1488_v57 = vadd.f32 %v9536_v49, %v1487_v59  ;;  %v1094_v34 = vsub.f32 %v15533_v7, %v9421_v4  ;;  %v1340_v55 = vmul.f32 1.442695, %v1092_v27 }
 0x1b0   : > { %15530 = vst [vmem:[#allocation17_spill] sm:$0xff] %v9552_v37  ;;  %v9558_v38 = vpop.eup %6071  ;;  %6091 = vpow2.f32 %v1336_v14  ;;  %v1452_v28 = vadd.f32 %v9394_v50, %v1451_v43  ;;  %v1095_v16 = vsub.f32 %v15535_v40, %v9421_v4  ;;  %v1432_v31 = vadd.f32 %v15536_v20, %v1431_v25  ;;  %v15538_v14 = vld [vmem:[#allocation32_spill] sm:$0xff]  ;;  %v15543_v20 = vld [vmem:[#allocation59_spill] sm:$0xff] }
 0x1b1   : > { %15532 = vst [vmem:[#allocation50_spill] sm:$0xff] %v9558_v38  ;;  %v9563_v62 = vpop.eup %6073  ;;  %6093 = vpow2.f32 %v9454_v18  ;;  %v1489_v59 = vadd.f32 %v9541_v47, %v1488_v57  ;;  %v1342_v21 = vmul.f32 1.442695, %v1093_v56  ;;  %v1371_v7 = vrot.slane %v1370_v51, 4  ;;  %v15541_v57 = vld [vmem:[#allocation94_spill] sm:$0xff] }
 0x1b2   : > { %15534 = vst [vmem:[#allocation52_spill] sm:$0xff] %v9563_v62  ;;  %v9570_v49 = vpop.eup %6075  ;;  %6095 = vpow2.f32 %v1338_v44  ;;  %v1412_v27 = vadd.f32 %v15538_v14, %v1411_v39  ;;  %v1392_v43 = vrot.slane %v1391_v19, 4  ;;  %v1473_v50 = vadd.f32 %v9510_v41, %v1472_v9  ;;  %v15544_v9 = vld [vmem:[#allocation25_spill] sm:$0xff] }
 0x1b3   : > { %15537 = vst [vmem:[#allocation81_spill] sm:$0xff] %v9570_v49  ;;  %v9573_v46 = vpop.eup %6077  ;;  %v1490_v40 = vadd.f32 %v9548_v12, %v1489_v59  ;;  %v1503_v18 = vadd.f32 %v9570_v49, %v9563_v62  ;;  %v1096_v47 = vsub.f32 %v15541_v57, %v9421_v4  ;;  %6097 = vpow2.f32 %v1340_v55 }
 0x1b4   : > { %15539 = vst [vmem:[#allocation75_spill] sm:$0xff] %v9573_v46  ;;  %v9579_v25 = vpop.eup %6079  ;;  %v1344_v44 = vmul.f32 1.442695, %v1094_v34  ;;  %v1453_v56 = vadd.f32 %v9410_v5, %v1452_v28  ;;  %v1097_v53 = vsub.f32 %v15543_v20, %v9421_v4  ;;  %v1433_v41 = vadd.f32 %v15544_v9, %v1432_v31 }
 0x1b5   : > { %15540 = vst [vmem:[#allocation42_spill] sm:$0xff] %v9579_v25  ;;  %v9584_v39 = vpop.eup %6081  ;;  %v1491_v59 = vadd.f32 %v9552_v37, %v1490_v40  ;;  %v1504_v62 = vadd.f32 %v9573_v46, %v1503_v18  ;;  %6099 = vpow2.f32 %v1342_v21  ;;  %v1346_v12 = vmul.f32 1.442695, %v1095_v16  ;;  %v15548_v40 = vld [vmem:[#allocation60_spill] sm:$0xff]  ;;  %v15550_v16 = vld [vmem:[#allocation49_spill] sm:$0xff] }
 0x1b6   : > { %15542 = vst [vmem:[#allocation54_spill] sm:$0xff] %v9584_v39  ;;  %v9591_v49 = vpop.eup %6083  ;;  %v1372_v57 = vadd.f32 %v1371_v7, %v1370_v51  ;;  %v1413_v55 = vrot.slane %v1412_v27, 4  ;;  %v1393_v28 = vadd.f32 %v1392_v43, %v1391_v19  ;;  %v1474_v5 = vadd.f32 %v9520_v33, %v1473_v50 }
 0x1b7   : > { %15545 = vst [vmem:[#allocation93_spill] sm:$0xff] %v9591_v49  ;;  %v9593_v34 = vpop.eup %6085  ;;  %v1492_v14 = vadd.f32 %v9558_v38, %v1491_v59  ;;  %v1505_v20 = vadd.f32 %v9579_v25, %v1504_v62  ;;  %v1098_v18 = vsub.f32 %v15548_v40, %v9421_v4  ;;  %6101 = vpow2.f32 %v1344_v44 }
 0x1b8   : > { %15546 = vst [vmem:[#allocation82_spill] sm:$0xff] %v9593_v34  ;;  %v9598_v31 = vpop.eup %6087  ;;  %v1348_v46 = vmul.f32 1.442695, %v1096_v47  ;;  %v1454_v21 = vadd.f32 %v9425_v22, %v1453_v56  ;;  %v1099_v19 = vsub.f32 %v15550_v16, %v9421_v4  ;;  %v1434_v7 = vrot.slane %v1433_v41, 4 }
 0x1b9   : > { %15547 = vst [vmem:[#allocation45_spill] sm:$0xff] %v9598_v31  ;;  %v9603_v51 = vpop.eup %6089  ;;  %v1493_v50 = vadd.f32 %v9584_v39, %v1492_v14  ;;  %v1506_v43 = vadd.f32 %v9591_v49, %v1505_v20  ;;  %6103 = vpow2.f32 %v1346_v12  ;;  %v1350_v59 = vmul.f32 1.442695, %v1097_v53 }
 0x1ba   : > { %15549 = vst [vmem:[#allocation56_spill] sm:$0xff] %v9603_v51  ;;  %v9609_v62 = vpop.eup %6091  ;;  %v1373_v25 = vrot.slane %v1372_v57, 2  ;;  %v1414_v40 = vadd.f32 %v1413_v55, %v1412_v27  ;;  %v1394_v47 = vrot.slane %v1393_v28, 2  ;;  %v1475_v56 = vadd.f32 %v9530_v11, %v1474_v5 }
 0x1bb   : > { %15551 = vst [vmem:[#allocation58_spill] sm:$0xff] %v9609_v62  ;;  %v9611_v44 = vpop.eup %6093  ;;  %v1494_v37 = vadd.f32 %v9593_v34, %v1493_v50  ;;  %v1507_v4 = vadd.f32 %v9598_v31, %v1506_v43  ;;  %6105 = vpow2.f32 %v1348_v46  ;;  %v1352_v14 = vmul.f32 1.442695, %v1098_v18 }
 0x1bc   : > { %15552 = vst [vmem:[#allocation94_spill] sm:$0xff] %v9611_v44  ;;  %v9616_v16 = vpop.eup %6095  ;;  %v1455_v20 = vrot.slane %v1454_v21, 4  ;;  %v1435_v49 = vadd.f32 %v1434_v7, %v1433_v41  ;;  %6107 = vpow2.f32 %v1350_v59  ;;  %v1354_v55 = vmul.f32 1.442695, %v1099_v19 }
 0x1bd   : > { %15553 = vst [vmem:[#allocation59_spill] sm:$0xff] %v9616_v16  ;;  %v1495_v12 = vadd.f32 %v9603_v51, %v1494_v37  ;;  %v1508_v53 = vadd.f32 %v9609_v62, %v1507_v4  ;;  %v9620_v27 = vpop.eup %6097  ;;  %v1374_v39 = vadd.f32 %v1373_v25, %v1372_v57  ;;  %v1415_v5 = vrot.slane %v1414_v40, 2 }
 0x1be   : > { %15554 = vst [vmem:[#allocation25_spill] sm:$0xff] %v9620_v27  ;;  %v1395_v38 = vadd.f32 %v1394_v47, %v1393_v28  ;;  %v1476_v50 = vrot.slane %v1475_v56, 4  ;;  %6109 = vpow2.f32 %v1352_v14  ;;  %v1456_v41 = vadd.f32 %v1455_v20, %v1454_v21 }
 0x1bf   : > { %v1496_v43 = vadd.f32 %v9611_v44, %v1495_v12  ;;  %v1509_v31 = vadd.f32 %v9616_v16, %v1508_v53  ;;  %v9624_v46 = vpop.eup %6099  ;;  %v1436_v18 = vrot.slane %v1435_v49, 2  ;;  %6111 = vpow2.f32 %v1354_v55 }
 0x1c0   : > { %15555 = vst [vmem:[#allocation60_spill] sm:$0xff] %v9624_v46  ;;  %v1416_v59 = vadd.f32 %v1415_v5, %v1414_v40  ;;  %v1375_v25 = vrot.slane %v1374_v39, 1  ;;  %v1396_v57 = vrot.slane %v1395_v38, 1  ;;  %v1477_v28 = vadd.f32 %v1476_v50, %v1475_v56 }
 0x1c1   : > { %v1510_v37 = vadd.f32 %v9620_v27, %v1509_v31  ;;  %v9627_v7 = vpop.eup %6101  ;;  %v1497_v19 = vrot.slane %v1496_v43, 4  ;;  %v1457_v12 = vrot.slane %v1456_v41, 2  ;;  %v1437_v53 = vadd.f32 %v1436_v18, %v1435_v49 }
 0x1c2   : > { %15556 = vst [vmem:[#allocation49_spill] sm:$0xff] %v9627_v7  ;;  %v1417_v20 = vrot.slane %v1416_v59, 1  ;;  %v1376_v27 = vadd.f32 %v1375_v25, %v1374_v39  ;;  %v1397_v62 = vadd.f32 %v1396_v57, %v1395_v38  ;;  %v1478_v55 = vrot.slane %v1477_v28, 2 }
 0x1c3   : > { %v1511_v47 = vadd.f32 %v9624_v46, %v1510_v37  ;;  %v9630_v4 = vpop.eup %6103  ;;  %v1498_v31 = vadd.f32 %v1497_v19, %v1496_v43  ;;  %v1458_v56 = vadd.f32 %v1457_v12, %v1456_v41  ;;  %v1438_v50 = vrot.slane %v1437_v53, 1 }
 0x1c4   : > { %15557 = vst [vmem:[#allocation106_spill] sm:$0xff] %v9630_v4  ;;  %v1418_v49 = vadd.f32 %v1417_v20, %v1416_v59  ;;  %v1533_v39 = vsel %vm14776_vm0, %v1397_v62, %v1376_v27 }
 0x1c5   : > { %v1512_v14 = vadd.f32 %v9627_v7, %v1511_v47  ;;  %v9633_v21 = vpop.eup %6105  ;;  %v1499_v18 = vrot.slane %v1498_v31, 2  ;;  %v1479_v47 = vadd.f32 %v1478_v55, %v1477_v28  ;;  %v1459_v43 = vrot.slane %v1458_v56, 1 }
 0x1c6   : > { %15558 = vst [vmem:[#allocation107_spill] sm:$0xff] %v9633_v21  ;;  %v9636_v5 = vpop.eup %6107  ;;  %v1439_v19 = vadd.f32 %v1438_v50, %v1437_v53  ;;  %v1535_v57 = vsel %vm14423_vm1, %v1418_v49, %v1533_v39  ;;  %v6633_v39 = vld [vmem:[%s6955_s23] sm:$0xff]  ;;  %vm14774_vm1 = vcmask 1048512  }
 0x1c7   : > { %v1513_v40 = vadd.f32 %v9630_v4, %v1512_v14  ;;  %15559 = vst [vmem:[#allocation108_spill] sm:$0xff] %v9636_v5  ;;  %v1500_v25 = vadd.f32 %v1499_v18, %v1498_v31  ;;  %v1480_v12 = vrot.slane %v1479_v47, 1  ;;  %v1460_v14 = vadd.f32 %v1459_v43, %v1458_v56  ;;  %v15597_v4 = vld [vmem:[#allocation101_spill] sm:$0xff] }
 0x1c8   : > { %v9639_v46 = vpop.eup %6109  ;;  %v1537_v20 = vsel %vm14422_vm2, %v1439_v19, %v1535_v57  ;;  %v15562_v19 = vld [vmem:[#allocation12_spill] sm:$0xff]  ;;  %v15563_v57 = vld [vmem:[#allocation13_spill] sm:$0xff]  ;;  %vm2253_vm2 = vcmask 982912  }
 0x1c9   : > { %v1514_v37 = vadd.f32 %v9633_v21, %v1513_v40  ;;  %15560 = vst [vmem:[#allocation109_spill] sm:$0xff] %v9639_v46  ;;  %v9643_v38 = vpop.eup %6111  ;;  %v1501_v62 = vrot.slane %v1500_v25, 1  ;;  %v1481_v27 = vadd.f32 %v1480_v12, %v1479_v47  ;;  %v1539_v53 = vsel %vm14421_vm3, %v1460_v14, %v1537_v20 }
 0x1ca   : > { %15561 = vst [vmem:[#allocation110_spill] sm:$0xff] %v9643_v38  ;;  %vm2246_vm3 = vcmask 917312  }
 0x1cb   : > { %v1515_v7 = vadd.f32 %v9636_v5, %v1514_v37  ;;  %v1502_v31 = vadd.f32 %v1501_v62, %v1500_v25  ;;  %v1541_v50 = vsel %vm14420_vm4, %v1481_v27, %v1539_v53  ;;  %v15566_v62 = vld [vmem:[#allocation63_spill] sm:$0xff]  ;;  %vm2239_vm4 = vcmask 851712  }
 0x1cd   : > { %v1516_v41 = vadd.f32 %v9639_v46, %v1515_v7  ;;  %v1543_v56 = vsel %vm14419_vm5, %v1502_v31, %v1541_v50  ;;  %vm2232_vm5 = vcmask 786112  }
 0x1cf   : > { %v1517_v59 = vadd.f32 %v9643_v38, %v1516_v41 }
 0x1d1   : > { %v1518_v28 = vrot.slane %v1517_v59, 4 }
 0x1d3   : > { %v1519_v55 = vadd.f32 %v1518_v28, %v1517_v59  ;;  %v15564_v59 = vld [vmem:[#allocation62_spill] sm:$0xff]  ;;  %v15565_v28 = vld [vmem:[#allocation48_spill] sm:$0xff] }
 0x1d5   : > { %v1520_v7 = vrot.slane %v1519_v55, 2 }
 0x1d7   : > { %v1521_v40 = vadd.f32 %v1520_v7, %v1519_v55  ;;  %v15567_v55 = vld [vmem:[#allocation61_spill] sm:$0xff]  ;;  %v15568_v7 = vld [vmem:[#allocation66_spill] sm:$0xff] }
 0x1d9   : > { %v1522_v37 = vrot.slane %v1521_v40, 1 }
 0x1db   : > { %v1523_v49 = vadd.f32 %v1522_v37, %v1521_v40  ;;  %v15569_v40 = vld [vmem:[#allocation64_spill] sm:$0xff] }
 0x1dc   : > { %v5525_v37 = vld [vmem:[%s6955_s23 + $0x8] sm:$0xff] }
 0x1dd   : > { %v1545_v18 = vsel %vm14418_vm6, %v1523_v49, %v1543_v56  ;;  %v5526_v49 = vmul.f32 -1.442695, %v5525_v37  ;;  %vm2225_vm6 = vcmask 720512  }
 0x1de   : > { %6113 = vrcp.f32 %v1545_v18 }
 0x1df   : > { %6115 = vpow2.f32 %v5526_v49 }
 0x1e8   : > { %v6114_v47 = vpop.eup %6113 }
 0x1e9   : > { %v9654_v43 = vmul.f32 %v6633_v39, %v6114_v47 }
 0x1eb   : > { %v1557_v41 = vrot.slane %v9654_v43, %v15562_v19 }
 0x1ed   : > { %v9659_v25 = vrot.slane %v1557_v41, %v15562_v19 }
 0x1ef   : > { %v1602_v12 = vrot.slane %v9659_v25, %v15563_v57 }
 0x1f1   : > { %v1641_v14 = vmul.f32 %v15564_v59, %v1602_v12  ;;  %v1639_v20 = vmul.f32 %v15565_v28, %v1602_v12  ;;  %v1642_v27 = vmul.f32 %v15566_v62, %v1602_v12  ;;  %v1640_v53 = vmul.f32 %v15567_v55, %v1602_v12  ;;  %v15570_v62 = vld [vmem:[#allocation16_spill] sm:$0xff]  ;;  %v15571_v55 = vld [vmem:[#allocation83_spill] sm:$0xff] }
 0x1f2   : > { %v1644_v31 = vmul.f32 %v15568_v7, %v1602_v12  ;;  %v1643_v50 = vmul.f32 %v15569_v40, %v1602_v12  ;;  %v1646_v56 = vmul.f32 %v15447_v48, %v1602_v12  ;;  %v1645_v18 = vmul.f32 %v15432_v60, %v1602_v12  ;;  %v15573_v7 = vld [vmem:[#allocation86_spill] sm:$0xff]  ;;  %v15574_v40 = vld [vmem:[#allocation31_spill] sm:$0xff] }
 0x1f3   : > { %1771 = vadd.xlane.f32.xlu1 %v1641_v14  ;;  %1767 = vadd.xlane.f32.xlu0 %v1639_v20  ;;  %v1648_v47 = vmul.f32 %v15471_v13, %v1602_v12  ;;  %v1647_v39 = vmul.f32 %v15460_v61, %v1602_v12  ;;  %v1565_v59 = vcombine.high %v1557_v41, %v1557_v41  ;;  %v6116_v20 = vpop.eup %6115 }
 0x1f4   : > { %v1650_v14 = vmul.f32 %v15492_v45, %v1602_v12  ;;  %v1649_v28 = vmul.f32 %v15482_v36, %v1602_v12  ;;  %v1652_v60 = vmul.f32 %v15510_v15, %v1602_v12  ;;  %v1651_v13 = vmul.f32 %v15502_v58, %v1602_v12  ;;  %v15572_v58 = vld [vmem:[#allocation88_spill] sm:$0xff] }
 0x1f5   : > { %v9677_v48 = vrot.slane %v1565_v59, %v15562_v19  ;;  %v1654_v41 = vmul.f32 %v15528_v8, %v1602_v12  ;;  %v1653_v45 = vmul.f32 %v15519_v52, %v1602_v12  ;;  %v2829_v36 = vadd.f32 1.0, %v6116_v20 }
 0x1f7   : > { %1773 = vadd.xlane.f32.xlu1 %v1642_v27  ;;  %1769 = vadd.xlane.f32.xlu0 %v1640_v53  ;;  %v1606_v61 = vrot.slane %v9677_v48, %v15563_v57  ;;  %6117 = vrcp.f32 %v2829_v36 }
 0x1f9   : > { %v1656_v27 = vmul.f32 %v15570_v62, %v1606_v61  ;;  %v1655_v15 = vmul.f32 %v15571_v55, %v1606_v61  ;;  %v1658_v53 = vmul.f32 %v15572_v58, %v1606_v61  ;;  %v1660_v8 = vmul.f32 %v15574_v40, %v1606_v61 }
 0x1fa   : > { %v1662_v37 = vmul.f32 %v15452_v35, %v1606_v61  ;;  %v1665_v35 = vmul.f32 %v15485_v24, %v1606_v61  ;;  %v1667_v20 = vmul.f32 %v15505_v30, %v1606_v61  ;;  %v1550_v24 = vcombine.high %v9654_v43, %v9654_v43 }
 0x1fb   : > { %1777 = vadd.xlane.f32.xlu1 %v1644_v31  ;;  %1775 = vadd.xlane.f32.xlu0 %v1643_v50  ;;  %v1657_v31 = vmul.f32 %v15573_v7, %v1606_v61  ;;  %v15575_v50 = vld [vmem:[#allocation89_spill] sm:$0xff]  ;;  %v1670_v30 = vmul.f32 %v15531_v29, %v1606_v61 }
 0x1fc   : > { %v1659_v52 = vmul.f32 %v15575_v50, %v1606_v61  ;;  %v9727_v7 = vld [vmem:[#allocation5 + $0x10] sm:$0xff] }
 0x1ff   : > { %1781 = vadd.xlane.f32.xlu1 %v1646_v56  ;;  %1779 = vadd.xlane.f32.xlu0 %v1645_v18  ;;  %v1661_v56 = vmul.f32 %v15439_v0, %v1606_v61 }
 0x201   : > { %v6118_v12 = vpop.eup %6117 }
 0x202   : > { %v2833_v49 = vcombine.high %v6118_v12, %v6118_v12  ;;  %v2840_v18 = vrot.slane %v6118_v12, %v15562_v19 }
 0x203   : > { %1785 = vadd.xlane.f32.xlu1 %v1648_v47  ;;  %1783 = vadd.xlane.f32.xlu0 %v1647_v39  ;;  %v1664_v47 = vmul.f32 %v15475_v63, %v1606_v61  ;;  %v1663_v39 = vmul.f32 %v15464_v17, %v1606_v61  ;;  %v1595_v63 = vcombine.high %v9659_v25, %v9659_v25 }
 0x204   : > { %v2847_v59 = vrot.slane %v2833_v49, %v15562_v19  ;;  %v2856_v0 = vrot.slane %v2840_v18, %v15562_v19  ;;  %v1668_v17 = vmul.f32 %v15513_v42, %v1606_v61 }
 0x205   : > { %v9716_v42 = vrot.slane %v1595_v63, %v15563_v57 }
 0x206   : > { %v9710_v62 = vrot.slane %v2856_v0, %v15563_v57 }
 0x207   : > { %1789 = vadd.xlane.f32.xlu1 %v1650_v14  ;;  %1787 = vadd.xlane.f32.xlu0 %v1649_v28  ;;  %v2848_v14 = vcombine.high %v2840_v18, %v2840_v18  ;;  %v1666_v28 = vmul.f32 %v15495_v32, %v1606_v61  ;;  %v2878_v32 = vcombine.high %v2856_v0, %v2856_v0  ;;  %v15579_v18 = vld [vmem:[#allocation46_spill] sm:$0xff] }
 0x208   : > { %v1676_v16 = vmul.f32 %v15597_v4, %v9716_v42  ;;  %v15600_v4 = vld [vmem:[#allocation57_spill] sm:$0xff] }
 0x209   : > { %v9721_v43 = vrot.slane %v2878_v32, %v15563_v57 }
 0x20b   : > { %1793 = vadd.xlane.f32.xlu1 %v1652_v60  ;;  %1791 = vadd.xlane.f32.xlu0 %v1651_v13  ;;  %v2849_v60 = vcombine.high %v2847_v59, %v2847_v59  ;;  %v2870_v13 = vrot.slane %v2848_v14, %v15562_v19  ;;  %v9772_v14 = vmul.f32 %v9727_v7, %v9721_v43 }
 0x20d   : > { %v2880_v36 = vcombine.high %v2870_v13, %v2870_v13  ;;  %v9713_v25 = vrot.slane %v2870_v13, %v15563_v57  ;;  %15581 = vst [vmem:[#allocation61_spill] sm:$0xff] %v9772_v14 }
 0x20f   : > { %1797 = vadd.xlane.f32.xlu1 %v1654_v41  ;;  %1795 = vadd.xlane.f32.xlu0 %v1653_v45  ;;  %v2863_v41 = vrot.slane %v2847_v59, %v15562_v19  ;;  %v2877_v45 = vrot.slane %v2849_v60, %v15562_v19  ;;  %v9744_v40 = vmul.f32 %v9727_v7, %v9713_v25 }
 0x211   : > { %v2879_v55 = vcombine.high %v2863_v41, %v2863_v41  ;;  %v2881_v58 = vcombine.high %v2877_v45, %v2877_v45  ;;  %v9734_v29 = vrot.slane %v2863_v41, %v15563_v57  ;;  %15576 = vst [vmem:[#allocation62_spill] sm:$0xff] %v9744_v40 }
 0x213   : > { %1801 = vadd.xlane.f32.xlu1 %v1656_v27  ;;  %1799 = vadd.xlane.f32.xlu0 %v1655_v15  ;;  %v1669_v27 = vmul.f32 %v15521_v1, %v1606_v61  ;;  %v1564_v15 = vrot.slane %v1550_v24, %v15562_v19  ;;  %v9736_v1 = vld [vmem:[#allocation5 + $0x18] sm:$0xff]  ;;  %v15587_v24 = vld [vmem:[#allocation55_spill] sm:$0xff] }
 0x214   : > { %v9740_v61 = vmul.f32 %v9736_v1, %v9710_v62  ;;  %v9789_v13 = vmul.f32 %v9736_v1, %v9721_v43 }
 0x215   : > { %v1566_v50 = vcombine.high %v1564_v15, %v1564_v15  ;;  %v1580_v63 = vrot.slane %v1564_v15, %v15562_v19  ;;  %v1597_v15 = vcombine.high %v9677_v48, %v9677_v48 }
 0x216   : > { %15583 = vst [vmem:[#allocation64_spill] sm:$0xff] %v9789_v13 }
 0x217   : > { %1805 = vadd.xlane.f32.xlu1 %v1658_v53  ;;  %1803 = vadd.xlane.f32.xlu0 %v1657_v31  ;;  %v9725_v53 = vrot.slane %v2880_v36, %v15563_v57  ;;  %v9731_v31 = vmul.f32 %v9727_v7, %v9710_v62  ;;  %v1594_v32 = vrot.slane %v1566_v50, %v15562_v19  ;;  %v9807_v36 = vld [vmem:[#allocation5 + $0x30] sm:$0xff] }
 0x218   : > { %v9833_v19 = vmul.f32 %v9807_v36, %v9721_v43  ;;  %v1618_v5 = vrot.slane %v1580_v63, %v15563_v57  ;;  %v9869_v34 = vrot.slane %v1597_v15, %v15563_v57 }
 0x219   : > { %v9802_v41 = vmul.f32 %v9727_v7, %v9725_v53  ;;  %v9855_v21 = vmul.f32 %v9807_v36, %v9725_v53 }
 0x21a   : > { %15591 = vst [vmem:[#allocation89_spill] sm:$0xff] %v9833_v19  ;;  %v15609_v19 = vld [vmem:[#allocation27_spill] sm:$0xff] }
 0x21b   : > { %1809 = vadd.xlane.f32.xlu1 %v1660_v8  ;;  %1807 = vadd.xlane.f32.xlu0 %v1659_v52  ;;  %v9748_v8 = vmul.f32 %v9736_v1, %v9713_v25  ;;  %v15578_v52 = vld [vmem:[#allocation51_spill] sm:$0xff]  ;;  %15586 = vst [vmem:[#allocation88_spill] sm:$0xff] %v9802_v41  ;;  %15596 = vst [vmem:[#allocation111_spill] sm:$0xff] %v9855_v21 }
 0x21c   : > { %v1672_v12 = vmul.f32 %v15578_v52, %v9716_v42  ;;  %v9823_v52 = vmul.f32 %v9736_v1, %v9725_v53 }
 0x21d   : > { %15577 = vst [vmem:[#allocation48_spill] sm:$0xff] %v9748_v8 }
 0x21e   : > { %15590 = vst [vmem:[#allocation31_spill] sm:$0xff] %v9823_v52  ;;  %v15602_v52 = vld [vmem:[#allocation102_spill] sm:$0xff] }
 0x21f   : > { %1813 = vadd.xlane.f32.xlu1 %v1662_v37  ;;  %1811 = vadd.xlane.f32.xlu0 %v1661_v56  ;;  %v9753_v37 = vrot.slane %v2877_v45, %v15563_v57  ;;  %v9755_v56 = vld [vmem:[#allocation5 + $0x20] sm:$0xff]  ;;  %v1674_v45 = vmul.f32 %v15587_v24, %v9716_v42  ;;  %v1677_v15 = vmul.f32 %v15602_v52, %v9716_v42 }
 0x220   : > { %v9759_v49 = vmul.f32 %v9755_v56, %v9710_v62  ;;  %v9768_v59 = vmul.f32 %v9755_v56, %v9713_v25  ;;  %v9837_v48 = vmul.f32 %v9755_v56, %v9725_v53 }
 0x222   : > { %15580 = vst [vmem:[#allocation63_spill] sm:$0xff] %v9768_v59  ;;  %15592 = vst [vmem:[#allocation51_spill] sm:$0xff] %v9837_v48  ;;  %v1678_v48 = vmul.f32 %v15461_v3, %v9716_v42  ;;  %v9902_v3 = vmul.f32 %v15511_v6, %v9716_v42  ;;  %v15608_v6 = vld [vmem:[#allocation21_spill] sm:$0xff] }
 0x223   : > { %1817 = vadd.xlane.f32.xlu1 %v1664_v47  ;;  %1815 = vadd.xlane.f32.xlu0 %v1663_v39  ;;  %v1671_v47 = vmul.f32 %v15579_v18, %v9716_v42  ;;  %v9764_v39 = vrot.slane %v2879_v55, %v15563_v57  ;;  %v1596_v55 = vcombine.high %v1580_v63, %v1580_v63  ;;  %v9825_v18 = vld [vmem:[#allocation5 + $0x38] sm:$0xff] }
 0x224   : > { %v9829_v24 = vmul.f32 %v9825_v18, %v9710_v62  ;;  %v9847_v46 = vmul.f32 %v9825_v18, %v9713_v25  ;;  %v9866_v44 = vmul.f32 %v9825_v18, %v9721_v43 }
 0x225   : > { %v9875_v63 = vrot.slane %v1596_v55, %v15563_v57  ;;  %v1679_v55 = vmul.f32 %v15472_v23, %v9716_v42  ;;  %v15604_v23 = vld [vmem:[#allocation76_spill] sm:$0xff] }
 0x226   : > { %15594 = vst [vmem:[#allocation55_spill] sm:$0xff] %v9847_v46  ;;  %15599 = vst [vmem:[#allocation112_spill] sm:$0xff] %v9866_v44  ;;  %v9922_v44 = vmul.f32 %v15608_v6, %v1618_v5  ;;  %v15615_v6 = vld [vmem:[#allocation85_spill] sm:$0xff] }
 0x227   : > { %1821 = vadd.xlane.f32.xlu1 %v1666_v28  ;;  %1819 = vadd.xlane.f32.xlu0 %v1665_v35  ;;  %v9775_v28 = vrot.slane %v2881_v58, %v15563_v57  ;;  %v9777_v35 = vld [vmem:[#allocation5 + $0x28] sm:$0xff]  ;;  %v15589_v58 = vld [vmem:[#allocation53_spill] sm:$0xff] }
 0x228   : > { %v9781_v0 = vmul.f32 %v9777_v35, %v9710_v62  ;;  %v9785_v60 = vmul.f32 %v9777_v35, %v9713_v25  ;;  %v1673_v50 = vmul.f32 %v15589_v58, %v9716_v42  ;;  %v9851_v38 = vmul.f32 %v9777_v35, %v9725_v53 }
 0x22a   : > { %15582 = vst [vmem:[#allocation66_spill] sm:$0xff] %v9785_v60  ;;  %15595 = vst [vmem:[#allocation53_spill] sm:$0xff] %v9851_v38  ;;  %v9872_v38 = vrot.slane %v1594_v32, %v15563_v57 }
 0x22b   : > { %1825 = vadd.xlane.f32.xlu1 %v1668_v17  ;;  %1823 = vadd.xlane.f32.xlu0 %v1667_v20  ;;  %v9794_v17 = vmul.f32 %v9755_v56, %v9721_v43  ;;  %v9798_v20 = vmul.f32 %v9777_v35, %v9721_v43 }
 0x22d   : > { %15584 = vst [vmem:[#allocation16_spill] sm:$0xff] %v9794_v17  ;;  %15585 = vst [vmem:[#allocation83_spill] sm:$0xff] %v9798_v20  ;;  %v15610_v20 = vld [vmem:[#allocation26_spill] sm:$0xff] }
 0x22e   : > { %v9928_v17 = vmul.f32 %v15610_v20, %v1618_v5  ;;  %v15617_v20 = vld [vmem:[#allocation33_spill] sm:$0xff] }
 0x22f   : > { %1829 = vadd.xlane.f32.xlu1 %v1670_v30  ;;  %1827 = vadd.xlane.f32.xlu0 %v1669_v27  ;;  %v9811_v30 = vmul.f32 %v9807_v36, %v9710_v62  ;;  %v9815_v27 = vmul.f32 %v9807_v36, %v9713_v25 }
 0x231   : > { %15588 = vst [vmem:[#allocation86_spill] sm:$0xff] %v9815_v27  ;;  %v9949_v27 = vmul.f32 %v15617_v20, %v1618_v5  ;;  %v15626_v20 = vld [vmem:[#allocation30_spill] sm:$0xff] }
 0x233   : > { %1833 = vadd.xlane.f32.xlu1 %v1672_v12  ;;  %1831 = vadd.xlane.f32.xlu0 %v1671_v47  ;;  %v1598_v12 = vcombine.high %v1594_v32, %v1594_v32  ;;  %v9839_v47 = vld [vmem:[#allocation5 + $0x40] sm:$0xff]  ;;  %v1680_v32 = vmul.f32 %v15483_v54, %v9716_v42  ;;  %v15603_v54 = vld [vmem:[#allocation32_spill] sm:$0xff] }
 0x234   : > { %v9843_v58 = vmul.f32 %v9839_v47, %v9710_v62  ;;  %v9862_v51 = vmul.f32 %v9839_v47, %v9713_v25  ;;  %v9906_v52 = vmul.f32 %v15603_v54, %v9716_v42  ;;  %v9925_v54 = vmul.f32 %v15609_v19, %v1618_v5  ;;  %v15616_v19 = vld [vmem:[#allocation90_spill] sm:$0xff] }
 0x235   : > { %v9880_v21 = vrot.slane %v1598_v12, %v15563_v57  ;;  %v9898_v12 = vmul.f32 %v15520_v26, %v9716_v42  ;;  %v15605_v57 = vld [vmem:[#allocation20_spill] sm:$0xff]  ;;  %v9946_v46 = vmul.f32 %v15616_v19, %v1618_v5 }
 0x236   : > { %15593 = vst [vmem:[#allocation46_spill] sm:$0xff] %v9843_v58  ;;  %15598 = vst [vmem:[#allocation101_spill] sm:$0xff] %v9862_v51  ;;  %v9943_v51 = vmul.f32 %v15615_v6, %v1618_v5  ;;  %v15624_v6 = vld [vmem:[#allocation103_spill] sm:$0xff] }
 0x237   : > { %1837 = vadd.xlane.f32.xlu1 %v1674_v45  ;;  %1835 = vadd.xlane.f32.xlu0 %v1673_v50  ;;  %v1675_v45 = vmul.f32 %v15600_v4, %v9716_v42  ;;  %15601 = vst [vmem:[#allocation57_spill] sm:$0xff] %v9880_v21  ;;  %v1682_v50 = vmul.f32 %v15503_v2, %v9716_v42  ;;  %v15606_v21 = vld [vmem:[#allocation19_spill] sm:$0xff] }
 0x238   : > { %v9894_v4 = vmul.f32 %v15493_v10, %v9716_v42  ;;  %v9910_v2 = vmul.f32 %v15604_v23, %v9716_v42  ;;  %v9913_v10 = vmul.f32 %v15605_v57, %v1618_v5  ;;  %v9916_v26 = vmul.f32 %v15606_v21, %v1618_v5  ;;  %v15611_v42 = vld [vmem:[#allocation28_spill] sm:$0xff]  ;;  %v15640_v58 = vld [vmem:[#allocation11_spill] sm:$0xff] }
 0x239   : > { %v9931_v23 = vmul.f32 %v15611_v42, %v1618_v5  ;;  %v15612_v57 = vld [vmem:[#allocation40_spill] sm:$0xff]  ;;  %v15613_v21 = vlaneseq  ;;  %v15618_v42 = vld [vmem:[#allocation71_spill] sm:$0xff]  ;;  %v9965_v19 = vmul.f32 %v15624_v6, %v9869_v34 }
 0x23a   : > { %v9952_v60 = vmul.f32 %v15618_v42, %v1618_v5  ;;  %v15628_v42 = vld [vmem:[#allocation105_spill] sm:$0xff] }
 0x23b   : > { %1841 = vadd.xlane.f32.xlu1 %v1676_v16  ;;  %1839 = vadd.xlane.f32.xlu0 %v1675_v45  ;;  %v15607_v16 = vld [vmem:[#allocation22_spill] sm:$0xff]  ;;  %v9934_v45 = vmul.f32 %v15612_v57, %v1618_v5  ;;  %v9937_v13 = vand.u32 127, %v15613_v21  ;;  %v9958_v21 = vmul.f32 %v9425_v22, %v1618_v5  ;;  %15625 = vst [vmem:[#allocation20_spill] sm:$0xff] %v9965_v19  ;;  %v15632_v19 = vld [vmem:[#allocation29_spill] sm:$0xff] }
 0x23c   : > { %v9919_v41 = vmul.f32 %v15607_v16, %v1618_v5  ;;  %v15614_v16 = vld [vmem:[#allocation84_spill] sm:$0xff]  ;;  %v15619_v57 = vld [vmem:[#allocation70_spill] sm:$0xff]  ;;  %v9973_v40 = vmul.f32 %v15628_v42, %v9869_v34 }
 0x23d   : > { %v9940_v14 = vmul.f32 %v15614_v16, %v1618_v5  ;;  %v9955_v59 = vmul.f32 %v15619_v57, %v1618_v5  ;;  %15621 = vst [vmem:[#allocation32_spill] sm:$0xff] %v9958_v21  ;;  %v15622_v16 = vld [vmem:[#allocation34_spill] sm:$0xff]  ;;  %v15630_v57 = vld [vmem:[#allocation104_spill] sm:$0xff]  ;;  %v2185_v6 = vadd.s32 4294967256, %v9937_v13 }
 0x23e   : > { %v9961_v8 = vmul.f32 %v15622_v16, %v1618_v5  ;;  %15629 = vst [vmem:[#allocation22_spill] sm:$0xff] %v9973_v40  ;;  %v9977_v22 = vmul.f32 %v15630_v57, %v9869_v34  ;;  %v2164_v5 = vadd.s32 4294967280, %v9937_v13  ;;  %v2157_v16 = vadd.s32 4294967288, %v9937_v13  ;;  %v15636_v40 = vld [vmem:[#allocation96_spill] sm:$0xff] }
 0x23f   : > { %1845 = vadd.xlane.f32.xlu1 %v1678_v48  ;;  %15620 = vst [vmem:[#allocation102_spill] sm:$0xff] %v9955_v59  ;;  %1843 = vadd.xlane.f32.xlu0 %v1677_v15  ;;  %v9969_v48 = vmul.f32 %v15626_v20, %v9869_v34  ;;  %v2171_v15 = vadd.s32 4294967272, %v9937_v13  ;;  %v9985_v20 = vmul.f32 %v15632_v19, %v9869_v34  ;;  %v15642_v19 = vld [vmem:[#allocation98_spill] sm:$0xff] }
 0x240   : > { %15623 = vst [vmem:[#allocation76_spill] sm:$0xff] %v9961_v8  ;;  %15631 = vst [vmem:[#allocation21_spill] sm:$0xff] %v9977_v22  ;;  %v9993_v57 = vmul.f32 %v15636_v40, %v9869_v34  ;;  %v2178_v22 = vadd.s32 4294967264, %v9937_v13  ;;  %v15638_v8 = vld [vmem:[#allocation91_spill] sm:$0xff]  ;;  %v10002_v59 = vsub.s32 %v9937_v13, %v15640_v58 }
 0x241   : > { %15627 = vst [vmem:[#allocation19_spill] sm:$0xff] %v9969_v48  ;;  %15633 = vst [vmem:[#allocation27_spill] sm:$0xff] %v9985_v20  ;;  %v15634_v48 = vld [vmem:[#allocation87_spill] sm:$0xff]  ;;  %v9998_v21 = vmul.f32 %v15638_v8, %v9869_v34  ;;  %v10006_v20 = vmul.f32 %v15642_v19, %v9869_v34  ;;  %v15648_v8 = vld [vmem:[#allocation14_spill] sm:$0xff]  ;;  %v10023_v19 = vsub.s32 %v2164_v5, %v15640_v58 }
 0x242   : > { %v9989_v42 = vmul.f32 %v15634_v48, %v9869_v34  ;;  %15637 = vst [vmem:[#allocation28_spill] sm:$0xff] %v9993_v57  ;;  %15641 = vst [vmem:[#allocation84_spill] sm:$0xff] %v10002_v59  ;;  %v15644_v48 = vld [vmem:[#allocation97_spill] sm:$0xff]  ;;  %v15646_v40 = vld [vmem:[#allocation15_spill] sm:$0xff]  ;;  %v2199_v57 = vadd.s32 4294967240, %v9937_v13  ;;  %v2192_v59 = vadd.s32 4294967248, %v9937_v13 }
 0x243   : > { %1849 = vadd.xlane.f32.xlu1 %v1680_v32  ;;  %15639 = vst [vmem:[#allocation40_spill] sm:$0xff] %v9998_v21  ;;  %15643 = vst [vmem:[#allocation85_spill] sm:$0xff] %v10006_v20  ;;  %1847 = vadd.xlane.f32.xlu0 %v1679_v55  ;;  %v10014_v32 = vmul.f32 %v15646_v40, %v9869_v34  ;;  %v10018_v21 = vmul.f32 %v15648_v8, %v9869_v34  ;;  %v15655_v8 = vld [vmem:[#allocation23_spill] sm:$0xff] }
 0x244   : > { %15635 = vst [vmem:[#allocation26_spill] sm:$0xff] %v9989_v42  ;;  %v10010_v42 = vmul.f32 %v15644_v48, %v9869_v34  ;;  %15650 = vst [vmem:[#allocation70_spill] sm:$0xff] %v10023_v19  ;;  %v10026_v20 = vsub.s32 %v2171_v15, %v15640_v58  ;;  %v10029_v55 = vsub.s32 %v2157_v16, %v15640_v58  ;;  %v2206_v15 = vadd.s32 4294967232, %v9937_v13  ;;  %v10047_v19 = vld [vmem:[#allocation5] sm:$0xff] }
 0x245   : > { %15647 = vst [vmem:[#allocation33_spill] sm:$0xff] %v10014_v32  ;;  %15649 = vst [vmem:[#allocation71_spill] sm:$0xff] %v10018_v21  ;;  %v10032_v48 = vsub.s32 %v2185_v6, %v15640_v58  ;;  %v10035_v40 = vsub.s32 %v2178_v22, %v15640_v58  ;;  %v10039_v21 = vmul.f32 %v15655_v8, %v9869_v34  ;;  %v15657_v32 = vld [vmem:[#allocation38_spill] sm:$0xff]  ;;  %v2213_v16 = vadd.s32 4294967224, %v9937_v13  ;;  %v10053_v22 = vld [vmem:[#allocation5 + $0x8] sm:$0xff] }
 0x246   : > { %15645 = vst [vmem:[#allocation90_spill] sm:$0xff] %v10010_v42  ;;  %15651 = vst [vmem:[#allocation34_spill] sm:$0xff] %v10026_v20  ;;  %v10043_v5 = vmul.f32 %v15657_v32, %v9869_v34  ;;  %v10051_v6 = vmul.f32 %v10047_v19, %v9710_v62  ;;  %v10057_v8 = vmul.f32 %v10053_v22, %v9710_v62  ;;  %v10098_v42 = vld [vmem:[#allocation5 + $0x68] sm:$0xff] }
 0x247   : > { %15652 = vst [vmem:[#allocation103_spill] sm:$0xff] %v10029_v55  ;;  %15653 = vst [vmem:[#allocation30_spill] sm:$0xff] %v10032_v48  ;;  %1853 = vadd.xlane.f32.xlu1 %v1682_v50  ;;  %1851 = vadd.xlane.f32.xlu0 %v9894_v4  ;;  %v10067_v50 = vsub.s32 %v2199_v57, %v15640_v58  ;;  %v10078_v55 = vld [vmem:[#allocation5 + $0x58] sm:$0xff]  ;;  %v10086_v4 = vmul.f32 %v15544_v9, %v9869_v34  ;;  %v15664_v57 = vld [vmem:[#allocation24_spill] sm:$0xff]  ;;  %v2220_v9 = vadd.s32 4294967216, %v9937_v13 }
 0x248   : > { %15654 = vst [vmem:[#allocation105_spill] sm:$0xff] %v10035_v40  ;;  %15656 = vst [vmem:[#allocation104_spill] sm:$0xff] %v10039_v21  ;;  %v10059_v21 = vld [vmem:[#allocation5 + $0x48] sm:$0xff]  ;;  %v10072_v40 = vld [vmem:[#allocation5 + $0x50] sm:$0xff]  ;;  %v10082_v20 = vmul.f32 %v10078_v55, %v9710_v62 }
 0x249   : > { %15658 = vst [vmem:[#allocation29_spill] sm:$0xff] %v10043_v5  ;;  %v10063_v32 = vmul.f32 %v10059_v21, %v9710_v62  ;;  %15659 = vst [vmem:[#allocation87_spill] sm:$0xff] %v10067_v50  ;;  %v10070_v5 = vsub.s32 %v2192_v59, %v15640_v58  ;;  %v10076_v48 = vmul.f32 %v10072_v40, %v9710_v62 }
 0x24a   : > { %15662 = vst [vmem:[#allocation11_spill] sm:$0xff] %v10082_v20  ;;  %15663 = vst [vmem:[#allocation98_spill] sm:$0xff] %v10086_v4  ;;  %v10090_v59 = vmul.f32 %v15664_v57, %v9869_v34  ;;  %v10105_v20 = vsub.s32 %v2206_v15, %v15640_v58  ;;  %v10108_v4 = vld [vmem:[#allocation5 + $0x70] sm:$0xff]  ;;  %v10114_v57 = vld [vmem:[#allocation5 + $0x78] sm:$0xff]  ;;  %v2227_v15 = vadd.s32 4294967208, %v9937_v13 }
 0x24b   : > { %15660 = vst [vmem:[#allocation96_spill] sm:$0xff] %v10070_v5  ;;  %15661 = vst [vmem:[#allocation91_spill] sm:$0xff] %v10076_v48  ;;  %v10092_v5 = vld [vmem:[#allocation5 + $0x60] sm:$0xff]  ;;  %v10102_v48 = vmul.f32 %v10098_v42, %v9710_v62  ;;  %v10112_v34 = vmul.f32 %v10108_v4, %v9710_v62  ;;  %1857 = vadd.xlane.f32.xlu1 %v9898_v12  ;;  %1855 = vadd.xlane.f32.xlu0 %v9902_v3  ;;  %v15675_v12 = vld [vmem:[#allocation69_spill] sm:$0xff] }
 0x24c   : > { %15665 = vst [vmem:[#allocation97_spill] sm:$0xff] %v10090_v59  ;;  %v10096_v50 = vmul.f32 %v10092_v5, %v9710_v62  ;;  %15667 = vst [vmem:[#allocation14_spill] sm:$0xff] %v10105_v20  ;;  %v10118_v59 = vmul.f32 %v10114_v57, %v9710_v62  ;;  %v10127_v20 = vmul.f32 %v10047_v19, %v9713_v25  ;;  %v15673_v62 = vld [vmem:[#allocation92_spill] sm:$0xff] }
 0x24d   : > { %15666 = vst [vmem:[#allocation15_spill] sm:$0xff] %v10102_v48  ;;  %15668 = vst [vmem:[#allocation23_spill] sm:$0xff] %v10112_v34  ;;  %v10122_v48 = vsub.s32 %v2213_v16, %v15640_v58  ;;  %v10131_v34 = vmul.f32 %v10053_v22, %v9713_v25  ;;  %v10140_v16 = vmul.f32 %v15675_v12, %v9872_v38 }
 0x24e   : > { %15669 = vst [vmem:[#allocation38_spill] sm:$0xff] %v10118_v59  ;;  %15671 = vst [vmem:[#allocation113_spill] sm:$0xff] %v10127_v20  ;;  %v10136_v59 = vmul.f32 %v15673_v62, %v9872_v38  ;;  %v10148_v20 = vmul.f32 %v10072_v40, %v9713_v25  ;;  %v10156_v3 = vmul.f32 %v10092_v5, %v9713_v25 }
 0x24f   : > { %15670 = vst [vmem:[#allocation24_spill] sm:$0xff] %v10122_v48  ;;  %15672 = vst [vmem:[#allocation114_spill] sm:$0xff] %v10131_v34  ;;  %v10144_v48 = vmul.f32 %v10059_v21, %v9713_v25  ;;  %v10152_v34 = vmul.f32 %v10078_v55, %v9713_v25  ;;  %v10160_v62 = vmul.f32 %v10098_v42, %v9713_v25  ;;  %1861 = vadd.xlane.f32.xlu1 %v9906_v52 }
 0x250   : > { %15674 = vst [vmem:[#allocation92_spill] sm:$0xff] %v10136_v59  ;;  %15676 = vst [vmem:[#allocation69_spill] sm:$0xff] %v10140_v16  ;;  %v10164_v12 = vmul.f32 %v10108_v4, %v9713_v25  ;;  %v10167_v16 = vsub.s32 %v2220_v9, %v15640_v58  ;;  %v2241_v59 = vadd.s32 4294967192, %v9937_v13  ;;  %v10185_v9 = vmul.f32 %v10053_v22, %v9721_v43 }
 0x251   : > { %15677 = vst [vmem:[#allocation115_spill] sm:$0xff] %v10148_v20  ;;  %15678 = vst [vmem:[#allocation116_spill] sm:$0xff] %v10152_v34  ;;  %v2234_v20 = vadd.s32 4294967200, %v9937_v13  ;;  %v10173_v34 = vmul.f32 %v10114_v57, %v9713_v25  ;;  %1859 = vadd.xlane.f32.xlu0 %v9910_v2  ;;  %v15686_v25 = vld [vmem:[#allocation99_spill] sm:$0xff]  ;;  %v2248_v2 = vadd.s32 4294967184, %v9937_v13 }
 0x252   : > { %15679 = vst [vmem:[#allocation117_spill] sm:$0xff] %v10156_v3  ;;  %15680 = vst [vmem:[#allocation118_spill] sm:$0xff] %v10160_v62  ;;  %v10177_v3 = vsub.s32 %v2227_v15, %v15640_v58  ;;  %v10181_v62 = vmul.f32 %v10047_v19, %v9721_v43  ;;  %v10194_v52 = vmul.f32 %v15686_v25, %v9872_v38  ;;  %v15688_v15 = vld [vmem:[#allocation95_spill] sm:$0xff] }
 0x253   : > { %15681 = vst [vmem:[#allocation119_spill] sm:$0xff] %v10167_v16  ;;  %15684 = vst [vmem:[#allocation122_spill] sm:$0xff] %v10185_v9  ;;  %v10189_v16 = vmul.f32 %v9839_v47, %v9721_v43  ;;  %v10206_v9 = vmul.f32 %v10072_v40, %v9721_v43  ;;  %v10212_v25 = vmul.f32 %v10078_v55, %v9721_v43  ;;  %1897 = vadd.xlane.f32.xlu1 %v9913_v10 }
 0x254   : > { %15682 = vst [vmem:[#allocation120_spill] sm:$0xff] %v10177_v3  ;;  %15683 = vst [vmem:[#allocation121_spill] sm:$0xff] %v10181_v62  ;;  %v10198_v3 = vmul.f32 %v15688_v15, %v9872_v38  ;;  %v10202_v62 = vmul.f32 %v10059_v21, %v9721_v43  ;;  %v10216_v15 = vmul.f32 %v10092_v5, %v9721_v43 }
 0x255   : > { %15685 = vst [vmem:[#allocation123_spill] sm:$0xff] %v10189_v16  ;;  %15687 = vst [vmem:[#allocation99_spill] sm:$0xff] %v10194_v52  ;;  %v2255_v16 = vadd.s32 4294967176, %v9937_v13  ;;  %v10222_v52 = vsub.s32 %v2234_v20, %v15640_v58  ;;  %v10230_v13 = vmul.f32 %v10108_v4, %v9721_v43  ;;  %v10243_v20 = vmul.f32 %v10114_v57, %v9721_v43 }
 0x256   : > { %15689 = vst [vmem:[#allocation95_spill] sm:$0xff] %v10198_v3  ;;  %15690 = vst [vmem:[#allocation124_spill] sm:$0xff] %v10202_v62  ;;  %v10219_v3 = vsub.s32 %v2241_v59, %v15640_v58  ;;  %v15697_v59 = vld [vmem:[#allocation100_spill] sm:$0xff]  ;;  %1895 = vadd.xlane.f32.xlu0 %v9916_v26  ;;  %v10252_v10 = vmul.f32 %v10053_v22, %v9725_v53  ;;  %v10270_v26 = vsub.s32 %v2248_v2, %v15640_v58 }
 0x257   : > { %15691 = vst [vmem:[#allocation125_spill] sm:$0xff] %v10206_v9  ;;  %15692 = vst [vmem:[#allocation126_spill] sm:$0xff] %v10212_v25  ;;  %v10226_v9 = vmul.f32 %v10098_v42, %v9721_v43  ;;  %v15695_v25 = vld [vmem:[#allocation65_spill] sm:$0xff]  ;;  %v10264_v43 = vmul.f32 %v10059_v21, %v9725_v53  ;;  %1901 = vadd.xlane.f32.xlu1 %v9919_v41  ;;  %v10299_v2 = vmul.f32 %v10108_v4, %v9725_v53 }
 0x258   : > { %15693 = vst [vmem:[#allocation127_spill] sm:$0xff] %v10219_v3  ;;  %15694 = vst [vmem:[#allocation128_spill] sm:$0xff] %v10222_v52  ;;  %v10235_v62 = vmul.f32 %v15695_v25, %v9872_v38  ;;  %v10239_v3 = vmul.f32 %v15697_v59, %v9872_v38  ;;  %v10247_v52 = vmul.f32 %v10047_v19, %v9725_v53 }
 0x259   : > { %15700 = vst [vmem:[#allocation130_spill] sm:$0xff] %v10252_v10  ;;  %v10256_v25 = vmul.f32 %v9825_v18, %v9725_v53  ;;  %v10260_v59 = vmul.f32 %v9839_v47, %v9725_v53  ;;  %15703 = vst [vmem:[#allocation133_spill] sm:$0xff] %v10264_v43  ;;  %v15708_v43 = vld [vmem:[#allocation74_spill] sm:$0xff]  ;;  %v10316_v41 = vmul.f32 %v9727_v7, %v9734_v29 }
 0x25a   : > { %15696 = vst [vmem:[#allocation65_spill] sm:$0xff] %v10235_v62  ;;  %15698 = vst [vmem:[#allocation100_spill] sm:$0xff] %v10239_v3  ;;  %v10267_v3 = vsub.s32 %v2255_v16, %v15640_v58  ;;  %v10274_v62 = vmul.f32 %v10072_v40, %v9725_v53  ;;  %v10290_v58 = vmul.f32 %v10092_v5, %v9725_v53  ;;  %1899 = vadd.xlane.f32.xlu0 %v9922_v44 }
 0x25b   : > { %15699 = vst [vmem:[#allocation129_spill] sm:$0xff] %v10247_v52  ;;  %15701 = vst [vmem:[#allocation131_spill] sm:$0xff] %v10256_v25  ;;  %v10278_v25 = vmul.f32 %v10078_v55, %v9725_v53  ;;  %v10286_v52 = vmul.f32 %v15708_v43, %v9872_v38  ;;  %v10294_v16 = vmul.f32 %v10098_v42, %v9725_v53  ;;  %1905 = vadd.xlane.f32.xlu1 %v9925_v54 }
 0x25c   : > { %15702 = vst [vmem:[#allocation132_spill] sm:$0xff] %v10260_v59  ;;  %15704 = vst [vmem:[#allocation134_spill] sm:$0xff] %v10267_v3  ;;  %v15706_v59 = vld [vmem:[#allocation67_spill] sm:$0xff]  ;;  %v10307_v43 = vmul.f32 %v10047_v19, %v9734_v29  ;;  %v10332_v3 = vmul.f32 %v9807_v36, %v9734_v29  ;;  %v10336_v44 = vmul.f32 %v9825_v18, %v9734_v29 }
 0x25d   : > { %15705 = vst [vmem:[#allocation135_spill] sm:$0xff] %v10270_v26  ;;  %v10282_v10 = vmul.f32 %v15706_v59, %v9872_v38  ;;  %15709 = vst [vmem:[#allocation74_spill] sm:$0xff] %v10286_v52  ;;  %v10303_v59 = vmul.f32 %v10114_v57, %v9725_v53  ;;  %v10311_v52 = vmul.f32 %v10053_v22, %v9734_v29 }
 0x25e   : > { %15710 = vst [vmem:[#allocation136_spill] sm:$0xff] %v10307_v43  ;;  %15712 = vst [vmem:[#allocation138_spill] sm:$0xff] %v10316_v41  ;;  %v10324_v53 = vmul.f32 %v9755_v56, %v9734_v29  ;;  %v10328_v26 = vmul.f32 %v9777_v35, %v9734_v29  ;;  %v10340_v41 = vmul.f32 %v9839_v47, %v9734_v29  ;;  %1903 = vadd.xlane.f32.xlu0 %v9928_v17 }
 0x25f   : > { %15707 = vst [vmem:[#allocation67_spill] sm:$0xff] %v10282_v10  ;;  %15711 = vst [vmem:[#allocation137_spill] sm:$0xff] %v10311_v52  ;;  %v10320_v10 = vmul.f32 %v9736_v1, %v9734_v29  ;;  %v10382_v54 = vmul.f32 %v10047_v19, %v9753_v37  ;;  %v10402_v17 = vmul.f32 %v9777_v35, %v9753_v37  ;;  %1909 = vadd.xlane.f32.xlu1 %v9931_v23 }
 0x260   : > { %15714 = vst [vmem:[#allocation140_spill] sm:$0xff] %v10324_v53  ;;  %15715 = vst [vmem:[#allocation141_spill] sm:$0xff] %v10328_v26  ;;  %v15719_v53 = vld [vmem:[#allocation77_spill] sm:$0xff]  ;;  %v15721_v26 = vld [vmem:[#allocation36_spill] sm:$0xff]  ;;  %v10448_v23 = vmul.f32 %v10108_v4, %v9753_v37 }
 0x261   : > { %15713 = vst [vmem:[#allocation139_spill] sm:$0xff] %v10320_v10  ;;  %15716 = vst [vmem:[#allocation142_spill] sm:$0xff] %v10332_v3  ;;  %v10344_v10 = vmul.f32 %v10059_v21, %v9734_v29  ;;  %v10348_v52 = vmul.f32 %v15719_v53, %v9872_v38  ;;  %v10352_v43 = vmul.f32 %v15721_v26, %v9872_v38 }
 0x262   : > { %15717 = vst [vmem:[#allocation143_spill] sm:$0xff] %v10336_v44  ;;  %v10356_v3 = vmul.f32 %v10072_v40, %v9734_v29  ;;  %v10360_v44 = vmul.f32 %v10078_v55, %v9734_v29  ;;  %v10369_v53 = vmul.f32 %v10098_v42, %v9734_v29  ;;  %v10373_v26 = vmul.f32 %v10108_v4, %v9734_v29 }
 0x263   : > { %15718 = vst [vmem:[#allocation144_spill] sm:$0xff] %v10344_v10  ;;  %15720 = vst [vmem:[#allocation77_spill] sm:$0xff] %v10348_v52  ;;  %v10365_v10 = vmul.f32 %v10092_v5, %v9734_v29  ;;  %v10386_v52 = vmul.f32 %v10053_v22, %v9753_v37  ;;  %1907 = vadd.xlane.f32.xlu0 %v9934_v45  ;;  %v10468_v45 = vmul.f32 %v9736_v1, %v9764_v39 }
 0x264   : > { %15722 = vst [vmem:[#allocation36_spill] sm:$0xff] %v10352_v43  ;;  %15724 = vst [vmem:[#allocation146_spill] sm:$0xff] %v10369_v53  ;;  %v10377_v43 = vmul.f32 %v10114_v57, %v9734_v29  ;;  %v10390_v53 = vmul.f32 %v9727_v7, %v9753_v37  ;;  %v10398_v29 = vmul.f32 %v9755_v56, %v9753_v37  ;;  %1913 = vadd.xlane.f32.xlu1 %v9940_v14 }
 0x265   : > { %15723 = vst [vmem:[#allocation145_spill] sm:$0xff] %v10365_v10  ;;  %15725 = vst [vmem:[#allocation147_spill] sm:$0xff] %v10373_v26  ;;  %v10394_v26 = vmul.f32 %v9736_v1, %v9753_v37  ;;  %v10514_v14 = vmul.f32 %v10092_v5, %v9764_v39 }
 0x266   : > { %15726 = vst [vmem:[#allocation148_spill] sm:$0xff] %v10377_v43  ;;  %15727 = vst [vmem:[#allocation149_spill] sm:$0xff] %v10382_v54  ;;  %v10406_v54 = vmul.f32 %v9807_v36, %v9753_v37 }
 0x267   : > { %15728 = vst [vmem:[#allocation150_spill] sm:$0xff] %v10386_v52  ;;  %15729 = vst [vmem:[#allocation151_spill] sm:$0xff] %v10390_v53  ;;  %v10410_v52 = vmul.f32 %v9825_v18, %v9753_v37  ;;  %v15734_v53 = vld [vmem:[#allocation37_spill] sm:$0xff]  ;;  %1911 = vadd.xlane.f32.xlu0 %v9943_v51  ;;  %v10534_v51 = vmul.f32 %v10053_v22, %v9775_v28 }
 0x268   : > { %15730 = vst [vmem:[#allocation152_spill] sm:$0xff] %v10394_v26  ;;  %15731 = vst [vmem:[#allocation153_spill] sm:$0xff] %v10398_v29  ;;  %v10414_v43 = vmul.f32 %v15734_v53, %v9872_v38  ;;  %v15736_v26 = vld [vmem:[#allocation68_spill] sm:$0xff]  ;;  %v10422_v29 = vmul.f32 %v9839_v47, %v9753_v37  ;;  %v10435_v53 = vmul.f32 %v10078_v55, %v9753_v37  ;;  %1917 = vadd.xlane.f32.xlu1 %v9946_v46 }
 0x269   : > { %15732 = vst [vmem:[#allocation154_spill] sm:$0xff] %v10402_v17  ;;  %15733 = vst [vmem:[#allocation155_spill] sm:$0xff] %v10410_v52  ;;  %v10418_v10 = vmul.f32 %v15736_v26, %v9872_v38  ;;  %v10426_v17 = vmul.f32 %v10059_v21, %v9753_v37  ;;  %v10431_v52 = vmul.f32 %v10072_v40, %v9753_v37 }
 0x26a   : > { %15735 = vst [vmem:[#allocation37_spill] sm:$0xff] %v10414_v43  ;;  %15739 = vst [vmem:[#allocation157_spill] sm:$0xff] %v10435_v53  ;;  %v10439_v26 = vmul.f32 %v10092_v5, %v9753_v37  ;;  %v10452_v43 = vmul.f32 %v10114_v57, %v9753_v37  ;;  %v10456_v53 = vmul.f32 %v10047_v19, %v9764_v39 }
 0x26b   : > { %15737 = vst [vmem:[#allocation68_spill] sm:$0xff] %v10418_v10  ;;  %15738 = vst [vmem:[#allocation156_spill] sm:$0xff] %v10431_v52  ;;  %v10443_v10 = vmul.f32 %v10098_v42, %v9753_v37  ;;  %v10472_v37 = vmul.f32 %v9755_v56, %v9764_v39  ;;  %1915 = vadd.xlane.f32.xlu0 %v9949_v27  ;;  %v10580_v46 = vmul.f32 %v10072_v40, %v9775_v28 }
 0x26c   : > { %15740 = vst [vmem:[#allocation158_spill] sm:$0xff] %v10439_v26  ;;  %15742 = vst [vmem:[#allocation160_spill] sm:$0xff] %v10448_v23  ;;  %v10460_v26 = vmul.f32 %v10053_v22, %v9764_v39  ;;  %v10554_v22 = vmul.f32 %v9755_v56, %v9775_v28  ;;  %v10584_v56 = vmul.f32 %v10078_v55, %v9775_v28  ;;  %1921 = vadd.xlane.f32.xlu1 %v9952_v60 }
 0x26d   : > { %15741 = vst [vmem:[#allocation159_spill] sm:$0xff] %v10443_v10  ;;  %15743 = vst [vmem:[#allocation161_spill] sm:$0xff] %v10452_v43  ;;  %v10464_v10 = vmul.f32 %v9727_v7, %v9764_v39  ;;  %v10476_v43 = vmul.f32 %v9777_v35, %v9764_v39  ;;  %v10600_v27 = vmul.f32 %v10114_v57, %v9775_v28 }
 0x26e   : > { %15744 = vst [vmem:[#allocation162_spill] sm:$0xff] %v10456_v53  ;;  %15745 = vst [vmem:[#allocation163_spill] sm:$0xff] %v10460_v26  ;;  %v15749_v53 = vld [vmem:[#allocation79_spill] sm:$0xff] }
 0x26f   : > { %15746 = vst [vmem:[#allocation164_spill] sm:$0xff] %v10464_v10  ;;  %15747 = vst [vmem:[#allocation165_spill] sm:$0xff] %v10468_v45  ;;  %v10480_v23 = vmul.f32 %v15749_v53, %v9872_v38  ;;  %v15751_v26 = vld [vmem:[#allocation43_spill] sm:$0xff]  ;;  %v10488_v10 = vmul.f32 %v9807_v36, %v9764_v39  ;;  %v10492_v45 = vmul.f32 %v9825_v18, %v9764_v39 }
 0x270   : > { %15748 = vst [vmem:[#allocation166_spill] sm:$0xff] %v10476_v43  ;;  %v10484_v52 = vmul.f32 %v15751_v26, %v9872_v38  ;;  %v10497_v43 = vmul.f32 %v9839_v47, %v9764_v39  ;;  %v10501_v53 = vmul.f32 %v10059_v21, %v9764_v39  ;;  %v10505_v26 = vmul.f32 %v10072_v40, %v9764_v39  ;;  %v15777_v40 = vld [vmem:[#allocation78_spill] sm:$0xff] }
 0x271   : > { %15750 = vst [vmem:[#allocation79_spill] sm:$0xff] %v10480_v23  ;;  %15756 = vst [vmem:[#allocation170_spill] sm:$0xff] %v10514_v14  ;;  %v10518_v23 = vmul.f32 %v10098_v42, %v9764_v39  ;;  %v10538_v14 = vmul.f32 %v9727_v7, %v9775_v28  ;;  %v10558_v7 = vmul.f32 %v9777_v35, %v9775_v28 }
 0x272   : > { %15752 = vst [vmem:[#allocation43_spill] sm:$0xff] %v10484_v52  ;;  %15753 = vst [vmem:[#allocation167_spill] sm:$0xff] %v10501_v53  ;;  %v10509_v52 = vmul.f32 %v10078_v55, %v9764_v39  ;;  %v10522_v53 = vmul.f32 %v10108_v4, %v9764_v39  ;;  %v10588_v35 = vmul.f32 %v10092_v5, %v9775_v28  ;;  %v15775_v55 = vld [vmem:[#allocation35_spill] sm:$0xff] }
 0x273   : > { %15754 = vst [vmem:[#allocation168_spill] sm:$0xff] %v10505_v26  ;;  %15757 = vst [vmem:[#allocation171_spill] sm:$0xff] %v10518_v23  ;;  %v10526_v26 = vmul.f32 %v10114_v57, %v9764_v39  ;;  %v10542_v23 = vmul.f32 %v9736_v1, %v9775_v28  ;;  %v10546_v39 = vmul.f32 %v9530_v11, %v9872_v38 }
 0x274   : > { %15755 = vst [vmem:[#allocation169_spill] sm:$0xff] %v10509_v52  ;;  %v10530_v52 = vmul.f32 %v10047_v19, %v9775_v28  ;;  %15758 = vst [vmem:[#allocation172_spill] sm:$0xff] %v10534_v51  ;;  %v10550_v19 = vmul.f32 %v9520_v33, %v9872_v38  ;;  %v10563_v1 = vmul.f32 %v9807_v36, %v9775_v28  ;;  %v15812_v51 = vld [vmem:[#allocation20_spill] sm:$0xff] }
 0x275   : > { %15759 = vst [vmem:[#allocation173_spill] sm:$0xff] %v10538_v14  ;;  %15760 = vst [vmem:[#allocation174_spill] sm:$0xff] %v10542_v23  ;;  %v10567_v11 = vmul.f32 %v9825_v18, %v9775_v28  ;;  %v10571_v33 = vmul.f32 %v9839_v47, %v9775_v28  ;;  %v10575_v38 = vmul.f32 %v10059_v21, %v9775_v28  ;;  %v15806_v23 = vld [vmem:[#allocation72_spill] sm:$0xff] }
 0x276   : > { %15761 = vst [vmem:[#allocation175_spill] sm:$0xff] %v10546_v39  ;;  %15762 = vst [vmem:[#allocation176_spill] sm:$0xff] %v10550_v19  ;;  %v10592_v36 = vmul.f32 %v10098_v42, %v9775_v28  ;;  %v10596_v18 = vmul.f32 %v10108_v4, %v9775_v28  ;;  %v10604_v47 = vmul.f32 %v10051_v6, %v10051_v6  ;;  %v15790_v19 = vld [vmem:[#allocation113_spill] sm:$0xff]  ;;  %v15808_v14 = vld [vmem:[#allocation44_spill] sm:$0xff] }
 0x277   : > { %15763 = vst [vmem:[#allocation177_spill] sm:$0xff] %v10554_v22  ;;  %15764 = vst [vmem:[#allocation178_spill] sm:$0xff] %v10558_v7  ;;  %v10608_v21 = vmul.f32 %v10057_v8, %v10057_v8  ;;  %v10612_v42 = vmul.f32 %v15775_v55, %v9875_v63  ;;  %v10616_v5 = vmul.f32 %v15777_v40, %v9875_v63  ;;  %v15780_v55 = vld [vmem:[#allocation46_spill] sm:$0xff]  ;;  %v15803_v7 = vld [vmem:[#allocation117_spill] sm:$0xff] }
 0x278   : > { %15765 = vst [vmem:[#allocation179_spill] sm:$0xff] %v10563_v1  ;;  %15766 = vst [vmem:[#allocation180_spill] sm:$0xff] %v10567_v11  ;;  %v10620_v28 = vmul.f32 %v9731_v31, %v9731_v31  ;;  %v10624_v6 = vmul.f32 %v9740_v61, %v9740_v61  ;;  %v10629_v8 = vmul.f32 %v9759_v49, %v9759_v49  ;;  %v15779_v61 = vld [vmem:[#allocation102_spill] sm:$0xff] }
 0x279   : > { %15767 = vst [vmem:[#allocation181_spill] sm:$0xff] %v10571_v33  ;;  %15768 = vst [vmem:[#allocation182_spill] sm:$0xff] %v10575_v38  ;;  %v10633_v4 = vmul.f32 %v9781_v0, %v9781_v0  ;;  %v10637_v57 = vmul.f32 %v9811_v30, %v9811_v30  ;;  %v10641_v31 = vmul.f32 %v9829_v24, %v9829_v24  ;;  %1919 = vadd.xlane.f32.xlu0 %v15779_v61  ;;  %v15781_v0 = vld [vmem:[#allocation91_spill] sm:$0xff]  ;;  %v15798_v38 = vld [vmem:[#allocation86_spill] sm:$0xff] }
 0x27a   : > { %15769 = vst [vmem:[#allocation183_spill] sm:$0xff] %v10580_v46  ;;  %15770 = vst [vmem:[#allocation184_spill] sm:$0xff] %v10584_v56  ;;  %v10646_v60 = vmul.f32 %v15780_v55, %v15780_v55  ;;  %v10650_v49 = vmul.f32 %v10063_v32, %v10063_v32  ;;  %v10654_v40 = vmul.f32 %v15781_v0, %v15781_v0  ;;  %v15782_v30 = vld [vmem:[#allocation11_spill] sm:$0xff]  ;;  %v15792_v56 = vld [vmem:[#allocation32_spill] sm:$0xff] }
 0x27b   : > { %15771 = vst [vmem:[#allocation185_spill] sm:$0xff] %v10588_v35  ;;  %15772 = vst [vmem:[#allocation186_spill] sm:$0xff] %v10592_v36  ;;  %v10662_v24 = vmul.f32 %v10096_v50, %v10096_v50  ;;  %v15783_v61 = vld [vmem:[#allocation15_spill] sm:$0xff]  ;;  %v15786_v36 = vld [vmem:[#allocation41_spill] sm:$0xff]  ;;  %1925 = vadd.xlane.f32.xlu1 %v15792_v56  ;;  %v10712_v56 = vmul.f32 %v15798_v38, %v15798_v38 }
 0x27c   : > { %15773 = vst [vmem:[#allocation187_spill] sm:$0xff] %v10596_v18  ;;  %15774 = vst [vmem:[#allocation188_spill] sm:$0xff] %v10600_v27  ;;  %v10658_v27 = vmul.f32 %v15782_v30, %v15782_v30  ;;  %v10666_v55 = vmul.f32 %v15783_v61, %v15783_v61  ;;  %v15785_v18 = vld [vmem:[#allocation38_spill] sm:$0xff]  ;;  %v10678_v30 = vmul.f32 %v15786_v36, %v9875_v63  ;;  %v15794_v36 = vld [vmem:[#allocation48_spill] sm:$0xff] }
 0x27d   : > { %15776 = vst [vmem:[#allocation35_spill] sm:$0xff] %v10612_v42  ;;  %15778 = vst [vmem:[#allocation78_spill] sm:$0xff] %v10616_v5  ;;  %v15784_v5 = vld [vmem:[#allocation23_spill] sm:$0xff]  ;;  %v10674_v0 = vmul.f32 %v15785_v18, %v15785_v18  ;;  %v10686_v61 = vmul.f32 %v15790_v19, %v15790_v19  ;;  %v15791_v35 = vld [vmem:[#allocation114_spill] sm:$0xff] }
 0x27e   : > { %v10670_v32 = vmul.f32 %v15784_v5, %v15784_v5  ;;  %15787 = vst [vmem:[#allocation102_spill] sm:$0xff] %v10678_v30  ;;  %v15788_v42 = vld [vmem:[#allocation39_spill] sm:$0xff]  ;;  %v10690_v5 = vmul.f32 %v15791_v35, %v15791_v35  ;;  %v15793_v18 = vld [vmem:[#allocation62_spill] sm:$0xff]  ;;  %v10699_v30 = vmul.f32 %v15794_v36, %v15794_v36  ;;  %v15797_v35 = vld [vmem:[#allocation76_spill] sm:$0xff] }
 0x27f   : > { %v10682_v50 = vmul.f32 %v15788_v42, %v9875_v63  ;;  %v10695_v39 = vmul.f32 %v15793_v18, %v15793_v18  ;;  %v15795_v42 = vld [vmem:[#allocation63_spill] sm:$0xff]  ;;  %v15796_v19 = vld [vmem:[#allocation66_spill] sm:$0xff]  ;;  %1923 = vadd.xlane.f32.xlu0 %v15797_v35  ;;  %v15800_v36 = vld [vmem:[#allocation101_spill] sm:$0xff]  ;;  %1865 = vadd.xlane.f32.xlu1 %v15812_v51 }
 0x280   : > { %v10707_v46 = vmul.f32 %v15796_v19, %v15796_v19  ;;  %v15799_v18 = vld [vmem:[#allocation55_spill] sm:$0xff]  ;;  %v10720_v11 = vmul.f32 %v15800_v36, %v15800_v36  ;;  %v15802_v35 = vld [vmem:[#allocation116_spill] sm:$0xff]  ;;  %v15804_v22 = vld [vmem:[#allocation118_spill] sm:$0xff] }
 0x281   : > { %15789 = vst [vmem:[#allocation46_spill] sm:$0xff] %v10682_v50  ;;  %v10703_v50 = vmul.f32 %v15795_v42, %v15795_v42  ;;  %v10716_v33 = vmul.f32 %v15799_v18, %v15799_v18  ;;  %v10724_v42 = vmul.f32 %v10144_v48, %v10144_v48  ;;  %v15801_v19 = vld [vmem:[#allocation115_spill] sm:$0xff]  ;;  %v10732_v38 = vmul.f32 %v15802_v35, %v15802_v35 }
 0x282   : > { %v10728_v1 = vmul.f32 %v15801_v19, %v15801_v19  ;;  %v10736_v18 = vmul.f32 %v15803_v7, %v15803_v7  ;;  %v10740_v36 = vmul.f32 %v15804_v22, %v15804_v22  ;;  %v10744_v48 = vmul.f32 %v15806_v23, %v9875_v63  ;;  %v15813_v22 = vld [vmem:[#allocation121_spill] sm:$0xff]  ;;  %v15815_v23 = vld [vmem:[#allocation122_spill] sm:$0xff] }
 0x283   : > { %v10748_v19 = vmul.f32 %v15808_v14, %v9875_v63  ;;  %v10752_v35 = vmul.f32 %v10164_v12, %v10164_v12  ;;  %v10756_v7 = vmul.f32 %v10173_v34, %v10173_v34  ;;  %v15817_v14 = vld [vmem:[#allocation61_spill] sm:$0xff]  ;;  %v15819_v12 = vld [vmem:[#allocation64_spill] sm:$0xff]  ;;  %v15821_v34 = vld [vmem:[#allocation19_spill] sm:$0xff] }
 0x284   : > { %15805 = vst [vmem:[#allocation91_spill] sm:$0xff] %v10740_v36  ;;  %15807 = vst [vmem:[#allocation11_spill] sm:$0xff] %v10744_v48  ;;  %v10761_v36 = vmul.f32 %v15813_v22, %v15813_v22  ;;  %v10765_v48 = vmul.f32 %v15815_v23, %v15815_v23  ;;  %1863 = vadd.xlane.f32.xlu0 %v15821_v34  ;;  %v15824_v22 = vld [vmem:[#allocation83_spill] sm:$0xff]  ;;  %v15826_v23 = vld [vmem:[#allocation89_spill] sm:$0xff] }
 0x285   : > { %15809 = vst [vmem:[#allocation15_spill] sm:$0xff] %v10748_v19  ;;  %15810 = vst [vmem:[#allocation23_spill] sm:$0xff] %v10752_v35  ;;  %v10769_v19 = vmul.f32 %v15817_v14, %v15817_v14  ;;  %v10773_v35 = vmul.f32 %v15819_v12, %v15819_v12  ;;  %v15828_v14 = vld [vmem:[#allocation112_spill] sm:$0xff]  ;;  %v15830_v12 = vld [vmem:[#allocation123_spill] sm:$0xff] }
 0x286   : > { %15811 = vst [vmem:[#allocation38_spill] sm:$0xff] %v10756_v7  ;;  %15814 = vst [vmem:[#allocation41_spill] sm:$0xff] %v10761_v36  ;;  %v15822_v7 = vld [vmem:[#allocation16_spill] sm:$0xff]  ;;  %v10782_v36 = vmul.f32 %v15824_v22, %v15824_v22 }
 0x287   : > { %15816 = vst [vmem:[#allocation39_spill] sm:$0xff] %v10765_v48  ;;  %15818 = vst [vmem:[#allocation113_spill] sm:$0xff] %v10769_v19  ;;  %v10778_v51 = vmul.f32 %v15822_v7, %v15822_v7  ;;  %v10786_v48 = vmul.f32 %v15826_v23, %v15826_v23  ;;  %v10790_v19 = vmul.f32 %v15828_v14, %v15828_v14  ;;  %v15831_v34 = vld [vmem:[#allocation124_spill] sm:$0xff] }
 0x288   : > { %15820 = vst [vmem:[#allocation114_spill] sm:$0xff] %v10773_v35  ;;  %15825 = vst [vmem:[#allocation62_spill] sm:$0xff] %v10782_v36  ;;  %v10794_v35 = vmul.f32 %v15830_v12, %v15830_v12  ;;  %v10798_v7 = vmul.f32 %v15831_v34, %v15831_v34  ;;  %v15834_v36 = vld [vmem:[#allocation126_spill] sm:$0xff]  ;;  %v10818_v34 = vmul.f32 %v10216_v15, %v10216_v15 }
 0x289   : > { %15823 = vst [vmem:[#allocation32_spill] sm:$0xff] %v10778_v51  ;;  %15827 = vst [vmem:[#allocation48_spill] sm:$0xff] %v10786_v48  ;;  %v15832_v51 = vld [vmem:[#allocation125_spill] sm:$0xff]  ;;  %v10806_v23 = vmul.f32 %v15834_v36, %v15834_v36  ;;  %v15835_v48 = vld [vmem:[#allocation47_spill] sm:$0xff]  ;;  %v10827_v36 = vmul.f32 %v10230_v13, %v10230_v13 }
 0x28a   : > { %15829 = vst [vmem:[#allocation63_spill] sm:$0xff] %v10790_v19  ;;  %v10802_v22 = vmul.f32 %v15832_v51, %v15832_v51  ;;  %v10810_v14 = vmul.f32 %v15835_v48, %v9875_v63  ;;  %v15837_v19 = vld [vmem:[#allocation18_spill] sm:$0xff]  ;;  %v10822_v51 = vmul.f32 %v10226_v9, %v10226_v9  ;;  %v10831_v48 = vmul.f32 %v10243_v20, %v10243_v20  ;;  %v15847_v9 = vld [vmem:[#allocation21_spill] sm:$0xff]  ;;  %v15850_v13 = vld [vmem:[#allocation31_spill] sm:$0xff] }
 0x28b   : > { %v10814_v12 = vmul.f32 %v15837_v19, %v9875_v63  ;;  %15841 = vst [vmem:[#allocation101_spill] sm:$0xff] %v10827_v36  ;;  %v15843_v19 = vld [vmem:[#allocation129_spill] sm:$0xff]  ;;  %v15845_v15 = vld [vmem:[#allocation130_spill] sm:$0xff]  ;;  %1867 = vadd.xlane.f32.xlu0 %v15847_v9  ;;  %v10848_v36 = vmul.f32 %v15850_v13, %v15850_v13  ;;  %v15852_v20 = vld [vmem:[#allocation51_spill] sm:$0xff] }
 0x28c   : > { %15833 = vst [vmem:[#allocation66_spill] sm:$0xff] %v10802_v22  ;;  %15836 = vst [vmem:[#allocation76_spill] sm:$0xff] %v10810_v14  ;;  %v15840_v22 = vld [vmem:[#allocation22_spill] sm:$0xff]  ;;  %v10839_v14 = vmul.f32 %v15845_v15, %v15845_v15  ;;  %v15856_v15 = vld [vmem:[#allocation111_spill] sm:$0xff] }
 0x28d   : > { %15838 = vst [vmem:[#allocation86_spill] sm:$0xff] %v10814_v12  ;;  %15839 = vst [vmem:[#allocation55_spill] sm:$0xff] %v10822_v51  ;;  %1869 = vadd.xlane.f32.xlu1 %v15840_v22  ;;  %v10835_v12 = vmul.f32 %v15843_v19, %v15843_v19  ;;  %v15848_v51 = vld [vmem:[#allocation88_spill] sm:$0xff]  ;;  %v15854_v19 = vld [vmem:[#allocation53_spill] sm:$0xff] }
 0x28e   : > { %15842 = vst [vmem:[#allocation115_spill] sm:$0xff] %v10831_v48  ;;  %15846 = vst [vmem:[#allocation117_spill] sm:$0xff] %v10839_v14  ;;  %v10844_v22 = vmul.f32 %v15848_v51, %v15848_v51  ;;  %v10852_v48 = vmul.f32 %v15852_v20, %v15852_v20  ;;  %v10860_v14 = vmul.f32 %v15856_v15, %v15856_v15  ;;  %v15857_v9 = vld [vmem:[#allocation131_spill] sm:$0xff] }
 0x28f   : > { %15844 = vst [vmem:[#allocation116_spill] sm:$0xff] %v10835_v12  ;;  %15851 = vst [vmem:[#allocation72_spill] sm:$0xff] %v10848_v36  ;;  %v10856_v12 = vmul.f32 %v15854_v19, %v15854_v19  ;;  %v10864_v51 = vmul.f32 %v15857_v9, %v15857_v9  ;;  %v15860_v36 = vld [vmem:[#allocation133_spill] sm:$0xff]  ;;  %v10884_v9 = vmul.f32 %v10274_v62, %v10274_v62 }
 0x290   : > { %15849 = vst [vmem:[#allocation118_spill] sm:$0xff] %v10844_v22  ;;  %15853 = vst [vmem:[#allocation44_spill] sm:$0xff] %v10852_v48  ;;  %v15858_v22 = vld [vmem:[#allocation132_spill] sm:$0xff]  ;;  %v10872_v20 = vmul.f32 %v15860_v36, %v15860_v36  ;;  %v15861_v48 = vld [vmem:[#allocation73_spill] sm:$0xff]  ;;  %v10893_v36 = vmul.f32 %v10290_v58, %v10290_v58  ;;  %v10905_v62 = vmul.f32 %v10303_v59, %v10303_v59 }
 0x291   : > { %15855 = vst [vmem:[#allocation20_spill] sm:$0xff] %v10856_v12  ;;  %v10868_v13 = vmul.f32 %v15858_v22, %v15858_v22  ;;  %v10876_v19 = vmul.f32 %v15861_v48, %v9875_v63  ;;  %v15863_v12 = vld [vmem:[#allocation80_spill] sm:$0xff]  ;;  %v10888_v22 = vmul.f32 %v10278_v25, %v10278_v25  ;;  %v10897_v48 = vmul.f32 %v10294_v16, %v10294_v16  ;;  %v15870_v25 = vld [vmem:[#allocation26_spill] sm:$0xff]  ;;  %v15873_v58 = vld [vmem:[#allocation137_spill] sm:$0xff] }
 0x292   : > { %v10880_v15 = vmul.f32 %v15863_v12, %v9875_v63  ;;  %15866 = vst [vmem:[#allocation64_spill] sm:$0xff] %v10893_v36  ;;  %v10901_v12 = vmul.f32 %v10299_v2, %v10299_v2  ;;  %15869 = vst [vmem:[#allocation83_spill] sm:$0xff] %v10905_v62  ;;  %1871 = vadd.xlane.f32.xlu0 %v15870_v25  ;;  %v15875_v16 = vld [vmem:[#allocation138_spill] sm:$0xff]  ;;  %v15877_v2 = vld [vmem:[#allocation139_spill] sm:$0xff] }
 0x293   : > { %15859 = vst [vmem:[#allocation121_spill] sm:$0xff] %v10868_v13  ;;  %15862 = vst [vmem:[#allocation122_spill] sm:$0xff] %v10876_v19  ;;  %v15865_v13 = vld [vmem:[#allocation27_spill] sm:$0xff]  ;;  %v10914_v19 = vmul.f32 %v15873_v58, %v15873_v58  ;;  %v15879_v59 = vld [vmem:[#allocation140_spill] sm:$0xff] }
 0x294   : > { %15864 = vst [vmem:[#allocation61_spill] sm:$0xff] %v10880_v15  ;;  %1873 = vadd.xlane.f32.xlu1 %v15865_v13  ;;  %15867 = vst [vmem:[#allocation19_spill] sm:$0xff] %v10897_v48  ;;  %v15871_v15 = vld [vmem:[#allocation136_spill] sm:$0xff]  ;;  %v10918_v48 = vmul.f32 %v15875_v16, %v15875_v16  ;;  %v10926_v25 = vmul.f32 %v15879_v59, %v15879_v59  ;;  %v15881_v62 = vld [vmem:[#allocation141_spill] sm:$0xff] }
 0x295   : > { %15868 = vst [vmem:[#allocation16_spill] sm:$0xff] %v10901_v12  ;;  %v10910_v13 = vmul.f32 %v15871_v15, %v15871_v15  ;;  %15874 = vst [vmem:[#allocation112_spill] sm:$0xff] %v10914_v19  ;;  %v10922_v12 = vmul.f32 %v15877_v2, %v15877_v2  ;;  %v10930_v15 = vmul.f32 %v15881_v62, %v15881_v62  ;;  %v15885_v19 = vld [vmem:[#allocation143_spill] sm:$0xff]  ;;  %v15887_v2 = vld [vmem:[#allocation50_spill] sm:$0xff] }
 0x296   : > { %15876 = vst [vmem:[#allocation123_spill] sm:$0xff] %v10918_v48  ;;  %15880 = vst [vmem:[#allocation125_spill] sm:$0xff] %v10926_v25  ;;  %v10938_v16 = vmul.f32 %v15885_v19, %v15885_v19  ;;  %v15889_v59 = vld [vmem:[#allocation17_spill] sm:$0xff]  ;;  %v10950_v62 = vmul.f32 %v10340_v41, %v10340_v41  ;;  %v10959_v19 = vmul.f32 %v10356_v3, %v10356_v3  ;;  %v15899_v41 = vld [vmem:[#allocation146_spill] sm:$0xff] }
 0x297   : > { %15872 = vst [vmem:[#allocation89_spill] sm:$0xff] %v10910_v13  ;;  %15878 = vst [vmem:[#allocation124_spill] sm:$0xff] %v10922_v12  ;;  %v15883_v13 = vld [vmem:[#allocation142_spill] sm:$0xff]  ;;  %v10942_v12 = vmul.f32 %v15887_v2, %v9875_v63  ;;  %v10946_v25 = vmul.f32 %v15889_v59, %v9875_v63  ;;  %v10963_v2 = vmul.f32 %v10360_v44, %v10360_v44  ;;  %v15897_v59 = vld [vmem:[#allocation145_spill] sm:$0xff] }
 0x298   : > { %15882 = vst [vmem:[#allocation126_spill] sm:$0xff] %v10930_v15  ;;  %v10934_v58 = vmul.f32 %v15883_v13, %v15883_v13  ;;  %15886 = vst [vmem:[#allocation18_spill] sm:$0xff] %v10938_v16  ;;  %v15892_v15 = vld [vmem:[#allocation144_spill] sm:$0xff]  ;;  %v10967_v16 = vmul.f32 %v15897_v59, %v15897_v59  ;;  %v15906_v44 = vld [vmem:[#allocation149_spill] sm:$0xff] }
 0x299   : > { %15888 = vst [vmem:[#allocation22_spill] sm:$0xff] %v10942_v12  ;;  %15890 = vst [vmem:[#allocation129_spill] sm:$0xff] %v10946_v25  ;;  %v10954_v13 = vmul.f32 %v15892_v15, %v15892_v15  ;;  %v15901_v15 = vld [vmem:[#allocation40_spill] sm:$0xff]  ;;  %v15908_v59 = vld [vmem:[#allocation150_spill] sm:$0xff] }
 0x29a   : > { %15884 = vst [vmem:[#allocation47_spill] sm:$0xff] %v10934_v58  ;;  %15891 = vst [vmem:[#allocation130_spill] sm:$0xff] %v10950_v62  ;;  %v15894_v58 = vld [vmem:[#allocation28_spill] sm:$0xff]  ;;  %v10971_v62 = vmul.f32 %v15899_v41, %v15899_v41  ;;  %1875 = vadd.xlane.f32.xlu0 %v15901_v15  ;;  %v1768_v41 = vpop.xlane.xlu0 %1767  ;;  %v15910_v15 = vld [vmem:[#allocation151_spill] sm:$0xff] }
 0x29b   : > { %15893 = vst [vmem:[#allocation21_spill] sm:$0xff] %v10954_v13  ;;  %1877 = vadd.xlane.f32.xlu1 %v15894_v58  ;;  %15895 = vst [vmem:[#allocation88_spill] sm:$0xff] %v10959_v19  ;;  %v1772_v58 = vpop.xlane.xlu1 %1771  ;;  %v15902_v13 = vld [vmem:[#allocation147_spill] sm:$0xff]  ;;  %v15904_v3 = vld [vmem:[#allocation148_spill] sm:$0xff] }
 0x29c   : > { %15896 = vst [vmem:[#allocation31_spill] sm:$0xff] %v10963_v2  ;;  %15898 = vst [vmem:[#allocation51_spill] sm:$0xff] %v10967_v16  ;;  %v10976_v25 = vmul.f32 %v15902_v13, %v15902_v13  ;;  %v10980_v19 = vmul.f32 %v15904_v3, %v15904_v3  ;;  %v10984_v2 = vmul.f32 %v15906_v44, %v15906_v44  ;;  %v15912_v13 = vld [vmem:[#allocation152_spill] sm:$0xff]  ;;  %v15914_v3 = vld [vmem:[#allocation153_spill] sm:$0xff] }
 0x29d   : > { %15900 = vst [vmem:[#allocation53_spill] sm:$0xff] %v10971_v62  ;;  %v10988_v16 = vmul.f32 %v15908_v59, %v15908_v59  ;;  %v10992_v62 = vmul.f32 %v15910_v15, %v15910_v15  ;;  %v15916_v44 = vld [vmem:[#allocation154_spill] sm:$0xff]  ;;  %v15941_v12 = vld [vmem:[#allocation103_spill] sm:$0xff] }
 0x29e   : > { %15903 = vst [vmem:[#allocation111_spill] sm:$0xff] %v10976_v25  ;;  %15905 = vst [vmem:[#allocation131_spill] sm:$0xff] %v10980_v19  ;;  %v10996_v25 = vmul.f32 %v15912_v13, %v15912_v13  ;;  %v11000_v19 = vmul.f32 %v15914_v3, %v15914_v3  ;;  %v15918_v59 = vld [vmem:[#allocation82_spill] sm:$0xff]  ;;  %v11016_v13 = vmul.f32 %v10406_v54, %v10406_v54  ;;  %v3178_v3 = vadd.f32 1e-07, %v10604_v47  ;;  %v15929_v47 = vld [vmem:[#allocation156_spill] sm:$0xff] }
 0x29f   : > { %15907 = vst [vmem:[#allocation132_spill] sm:$0xff] %v10984_v2  ;;  %15909 = vst [vmem:[#allocation133_spill] sm:$0xff] %v10988_v16  ;;  %v11004_v2 = vmul.f32 %v15916_v44, %v15916_v44  ;;  %v11008_v16 = vmul.f32 %v15918_v59, %v9875_v63  ;;  %v15920_v15 = vld [vmem:[#allocation54_spill] sm:$0xff]  ;;  %v11026_v59 = vmul.f32 %v10422_v29, %v10422_v29 }
 0x2a0   : > { %15911 = vst [vmem:[#allocation73_spill] sm:$0xff] %v10992_v62  ;;  %15913 = vst [vmem:[#allocation80_spill] sm:$0xff] %v10996_v25  ;;  %v11012_v62 = vmul.f32 %v15920_v15, %v9875_v63  ;;  %v15924_v25 = vld [vmem:[#allocation155_spill] sm:$0xff]  ;;  %v11030_v15 = vmul.f32 %v10426_v17, %v10426_v17  ;;  %v15928_v54 = vld [vmem:[#allocation90_spill] sm:$0xff]  ;;  %v3180_v17 = vadd.f32 1e-07, %v10620_v28  ;;  %6119 = vrsqrt.f32 %v3178_v3 }
 0x2a1   : > { %15915 = vst [vmem:[#allocation27_spill] sm:$0xff] %v11000_v19  ;;  %15917 = vst [vmem:[#allocation26_spill] sm:$0xff] %v11004_v2  ;;  %v15923_v19 = vld [vmem:[#allocation85_spill] sm:$0xff]  ;;  %v11022_v44 = vmul.f32 %v15924_v25, %v15924_v25  ;;  %v3179_v2 = vadd.f32 1e-07, %v10608_v21  ;;  %1879 = vadd.xlane.f32.xlu0 %v15928_v54  ;;  %v15935_v21 = vld [vmem:[#allocation159_spill] sm:$0xff] }
 0x2a2   : > { %15919 = vst [vmem:[#allocation136_spill] sm:$0xff] %v11008_v16  ;;  %15921 = vst [vmem:[#allocation137_spill] sm:$0xff] %v11012_v62  ;;  %1881 = vadd.xlane.f32.xlu1 %v15923_v19  ;;  %v11036_v19 = vmul.f32 %v15929_v47, %v15929_v47  ;;  %v15931_v62 = vld [vmem:[#allocation157_spill] sm:$0xff]  ;;  %v11049_v54 = vmul.f32 %v15935_v21, %v15935_v21  ;;  %v15942_v48 = vld [vmem:[#allocation70_spill] sm:$0xff] }
 0x2a3   : > { %15922 = vst [vmem:[#allocation138_spill] sm:$0xff] %v11016_v13  ;;  %15925 = vst [vmem:[#allocation139_spill] sm:$0xff] %v11022_v44  ;;  %v1774_v13 = vpop.xlane.xlu1 %1773  ;;  %v11040_v25 = vmul.f32 %v15931_v62, %v15931_v62  ;;  %v15933_v44 = vld [vmem:[#allocation158_spill] sm:$0xff]  ;;  %v3182_v62 = vadd.f32 1e-07, %v10629_v8  ;;  %v2168_v36 = vrot.slane %v1772_v58, %v15942_v48  ;;  %v15943_v21 = vld [vmem:[#allocation33_spill] sm:$0xff]  ;;  %6121 = vrsqrt.f32 %v3179_v2 }
 0x2a4   : > { %15926 = vst [vmem:[#allocation140_spill] sm:$0xff] %v11026_v59  ;;  %15927 = vst [vmem:[#allocation141_spill] sm:$0xff] %v11030_v15  ;;  %v11044_v29 = vmul.f32 %v15933_v44, %v15933_v44  ;;  %v1770_v15 = vpop.xlane.xlu0 %1769  ;;  %v15937_v59 = vld [vmem:[#allocation160_spill] sm:$0xff]  ;;  %v15940_v44 = vld [vmem:[#allocation34_spill] sm:$0xff]  ;;  %v3184_v58 = vadd.f32 1e-07, %v10637_v57  ;;  %6123 = vrsqrt.f32 %v3180_v17 }
 0x2a5   : > { %15930 = vst [vmem:[#allocation142_spill] sm:$0xff] %v11036_v19  ;;  %15932 = vst [vmem:[#allocation143_spill] sm:$0xff] %v11040_v25  ;;  %v11053_v47 = vmul.f32 %v15937_v59, %v15937_v59  ;;  %v3181_v19 = vadd.f32 1e-07, %v10624_v6  ;;  %v15939_v25 = vld [vmem:[#allocation84_spill] sm:$0xff]  ;;  %v2161_v28 = vrot.slane %v1770_v15, %v15941_v12  ;;  %v15950_v2 = vld [vmem:[#allocation105_spill] sm:$0xff] }
 0x2a6   : > { %15934 = vst [vmem:[#allocation50_spill] sm:$0xff] %v11044_v29  ;;  %15936 = vst [vmem:[#allocation17_spill] sm:$0xff] %v11049_v54  ;;  %v2156_v16 = vrot.slane %v1768_v41, %v15939_v25  ;;  %v2175_v29 = vrot.slane %v1774_v13, %v15940_v44  ;;  %1885 = vadd.xlane.f32.xlu1 %v15943_v21  ;;  %v15944_v54 = vld [vmem:[#allocation161_spill] sm:$0xff]  ;;  %v3183_v6 = vadd.f32 1e-07, %v10633_v4  ;;  %v15946_v41 = vld [vmem:[#allocation71_spill] sm:$0xff] }
 0x2a7   : > { %15938 = vst [vmem:[#allocation144_spill] sm:$0xff] %v11053_v47  ;;  %v11064_v59 = vmul.f32 %v15944_v54, %v15944_v54  ;;  %1883 = vadd.xlane.f32.xlu0 %v15946_v41  ;;  %v1778_v13 = vpop.xlane.xlu1 %1777  ;;  %v15947_v47 = vld [vmem:[#allocation162_spill] sm:$0xff]  ;;  %v3185_v4 = vadd.f32 1e-07, %v10641_v31  ;;  %6125 = vrsqrt.f32 %v3181_v19  ;;  %v15951_v41 = vld [vmem:[#allocation104_spill] sm:$0xff]  ;;  %v15952_v57 = vld [vmem:[#allocation163_spill] sm:$0xff] }
 0x2a8   : > { %v2163_v8 = vsel %vm2162_vm7, %v2161_v28, %v2156_v16  ;;  %v11071_v15 = vmul.f32 %v15947_v47, %v15947_v47  ;;  %v15949_v21 = vld [vmem:[#allocation30_spill] sm:$0xff]  ;;  %v3186_v47 = vadd.f32 1e-07, %v10646_v60  ;;  %6127 = vrsqrt.f32 %v3182_v62  ;;  %v15954_v17 = vld [vmem:[#allocation164_spill] sm:$0xff]  ;;  %v15957_v60 = vld [vmem:[#allocation165_spill] sm:$0xff] }
 0x2a9   : > { %15945 = vst [vmem:[#allocation28_spill] sm:$0xff] %v11064_v59  ;;  %v2170_v3 = vsel %vm2169_vm8, %v2168_v36, %v2163_v8  ;;  %v2189_v54 = vrot.slane %v1778_v13, %v15949_v21  ;;  %v1776_v59 = vpop.xlane.xlu0 %1775  ;;  %v11083_v36 = vmul.f32 %v15952_v57, %v15952_v57  ;;  %v11087_v8 = vmul.f32 %v15954_v17, %v15954_v17 }
 0x2aa   : > { %15948 = vst [vmem:[#allocation145_spill] sm:$0xff] %v11071_v15  ;;  %v2177_v16 = vsel %vm2176_vm9, %v2175_v29, %v2170_v3  ;;  %v2182_v28 = vrot.slane %v1776_v59, %v15950_v2  ;;  %1889 = vadd.xlane.f32.xlu1 %v15951_v41  ;;  %v3187_v31 = vadd.f32 1e-07, %v10650_v49  ;;  %6129 = vrsqrt.f32 %v3183_v6  ;;  %v15956_v29 = vld [vmem:[#allocation29_spill] sm:$0xff]  ;;  %v15959_v3 = vld [vmem:[#allocation87_spill] sm:$0xff]  ;;  %v15960_v6 = vld [vmem:[#allocation96_spill] sm:$0xff] }
 0x2ab   : > { %15953 = vst [vmem:[#allocation146_spill] sm:$0xff] %v11083_v36  ;;  %15955 = vst [vmem:[#allocation40_spill] sm:$0xff] %v11087_v8  ;;  %1887 = vadd.xlane.f32.xlu0 %v15956_v29  ;;  %v1782_v59 = vpop.xlane.xlu1 %1781  ;;  %v11094_v62 = vmul.f32 %v15957_v60, %v15957_v60  ;;  %v3188_v13 = vadd.f32 1e-07, %v10654_v40  ;;  %6131 = vrsqrt.f32 %v3184_v58  ;;  %v3189_v49 = vadd.f32 1e-07, %v10658_v27 }
 0x2ac   : > { %v2184_v19 = vsel %vm2183_vm10, %v2182_v28, %v2177_v16  ;;  %v2203_v41 = vrot.slane %v1782_v59, %v15959_v3  ;;  %6133 = vrsqrt.f32 %v3185_v4  ;;  %v11103_v28 = vmul.f32 %v10472_v37, %v10472_v37  ;;  %v15962_v40 = vld [vmem:[#allocation98_spill] sm:$0xff]  ;;  %v11116_v59 = vpop.eup %6119  ;;  %v15965_v60 = vld [vmem:[#allocation97_spill] sm:$0xff] }
 0x2ad   : > { %15958 = vst [vmem:[#allocation147_spill] sm:$0xff] %v11094_v62  ;;  %v2191_v57 = vsel %vm2190_vm11, %v2189_v54, %v2184_v19  ;;  %v1780_v17 = vpop.xlane.xlu0 %1779  ;;  %v3190_v29 = vadd.f32 1e-07, %v10662_v24  ;;  %6135 = vrsqrt.f32 %v3186_v47  ;;  %v15963_v58 = vld [vmem:[#allocation94_spill] sm:$0xff]  ;;  %v15964_v19 = vld [vmem:[#allocation56_spill] sm:$0xff]  ;;  %v15998_v62 = vld [vmem:[#allocation171_spill] sm:$0xff] }
 0x2ae   : > { %v2196_v16 = vrot.slane %v1780_v17, %v15960_v6  ;;  %15961 = vst [vmem:[#allocation148_spill] sm:$0xff] %v11103_v28  ;;  %1893 = vadd.xlane.f32.xlu1 %v15962_v40  ;;  %v11109_v54 = vmul.f32 %v15963_v58, %v9875_v63  ;;  %v11113_v27 = vmul.f32 %v15964_v19, %v9875_v63  ;;  %v3191_v4 = vadd.f32 1e-07, %v10666_v55  ;;  %v15966_v47 = vld [vmem:[#allocation166_spill] sm:$0xff]  ;;  %v11125_v58 = vpop.eup %6121  ;;  %v15968_v63 = vld [vmem:[#allocation24_spill] sm:$0xff] }
 0x2af   : > { %6137 = vrsqrt.f32 %v3187_v31  ;;  %1891 = vadd.xlane.f32.xlu0 %v15965_v60  ;;  %v1786_v24 = vpop.xlane.xlu1 %1785  ;;  %v11122_v17 = vmul.f32 %v15966_v47, %v15966_v47  ;;  %v3192_v40 = vadd.f32 1e-07, %v10670_v32  ;;  %v15970_v60 = vld [vmem:[#allocation14_spill] sm:$0xff]  ;;  %v11135_v32 = vmul.f32 %v10488_v10, %v10488_v10 }
 0x2b0   : > { %v2198_v37 = vsel %vm2197_vm12, %v2196_v16, %v2191_v57  ;;  %6139 = vrsqrt.f32 %v3188_v13  ;;  %v2217_v19 = vrot.slane %v1786_v24, %v15968_v63  ;;  %v3193_v57 = vadd.f32 1e-07, %v10674_v0  ;;  %v11130_v16 = vpop.eup %6123 }
 0x2b1   : > { %15967 = vst [vmem:[#allocation149_spill] sm:$0xff] %v11122_v17  ;;  %v2205_v55 = vsel %vm2204_vm13, %v2203_v41, %v2198_v37  ;;  %v1784_v31 = vpop.xlane.xlu0 %1783  ;;  %6141 = vrsqrt.f32 %v3189_v49  ;;  %15969 = vst [vmem:[#allocation150_spill] sm:$0xff] %v11130_v16  ;;  %v3194_v13 = vadd.f32 1e-07, %v10686_v61  ;;  %v11138_v24 = vpop.eup %6125  ;;  %v15973_v41 = vld [vmem:[#allocation92_spill] sm:$0xff]  ;;  %v11143_v0 = vmul.f32 %v10492_v45, %v10492_v45 }
 0x2b2   : > { %v2210_v28 = vrot.slane %v1784_v31, %v15970_v60  ;;  %15971 = vst [vmem:[#allocation151_spill] sm:$0xff] %v11135_v32  ;;  %6143 = vrsqrt.f32 %v3190_v29  ;;  %15972 = vst [vmem:[#allocation152_spill] sm:$0xff] %v11138_v24  ;;  %1929 = vadd.xlane.f32.xlu1 %v15973_v41  ;;  %v11147_v49 = vmul.f32 %v10497_v43, %v10497_v43  ;;  %v3195_v37 = vadd.f32 1e-07, %v10690_v5  ;;  %v11150_v10 = vpop.eup %6127  ;;  %v15977_v29 = vld [vmem:[#allocation69_spill] sm:$0xff]  ;;  %v15978_v31 = vld [vmem:[#allocation167_spill] sm:$0xff] }
 0x2b3   : > { %15974 = vst [vmem:[#allocation153_spill] sm:$0xff] %v11143_v0  ;;  %6145 = vrsqrt.f32 %v3191_v4  ;;  %15976 = vst [vmem:[#allocation82_spill] sm:$0xff] %v11150_v10  ;;  %1927 = vadd.xlane.f32.xlu0 %v15977_v29  ;;  %v1790_v47 = vpop.xlane.xlu1 %1789  ;;  %v11156_v41 = vmul.f32 %v15978_v31, %v15978_v31  ;;  %v3196_v45 = vadd.f32 1e-07, %v10695_v39  ;;  %v15981_v43 = vld [vmem:[#allocation120_spill] sm:$0xff]  ;;  %v15983_v29 = vld [vmem:[#allocation119_spill] sm:$0xff] }
 0x2b4   : > { %15975 = vst [vmem:[#allocation154_spill] sm:$0xff] %v11147_v49  ;;  %v2212_v61 = vsel %vm14780_vm14, %v2210_v28, %v2205_v55  ;;  %6147 = vrsqrt.f32 %v3192_v40  ;;  %v11159_v0 = vpop.eup %6129  ;;  %v2231_v49 = vrot.slane %v1790_v47, %v15981_v43  ;;  %v3197_v28 = vadd.f32 1e-07, %v10699_v30  ;;  %v15984_v31 = vld [vmem:[#allocation168_spill] sm:$0xff] }
 0x2b5   : > { %15979 = vst [vmem:[#allocation54_spill] sm:$0xff] %v11156_v41  ;;  %15980 = vst [vmem:[#allocation85_spill] sm:$0xff] %v11159_v0  ;;  %v2219_v5 = vsel %vm14779_vm15, %v2217_v19, %v2212_v61  ;;  %v1788_v4 = vpop.xlane.xlu0 %1787  ;;  %6149 = vrsqrt.f32 %v3193_v57  ;;  %v11164_v55 = vpop.eup %6131  ;;  %v11169_v39 = vmul.f32 %v15984_v31, %v15984_v31  ;;  %v3198_v40 = vadd.f32 1e-07, %v10703_v50  ;;  %v15987_v19 = vld [vmem:[#allocation99_spill] sm:$0xff]  ;;  %v15988_v61 = vld [vmem:[#allocation169_spill] sm:$0xff] }
 0x2b6   : > { %15982 = vst [vmem:[#allocation155_spill] sm:$0xff] %v11164_v55  ;;  %v2224_v32 = vrot.slane %v1788_v4, %v15983_v29  ;;  %6151 = vrsqrt.f32 %v3194_v13  ;;  %v11172_v47 = vpop.eup %6133  ;;  %1933 = vadd.xlane.f32.xlu1 %v15987_v19  ;;  %v11177_v30 = vmul.f32 %v15988_v61, %v15988_v61  ;;  %v15990_v57 = vld [vmem:[#allocation170_spill] sm:$0xff]  ;;  %v3199_v4 = vadd.f32 1e-07, %v10707_v46  ;;  %v15993_v13 = vld [vmem:[#allocation95_spill] sm:$0xff] }
 0x2b7   : > { %15985 = vst [vmem:[#allocation90_spill] sm:$0xff] %v11169_v39  ;;  %15986 = vst [vmem:[#allocation156_spill] sm:$0xff] %v11172_v47  ;;  %v11181_v41 = vmul.f32 %v15990_v57, %v15990_v57  ;;  %6153 = vrsqrt.f32 %v3195_v37  ;;  %v11184_v31 = vpop.eup %6135  ;;  %1931 = vadd.xlane.f32.xlu0 %v15993_v13  ;;  %v1794_v39 = vpop.xlane.xlu1 %1793  ;;  %v3200_v19 = vadd.f32 1e-07, %v10712_v56  ;;  %v3201_v17 = vadd.f32 1e-07, %v10716_v33 }
 0x2b8   : > { %15989 = vst [vmem:[#allocation157_spill] sm:$0xff] %v11177_v30  ;;  %15992 = vst [vmem:[#allocation159_spill] sm:$0xff] %v11184_v31  ;;  %v2226_v50 = vsel %vm2225_vm6, %v2224_v32, %v2219_v5  ;;  %6155 = vrsqrt.f32 %v3196_v45  ;;  %v15995_v30 = vld [vmem:[#allocation127_spill] sm:$0xff]  ;;  %v3435_v37 = vmax.f32 %v11138_v24, %v11130_v16  ;;  %v15997_v5 = vld [vmem:[#allocation128_spill] sm:$0xff]  ;;  %v11201_v56 = vmul.f32 %v15998_v62, %v15998_v62 }
 0x2b9   : > { %15991 = vst [vmem:[#allocation158_spill] sm:$0xff] %v11181_v41  ;;  %v11190_v61 = vpop.eup %6137  ;;  %v2245_v57 = vrot.slane %v1794_v39, %v15995_v30  ;;  %v2233_v41 = vsel %vm2232_vm5, %v2231_v49, %v2226_v50  ;;  %v1792_v46 = vpop.xlane.xlu0 %1791  ;;  %6157 = vrsqrt.f32 %v3197_v28  ;;  %v3202_v33 = vadd.f32 1e-07, %v10720_v11  ;;  %v16001_v39 = vld [vmem:[#allocation65_spill] sm:$0xff]  ;;  %v16007_v16 = vld [vmem:[#allocation134_spill] sm:$0xff] }
 0x2ba   : > { %15994 = vst [vmem:[#allocation160_spill] sm:$0xff] %v11190_v61  ;;  %v11196_v32 = vpop.eup %6139  ;;  %v2238_v13 = vrot.slane %v1792_v46, %v15997_v5  ;;  %15999 = vst [vmem:[#allocation161_spill] sm:$0xff] %v11201_v56  ;;  %6159 = vrsqrt.f32 %v3198_v40  ;;  %1937 = vadd.xlane.f32.xlu1 %v16001_v39  ;;  %v11209_v49 = vmul.f32 %v10522_v53, %v10522_v53  ;;  %v3203_v50 = vadd.f32 1e-07, %v10724_v42  ;;  %v16005_v40 = vld [vmem:[#allocation100_spill] sm:$0xff]  ;;  %v16021_v56 = vld [vmem:[#allocation38_spill] sm:$0xff] }
 0x2bb   : > { %15996 = vst [vmem:[#allocation33_spill] sm:$0xff] %v11196_v32  ;;  %v11204_v45 = vpop.eup %6141  ;;  %v11213_v28 = vmul.f32 %v10526_v26, %v10526_v26  ;;  %6161 = vrsqrt.f32 %v3199_v4  ;;  %1935 = vadd.xlane.f32.xlu0 %v16005_v40  ;;  %v1798_v46 = vpop.xlane.xlu1 %1797  ;;  %v3204_v39 = vadd.f32 1e-07, %v10728_v1  ;;  %v3205_v24 = vadd.f32 1e-07, %v10732_v38  ;;  %v16012_v40 = vld [vmem:[#allocation67_spill] sm:$0xff] }
 0x2bc   : > { %16000 = vst [vmem:[#allocation71_spill] sm:$0xff] %v11204_v45  ;;  %16002 = vst [vmem:[#allocation162_spill] sm:$0xff] %v11209_v49  ;;  %v11216_v62 = vpop.eup %6143  ;;  %v2240_v11 = vsel %vm2239_vm4, %v2238_v13, %v2233_v41  ;;  %6163 = vrsqrt.f32 %v3200_v19  ;;  %v2259_v26 = vrot.slane %v1798_v46, %v16007_v16  ;;  %v3436_v4 = vmax.f32 %v3435_v37, %v11150_v10  ;;  %v16009_v41 = vld [vmem:[#allocation135_spill] sm:$0xff] }
 0x2bd   : > { %16003 = vst [vmem:[#allocation104_spill] sm:$0xff] %v11213_v28  ;;  %16004 = vst [vmem:[#allocation163_spill] sm:$0xff] %v11216_v62  ;;  %v11222_v53 = vpop.eup %6145  ;;  %v2247_v28 = vsel %vm2246_vm3, %v2245_v57, %v2240_v11  ;;  %v1796_v42 = vpop.xlane.xlu0 %1795  ;;  %6165 = vrsqrt.f32 %v3201_v17  ;;  %v11232_v1 = vmul.f32 %v10530_v52, %v10530_v52  ;;  %v3206_v38 = vadd.f32 1e-07, %v10736_v18  ;;  %v16013_v57 = vld [vmem:[#allocation172_spill] sm:$0xff]  ;;  %v16015_v17 = vld [vmem:[#allocation173_spill] sm:$0xff] }
 0x2be   : > { %16006 = vst [vmem:[#allocation164_spill] sm:$0xff] %v11222_v53  ;;  %v11227_v49 = vpop.eup %6147  ;;  %v2252_v13 = vrot.slane %v1796_v42, %v16009_v41  ;;  %6167 = vrsqrt.f32 %v3202_v33  ;;  %1941 = vadd.xlane.f32.xlu1 %v16012_v40  ;;  %v11240_v11 = vmul.f32 %v16013_v57, %v16013_v57  ;;  %v11244_v37 = vmul.f32 %v16015_v17, %v16015_v17  ;;  %v16017_v46 = vld [vmem:[#allocation91_spill] sm:$0xff]  ;;  %v16019_v33 = vld [vmem:[#allocation74_spill] sm:$0xff] }
 0x2bf   : > { %16008 = vst [vmem:[#allocation29_spill] sm:$0xff] %v11227_v49  ;;  %16010 = vst [vmem:[#allocation165_spill] sm:$0xff] %v11232_v1  ;;  %v11235_v19 = vpop.eup %6149  ;;  %v3207_v42 = vadd.f32 1e-07, %v16017_v46  ;;  %6169 = vrsqrt.f32 %v3203_v50  ;;  %1939 = vadd.xlane.f32.xlu0 %v16019_v33  ;;  %v1802_v10 = vpop.xlane.xlu1 %1801  ;;  %v16020_v1 = vld [vmem:[#allocation23_spill] sm:$0xff]  ;;  %v16024_v33 = vld [vmem:[#allocation57_spill] sm:$0xff] }
 0x2c0   : > { %16011 = vst [vmem:[#allocation98_spill] sm:$0xff] %v11235_v19  ;;  %16014 = vst [vmem:[#allocation94_spill] sm:$0xff] %v11240_v11  ;;  %v11247_v52 = vpop.eup %6151  ;;  %v2254_v18 = vsel %vm2253_vm2, %v2252_v13, %v2247_v28  ;;  %v3208_v40 = vadd.f32 1e-07, %v16020_v1  ;;  %v3209_v8 = vadd.f32 1e-07, %v16021_v56  ;;  %6171 = vrsqrt.f32 %v3204_v39 }
 0x2c1   : > { %16016 = vst [vmem:[#allocation56_spill] sm:$0xff] %v11244_v37  ;;  %16018 = vst [vmem:[#allocation97_spill] sm:$0xff] %v11247_v52  ;;  %v11253_v57 = vpop.eup %6153  ;;  %v11256_v17 = vsel %vm14774_vm1, %v2259_v26, %v2254_v18  ;;  %v2269_v46 = vrot.slane %v1802_v10, %v15941_v12  ;;  %v1800_v50 = vpop.xlane.xlu0 %1799  ;;  %v3437_v37 = vmax.f32 %v3436_v4, %v11159_v0  ;;  %6173 = vrsqrt.f32 %v3205_v24  ;;  %v16025_v1 = vld [vmem:[#allocation81_spill] sm:$0xff]  ;;  %v16030_v10 = vld [vmem:[#allocation52_spill] sm:$0xff] }
 0x2c2   : > { %16022 = vst [vmem:[#allocation166_spill] sm:$0xff] %v11253_v57  ;;  %v11260_v28 = vpop.eup %6155  ;;  %v2265_v13 = vrot.slane %v1800_v50, %v15939_v25  ;;  %v11265_v11 = vmul.f32 %v16025_v1, %v16024_v33  ;;  %v16027_v56 = vld [vmem:[#allocation41_spill] sm:$0xff]  ;;  %6175 = vrsqrt.f32 %v3206_v38  ;;  %v11273_v18 = vmul.f32 %v16030_v10, %v16024_v33  ;;  %v16032_v24 = vld [vmem:[#allocation174_spill] sm:$0xff]  ;;  %v16034_v50 = vld [vmem:[#allocation39_spill] sm:$0xff] }
 0x2c3   : > { %16023 = vst [vmem:[#allocation92_spill] sm:$0xff] %v11260_v28  ;;  %v3210_v39 = vadd.f32 1e-07, %v16027_v56  ;;  %v11268_v52 = vpop.eup %6157  ;;  %v16029_v26 = vld [vmem:[#allocation77_spill] sm:$0xff]  ;;  %v11277_v4 = vmul.f32 %v16032_v24, %v16032_v24  ;;  %v3211_v25 = vadd.f32 1e-07, %v16034_v50  ;;  %6177 = vrsqrt.f32 %v3207_v42  ;;  %v1806_v12 = vpop.xlane.xlu1 %1805 }
 0x2c4   : > { %16026 = vst [vmem:[#allocation69_spill] sm:$0xff] %v11265_v11  ;;  %16028 = vst [vmem:[#allocation167_spill] sm:$0xff] %v11268_v52  ;;  %1945 = vadd.xlane.f32.xlu1 %v16029_v26  ;;  %v11280_v1 = vpop.eup %6159  ;;  %v2270_v56 = vsel %vm2162_vm7, %v2269_v46, %v2265_v13  ;;  %v16036_v38 = vld [vmem:[#allocation36_spill] sm:$0xff]  ;;  %v16037_v0 = vld [vmem:[#allocation177_spill] sm:$0xff]  ;;  %6179 = vrsqrt.f32 %v3208_v40  ;;  %v2279_v24 = vrot.slane %v1806_v12, %v15940_v44 }
 0x2c5   : > { %16031 = vst [vmem:[#allocation168_spill] sm:$0xff] %v11273_v18  ;;  %16033 = vst [vmem:[#allocation99_spill] sm:$0xff] %v11277_v4  ;;  %1943 = vadd.xlane.f32.xlu0 %v16036_v38  ;;  %v11286_v26 = vmul.f32 %v16037_v0, %v16037_v0  ;;  %v16039_v10 = vld [vmem:[#allocation113_spill] sm:$0xff]  ;;  %v11289_v36 = vpop.eup %6161  ;;  %v1804_v50 = vpop.xlane.xlu0 %1803  ;;  %v16041_v42 = vld [vmem:[#allocation114_spill] sm:$0xff]  ;;  %v3438_v15 = vmax.f32 %v3437_v37, %v11164_v55  ;;  %6181 = vrsqrt.f32 %v3209_v8 }
 0x2c6   : > { %16035 = vst [vmem:[#allocation169_spill] sm:$0xff] %v11280_v1  ;;  %v3212_v57 = vadd.f32 1e-07, %v16039_v10  ;;  %16040 = vst [vmem:[#allocation95_spill] sm:$0xff] %v11289_v36  ;;  %v3213_v4 = vadd.f32 1e-07, %v16041_v42  ;;  %v11294_v46 = vpop.eup %6163  ;;  %v2274_v13 = vrot.slane %v1804_v50, %v15942_v48  ;;  %6183 = vrsqrt.f32 %v3210_v39 }
 0x2c7   : > { %16038 = vst [vmem:[#allocation170_spill] sm:$0xff] %v11286_v26  ;;  %16042 = vst [vmem:[#allocation171_spill] sm:$0xff] %v11294_v46  ;;  %v16043_v38 = vld [vmem:[#allocation178_spill] sm:$0xff]  ;;  %v16045_v10 = vld [vmem:[#allocation32_spill] sm:$0xff]  ;;  %v11302_v26 = vpop.eup %6165  ;;  %6185 = vrsqrt.f32 %v3211_v25  ;;  %v1810_v55 = vpop.xlane.xlu1 %1809  ;;  %v3439_v25 = vmax.f32 %v3438_v15, %v11172_v47 }
 0x2c8   : > { %v11299_v0 = vmul.f32 %v16043_v38, %v16043_v38  ;;  %v3214_v40 = vadd.f32 1e-07, %v16045_v10  ;;  %16046 = vst [vmem:[#allocation100_spill] sm:$0xff] %v11302_v26  ;;  %v16047_v12 = vld [vmem:[#allocation37_spill] sm:$0xff]  ;;  %v16048_v44 = vld [vmem:[#allocation179_spill] sm:$0xff]  ;;  %v16050_v8 = vld [vmem:[#allocation180_spill] sm:$0xff]  ;;  %v11314_v38 = vpop.eup %6167  ;;  %v2275_v10 = vsel %vm2169_vm8, %v2274_v13, %v2270_v56  ;;  %6187 = vrsqrt.f32 %v3212_v57 }
 0x2c9   : > { %1949 = vadd.xlane.f32.xlu1 %v16047_v12  ;;  %v11307_v42 = vmul.f32 %v16048_v44, %v16048_v44  ;;  %v11311_v37 = vmul.f32 %v16050_v8, %v16050_v8  ;;  %v16052_v50 = vld [vmem:[#allocation62_spill] sm:$0xff]  ;;  %16053 = vst [vmem:[#allocation173_spill] sm:$0xff] %v11314_v38  ;;  %v16054_v39 = vld [vmem:[#allocation68_spill] sm:$0xff]  ;;  %v16056_v18 = vld [vmem:[#allocation63_spill] sm:$0xff]  ;;  %v11320_v44 = vpop.eup %6169  ;;  %v2289_v8 = vrot.slane %v1810_v55, %v15949_v21  ;;  %6189 = vrsqrt.f32 %v3213_v4 }
 0x2ca   : > { %16044 = vst [vmem:[#allocation65_spill] sm:$0xff] %v11299_v0  ;;  %v3215_v48 = vadd.f32 1e-07, %v16052_v50  ;;  %1947 = vadd.xlane.f32.xlu0 %v16054_v39  ;;  %v16055_v0 = vld [vmem:[#allocation48_spill] sm:$0xff]  ;;  %v3217_v11 = vadd.f32 1e-07, %v16056_v18  ;;  %v1808_v50 = vpop.xlane.xlu0 %1807  ;;  %6191 = vrsqrt.f32 %v3214_v40 }
 0x2cb   : > { %16049 = vst [vmem:[#allocation67_spill] sm:$0xff] %v11307_v42  ;;  %16051 = vst [vmem:[#allocation172_spill] sm:$0xff] %v11311_v37  ;;  %v3216_v12 = vadd.f32 1e-07, %v16055_v0  ;;  %v2280_v37 = vsel %vm2176_vm9, %v2279_v24, %v2275_v10  ;;  %v11325_v42 = vpop.eup %6171  ;;  %v2284_v56 = vrot.slane %v1808_v50, %v15950_v2  ;;  %v16059_v13 = vld [vmem:[#allocation181_spill] sm:$0xff]  ;;  %v16061_v55 = vld [vmem:[#allocation79_spill] sm:$0xff] }
 0x2cc   : > { %16057 = vst [vmem:[#allocation91_spill] sm:$0xff] %v11320_v44  ;;  %16058 = vst [vmem:[#allocation74_spill] sm:$0xff] %v11325_v42  ;;  %v11330_v0 = vmul.f32 %v16059_v13, %v16059_v13  ;;  %v3218_v57 = vadd.f32 1e-07, %v10794_v35  ;;  %v11333_v18 = vpop.eup %6173  ;;  %v16062_v24 = vld [vmem:[#allocation182_spill] sm:$0xff]  ;;  %v16063_v15 = vld [vmem:[#allocation183_spill] sm:$0xff]  ;;  %6193 = vrsqrt.f32 %v3215_v48  ;;  %v1814_v13 = vpop.xlane.xlu1 %1813  ;;  %v3440_v48 = vmax.f32 %v3439_v25, %v11184_v31 }
 0x2cd   : > { %16060 = vst [vmem:[#allocation23_spill] sm:$0xff] %v11333_v18  ;;  %1953 = vadd.xlane.f32.xlu1 %v16061_v55  ;;  %v11338_v10 = vmul.f32 %v16062_v24, %v16062_v24  ;;  %v11342_v4 = vmul.f32 %v16063_v15, %v16063_v15  ;;  %v3219_v39 = vadd.f32 1e-07, %v10798_v7  ;;  %v11345_v50 = vpop.eup %6175  ;;  %v2285_v35 = vsel %vm2183_vm10, %v2284_v56, %v2280_v37  ;;  %v16066_v40 = vld [vmem:[#allocation43_spill] sm:$0xff]  ;;  %v16067_v21 = vld [vmem:[#allocation66_spill] sm:$0xff]  ;;  %v16073_v25 = vld [vmem:[#allocation185_spill] sm:$0xff] }
 0x2ce   : > { %16065 = vst [vmem:[#allocation57_spill] sm:$0xff] %v11345_v50  ;;  %1951 = vadd.xlane.f32.xlu0 %v16066_v40  ;;  %v3220_v55 = vadd.f32 1e-07, %v16067_v21  ;;  %v3221_v2 = vadd.f32 1e-07, %v10806_v23  ;;  %6195 = vrsqrt.f32 %v3216_v12  ;;  %v11351_v24 = vpop.eup %6177  ;;  %v2299_v15 = vrot.slane %v1814_v13, %v15959_v3  ;;  %v1812_v7 = vpop.xlane.xlu0 %1811  ;;  %v16071_v12 = vld [vmem:[#allocation175_spill] sm:$0xff] }
 0x2cf   : > { %16064 = vst [vmem:[#allocation38_spill] sm:$0xff] %v11342_v4  ;;  %16068 = vst [vmem:[#allocation81_spill] sm:$0xff] %v11351_v24  ;;  %v2290_v47 = vsel %vm2190_vm11, %v2289_v8, %v2285_v35  ;;  %6197 = vrsqrt.f32 %v3217_v11  ;;  %v11356_v4 = vpop.eup %6179  ;;  %v2294_v37 = vrot.slane %v1812_v7, %v15960_v6  ;;  %v3222_v56 = vadd.f32 1e-07, %v10818_v34  ;;  %v16072_v40 = vld [vmem:[#allocation184_spill] sm:$0xff]  ;;  %v16074_v35 = vld [vmem:[#allocation55_spill] sm:$0xff] }
 0x2d0   : > { %16069 = vst [vmem:[#allocation41_spill] sm:$0xff] %v11356_v4  ;;  %v3456_v23 = vmax.f32 %v11268_v52, %v11260_v28  ;;  %6199 = vrsqrt.f32 %v3218_v57  ;;  %v11362_v21 = vpop.eup %6181  ;;  %v11367_v8 = vmul.f32 %v16072_v40, %v16072_v40  ;;  %v11371_v11 = vmul.f32 %v16073_v25, %v16073_v25  ;;  %v16076_v57 = vld [vmem:[#allocation176_spill] sm:$0xff]  ;;  %v1818_v3 = vpop.xlane.xlu1 %1817  ;;  %v16077_v6 = vld [vmem:[#allocation101_spill] sm:$0xff]  ;;  %v16078_v52 = vld [vmem:[#allocation115_spill] sm:$0xff] }
 0x2d1   : > { %16070 = vst [vmem:[#allocation77_spill] sm:$0xff] %v11362_v21  ;;  %1957 = vadd.xlane.f32.xlu1 %v16071_v12  ;;  %v3223_v13 = vadd.f32 1e-07, %v16074_v35  ;;  %6201 = vrsqrt.f32 %v3219_v39  ;;  %v11374_v34 = vpop.eup %6183  ;;  %v2295_v7 = vsel %vm2197_vm12, %v2294_v37, %v2290_v47  ;;  %v3224_v12 = vadd.f32 1e-07, %v16077_v6  ;;  %v16081_v37 = vld [vmem:[#allocation116_spill] sm:$0xff] }
 0x2d2   : > { %16075 = vst [vmem:[#allocation52_spill] sm:$0xff] %v11374_v34  ;;  %1955 = vadd.xlane.f32.xlu0 %v16076_v57  ;;  %v3225_v28 = vadd.f32 1e-07, %v16078_v52  ;;  %6203 = vrsqrt.f32 %v3220_v55  ;;  %v11380_v40 = vpop.eup %6185  ;;  %v2309_v25 = vrot.slane %v1818_v3, %v15968_v63  ;;  %v2300_v31 = vsel %vm2204_vm13, %v2299_v15, %v2295_v7  ;;  %v1816_v35 = vpop.xlane.xlu0 %1815  ;;  %v16083_v55 = vld [vmem:[#allocation35_spill] sm:$0xff]  ;;  %v16084_v3 = vld [vmem:[#allocation186_spill] sm:$0xff] }
 0x2d3   : > { %16079 = vst [vmem:[#allocation174_spill] sm:$0xff] %v11380_v40  ;;  %v3441_v39 = vmax.f32 %v3440_v48, %v11190_v61  ;;  %6205 = vrsqrt.f32 %v3221_v2  ;;  %v11385_v34 = vpop.eup %6187  ;;  %v2304_v47 = vrot.slane %v1816_v35, %v15970_v60  ;;  %v3226_v57 = vadd.f32 1e-07, %v16081_v37  ;;  %v16085_v7 = vld [vmem:[#allocation187_spill] sm:$0xff]  ;;  %v16087_v48 = vld [vmem:[#allocation117_spill] sm:$0xff]  ;;  %v16090_v60 = vld [vmem:[#allocation118_spill] sm:$0xff] }
 0x2d4   : > { %16080 = vst [vmem:[#allocation39_spill] sm:$0xff] %v11385_v34  ;;  %v3457_v6 = vmax.f32 %v3456_v23, %v11280_v1  ;;  %6207 = vrsqrt.f32 %v3222_v56  ;;  %v11390_v52 = vpop.eup %6189  ;;  %v11395_v15 = vmul.f32 %v16084_v3, %v16084_v3  ;;  %v11399_v2 = vmul.f32 %v16085_v7, %v16085_v7  ;;  %v16089_v56 = vld [vmem:[#allocation78_spill] sm:$0xff]  ;;  %v1822_v37 = vpop.xlane.xlu1 %1821  ;;  %v16091_v1 = vld [vmem:[#allocation72_spill] sm:$0xff] }
 0x2d5   : > { %16082 = vst [vmem:[#allocation36_spill] sm:$0xff] %v11390_v52  ;;  %1961 = vadd.xlane.f32.xlu1 %v16083_v55  ;;  %v3227_v63 = vadd.f32 1e-07, %v16087_v48  ;;  %6209 = vrsqrt.f32 %v3223_v13  ;;  %v11402_v35 = vpop.eup %6191  ;;  %v2305_v23 = vsel %vm14780_vm14, %v2304_v47, %v2300_v31  ;;  %v3228_v55 = vadd.f32 1e-07, %v16090_v60  ;;  %v16094_v47 = vld [vmem:[#allocation44_spill] sm:$0xff] }
 0x2d6   : > { %16086 = vst [vmem:[#allocation177_spill] sm:$0xff] %v11399_v2  ;;  %16088 = vst [vmem:[#allocation113_spill] sm:$0xff] %v11402_v35  ;;  %1959 = vadd.xlane.f32.xlu0 %v16089_v56  ;;  %v3229_v61 = vadd.f32 1e-07, %v16091_v1  ;;  %6211 = vrsqrt.f32 %v3224_v12  ;;  %v11408_v3 = vpop.eup %6193  ;;  %v2319_v7 = vrot.slane %v1822_v37, %v15981_v43  ;;  %v2310_v2 = vsel %vm14779_vm15, %v2309_v25, %v2305_v23  ;;  %v1820_v48 = vpop.xlane.xlu0 %1819  ;;  %v16096_v12 = vld [vmem:[#allocation102_spill] sm:$0xff]  ;;  %v16098_v23 = vld [vmem:[#allocation188_spill] sm:$0xff] }
 0x2d7   : > { %16092 = vst [vmem:[#allocation114_spill] sm:$0xff] %v11408_v3  ;;  %v3442_v13 = vmax.f32 %v3441_v39, %v11196_v32  ;;  %6213 = vrsqrt.f32 %v3225_v28  ;;  %v2314_v31 = vrot.slane %v1820_v48, %v15983_v29  ;;  %v3230_v56 = vadd.f32 1e-07, %v16094_v47  ;;  %v16097_v37 = vld [vmem:[#allocation42_spill] sm:$0xff]  ;;  %v16100_v39 = vld [vmem:[#allocation20_spill] sm:$0xff] }
 0x2d8   : > { %v11413_v40 = vpop.eup %6195  ;;  %v3458_v60 = vmax.f32 %v3457_v6, %v11289_v36  ;;  %6215 = vrsqrt.f32 %v3226_v57  ;;  %v11423_v25 = vmul.f32 %v16097_v37, %v16024_v33  ;;  %v11427_v28 = vmul.f32 %v16098_v23, %v16098_v23  ;;  %v16102_v57 = vld [vmem:[#allocation46_spill] sm:$0xff]  ;;  %v1826_v47 = vpop.xlane.xlu1 %1825 }
 0x2d9   : > { %16093 = vst [vmem:[#allocation178_spill] sm:$0xff] %v11413_v40  ;;  %v11418_v1 = vpop.eup %6197  ;;  %1965 = vadd.xlane.f32.xlu1 %v16096_v12  ;;  %v3231_v43 = vadd.f32 1e-07, %v16100_v39  ;;  %6217 = vrsqrt.f32 %v3227_v63  ;;  %v2315_v6 = vsel %vm2225_vm6, %v2314_v31, %v2310_v2  ;;  %v3232_v12 = vadd.f32 1e-07, %v10860_v14  ;;  %v16105_v31 = vld [vmem:[#allocation121_spill] sm:$0xff] }
 0x2da   : > { %16095 = vst [vmem:[#allocation32_spill] sm:$0xff] %v11418_v1  ;;  %16099 = vst [vmem:[#allocation37_spill] sm:$0xff] %v11427_v28  ;;  %v11430_v48 = vpop.eup %6199  ;;  %1963 = vadd.xlane.f32.xlu0 %v16102_v57  ;;  %v3233_v29 = vadd.f32 1e-07, %v10864_v51  ;;  %6219 = vrsqrt.f32 %v3228_v55  ;;  %v2329_v23 = vrot.slane %v1826_v47, %v15995_v30  ;;  %v2320_v36 = vsel %vm2232_vm5, %v2319_v7, %v2315_v6  ;;  %v1824_v39 = vpop.xlane.xlu0 %1823  ;;  %v16107_v55 = vld [vmem:[#allocation11_spill] sm:$0xff] }
 0x2db   : > { %16101 = vst [vmem:[#allocation179_spill] sm:$0xff] %v11430_v48  ;;  %v11436_v37 = vpop.eup %6201  ;;  %v3443_v63 = vmax.f32 %v3442_v13, %v11204_v45  ;;  %6221 = vrsqrt.f32 %v3229_v61  ;;  %v2324_v2 = vrot.slane %v1824_v39, %v15997_v5  ;;  %v3234_v57 = vadd.f32 1e-07, %v16105_v31  ;;  %v16108_v47 = vld [vmem:[#allocation75_spill] sm:$0xff] }
 0x2dc   : > { %16103 = vst [vmem:[#allocation180_spill] sm:$0xff] %v11436_v37  ;;  %v11441_v32 = vpop.eup %6203  ;;  %v3459_v14 = vmax.f32 %v3458_v60, %v11294_v46  ;;  %6223 = vrsqrt.f32 %v3230_v56  ;;  %v11451_v7 = vmul.f32 %v16108_v47, %v16024_v33  ;;  %v3235_v13 = vadd.f32 1e-07, %v10872_v20  ;;  %v16110_v60 = vld [vmem:[#allocation15_spill] sm:$0xff]  ;;  %v1830_v56 = vpop.xlane.xlu1 %1829  ;;  %v16141_v46 = vld [vmem:[#allocation125_spill] sm:$0xff] }
 0x2dd   : > { %16104 = vst [vmem:[#allocation62_spill] sm:$0xff] %v11441_v32  ;;  %v11446_v51 = vpop.eup %6205  ;;  %1969 = vadd.xlane.f32.xlu1 %v16107_v55  ;;  %v3477_v61 = vmax.f32 %v11390_v52, %v11385_v34  ;;  %6225 = vrsqrt.f32 %v3231_v43  ;;  %v2325_v39 = vsel %vm2239_vm4, %v2324_v2, %v2320_v36  ;;  %v3236_v31 = vadd.f32 1e-07, %v10884_v9  ;;  %v16113_v2 = vld [vmem:[#allocation64_spill] sm:$0xff]  ;;  %v16123_v34 = vld [vmem:[#allocation83_spill] sm:$0xff] }
 0x2de   : > { %16106 = vst [vmem:[#allocation68_spill] sm:$0xff] %v11446_v51  ;;  %v11456_v6 = vpop.eup %6207  ;;  %1967 = vadd.xlane.f32.xlu0 %v16110_v60  ;;  %v3237_v55 = vadd.f32 1e-07, %v10888_v22  ;;  %6227 = vrsqrt.f32 %v3232_v12  ;;  %v2339_v20 = vrot.slane %v1830_v56, %v16007_v16  ;;  %v2330_v30 = vsel %vm2246_vm3, %v2329_v23, %v2325_v39  ;;  %v1828_v5 = vpop.xlane.xlu0 %1827  ;;  %v16115_v12 = vld [vmem:[#allocation76_spill] sm:$0xff]  ;;  %v16116_v56 = vld [vmem:[#allocation45_spill] sm:$0xff]  ;;  %v16117_v39 = vld [vmem:[#allocation19_spill] sm:$0xff] }
 0x2df   : > { %16109 = vst [vmem:[#allocation48_spill] sm:$0xff] %v11456_v6  ;;  %v11462_v47 = vpop.eup %6209  ;;  %v3444_v43 = vmax.f32 %v3443_v63, %v11216_v62  ;;  %6229 = vrsqrt.f32 %v3233_v29  ;;  %v2334_v36 = vrot.slane %v1828_v5, %v16009_v41  ;;  %v3238_v60 = vadd.f32 1e-07, %v16113_v2  ;;  %v16119_v2 = vld [vmem:[#allocation86_spill] sm:$0xff] }
 0x2e0   : > { %16111 = vst [vmem:[#allocation63_spill] sm:$0xff] %v11462_v47  ;;  %v11467_v52 = vpop.eup %6211  ;;  %v3460_v9 = vmax.f32 %v3459_v14, %v11302_v26  ;;  %6231 = vrsqrt.f32 %v3234_v57  ;;  %v11477_v23 = vmul.f32 %v16116_v56, %v16024_v33  ;;  %v3239_v63 = vadd.f32 1e-07, %v16117_v39  ;;  %v16120_v57 = vld [vmem:[#allocation93_spill] sm:$0xff]  ;;  %v16140_v26 = vld [vmem:[#allocation106_spill] sm:$0xff] }
 0x2e1   : > { %16112 = vst [vmem:[#allocation181_spill] sm:$0xff] %v11467_v52  ;;  %v11472_v22 = vpop.eup %6213  ;;  %1973 = vadd.xlane.f32.xlu1 %v16115_v12  ;;  %v3478_v29 = vmax.f32 %v3477_v61, %v11402_v35  ;;  %6233 = vrsqrt.f32 %v3235_v13  ;;  %v2335_v5 = vsel %vm2253_vm2, %v2334_v36, %v2330_v30  ;;  %v11487_v14 = vmul.f32 %v16120_v57, %v16024_v33  ;;  %v16121_v12 = vld [vmem:[#allocation16_spill] sm:$0xff]  ;;  %v16126_v36 = vld [vmem:[#allocation89_spill] sm:$0xff] }
 0x2e2   : > { %16114 = vst [vmem:[#allocation79_spill] sm:$0xff] %v11472_v22  ;;  %v11481_v16 = vpop.eup %6215  ;;  %1971 = vadd.xlane.f32.xlu0 %v16119_v2  ;;  %v3240_v41 = vadd.f32 1e-07, %v16121_v12  ;;  %6235 = vrsqrt.f32 %v3236_v31  ;;  %v2340_v39 = vsel %vm14774_vm1, %v2339_v20, %v2335_v5  ;;  %v3241_v61 = vadd.f32 1e-07, %v16123_v34  ;;  %v16128_v12 = vld [vmem:[#allocation122_spill] sm:$0xff] }
 0x2e3   : > { %16118 = vst [vmem:[#allocation182_spill] sm:$0xff] %v11481_v16  ;;  %v11490_v56 = vpop.eup %6217  ;;  %v3445_v13 = vmax.f32 %v3444_v43, %v11222_v53  ;;  %6237 = vrsqrt.f32 %v3237_v55  ;;  %v11499_v30 = vsel %vm14776_vm0, %v2340_v39, %v11256_v17  ;;  %v3242_v2 = vadd.f32 1e-07, %v16126_v36  ;;  %v16129_v34 = vld [vmem:[#allocation59_spill] sm:$0xff]  ;;  %v16130_v55 = vld [vmem:[#allocation112_spill] sm:$0xff]  ;;  %v16132_v39 = vld [vmem:[#allocation61_spill] sm:$0xff] }
 0x2e4   : > { %16122 = vst [vmem:[#allocation183_spill] sm:$0xff] %v11490_v56  ;;  %v11495_v35 = vpop.eup %6219  ;;  %16125 = vst [vmem:[#allocation66_spill] sm:$0xff] %v11499_v30  ;;  %v3461_v57 = vmax.f32 %v3460_v9, %v11314_v38  ;;  %6239 = vrsqrt.f32 %v3238_v60  ;;  %v11508_v20 = vmul.f32 %v16129_v34, %v16024_v33  ;;  %v3243_v43 = vadd.f32 1e-07, %v16130_v55  ;;  %v16133_v9 = vld [vmem:[#allocation58_spill] sm:$0xff]  ;;  %v16134_v36 = vld [vmem:[#allocation60_spill] sm:$0xff] }
 0x2e5   : > { %16124 = vst [vmem:[#allocation43_spill] sm:$0xff] %v11495_v35  ;;  %v11503_v31 = vpop.eup %6221  ;;  %1977 = vadd.xlane.f32.xlu1 %v16128_v12  ;;  %v3479_v5 = vmax.f32 %v3478_v29, %v11408_v3  ;;  %6241 = vrsqrt.f32 %v3239_v63  ;;  %v11517_v60 = vmul.f32 %v16133_v9, %v16024_v33  ;;  %v11521_v12 = vmul.f32 %v16134_v36, %v16024_v33  ;;  %v16135_v30 = vld [vmem:[#allocation123_spill] sm:$0xff]  ;;  %v16137_v29 = vld [vmem:[#allocation25_spill] sm:$0xff]  ;;  %v16138_v55 = vld [vmem:[#allocation124_spill] sm:$0xff] }
 0x2e6   : > { %16127 = vst [vmem:[#allocation175_spill] sm:$0xff] %v11503_v31  ;;  %v11512_v17 = vpop.eup %6223  ;;  %1975 = vadd.xlane.f32.xlu0 %v16132_v39  ;;  %v3244_v34 = vadd.f32 1e-07, %v16135_v30  ;;  %6243 = vrsqrt.f32 %v3240_v41  ;;  %v11528_v63 = vmul.f32 %v16137_v29, %v16024_v33  ;;  %v3245_v3 = vadd.f32 1e-07, %v16138_v55  ;;  %v16143_v29 = vld [vmem:[#allocation22_spill] sm:$0xff] }
 0x2e7   : > { %16131 = vst [vmem:[#allocation184_spill] sm:$0xff] %v11512_v17  ;;  %v11524_v38 = vpop.eup %6225  ;;  %v3446_v39 = vmax.f32 %v3445_v13, %v11227_v49  ;;  %6245 = vrsqrt.f32 %v3241_v61  ;;  %v11536_v36 = vmul.f32 %v16140_v26, %v16024_v33  ;;  %v3246_v30 = vadd.f32 1e-07, %v16141_v46  ;;  %v16144_v56 = vld [vmem:[#allocation126_spill] sm:$0xff]  ;;  %v16146_v26 = vld [vmem:[#allocation129_spill] sm:$0xff] }
 0x2e8   : > { %16136 = vst [vmem:[#allocation185_spill] sm:$0xff] %v11524_v38  ;;  %v11532_v9 = vpop.eup %6227  ;;  %v3462_v41 = vmax.f32 %v3461_v57, %v11320_v44  ;;  %6247 = vrsqrt.f32 %v3242_v2  ;;  %v3247_v55 = vadd.f32 1e-07, %v16144_v56  ;;  %v3480_v13 = vmax.f32 %v3479_v5, %v11413_v40  ;;  %v16147_v46 = vld [vmem:[#allocation49_spill] sm:$0xff]  ;;  %v16148_v2 = vld [vmem:[#allocation108_spill] sm:$0xff]  ;;  %v16152_v40 = vld [vmem:[#allocation18_spill] sm:$0xff] }
 0x2e9   : > { %16139 = vst [vmem:[#allocation55_spill] sm:$0xff] %v11532_v9  ;;  %v11540_v16 = vpop.eup %6229  ;;  %1981 = vadd.xlane.f32.xlu1 %v16143_v29  ;;  %v3498_v61 = vmax.f32 %v11503_v31, %v11495_v35  ;;  %6249 = vrsqrt.f32 %v3243_v43  ;;  %v11552_v57 = vmul.f32 %v16147_v46, %v16024_v33  ;;  %v11556_v44 = vmul.f32 %v16148_v2, %v16024_v33  ;;  %v16150_v29 = vld [vmem:[#allocation47_spill] sm:$0xff]  ;;  %v16156_v2 = vld [vmem:[#allocation130_spill] sm:$0xff] }
 0x2ea   : > { %16142 = vst [vmem:[#allocation176_spill] sm:$0xff] %v11540_v16  ;;  %v11547_v49 = vpop.eup %6231  ;;  %1979 = vadd.xlane.f32.xlu0 %v16146_v26  ;;  %v3248_v56 = vadd.f32 1e-07, %v16150_v29  ;;  %6251 = vrsqrt.f32 %v3244_v34  ;;  %v3249_v31 = vadd.f32 1e-07, %v16152_v40  ;;  %v3447_v43 = vmax.f32 %v3446_v39, %v11235_v19  ;;  %v16154_v46 = vld [vmem:[#allocation107_spill] sm:$0xff] }
 0x2eb   : > { %16145 = vst [vmem:[#allocation101_spill] sm:$0xff] %v11547_v49  ;;  %16149 = vst [vmem:[#allocation115_spill] sm:$0xff] %v11556_v44  ;;  %v11559_v5 = vpop.eup %6233  ;;  %6253 = vrsqrt.f32 %v3245_v3  ;;  %v3434_v26 = vmax.f32 %v11116_v59, %v11125_v58  ;;  %v11569_v53 = vmul.f32 %v16154_v46, %v16024_v33  ;;  %v3250_v62 = vadd.f32 1e-07, %v16156_v2  ;;  %v16158_v40 = vld [vmem:[#allocation136_spill] sm:$0xff]  ;;  %v16159_v39 = vld [vmem:[#allocation21_spill] sm:$0xff] }
 0x2ec   : > { %16151 = vst [vmem:[#allocation116_spill] sm:$0xff] %v11559_v5  ;;  %v11565_v35 = vpop.eup %6235  ;;  %v3463_v34 = vmax.f32 %v3462_v41, %v11325_v42  ;;  %6255 = vrsqrt.f32 %v3246_v30  ;;  %v3251_v3 = vadd.f32 1e-07, %v16159_v39  ;;  %v3481_v19 = vmax.f32 %v3480_v13, %v11418_v1  ;;  %v16161_v46 = vld [vmem:[#allocation137_spill] sm:$0xff]  ;;  %v16162_v2 = vld [vmem:[#allocation110_spill] sm:$0xff]  ;;  %v16168_v13 = vld [vmem:[#allocation31_spill] sm:$0xff] }
 0x2ed   : > { %16153 = vst [vmem:[#allocation35_spill] sm:$0xff] %v11565_v35  ;;  %16155 = vst [vmem:[#allocation186_spill] sm:$0xff] %v11569_v53  ;;  %v11573_v29 = vpop.eup %6237  ;;  %1985 = vadd.xlane.f32.xlu1 %v16158_v40  ;;  %v3499_v45 = vmax.f32 %v3498_v61, %v11512_v17  ;;  %6257 = vrsqrt.f32 %v3247_v55  ;;  %v11584_v53 = vmul.f32 %v16162_v2, %v16024_v33  ;;  %v16164_v30 = vld [vmem:[#allocation109_spill] sm:$0xff]  ;;  %v16166_v40 = vld [vmem:[#allocation88_spill] sm:$0xff]  ;;  %v3253_v61 = vadd.f32 1e-07, %v16168_v13 }
 0x2ee   : > { %16157 = vst [vmem:[#allocation187_spill] sm:$0xff] %v11573_v29  ;;  %v11579_v28 = vpop.eup %6239  ;;  %1983 = vadd.xlane.f32.xlu0 %v16161_v46  ;;  %v11588_v41 = vmul.f32 %v16164_v30, %v16024_v33  ;;  %v3252_v42 = vadd.f32 1e-07, %v16166_v40  ;;  %6259 = vrsqrt.f32 %v3248_v56  ;;  %v16169_v55 = vld [vmem:[#allocation51_spill] sm:$0xff]  ;;  %v3448_v1 = vmax.f32 %v3447_v43, %v3434_v26  ;;  %v16177_v26 = vld [vmem:[#allocation133_spill] sm:$0xff] }
 0x2ef   : > { %16160 = vst [vmem:[#allocation117_spill] sm:$0xff] %v11579_v28  ;;  %16163 = vst [vmem:[#allocation78_spill] sm:$0xff] %v11584_v53  ;;  %v11591_v39 = vpop.eup %6241  ;;  %v3254_v17 = vadd.f32 1e-07, %v16169_v55  ;;  %6261 = vrsqrt.f32 %v3249_v31  ;;  %v16171_v28 = vld [vmem:[#allocation53_spill] sm:$0xff]  ;;  %v16172_v53 = vld [vmem:[#allocation111_spill] sm:$0xff]  ;;  %v3464_v33 = vmax.f32 %v3463_v34, %v11333_v18  ;;  %v3482_v13 = vmax.f32 %v3481_v19, %v11430_v48 }
 0x2f0   : > { %16165 = vst [vmem:[#allocation118_spill] sm:$0xff] %v11588_v41  ;;  %16167 = vst [vmem:[#allocation72_spill] sm:$0xff] %v11591_v39  ;;  %v11595_v46 = vpop.eup %6243  ;;  %v3255_v2 = vadd.f32 1e-07, %v16171_v28  ;;  %v3256_v22 = vadd.f32 1e-07, %v16172_v53  ;;  %6263 = vrsqrt.f32 %v3250_v62  ;;  %v3500_v31 = vmax.f32 %v3499_v45, %v11524_v38 }
 0x2f1   : > { %16170 = vst [vmem:[#allocation44_spill] sm:$0xff] %v11595_v46  ;;  %v11600_v30 = vpop.eup %6245  ;;  %1989 = vadd.xlane.f32.xlu1 %v11109_v54  ;;  %v16174_v56 = vld [vmem:[#allocation131_spill] sm:$0xff]  ;;  %6265 = vrsqrt.f32 %v3251_v3  ;;  %v16176_v28 = vld [vmem:[#allocation132_spill] sm:$0xff]  ;;  %v3259_v34 = vadd.f32 1e-07, %v16177_v26  ;;  %v16178_v62 = vld [vmem:[#allocation73_spill] sm:$0xff] }
 0x2f2   : > { %16173 = vst [vmem:[#allocation102_spill] sm:$0xff] %v11600_v30  ;;  %v3257_v40 = vadd.f32 1e-07, %v16174_v56  ;;  %v11606_v43 = vpop.eup %6247  ;;  %1987 = vadd.xlane.f32.xlu0 %v11113_v27  ;;  %v3258_v53 = vadd.f32 1e-07, %v16176_v28  ;;  %6267 = vrsqrt.f32 %v3252_v42  ;;  %v16180_v54 = vld [vmem:[#allocation80_spill] sm:$0xff]  ;;  %v3465_v28 = vmax.f32 %v3464_v33, %v11345_v50 }
 0x2f3   : > { %16175 = vst [vmem:[#allocation42_spill] sm:$0xff] %v11606_v43  ;;  %v3260_v55 = vadd.f32 1e-07, %v16178_v62  ;;  %v11612_v18 = vpop.eup %6249  ;;  %v3261_v56 = vadd.f32 1e-07, %v16180_v54  ;;  %v16181_v30 = vld [vmem:[#allocation27_spill] sm:$0xff]  ;;  %6269 = vrsqrt.f32 %v3253_v61  ;;  %v3483_v54 = vmax.f32 %v3482_v13, %v11436_v37 }
 0x2f4   : > { %16179 = vst [vmem:[#allocation188_spill] sm:$0xff] %v11612_v18  ;;  %v3262_v19 = vadd.f32 1e-07, %v16181_v30  ;;  %v3449_v45 = vrot.slane %v3448_v1, 4  ;;  %v11616_v3 = vpop.eup %6251  ;;  %v16183_v38 = vld [vmem:[#allocation26_spill] sm:$0xff]  ;;  %6271 = vrsqrt.f32 %v3254_v17  ;;  %v16186_v42 = vld [vmem:[#allocation69_spill] sm:$0xff]  ;;  %v3501_v61 = vmax.f32 %v3500_v31, %v11532_v9 }
 0x2f5   : > { %16182 = vst [vmem:[#allocation20_spill] sm:$0xff] %v11616_v3  ;;  %v3263_v48 = vadd.f32 1e-07, %v16183_v38  ;;  %v16184_v27 = vld [vmem:[#allocation138_spill] sm:$0xff]  ;;  %v11621_v26 = vpop.eup %6253  ;;  %1993 = vadd.xlane.f32.xlu1 %v16186_v42  ;;  %v16187_v62 = vld [vmem:[#allocation139_spill] sm:$0xff]  ;;  %6273 = vrsqrt.f32 %v3255_v2  ;;  %v16189_v46 = vld [vmem:[#allocation168_spill] sm:$0xff] }
 0x2f6   : > { %v3264_v43 = vadd.f32 1e-07, %v16184_v27  ;;  %16185 = vst [vmem:[#allocation46_spill] sm:$0xff] %v11621_v26  ;;  %v3265_v18 = vadd.f32 1e-07, %v16187_v62  ;;  %v11627_v30 = vpop.eup %6255  ;;  %1991 = vadd.xlane.f32.xlu0 %v16189_v46  ;;  %v16190_v38 = vld [vmem:[#allocation140_spill] sm:$0xff]  ;;  %6275 = vrsqrt.f32 %v3256_v22  ;;  %v3450_v2 = vmax.f32 %v3448_v1, %v3449_v45 }
 0x2f7   : > { %16188 = vst [vmem:[#allocation121_spill] sm:$0xff] %v11627_v30  ;;  %v3266_v27 = vadd.f32 1e-07, %v16190_v38  ;;  %v16191_v41 = vld [vmem:[#allocation141_spill] sm:$0xff]  ;;  %v16192_v17 = vld [vmem:[#allocation142_spill] sm:$0xff]  ;;  %v11635_v42 = vpop.eup %6257  ;;  %v16194_v62 = vld [vmem:[#allocation143_spill] sm:$0xff]  ;;  %6277 = vrsqrt.f32 %v3257_v40  ;;  %v3466_v22 = vmax.f32 %v3465_v28, %v11351_v24  ;;  %v3484_v1 = vmax.f32 %v3483_v54, %v11441_v32 }
 0x2f8   : > { %v3267_v33 = vadd.f32 1e-07, %v16191_v41  ;;  %v11633_v50 = vadd.f32 1e-07, %v16192_v17  ;;  %16193 = vst [vmem:[#allocation11_spill] sm:$0xff] %v11635_v42  ;;  %v16195_v13 = vld [vmem:[#allocation50_spill] sm:$0xff]  ;;  %v11643_v9 = vpop.eup %6259  ;;  %6279 = vrsqrt.f32 %v3258_v53  ;;  %v3502_v40 = vmax.f32 %v3501_v61, %v11540_v16 }
 0x2f9   : > { %v11638_v39 = vadd.f32 1e-07, %v16194_v62  ;;  %v11641_v31 = vadd.f32 1e-07, %v16195_v13  ;;  %16196 = vst [vmem:[#allocation75_spill] sm:$0xff] %v11643_v9  ;;  %v16197_v46 = vld [vmem:[#allocation17_spill] sm:$0xff]  ;;  %v11652_v17 = vpop.eup %6261  ;;  %1997 = vadd.xlane.f32.xlu1 %v11423_v25  ;;  %6281 = vrsqrt.f32 %v3260_v55  ;;  %v3519_v25 = vmax.f32 %v11621_v26, %v11616_v3 }
 0x2fa   : > { %v11646_v38 = vadd.f32 1e-07, %v16197_v46  ;;  %v16198_v41 = vld [vmem:[#allocation144_spill] sm:$0xff]  ;;  %16199 = vst [vmem:[#allocation15_spill] sm:$0xff] %v11652_v17  ;;  %v11660_v45 = vpop.eup %6263  ;;  %1995 = vadd.xlane.f32.xlu0 %v11451_v7  ;;  %v16202_v46 = vld [vmem:[#allocation145_spill] sm:$0xff]  ;;  %v16203_v53 = vld [vmem:[#allocation146_spill] sm:$0xff]  ;;  %6283 = vrsqrt.f32 %v3261_v56  ;;  %v3467_v44 = vmax.f32 %v3466_v22, %v11356_v4 }
 0x2fb   : > { %v11649_v37 = vadd.f32 1e-07, %v16198_v41  ;;  %v16200_v62 = vld [vmem:[#allocation28_spill] sm:$0xff]  ;;  %16201 = vst [vmem:[#allocation64_spill] sm:$0xff] %v11660_v45  ;;  %v11664_v41 = vadd.f32 1e-07, %v16202_v46  ;;  %6285 = vrsqrt.f32 %v3259_v34  ;;  %v3485_v34 = vmax.f32 %v3484_v1, %v11446_v51 }
 0x2fc   : > { %v11656_v13 = vadd.f32 1e-07, %v16200_v62  ;;  %v11667_v28 = vadd.f32 1e-07, %v16203_v53  ;;  %v11671_v62 = vpop.eup %6265  ;;  %v16205_v54 = vld [vmem:[#allocation40_spill] sm:$0xff]  ;;  %v16206_v61 = vld [vmem:[#allocation147_spill] sm:$0xff]  ;;  %6287 = vrsqrt.f32 %v3262_v19 }
 0x2fd   : > { %16204 = vst [vmem:[#allocation76_spill] sm:$0xff] %v11671_v62  ;;  %v3276_v32 = vadd.f32 1e-07, %v16205_v54  ;;  %v3277_v55 = vadd.f32 1e-07, %v16206_v61  ;;  %v3451_v16 = vrot.slane %v3450_v2, 2  ;;  %v11675_v24 = vpop.eup %6267  ;;  %2001 = vadd.xlane.f32.xlu1 %v11477_v23  ;;  %v3503_v61 = vmax.f32 %v3502_v40, %v11547_v49 }
 0x2fe   : > { %16207 = vst [vmem:[#allocation45_spill] sm:$0xff] %v11675_v24  ;;  %v16208_v7 = vld [vmem:[#allocation148_spill] sm:$0xff]  ;;  %v16209_v45 = vld [vmem:[#allocation149_spill] sm:$0xff]  ;;  %v11684_v56 = vpop.eup %6269  ;;  %v16211_v54 = vld [vmem:[#allocation151_spill] sm:$0xff]  ;;  %6289 = vrsqrt.f32 %v3263_v48  ;;  %1999 = vadd.xlane.f32.xlu0 %v11487_v14  ;;  %v3520_v23 = vmax.f32 %v3519_v25, %v11627_v30  ;;  %vm16777_vm1 = vcmask 1042434  }
 0x2ff   : > { %v11678_v46 = vadd.f32 1e-07, %v16208_v7  ;;  %v11681_v53 = vadd.f32 1e-07, %v16209_v45  ;;  %16210 = vst [vmem:[#allocation19_spill] sm:$0xff] %v11684_v56  ;;  %v11692_v7 = vpop.eup %6271  ;;  %v16213_v45 = vld [vmem:[#allocation153_spill] sm:$0xff]  ;;  %6291 = vrsqrt.f32 %v3264_v43  ;;  %v3452_v49 = vmax.f32 %v3450_v2, %v3451_v16 }
 0x300   : > { %v11688_v26 = vadd.f32 1e-07, %v16211_v54  ;;  %16212 = vst [vmem:[#allocation86_spill] sm:$0xff] %v11692_v7  ;;  %v11696_v3 = vadd.f32 1e-07, %v16213_v45  ;;  %v16214_v19 = vld [vmem:[#allocation154_spill] sm:$0xff]  ;;  %v11702_v54 = vpop.eup %6273  ;;  %6293 = vrsqrt.f32 %v3265_v18  ;;  %v3486_v16 = vmax.f32 %v3485_v34, %v11456_v6 }
 0x301   : > { %v11699_v22 = vadd.f32 1e-07, %v16214_v19  ;;  %16215 = vst [vmem:[#allocation93_spill] sm:$0xff] %v11702_v54  ;;  %v16216_v4 = vld [vmem:[#allocation54_spill] sm:$0xff]  ;;  %v11710_v14 = vpop.eup %6275  ;;  %v16219_v45 = vld [vmem:[#allocation157_spill] sm:$0xff]  ;;  %v3468_v19 = vmax.f32 %v3467_v44, %v11362_v21  ;;  %6295 = vrsqrt.f32 %v3266_v27  ;;  %2005 = vadd.xlane.f32.xlu1 %v11508_v20  ;;  %v3504_v18 = vmax.f32 %v3503_v61, %v11559_v5  ;;  %v16228_v34 = vld [vmem:[#allocation104_spill] sm:$0xff] }
 0x302   : > { %v11705_v1 = vadd.f32 1e-07, %v16216_v4  ;;  %v16217_v40 = vld [vmem:[#allocation90_spill] sm:$0xff]  ;;  %16218 = vst [vmem:[#allocation16_spill] sm:$0xff] %v11710_v14  ;;  %v11713_v51 = vadd.f32 1e-07, %v16219_v45  ;;  %v11718_v54 = vpop.eup %6277  ;;  %6297 = vrsqrt.f32 %v3267_v33  ;;  %2003 = vadd.xlane.f32.xlu0 %v11517_v60  ;;  %v3521_v20 = vmax.f32 %v3520_v23, %v11635_v42 }
 0x303   : > { %v11708_v48 = vadd.f32 1e-07, %v16217_v40  ;;  %v16220_v25 = vld [vmem:[#allocation166_spill] sm:$0xff]  ;;  %v16221_v43 = vld [vmem:[#allocation97_spill] sm:$0xff]  ;;  %16222 = vst [vmem:[#allocation83_spill] sm:$0xff] %v11718_v54  ;;  %v11726_v2 = vpop.eup %6279  ;;  %6299 = vrsqrt.f32 %v11633_v50  ;;  %v3453_v60 = vrot.slane %v3452_v49, 1  ;;  %v3505_v54 = vmax.f32 %v3504_v18, %v11565_v35 }
 0x304   : > { %v3455_v30 = vmax.f32 %v16221_v43, %v16220_v25  ;;  %v16223_v4 = vld [vmem:[#allocation158_spill] sm:$0xff]  ;;  %16224 = vst [vmem:[#allocation89_spill] sm:$0xff] %v11726_v2  ;;  %v16225_v44 = vld [vmem:[#allocation161_spill] sm:$0xff]  ;;  %v11740_v6 = vadd.f32 1e-07, %v16228_v34  ;;  %6301 = vrsqrt.f32 %v11638_v39  ;;  %v16232_v2 = vld [vmem:[#allocation56_spill] sm:$0xff]  ;;  %v3487_v39 = vmax.f32 %v3486_v16, %v11462_v47 }
 0x305   : > { %v11722_v40 = vadd.f32 1e-07, %v16223_v4  ;;  %v11730_v27 = vadd.f32 1e-07, %v16225_v44  ;;  %v16226_v45 = vld [vmem:[#allocation162_spill] sm:$0xff]  ;;  %v11737_v4 = vpop.eup %6281  ;;  %v16229_v33 = vld [vmem:[#allocation165_spill] sm:$0xff]  ;;  %6303 = vrsqrt.f32 %v3276_v32  ;;  %2009 = vadd.xlane.f32.xlu1 %v11521_v12  ;;  %v3522_v12 = vmax.f32 %v3521_v20, %v11643_v9 }
 0x306   : > { %v11733_v21 = vadd.f32 1e-07, %v16226_v45  ;;  %16227 = vst [vmem:[#allocation122_spill] sm:$0xff] %v11737_v4  ;;  %v11743_v61 = vadd.f32 1e-07, %v16229_v33  ;;  %v11746_v44 = vpop.eup %6283  ;;  %v16231_v5 = vld [vmem:[#allocation94_spill] sm:$0xff]  ;;  %v3469_v50 = vmax.f32 %v3468_v19, %v3455_v30  ;;  %6305 = vrsqrt.f32 %v3277_v55  ;;  %2007 = vadd.xlane.f32.xlu0 %v11528_v63 }
 0x307   : > { %16230 = vst [vmem:[#allocation59_spill] sm:$0xff] %v11746_v44  ;;  %v11749_v45 = vadd.f32 1e-07, %v16231_v5  ;;  %v11752_v23 = vadd.f32 1e-07, %v16232_v2  ;;  %v11754_v42 = vpop.eup %6285  ;;  %v16234_v34 = vld [vmem:[#allocation99_spill] sm:$0xff]  ;;  %6307 = vrsqrt.f32 %v11641_v31  ;;  %v3540_v55 = vmax.f32 %v11746_v44, %v11737_v4 }
 0x308   : > { %16233 = vst [vmem:[#allocation112_spill] sm:$0xff] %v11754_v42  ;;  %v11758_v33 = vadd.f32 1e-07, %v16234_v34  ;;  %v11762_v14 = vpop.eup %6287  ;;  %v16236_v5 = vld [vmem:[#allocation170_spill] sm:$0xff]  ;;  %v16237_v32 = vld [vmem:[#allocation65_spill] sm:$0xff]  ;;  %v16239_v16 = vld [vmem:[#allocation67_spill] sm:$0xff]  ;;  %6309 = vrsqrt.f32 %v11646_v38  ;;  %v11781_v63 = vmax.f32 %v3452_v49, %v3453_v60  ;;  %v3488_v49 = vmax.f32 %v3487_v39, %v11467_v52 }
 0x309   : > { %16235 = vst [vmem:[#allocation61_spill] sm:$0xff] %v11762_v14  ;;  %v11766_v2 = vadd.f32 1e-07, %v16236_v5  ;;  %v11769_v30 = vadd.f32 1e-07, %v16237_v32  ;;  %v11773_v19 = vpop.eup %6289  ;;  %v16241_v5 = vld [vmem:[#allocation172_spill] sm:$0xff]  ;;  %6311 = vrsqrt.f32 %v11649_v37  ;;  %2013 = vadd.xlane.f32.xlu1 %v11536_v36  ;;  %v3506_v38 = vmax.f32 %v3505_v54, %v11573_v29 }
 0x30a   : > { %16238 = vst [vmem:[#allocation58_spill] sm:$0xff] %v11773_v19  ;;  %v11776_v34 = vadd.f32 1e-07, %v16239_v16  ;;  %v11783_v18 = vpop.eup %6291  ;;  %v11786_v32 = vadd.f32 1e-07, %v16241_v5  ;;  %v3470_v31 = vrot.slane %v3469_v50, 4  ;;  %6313 = vrsqrt.f32 %v11678_v46  ;;  %2011 = vadd.xlane.f32.xlu0 %v11552_v57 }
 0x30b   : > { %16240 = vst [vmem:[#allocation60_spill] sm:$0xff] %v11783_v18  ;;  %v11789_v20 = vadd.f32 1e-07, %v11330_v0  ;;  %v11792_v16 = vpop.eup %6293  ;;  %v11796_v44 = vadd.f32 1e-07, %v11338_v10  ;;  %v16244_v0 = vld [vmem:[#allocation38_spill] sm:$0xff]  ;;  %v3523_v36 = vmax.f32 %v3522_v12, %v11652_v17  ;;  %6315 = vrsqrt.f32 %v11656_v13 }
 0x30c   : > { %16242 = vst [vmem:[#allocation123_spill] sm:$0xff] %v11792_v16  ;;  %v11801_v60 = vpop.eup %6295  ;;  %v11805_v37 = vadd.f32 1e-07, %v16244_v0  ;;  %v11808_v5 = vadd.f32 1e-07, %v11367_v8  ;;  %v3541_v46 = vmax.f32 %v3540_v55, %v11762_v14  ;;  %6317 = vrsqrt.f32 %v11664_v41  ;;  %v16248_v0 = vld [vmem:[#allocation115_spill] sm:$0xff] }
 0x30d   : > { %16243 = vst [vmem:[#allocation25_spill] sm:$0xff] %v11801_v60  ;;  %v11812_v10 = vpop.eup %6297  ;;  %v11815_v54 = vadd.f32 1e-07, %v11371_v11  ;;  %v3602_v57 = vsub.f32 %v11116_v59, %v11781_v63  ;;  %v11824_v8 = vadd.f32 1e-07, %v11395_v15  ;;  %6319 = vrsqrt.f32 %v11667_v28  ;;  %2017 = vadd.xlane.f32.xlu1 %v16248_v0  ;;  %v16249_v55 = vld [vmem:[#allocation79_spill] sm:$0xff] }
 0x30e   : > { %16245 = vst [vmem:[#allocation124_spill] sm:$0xff] %v11812_v10  ;;  %v11821_v39 = vpop.eup %6299  ;;  %v3471_v13 = vmax.f32 %v3469_v50, %v3470_v31  ;;  %v3603_v12 = vsub.f32 %v11125_v58, %v11781_v63  ;;  %v3489_v41 = vmax.f32 %v3488_v49, %v16249_v55  ;;  %v16250_v14 = vld [vmem:[#allocation117_spill] sm:$0xff]  ;;  %6321 = vrsqrt.f32 %v11681_v53  ;;  %v16251_v59 = vld [vmem:[#allocation174_spill] sm:$0xff]  ;;  %v16252_v17 = vld [vmem:[#allocation52_spill] sm:$0xff] }
 0x30f   : > { %16246 = vst [vmem:[#allocation106_spill] sm:$0xff] %v11821_v39  ;;  %v11829_v11 = vpop.eup %6301  ;;  %v3507_v4 = vmax.f32 %v3506_v38, %v16250_v14  ;;  %v3476_v15 = vmax.f32 %v16252_v17, %v16251_v59  ;;  %v16254_v28 = vld [vmem:[#allocation186_spill] sm:$0xff]  ;;  %v16255_v50 = vld [vmem:[#allocation177_spill] sm:$0xff]  ;;  %v16257_v0 = vld [vmem:[#allocation64_spill] sm:$0xff]  ;;  %6323 = vrsqrt.f32 %v11688_v26  ;;  %v3542_v53 = vmax.f32 %v3541_v46, %v11773_v19 }
 0x310   : > { %16247 = vst [vmem:[#allocation125_spill] sm:$0xff] %v11829_v11  ;;  %v11837_v9 = vpop.eup %6303  ;;  %2015 = vadd.xlane.f32.xlu0 %v16254_v28  ;;  %v11841_v31 = vadd.f32 1e-07, %v16255_v50  ;;  %v16256_v58 = vld [vmem:[#allocation37_spill] sm:$0xff]  ;;  %v3524_v35 = vmax.f32 %v3523_v36, %v16257_v0  ;;  %6325 = vrsqrt.f32 %v11696_v3  ;;  %v16259_v38 = vld [vmem:[#allocation150_spill] sm:$0xff]  ;;  %v16261_v36 = vld [vmem:[#allocation152_spill] sm:$0xff] }
 0x311   : > { %16253 = vst [vmem:[#allocation22_spill] sm:$0xff] %v11837_v9  ;;  %v11844_v29 = vadd.f32 1e-07, %v16256_v58  ;;  %v11848_v49 = vpop.eup %6305  ;;  %v3604_v14 = vsub.f32 %v16259_v38, %v11781_v63  ;;  %v11854_v28 = vmul.f32 1.442695, %v3602_v57  ;;  %6327 = vrsqrt.f32 %v11699_v22  ;;  %v16263_v46 = vld [vmem:[#allocation78_spill] sm:$0xff] }
 0x312   : > { %16258 = vst [vmem:[#allocation126_spill] sm:$0xff] %v11848_v49  ;;  %v11856_v50 = vpop.eup %6307  ;;  %v3472_v58 = vrot.slane %v3471_v13, 2  ;;  %v3605_v0 = vsub.f32 %v16261_v36, %v11781_v63  ;;  %v11861_v26 = vmul.f32 1.442695, %v3603_v12  ;;  %2021 = vadd.xlane.f32.xlu1 %v16263_v46  ;;  %v16264_v3 = vld [vmem:[#allocation72_spill] sm:$0xff]  ;;  %6329 = vrsqrt.f32 %v11705_v1  ;;  %v16265_v38 = vld [vmem:[#allocation82_spill] sm:$0xff] }
 0x313   : > { %16260 = vst [vmem:[#allocation129_spill] sm:$0xff] %v11856_v50  ;;  %v11863_v55 = vpop.eup %6309  ;;  %v3508_v19 = vmax.f32 %v3507_v4, %v16264_v3  ;;  %v3490_v57 = vmax.f32 %v3489_v41, %v3476_v15  ;;  %v3606_v52 = vsub.f32 %v16265_v38, %v11781_v63  ;;  %v16267_v22 = vld [vmem:[#allocation118_spill] sm:$0xff]  ;;  %v3525_v36 = vmax.f32 %v3524_v35, %v11671_v62  ;;  %v16268_v46 = vld [vmem:[#allocation85_spill] sm:$0xff]  ;;  %v16270_v41 = vld [vmem:[#allocation155_spill] sm:$0xff] }
 0x314   : > { %16262 = vst [vmem:[#allocation49_spill] sm:$0xff] %v11863_v55  ;;  %v11870_v47 = vpop.eup %6311  ;;  %2019 = vadd.xlane.f32.xlu0 %v16267_v22  ;;  %v3561_v12 = vmax.f32 %v11848_v49, %v11837_v9  ;;  %6331 = vrsqrt.f32 %v11708_v48  ;;  %v3607_v4 = vsub.f32 %v16268_v46, %v11781_v63  ;;  %v3543_v1 = vmax.f32 %v3542_v53, %v11783_v18  ;;  %v16271_v38 = vld [vmem:[#allocation156_spill] sm:$0xff]  ;;  %v11889_v49 = vpop.xlane.xlu1 %1833  ;;  %v16275_v9 = vld [vmem:[#allocation159_spill] sm:$0xff] }
 0x315   : > { %16266 = vst [vmem:[#allocation108_spill] sm:$0xff] %v11870_v47  ;;  %v11879_v3 = vpop.eup %6313  ;;  %6333 = vrsqrt.f32 %v11713_v51  ;;  %v3608_v15 = vsub.f32 %v16270_v41, %v11781_v63  ;;  %v3609_v35 = vsub.f32 %v16271_v38, %v11781_v63  ;;  %16273 = vst [vmem:[#allocation107_spill] sm:$0xff] %v11889_v49  ;;  %v11891_v48 = vpop.xlane.xlu0 %1831  ;;  %v3473_v46 = vmax.f32 %v3471_v13, %v3472_v58  ;;  %v16276_v51 = vld [vmem:[#allocation160_spill] sm:$0xff]  ;;  %v16279_v49 = vld [vmem:[#allocation33_spill] sm:$0xff] }
 0x316   : > { %16269 = vst [vmem:[#allocation47_spill] sm:$0xff] %v11879_v3  ;;  %v11887_v22 = vpop.eup %6315  ;;  %16274 = vst [vmem:[#allocation130_spill] sm:$0xff] %v11891_v48  ;;  %6335 = vrsqrt.f32 %v11722_v40  ;;  %v3610_v53 = vsub.f32 %v16275_v9, %v11781_v63  ;;  %v3611_v18 = vsub.f32 %v16276_v51, %v11781_v63  ;;  %v16278_v41 = vld [vmem:[#allocation44_spill] sm:$0xff]  ;;  %v3491_v38 = vrot.slane %v3490_v57, 4  ;;  %v16281_v9 = vld [vmem:[#allocation71_spill] sm:$0xff] }
 0x317   : > { %16272 = vst [vmem:[#allocation18_spill] sm:$0xff] %v11887_v22  ;;  %v11898_v62 = vpop.eup %6317  ;;  %v3509_v42 = vmax.f32 %v3508_v19, %v16278_v41  ;;  %6337 = vrsqrt.f32 %v11730_v27  ;;  %v3612_v22 = vsub.f32 %v16279_v49, %v11781_v63  ;;  %v3526_v40 = vmax.f32 %v3525_v36, %v11675_v24  ;;  %v16283_v27 = vld [vmem:[#allocation163_spill] sm:$0xff]  ;;  %v16284_v41 = vld [vmem:[#allocation164_spill] sm:$0xff] }
 0x318   : > { %16277 = vst [vmem:[#allocation136_spill] sm:$0xff] %v11898_v62  ;;  %v11904_v48 = vpop.eup %6319  ;;  %v3562_v13 = vmax.f32 %v3561_v12, %v11879_v3  ;;  %6339 = vrsqrt.f32 %v11733_v21  ;;  %v3613_v58 = vsub.f32 %v16281_v9, %v11781_v63  ;;  %v3544_v19 = vmax.f32 %v3543_v1, %v11792_v16  ;;  %v16286_v12 = vld [vmem:[#allocation29_spill] sm:$0xff]  ;;  %v16287_v3 = vld [vmem:[#allocation98_spill] sm:$0xff] }
 0x319   : > { %16280 = vst [vmem:[#allocation21_spill] sm:$0xff] %v11904_v48  ;;  %v11911_v51 = vpop.eup %6321  ;;  %6341 = vrsqrt.f32 %v11740_v6  ;;  %v3474_v21 = vrot.slane %v3473_v46, 1  ;;  %v16289_v6 = vld [vmem:[#allocation102_spill] sm:$0xff]  ;;  %v3492_v49 = vmax.f32 %v3490_v57, %v3491_v38  ;;  %v16290_v48 = vld [vmem:[#allocation183_spill] sm:$0xff]  ;;  %v11936_v59 = vpop.xlane.xlu0 %1835  ;;  %v3527_v9 = vmax.f32 %v3526_v40, %v11684_v56  ;;  %v16332_v56 = vld [vmem:[#allocation77_spill] sm:$0xff] }
 0x31a   : > { %16282 = vst [vmem:[#allocation137_spill] sm:$0xff] %v11911_v51  ;;  %v11919_v36 = vpop.eup %6323  ;;  %6343 = vrsqrt.f32 %v11743_v61  ;;  %v3510_v16 = vmax.f32 %v3509_v42, %v16289_v6  ;;  %v16291_v62 = vld [vmem:[#allocation182_spill] sm:$0xff]  ;;  %v11934_v61 = vpop.xlane.xlu1 %1837  ;;  %16294 = vst [vmem:[#allocation51_spill] sm:$0xff] %v11936_v59  ;;  %v3563_v24 = vmax.f32 %v3562_v13, %v11911_v51  ;;  %v11941_v17 = vmul.f32 1.442695, %v3604_v14  ;;  %v16315_v51 = vld [vmem:[#allocation91_spill] sm:$0xff] }
 0x31b   : > { %16285 = vst [vmem:[#allocation110_spill] sm:$0xff] %v11919_v36  ;;  %v11926_v1 = vpop.eup %6325  ;;  %6345 = vrsqrt.f32 %v11749_v45  ;;  %v3497_v47 = vmax.f32 %v16291_v62, %v16290_v48  ;;  %16293 = vst [vmem:[#allocation31_spill] sm:$0xff] %v11934_v61  ;;  %v3545_v45 = vmax.f32 %v3544_v19, %v11801_v60  ;;  %v11947_v57 = vmul.f32 1.442695, %v3605_v0 }
 0x31c   : > { %16288 = vst [vmem:[#allocation109_spill] sm:$0xff] %v11926_v1  ;;  %v11932_v55 = vpop.eup %6327  ;;  %6347 = vrsqrt.f32 %v11752_v23  ;;  %v11949_v38 = vmul.f32 1.442695, %v3606_v52  ;;  %v11954_v40 = vmax.f32 %v3473_v46, %v3474_v21  ;;  %v11956_v13 = vmul.f32 1.442695, %v3607_v4 }
 0x31d   : > { %16292 = vst [vmem:[#allocation88_spill] sm:$0xff] %v11932_v55  ;;  %v11943_v42 = vpop.eup %6329  ;;  %6349 = vrsqrt.f32 %v11758_v33  ;;  %v11958_v14 = vmul.f32 1.442695, %v3608_v15  ;;  %v3493_v19 = vrot.slane %v3492_v49, 2  ;;  %v3511_v33 = vmax.f32 %v3510_v16, %v3497_v47  ;;  %v11984_v21 = vpop.xlane.xlu0 %1839 }
 0x31e   : > { %16295 = vst [vmem:[#allocation53_spill] sm:$0xff] %v11943_v42  ;;  %v11951_v61 = vpop.eup %6331  ;;  %6351 = vrsqrt.f32 %v11766_v2  ;;  %v11963_v0 = vmul.f32 1.442695, %v3609_v35  ;;  %v3528_v59 = vmax.f32 %v3527_v9, %v11692_v7  ;;  %v3564_v2 = vmax.f32 %v3563_v24, %v11919_v36  ;;  %v11982_v35 = vpop.xlane.xlu1 %1841  ;;  %16301 = vst [vmem:[#allocation80_spill] sm:$0xff] %v11984_v21  ;;  %v16303_v9 = vld [vmem:[#allocation92_spill] sm:$0xff] }
 0x31f   : > { %16296 = vst [vmem:[#allocation111_spill] sm:$0xff] %v11951_v61  ;;  %v11960_v23 = vpop.eup %6333  ;;  %6353 = vrsqrt.f32 %v11769_v30  ;;  %v11970_v4 = vmul.f32 1.442695, %v3610_v53  ;;  %v3546_v46 = vmax.f32 %v3545_v45, %v11812_v10  ;;  %v11976_v30 = vmul.f32 1.442695, %v3611_v18  ;;  %16300 = vst [vmem:[#allocation73_spill] sm:$0xff] %v11982_v35 }
 0x320   : > { %16297 = vst [vmem:[#allocation131_spill] sm:$0xff] %v11960_v23  ;;  %v11965_v52 = vpop.eup %6335  ;;  %6355 = vrsqrt.f32 %v11776_v34  ;;  %v11978_v47 = vmul.f32 1.442695, %v3612_v22  ;;  %v11991_v53 = vmul.f32 1.442695, %v3613_v58  ;;  %v3512_v22 = vrot.slane %v3511_v33, 4 }
 0x321   : > { %v11972_v15 = vpop.eup %6337  ;;  %6357 = vrsqrt.f32 %v11786_v32  ;;  %v3494_v32 = vmax.f32 %v3492_v49, %v3493_v19  ;;  %v3565_v24 = vmax.f32 %v3564_v2, %v11926_v1  ;;  %v16306_v58 = vld [vmem:[#allocation167_spill] sm:$0xff]  ;;  %v16308_v49 = vld [vmem:[#allocation169_spill] sm:$0xff]  ;;  %v16312_v34 = vld [vmem:[#allocation100_spill] sm:$0xff]  ;;  %v12031_v2 = vpop.xlane.xlu0 %1843 }
 0x322   : > { %16298 = vst [vmem:[#allocation132_spill] sm:$0xff] %v11972_v15  ;;  %v11980_v16 = vpop.eup %6339  ;;  %6359 = vrsqrt.f32 %v11789_v20  ;;  %v16305_v20 = vld [vmem:[#allocation93_spill] sm:$0xff]  ;;  %v16309_v45 = vld [vmem:[#allocation95_spill] sm:$0xff]  ;;  %v3513_v10 = vmax.f32 %v3511_v33, %v3512_v22  ;;  %16318 = vst [vmem:[#allocation141_spill] sm:$0xff] %v12031_v2 }
 0x323   : > { %16299 = vst [vmem:[#allocation133_spill] sm:$0xff] %v11980_v16  ;;  %v11993_v18 = vpop.eup %6341  ;;  %6361 = vrsqrt.f32 %v11796_v44  ;;  %v3529_v21 = vmax.f32 %v3528_v59, %v16305_v20  ;;  %v3547_v44 = vmax.f32 %v3546_v46, %v11821_v39  ;;  %v16313_v46 = vld [vmem:[#allocation173_spill] sm:$0xff]  ;;  %v3495_v19 = vrot.slane %v3494_v32, 1  ;;  %v16319_v7 = vld [vmem:[#allocation16_spill] sm:$0xff]  ;;  %v16320_v39 = vld [vmem:[#allocation74_spill] sm:$0xff] }
 0x324   : > { %16302 = vst [vmem:[#allocation27_spill] sm:$0xff] %v11993_v18  ;;  %v11998_v35 = vpop.eup %6343  ;;  %6363 = vrsqrt.f32 %v11805_v37  ;;  %v16311_v37 = vld [vmem:[#allocation171_spill] sm:$0xff]  ;;  %v3514_v60 = vrot.slane %v3513_v10, 2  ;;  %v16329_v2 = vld [vmem:[#allocation41_spill] sm:$0xff] }
 0x325   : > { %16304 = vst [vmem:[#allocation26_spill] sm:$0xff] %v11998_v35  ;;  %v12005_v36 = vpop.eup %6345  ;;  %6365 = vrsqrt.f32 %v11808_v5  ;;  %v3530_v1 = vmax.f32 %v3529_v21, %v16319_v7  ;;  %v3566_v35 = vmax.f32 %v3565_v24, %v11932_v55  ;;  %v3548_v33 = vmax.f32 %v3547_v44, %v11829_v11  ;;  %v16322_v22 = vld [vmem:[#allocation23_spill] sm:$0xff]  ;;  %v16325_v24 = vld [vmem:[#allocation188_spill] sm:$0xff]  ;;  %v16326_v55 = vld [vmem:[#allocation42_spill] sm:$0xff] }
 0x326   : > { %16307 = vst [vmem:[#allocation138_spill] sm:$0xff] %v12005_v36  ;;  %v12013_v59 = vpop.eup %6347  ;;  %6367 = vrsqrt.f32 %v11815_v54  ;;  %v12029_v54 = vpop.xlane.xlu1 %1845  ;;  %v16327_v7 = vld [vmem:[#allocation81_spill] sm:$0xff]  ;;  %v12057_v44 = vmax.f32 %v3494_v32, %v3495_v19 }
 0x327   : > { %16310 = vst [vmem:[#allocation69_spill] sm:$0xff] %v12013_v59  ;;  %v12022_v5 = vpop.eup %6349  ;;  %6369 = vrsqrt.f32 %v11824_v8  ;;  %16317 = vst [vmem:[#allocation140_spill] sm:$0xff] %v12029_v54  ;;  %v16323_v54 = vld [vmem:[#allocation57_spill] sm:$0xff]  ;;  %v3518_v8 = vmax.f32 %v16326_v55, %v16325_v24  ;;  %v3567_v24 = vmax.f32 %v3566_v35, %v11943_v42  ;;  %v3549_v32 = vmax.f32 %v3548_v33, %v11856_v50  ;;  %v12083_v55 = vpop.xlane.xlu0 %1847  ;;  %v16342_v50 = vld [vmem:[#allocation52_spill] sm:$0xff] }
 0x328   : > { %16314 = vst [vmem:[#allocation139_spill] sm:$0xff] %v12022_v5  ;;  %v12027_v20 = vpop.eup %6351  ;;  %6371 = vrsqrt.f32 %v11841_v31  ;;  %v3582_v31 = vmax.f32 %v12022_v5, %v12013_v59  ;;  %v16331_v5 = vld [vmem:[#allocation83_spill] sm:$0xff]  ;;  %16338 = vst [vmem:[#allocation146_spill] sm:$0xff] %v12083_v55  ;;  %v16343_v55 = vld [vmem:[#allocation174_spill] sm:$0xff] }
 0x329   : > { %16316 = vst [vmem:[#allocation168_spill] sm:$0xff] %v12027_v20  ;;  %v12038_v36 = vpop.eup %6353  ;;  %6373 = vrsqrt.f32 %v11844_v29  ;;  %v3531_v59 = vmax.f32 %v3530_v1, %v16331_v5  ;;  %v16335_v1 = vsub.f32 %v16284_v41, %v11781_v63  ;;  %v16349_v5 = vld [vmem:[#allocation113_spill] sm:$0xff] }
 0x32a   : > { %16321 = vst [vmem:[#allocation142_spill] sm:$0xff] %v12038_v36  ;;  %v12046_v21 = vpop.eup %6355  ;;  %6375 = vpow2.f32 %v11854_v28  ;;  %v12081_v42 = vpop.xlane.xlu1 %1849 }
 0x32b   : > { %16324 = vst [vmem:[#allocation143_spill] sm:$0xff] %v12046_v21  ;;  %v12055_v29 = vpop.eup %6357  ;;  %6377 = vpow2.f32 %v11861_v26  ;;  %v16334_v26 = vsub.f32 %v16283_v27, %v11781_v63  ;;  %v3756_v11 = vmul.f32 1.442695, %v16335_v1  ;;  %16337 = vst [vmem:[#allocation145_spill] sm:$0xff] %v12081_v42  ;;  %v16340_v27 = vsub.f32 %v16287_v3, %v11781_v63 }
 0x32c   : > { %16328 = vst [vmem:[#allocation50_spill] sm:$0xff] %v12055_v29  ;;  %v12062_v6 = vpop.eup %6359  ;;  %6379 = vpow2.f32 %v11941_v17  ;;  %v3583_v17 = vmax.f32 %v3582_v31, %v12027_v20  ;;  %v3515_v1 = vmax.f32 %v3513_v10, %v3514_v60  ;;  %v3532_v31 = vmax.f32 %v3531_v59, %v3518_v8  ;;  %v16347_v60 = vld [vmem:[#allocation49_spill] sm:$0xff]  ;;  %v16351_v8 = vld [vmem:[#allocation114_spill] sm:$0xff] }
 0x32d   : > { %16330 = vst [vmem:[#allocation17_spill] sm:$0xff] %v12062_v6  ;;  %v12069_v28 = vpop.eup %6361  ;;  %6381 = vpow2.f32 %v11947_v57  ;;  %v3754_v19 = vmul.f32 1.442695, %v16334_v26  ;;  %v16339_v57 = vsub.f32 %v16286_v12, %v11781_v63  ;;  %v3760_v26 = vmul.f32 1.442695, %v16340_v27  ;;  %v16348_v27 = vld [vmem:[#allocation36_spill] sm:$0xff] }
 0x32e   : > { %16333 = vst [vmem:[#allocation144_spill] sm:$0xff] %v12069_v28  ;;  %v12079_v35 = vpop.eup %6363  ;;  %6383 = vpow2.f32 %v11949_v38  ;;  %v3568_v12 = vmax.f32 %v3567_v24, %v11951_v61  ;;  %v3550_v10 = vmax.f32 %v3549_v32, %v16347_v60  ;;  %v3584_v59 = vmax.f32 %v3583_v17, %v12038_v36  ;;  %v16354_v61 = vld [vmem:[#allocation32_spill] sm:$0xff]  ;;  %v12131_v36 = vpop.xlane.xlu1 %1853 }
 0x32f   : > { %16336 = vst [vmem:[#allocation28_spill] sm:$0xff] %v12079_v35  ;;  %v3758_v33 = vmul.f32 1.442695, %v16339_v57  ;;  %v12093_v41 = vpop.eup %6365  ;;  %6385 = vpow2.f32 %v11956_v13  ;;  %v16345_v57 = vld [vmem:[#allocation39_spill] sm:$0xff]  ;;  %v3516_v42 = vrot.slane %v3515_v1, 1  ;;  %16357 = vst [vmem:[#allocation154_spill] sm:$0xff] %v12131_v36  ;;  %v12133_v24 = vpop.xlane.xlu0 %1851 }
 0x330   : > { %16341 = vst [vmem:[#allocation40_spill] sm:$0xff] %v12093_v41  ;;  %v12100_v38 = vpop.eup %6367  ;;  %6387 = vpow2.f32 %v11958_v14  ;;  %v16352_v14 = vld [vmem:[#allocation178_spill] sm:$0xff]  ;;  %16358 = vst [vmem:[#allocation54_spill] sm:$0xff] %v12133_v24  ;;  %v3569_v63 = vmax.f32 %v3568_v12, %v11960_v23  ;;  %v3585_v12 = vmax.f32 %v3584_v59, %v12046_v21  ;;  %v16369_v36 = vld [vmem:[#allocation89_spill] sm:$0xff] }
 0x331   : > { %16344 = vst [vmem:[#allocation147_spill] sm:$0xff] %v12100_v38  ;;  %v12106_v3 = vpop.eup %6369  ;;  %6389 = vpow2.f32 %v11963_v0  ;;  %v12157_v0 = vmax.f32 %v3515_v1, %v3516_v42  ;;  %v16374_v1 = vld [vmem:[#allocation18_spill] sm:$0xff] }
 0x332   : > { %16346 = vst [vmem:[#allocation148_spill] sm:$0xff] %v12106_v3  ;;  %v12114_v20 = vpop.eup %6371  ;;  %6391 = vpow2.f32 %v11970_v4  ;;  %v3533_v4 = vrot.slane %v3532_v31, 4  ;;  %v16361_v3 = vld [vmem:[#allocation108_spill] sm:$0xff] }
 0x333   : > { %16350 = vst [vmem:[#allocation149_spill] sm:$0xff] %v12114_v20  ;;  %v12122_v32 = vpop.eup %6373  ;;  %6393 = vpow2.f32 %v11976_v30  ;;  %v3551_v60 = vmax.f32 %v3550_v10, %v16361_v3  ;;  %v16362_v30 = vld [vmem:[#allocation62_spill] sm:$0xff]  ;;  %v16365_v20 = vld [vmem:[#allocation48_spill] sm:$0xff] }
 0x334   : > { %16353 = vst [vmem:[#allocation151_spill] sm:$0xff] %v12122_v32  ;;  %v12129_v17 = vpop.eup %6375  ;;  %v16359_v32 = vld [vmem:[#allocation180_spill] sm:$0xff]  ;;  %6395 = vpow2.f32 %v11978_v47  ;;  %v16366_v47 = vsub.f32 %v16221_v43, %v11954_v40  ;;  %v3534_v23 = vmax.f32 %v3532_v31, %v3533_v4  ;;  %v16372_v43 = vsub.f32 %v16303_v9, %v11954_v40  ;;  %v12180_v31 = vpop.xlane.xlu1 %1857 }
 0x335   : > { %16356 = vst [vmem:[#allocation153_spill] sm:$0xff] %v12129_v17  ;;  %v12139_v13 = vpop.eup %6377  ;;  %6397 = vpow2.f32 %v11991_v53  ;;  %v16368_v3 = vld [vmem:[#allocation112_spill] sm:$0xff]  ;;  %v16370_v53 = vsub.f32 %v16220_v25, %v11954_v40  ;;  %v16376_v25 = vsub.f32 %v16306_v58, %v11954_v40  ;;  %16378 = vst [vmem:[#allocation162_spill] sm:$0xff] %v12180_v31  ;;  %v3586_v9 = vmax.f32 %v3585_v12, %v12055_v29  ;;  %v16383_v58 = vld [vmem:[#allocation79_spill] sm:$0xff] }
 0x336   : > { %16360 = vst [vmem:[#allocation90_spill] sm:$0xff] %v12139_v13  ;;  %v12147_v24 = vpop.eup %6379  ;;  %6399 = vpow2.f32 %v3754_v19  ;;  %v3762_v10 = vmul.f32 1.442695, %v16366_v47  ;;  %v3539_v17 = vmax.f32 %v16369_v36, %v16368_v3  ;;  %v3570_v19 = vmax.f32 %v3569_v63, %v11965_v52  ;;  %v16380_v63 = vld [vmem:[#allocation181_spill] sm:$0xff] }
 0x337   : > { %16364 = vst [vmem:[#allocation157_spill] sm:$0xff] %v12147_v24  ;;  %v12155_v13 = vpop.eup %6381  ;;  %6401 = vpow2.f32 %v3756_v11  ;;  %v3764_v59 = vmul.f32 1.442695, %v16370_v53  ;;  %v3766_v47 = vmul.f32 1.442695, %v16372_v43  ;;  %v16375_v11 = vld [vmem:[#allocation63_spill] sm:$0xff]  ;;  %v16384_v12 = vsub.f32 %v16309_v45, %v11954_v40 }
 0x338   : > { %16367 = vst [vmem:[#allocation166_spill] sm:$0xff] %v12155_v13  ;;  %v12164_v21 = vpop.eup %6383  ;;  %6403 = vpow2.f32 %v3758_v33  ;;  %v3552_v13 = vmax.f32 %v3551_v60, %v16374_v1  ;;  %v3768_v53 = vmul.f32 1.442695, %v16376_v25  ;;  %v12182_v33 = vpop.xlane.xlu0 %1855  ;;  %v16381_v60 = vsub.f32 %v16308_v49, %v11954_v40 }
 0x339   : > { %16371 = vst [vmem:[#allocation97_spill] sm:$0xff] %v12164_v21  ;;  %v12170_v42 = vpop.eup %6385  ;;  %6405 = vpow2.f32 %v3760_v26  ;;  %16379 = vst [vmem:[#allocation104_spill] sm:$0xff] %v12182_v33  ;;  %v3772_v31 = vmul.f32 1.442695, %v16384_v12  ;;  %v3535_v4 = vrot.slane %v3534_v23, 2  ;;  %v16386_v49 = vsub.f32 %v16311_v37, %v11954_v40 }
 0x33a   : > { %16373 = vst [vmem:[#allocation158_spill] sm:$0xff] %v12170_v42  ;;  %v12178_v21 = vpop.eup %6387  ;;  %6407 = vpow2.f32 %v3762_v10  ;;  %v3770_v26 = vmul.f32 1.442695, %v16381_v60  ;;  %v3571_v10 = vmax.f32 %v3570_v19, %v11972_v15  ;;  %v3553_v25 = vmax.f32 %v3552_v13, %v3539_v17  ;;  %v16478_v15 = vld [vmem:[#allocation138_spill] sm:$0xff] }
 0x33b   : > { %16377 = vst [vmem:[#allocation161_spill] sm:$0xff] %v12178_v21  ;;  %v12190_v43 = vpop.eup %6389  ;;  %6409 = vpow2.f32 %v3764_v59  ;;  %v3774_v60 = vmul.f32 1.442695, %v16386_v49  ;;  %v16388_v45 = vsub.f32 %v16312_v34, %v11954_v40  ;;  %v3587_v19 = vmax.f32 %v3586_v9, %v12062_v6  ;;  %v16394_v34 = vld [vmem:[#allocation184_spill] sm:$0xff] }
 0x33c   : > { %16382 = vst [vmem:[#allocation165_spill] sm:$0xff] %v12190_v43  ;;  %v12199_v33 = vpop.eup %6391  ;;  %6411 = vpow2.f32 %v3766_v47  ;;  %v16390_v47 = vld [vmem:[#allocation43_spill] sm:$0xff]  ;;  %v16391_v37 = vsub.f32 %v16313_v46, %v11954_v40  ;;  %v16395_v9 = vsub.f32 %v16315_v51, %v11954_v40  ;;  %v3572_v46 = vmax.f32 %v3571_v10, %v11980_v16  ;;  %v16401_v51 = vld [vmem:[#allocation185_spill] sm:$0xff] }
 0x33d   : > { %16385 = vst [vmem:[#allocation94_spill] sm:$0xff] %v12199_v33  ;;  %v12205_v29 = vpop.eup %6393  ;;  %6413 = vpow2.f32 %v3768_v53  ;;  %v3776_v12 = vmul.f32 1.442695, %v16388_v45  ;;  %v16393_v53 = vld [vmem:[#allocation175_spill] sm:$0xff]  ;;  %v12233_v33 = vpop.xlane.xlu0 %1859  ;;  %v16399_v49 = vsub.f32 %v16320_v39, %v11954_v40  ;;  %v16405_v39 = vsub.f32 %v16323_v54, %v11954_v40 }
 0x33e   : > { %16387 = vst [vmem:[#allocation56_spill] sm:$0xff] %v12205_v29  ;;  %v12212_v24 = vpop.eup %6395  ;;  %6415 = vpow2.f32 %v3770_v26  ;;  %v3778_v13 = vmul.f32 1.442695, %v16391_v37  ;;  %v3780_v59 = vmul.f32 1.442695, %v16395_v9  ;;  %v12231_v26 = vpop.xlane.xlu1 %1861  ;;  %16398 = vst [vmem:[#allocation172_spill] sm:$0xff] %v12233_v33  ;;  %v3536_v37 = vmax.f32 %v3534_v23, %v3535_v4 }
 0x33f   : > { %16389 = vst [vmem:[#allocation99_spill] sm:$0xff] %v12212_v24  ;;  %v12220_v17 = vpop.eup %6397  ;;  %6417 = vpow2.f32 %v3772_v31  ;;  %16397 = vst [vmem:[#allocation67_spill] sm:$0xff] %v12231_v26  ;;  %v3554_v31 = vrot.slane %v3553_v25, 4  ;;  %v16402_v26 = vsub.f32 %v16322_v22, %v11954_v40  ;;  %v3588_v23 = vmax.f32 %v3587_v19, %v12069_v28  ;;  %v16404_v4 = vld [vmem:[#allocation55_spill] sm:$0xff]  ;;  %v16407_v9 = vld [vmem:[#allocation21_spill] sm:$0xff] }
 0x340   : > { %16392 = vst [vmem:[#allocation170_spill] sm:$0xff] %v12220_v17  ;;  %v12229_v6 = vpop.eup %6399  ;;  %6419 = vpow2.f32 %v3774_v60  ;;  %v3782_v17 = vmul.f32 1.442695, %v16399_v49  ;;  %v3786_v60 = vmul.f32 1.442695, %v16405_v39  ;;  %v16409_v22 = vld [vmem:[#allocation176_spill] sm:$0xff]  ;;  %v16410_v19 = vsub.f32 %v16327_v7, %v11954_v40 }
 0x341   : > { %16396 = vst [vmem:[#allocation65_spill] sm:$0xff] %v12229_v6  ;;  %v12239_v45 = vpop.eup %6401  ;;  %6421 = vpow2.f32 %v3776_v12  ;;  %v3784_v6 = vmul.f32 1.442695, %v16402_v26  ;;  %v16408_v12 = vld [vmem:[#allocation136_spill] sm:$0xff]  ;;  %v3537_v10 = vrot.slane %v3536_v37, 1  ;;  %v16412_v54 = vsub.f32 %v16329_v2, %v11954_v40  ;;  %v16414_v26 = vld [vmem:[#allocation101_spill] sm:$0xff] }
 0x342   : > { %16400 = vst [vmem:[#allocation38_spill] sm:$0xff] %v12239_v45  ;;  %v12246_v33 = vpop.eup %6403  ;;  %6423 = vpow2.f32 %v3778_v13  ;;  %v3560_v45 = vmax.f32 %v16408_v12, %v16407_v9  ;;  %v3788_v28 = vmul.f32 1.442695, %v16410_v19  ;;  %v3573_v13 = vmax.f32 %v3572_v46, %v11993_v18  ;;  %v12278_v46 = vpop.xlane.xlu1 %1897  ;;  %v16454_v18 = vld [vmem:[#allocation11_spill] sm:$0xff] }
 0x343   : > { %16403 = vst [vmem:[#allocation115_spill] sm:$0xff] %v12246_v33  ;;  %v12254_v49 = vpop.eup %6405  ;;  %6425 = vpow2.f32 %v3780_v59  ;;  %v3790_v39 = vmul.f32 1.442695, %v16412_v54  ;;  %v3555_v24 = vmax.f32 %v3553_v25, %v3554_v31  ;;  %v16415_v7 = vsub.f32 %v16332_v56, %v11954_v40  ;;  %16417 = vst [vmem:[#allocation152_spill] sm:$0xff] %v12278_v46  ;;  %v16419_v54 = vld [vmem:[#allocation116_spill] sm:$0xff]  ;;  %v16422_v56 = vld [vmem:[#allocation35_spill] sm:$0xff] }
 0x344   : > { %16406 = vst [vmem:[#allocation186_spill] sm:$0xff] %v12254_v49  ;;  %v12263_v33 = vpop.eup %6407  ;;  %6427 = vpow2.f32 %v3782_v17  ;;  %v12280_v17 = vpop.xlane.xlu0 %1895  ;;  %v3589_v2 = vmax.f32 %v3588_v23, %v12079_v35  ;;  %v16420_v25 = vsub.f32 %v16342_v50, %v12057_v44  ;;  %v16424_v23 = vsub.f32 %v16343_v55, %v12057_v44  ;;  %v16428_v59 = vld [vmem:[#allocation117_spill] sm:$0xff] }
 0x345   : > { %16411 = vst [vmem:[#allocation177_spill] sm:$0xff] %v12263_v33  ;;  %v12269_v49 = vpop.eup %6409  ;;  %6429 = vpow2.f32 %v3784_v6  ;;  %v3792_v19 = vmul.f32 1.442695, %v16415_v7  ;;  %16418 = vst [vmem:[#allocation78_spill] sm:$0xff] %v12280_v17  ;;  %v16423_v7 = vld [vmem:[#allocation187_spill] sm:$0xff]  ;;  %v3574_v43 = vmax.f32 %v3573_v13, %v3560_v45  ;;  %v16426_v50 = vsub.f32 %v16345_v57, %v12057_v44 }
 0x346   : > { %16413 = vst [vmem:[#allocation37_spill] sm:$0xff] %v12269_v49  ;;  %v12276_v29 = vpop.eup %6411  ;;  %6431 = vpow2.f32 %v3786_v60  ;;  %v3794_v6 = vmul.f32 1.442695, %v16420_v25  ;;  %v3796_v17 = vmul.f32 1.442695, %v16424_v23  ;;  %v12299_v60 = vmax.f32 %v3536_v37, %v3537_v10  ;;  %v16431_v37 = vld [vmem:[#allocation72_spill] sm:$0xff] }
 0x347   : > { %16416 = vst [vmem:[#allocation150_spill] sm:$0xff] %v12276_v29  ;;  %v12288_v31 = vpop.eup %6413  ;;  %6433 = vpow2.f32 %v3788_v28  ;;  %v3798_v25 = vmul.f32 1.442695, %v16426_v50  ;;  %v3556_v40 = vrot.slane %v3555_v24, 2  ;;  %v16429_v55 = vsub.f32 %v16348_v27, %v12057_v44  ;;  %v16435_v27 = vld [vmem:[#allocation102_spill] sm:$0xff] }
 0x348   : > { %16421 = vst [vmem:[#allocation82_spill] sm:$0xff] %v12288_v31  ;;  %v12297_v46 = vpop.eup %6415  ;;  %6435 = vpow2.f32 %v3790_v39  ;;  %v3590_v45 = vmax.f32 %v3589_v2, %v12093_v41  ;;  %v16432_v57 = vsub.f32 %v16349_v5, %v12057_v44  ;;  %v16436_v2 = vsub.f32 %v16351_v8, %v12057_v44  ;;  %v12332_v10 = vpop.xlane.xlu0 %1899  ;;  %v16443_v8 = vld [vmem:[#allocation188_spill] sm:$0xff] }
 0x349   : > { %16425 = vst [vmem:[#allocation118_spill] sm:$0xff] %v12297_v46  ;;  %v12304_v35 = vpop.eup %6417  ;;  %6437 = vpow2.f32 %v3792_v19  ;;  %v3800_v23 = vmul.f32 1.442695, %v16429_v55  ;;  %v16434_v19 = vld [vmem:[#allocation44_spill] sm:$0xff]  ;;  %16439 = vst [vmem:[#allocation33_spill] sm:$0xff] %v12332_v10  ;;  %v3575_v5 = vrot.slane %v3574_v43, 4  ;;  %v16441_v50 = vsub.f32 %v16352_v14, %v12057_v44 }
 0x34a   : > { %16427 = vst [vmem:[#allocation85_spill] sm:$0xff] %v12304_v35  ;;  %v12311_v21 = vpop.eup %6419  ;;  %6439 = vpow2.f32 %v3794_v6  ;;  %v3802_v13 = vmul.f32 1.442695, %v16432_v57  ;;  %v3804_v28 = vmul.f32 1.442695, %v16436_v2  ;;  %v12330_v6 = vpop.xlane.xlu1 %1901  ;;  %v16440_v57 = vld [vmem:[#allocation42_spill] sm:$0xff] }
 0x34b   : > { %16430 = vst [vmem:[#allocation155_spill] sm:$0xff] %v12311_v21  ;;  %v12319_v39 = vpop.eup %6421  ;;  %6441 = vpow2.f32 %v3796_v17  ;;  %16438 = vst [vmem:[#allocation160_spill] sm:$0xff] %v12330_v6  ;;  %v3806_v55 = vmul.f32 1.442695, %v16441_v50  ;;  %v3557_v21 = vmax.f32 %v3555_v24, %v3556_v40  ;;  %v16444_v6 = vsub.f32 %v16354_v61, %v12057_v44  ;;  %v16447_v14 = vld [vmem:[#allocation179_spill] sm:$0xff]  ;;  %v16451_v61 = vld [vmem:[#allocation121_spill] sm:$0xff] }
 0x34c   : > { %16433 = vst [vmem:[#allocation156_spill] sm:$0xff] %v12319_v39  ;;  %v12328_v41 = vpop.eup %6423  ;;  %6443 = vpow2.f32 %v3798_v25  ;;  %v3591_v39 = vmax.f32 %v3590_v45, %v12100_v38  ;;  %v16446_v25 = vld [vmem:[#allocation20_spill] sm:$0xff]  ;;  %v16448_v50 = vsub.f32 %v16447_v14, %v12057_v44  ;;  %v16452_v45 = vsub.f32 %v16359_v32, %v12057_v44  ;;  %v16479_v46 = vld [vmem:[#allocation26_spill] sm:$0xff] }
 0x34d   : > { %16437 = vst [vmem:[#allocation159_spill] sm:$0xff] %v12328_v41  ;;  %v12339_v17 = vpop.eup %6425  ;;  %6445 = vpow2.f32 %v3800_v23  ;;  %v3808_v10 = vmul.f32 1.442695, %v16444_v6  ;;  %v16450_v23 = vld [vmem:[#allocation46_spill] sm:$0xff]  ;;  %v16458_v32 = vld [vmem:[#allocation68_spill] sm:$0xff]  ;;  %v16465_v6 = vsub.f32 %v16365_v20, %v12057_v44  ;;  %v16477_v20 = vld [vmem:[#allocation149_spill] sm:$0xff] }
 0x34e   : > { %16442 = vst [vmem:[#allocation71_spill] sm:$0xff] %v12339_v17  ;;  %v12346_v41 = vpop.eup %6427  ;;  %6447 = vpow2.f32 %v3802_v13  ;;  %v3810_v24 = vmul.f32 1.442695, %v16448_v50  ;;  %v3812_v38 = vmul.f32 1.442695, %v16452_v45  ;;  %v3576_v13 = vmax.f32 %v3574_v43, %v3575_v5  ;;  %v12379_v5 = vpop.xlane.xlu1 %1905  ;;  %v16463_v14 = vld [vmem:[#allocation148_spill] sm:$0xff] }
 0x34f   : > { %16445 = vst [vmem:[#allocation163_spill] sm:$0xff] %v12346_v41  ;;  %v12354_v40 = vpop.eup %6429  ;;  %6449 = vpow2.f32 %v3804_v28  ;;  %v16455_v50 = vsub.f32 %v16362_v30, %v12057_v44  ;;  %v3558_v17 = vrot.slane %v3557_v21, 1  ;;  %v16457_v28 = vld [vmem:[#allocation75_spill] sm:$0xff]  ;;  %v16459_v45 = vsub.f32 %v16458_v32, %v12057_v44  ;;  %16461 = vst [vmem:[#allocation182_spill] sm:$0xff] %v12379_v5  ;;  %v16467_v32 = vld [vmem:[#allocation64_spill] sm:$0xff] }
 0x350   : > { %16449 = vst [vmem:[#allocation164_spill] sm:$0xff] %v12354_v40  ;;  %v12363_v41 = vpop.eup %6431  ;;  %6451 = vpow2.f32 %v3806_v55  ;;  %v12381_v55 = vpop.xlane.xlu0 %1903  ;;  %v3592_v30 = vmax.f32 %v3591_v39, %v16463_v14  ;;  %v16469_v39 = vsub.f32 %v16375_v11, %v12057_v44  ;;  %v16475_v11 = vsub.f32 %v16383_v58, %v12057_v44 }
 0x351   : > { %16453 = vst [vmem:[#allocation29_spill] sm:$0xff] %v12363_v41  ;;  %v3814_v40 = vmul.f32 1.442695, %v16455_v50  ;;  %v12370_v2 = vpop.eup %6433  ;;  %6453 = vpow2.f32 %v3808_v10  ;;  %v3816_v41 = vmul.f32 1.442695, %v16459_v45  ;;  %16462 = vst [vmem:[#allocation92_spill] sm:$0xff] %v12381_v55  ;;  %v12407_v35 = vmax.f32 %v3557_v21, %v3558_v17 }
 0x352   : > { %16456 = vst [vmem:[#allocation98_spill] sm:$0xff] %v12370_v2  ;;  %v12377_v43 = vpop.eup %6435  ;;  %v16464_v50 = vld [vmem:[#allocation15_spill] sm:$0xff]  ;;  %6455 = vpow2.f32 %v3810_v24  ;;  %v3818_v10 = vmul.f32 1.442695, %v16465_v6  ;;  %v3820_v55 = vmul.f32 1.442695, %v16469_v39  ;;  %v16472_v6 = vsub.f32 %v16380_v63, %v12057_v44 }
 0x353   : > { %16460 = vst [vmem:[#allocation183_spill] sm:$0xff] %v12377_v43  ;;  %v12389_v16 = vpop.eup %6437  ;;  %v16468_v43 = vld [vmem:[#allocation76_spill] sm:$0xff]  ;;  %6457 = vpow2.f32 %v3812_v38  ;;  %v3577_v24 = vrot.slane %v3576_v13, 2  ;;  %v16471_v2 = vld [vmem:[#allocation45_spill] sm:$0xff]  ;;  %v16474_v38 = vld [vmem:[#allocation19_spill] sm:$0xff]  ;;  %v3581_v63 = vmax.f32 %v16479_v46, %v16478_v15  ;;  %v16480_v21 = vsub.f32 %v16291_v62, %v12157_v0 }
 0x354   : > { %16466 = vst [vmem:[#allocation167_spill] sm:$0xff] %v12389_v16  ;;  %v12398_v14 = vpop.eup %6439  ;;  %6459 = vpow2.f32 %v3814_v40  ;;  %v3822_v16 = vmul.f32 1.442695, %v16472_v6  ;;  %v3824_v39 = vmul.f32 1.442695, %v16475_v11  ;;  %v3593_v40 = vmax.f32 %v3592_v30, %v16477_v20  ;;  %v12435_v15 = vpop.xlane.xlu0 %1907 }
 0x355   : > { %16470 = vst [vmem:[#allocation169_spill] sm:$0xff] %v12398_v14  ;;  %v12405_v45 = vpop.eup %6441  ;;  %6461 = vpow2.f32 %v3816_v41  ;;  %v3826_v17 = vmul.f32 1.442695, %v16480_v21  ;;  %v16482_v41 = vld [vmem:[#allocation86_spill] sm:$0xff]  ;;  %v16484_v30 = vsub.f32 %v16290_v48, %v12157_v0  ;;  %16487 = vst [vmem:[#allocation74_spill] sm:$0xff] %v12435_v15  ;;  %v3578_v62 = vmax.f32 %v3576_v13, %v3577_v24 }
 0x356   : > { %16473 = vst [vmem:[#allocation95_spill] sm:$0xff] %v12405_v45  ;;  %v12414_v42 = vpop.eup %6443  ;;  %6463 = vpow2.f32 %v3818_v10  ;;  %v12433_v10 = vpop.xlane.xlu1 %1909  ;;  %v16489_v5 = vsub.f32 %v16390_v47, %v12157_v0  ;;  %v16492_v13 = vsub.f32 %v16393_v53, %v12157_v0  ;;  %v16498_v53 = vld [vmem:[#allocation59_spill] sm:$0xff]  ;;  %v16501_v47 = vld [vmem:[#allocation61_spill] sm:$0xff] }
 0x357   : > { %16476 = vst [vmem:[#allocation171_spill] sm:$0xff] %v12414_v42  ;;  %v12422_v6 = vpop.eup %6445  ;;  %6465 = vpow2.f32 %v3820_v55  ;;  %v3828_v11 = vmul.f32 1.442695, %v16484_v30  ;;  %16486 = vst [vmem:[#allocation91_spill] sm:$0xff] %v12433_v10 }
 0x358   : > { %16481 = vst [vmem:[#allocation100_spill] sm:$0xff] %v12422_v6  ;;  %v12431_v20 = vpop.eup %6447  ;;  %6467 = vpow2.f32 %v3822_v16  ;;  %v3830_v58 = vmul.f32 1.442695, %v16489_v5  ;;  %v3832_v24 = vmul.f32 1.442695, %v16492_v13  ;;  %v16494_v16 = vld [vmem:[#allocation151_spill] sm:$0xff]  ;;  %v16495_v5 = vsub.f32 %v16394_v34, %v12157_v0  ;;  %v12488_v34 = vpop.xlane.xlu0 %1911 }
 0x359   : > { %16485 = vst [vmem:[#allocation173_spill] sm:$0xff] %v12431_v20  ;;  %v12442_v55 = vpop.eup %6449  ;;  %6469 = vpow2.f32 %v3824_v39  ;;  %v3594_v46 = vmax.f32 %v3593_v40, %v16494_v16  ;;  %v16497_v39 = vld [vmem:[#allocation122_spill] sm:$0xff]  ;;  %v16499_v40 = vsub.f32 %v16401_v51, %v12157_v0  ;;  %16509 = vst [vmem:[#allocation39_spill] sm:$0xff] %v12488_v34 }
 0x35a   : > { %16490 = vst [vmem:[#allocation23_spill] sm:$0xff] %v12442_v55  ;;  %v12451_v10 = vpop.eup %6451  ;;  %6471 = vpow2.f32 %v3826_v17  ;;  %v3834_v30 = vmul.f32 1.442695, %v16495_v5  ;;  %v3579_v17 = vrot.slane %v3578_v62, 1  ;;  %v16502_v5 = vsub.f32 %v16404_v4, %v12157_v0  ;;  %v16504_v13 = vld [vmem:[#allocation58_spill] sm:$0xff] }
 0x35b   : > { %16493 = vst [vmem:[#allocation57_spill] sm:$0xff] %v12451_v10  ;;  %v12459_v15 = vpop.eup %6453  ;;  %6473 = vpow2.f32 %v3828_v11  ;;  %v3836_v16 = vmul.f32 1.442695, %v16499_v40  ;;  %v16506_v40 = vsub.f32 %v16409_v22, %v12157_v0  ;;  %v3595_v4 = vmax.f32 %v3594_v46, %v3581_v63  ;;  %v16513_v22 = vld [vmem:[#allocation25_spill] sm:$0xff] }
 0x35c   : > { %16496 = vst [vmem:[#allocation81_spill] sm:$0xff] %v12459_v15  ;;  %v12468_v10 = vpop.eup %6455  ;;  %6475 = vpow2.f32 %v3830_v58  ;;  %v3838_v15 = vmul.f32 1.442695, %v16502_v5  ;;  %v12486_v58 = vpop.xlane.xlu1 %1913  ;;  %v16510_v5 = vld [vmem:[#allocation123_spill] sm:$0xff]  ;;  %v16511_v11 = vsub.f32 %v16414_v26, %v12157_v0  ;;  %v16515_v46 = vsub.f32 %v16419_v54, %v12157_v0  ;;  %v16517_v26 = vld [vmem:[#allocation106_spill] sm:$0xff]  ;;  %v16521_v54 = vld [vmem:[#allocation129_spill] sm:$0xff] }
 0x35d   : > { %16500 = vst [vmem:[#allocation41_spill] sm:$0xff] %v12468_v10  ;;  %v12475_v44 = vpop.eup %6457  ;;  %6477 = vpow2.f32 %v3832_v24  ;;  %v3840_v10 = vmul.f32 1.442695, %v16506_v40  ;;  %16508 = vst [vmem:[#allocation174_spill] sm:$0xff] %v12486_v58 }
 0x35e   : > { %16503 = vst [vmem:[#allocation77_spill] sm:$0xff] %v12475_v44  ;;  %v12484_v21 = vpop.eup %6459  ;;  %6479 = vpow2.f32 %v3834_v30  ;;  %v3842_v51 = vmul.f32 1.442695, %v16511_v11  ;;  %v3844_v63 = vmul.f32 1.442695, %v16515_v46  ;;  %v12506_v30 = vmax.f32 %v3578_v62, %v3579_v17 }
 0x35f   : > { %16507 = vst [vmem:[#allocation52_spill] sm:$0xff] %v12484_v21  ;;  %v12495_v24 = vpop.eup %6461  ;;  %v16514_v21 = vld [vmem:[#allocation124_spill] sm:$0xff]  ;;  %6481 = vpow2.f32 %v3836_v16  ;;  %v16518_v44 = vsub.f32 %v16422_v56, %v12157_v0  ;;  %v16520_v16 = vld [vmem:[#allocation125_spill] sm:$0xff]  ;;  %v16522_v62 = vsub.f32 %v16423_v7, %v12157_v0 }
 0x360   : > { %16512 = vst [vmem:[#allocation36_spill] sm:$0xff] %v12495_v24  ;;  %v12504_v58 = vpop.eup %6463  ;;  %6483 = vpow2.f32 %v3838_v15  ;;  %v3596_v15 = vrot.slane %v3595_v4, 4  ;;  %v12547_v56 = vpop.xlane.xlu1 %1917 }
 0x361   : > { %16516 = vst [vmem:[#allocation113_spill] sm:$0xff] %v12504_v58  ;;  %v3846_v40 = vmul.f32 1.442695, %v16518_v44  ;;  %v12513_v34 = vpop.eup %6465  ;;  %6485 = vpow2.f32 %v3840_v10  ;;  %v3848_v17 = vmul.f32 1.442695, %v16522_v62  ;;  %v16525_v44 = vsub.f32 %v16440_v57, %v12299_v60  ;;  %16531 = vst [vmem:[#allocation62_spill] sm:$0xff] %v12547_v56 }
 0x362   : > { %16519 = vst [vmem:[#allocation114_spill] sm:$0xff] %v12513_v34  ;;  %v12522_v58 = vpop.eup %6467  ;;  %6487 = vpow2.f32 %v3842_v51  ;;  %v16528_v62 = vsub.f32 %v16443_v8, %v12299_v60  ;;  %v16534_v8 = vld [vmem:[#allocation22_spill] sm:$0xff]  ;;  %v16535_v51 = vsub.f32 %v16428_v59, %v12157_v0  ;;  %v16536_v57 = vld [vmem:[#allocation153_spill] sm:$0xff] }
 0x363   : > { %16523 = vst [vmem:[#allocation178_spill] sm:$0xff] %v12522_v58  ;;  %v3858_v34 = vmul.f32 1.442695, %v16525_v44  ;;  %v12529_v48 = vpop.eup %6469  ;;  %6489 = vpow2.f32 %v3844_v63  ;;  %v16530_v44 = vsub.f32 %v16446_v25, %v12299_v60  ;;  %v12549_v63 = vpop.xlane.xlu0 %1915  ;;  %v3597_v25 = vmax.f32 %v3595_v4, %v3596_v15  ;;  %v16552_v15 = vld [vmem:[#allocation157_spill] sm:$0xff] }
 0x364   : > { %16526 = vst [vmem:[#allocation32_spill] sm:$0xff] %v12529_v48  ;;  %v3860_v58 = vmul.f32 1.442695, %v16528_v62  ;;  %v12538_v24 = vpop.eup %6471  ;;  %6491 = vpow2.f32 %v3846_v40  ;;  %16532 = vst [vmem:[#allocation48_spill] sm:$0xff] %v12549_v63  ;;  %v3850_v48 = vmul.f32 1.442695, %v16535_v51  ;;  %v4007_v63 = vadd.f32 %v12269_v49, %v12263_v33 }
 0x365   : > { %16529 = vst [vmem:[#allocation180_spill] sm:$0xff] %v12538_v24  ;;  %v3862_v10 = vmul.f32 1.442695, %v16530_v44  ;;  %v12551_v7 = vpop.eup %6473  ;;  %6493 = vpow2.f32 %v3848_v17  ;;  %v16537_v40 = vld [vmem:[#allocation90_spill] sm:$0xff]  ;;  %v16539_v44 = vsub.f32 %v16450_v23, %v12299_v60  ;;  %v16542_v51 = vld [vmem:[#allocation47_spill] sm:$0xff]  ;;  %v16547_v49 = vsub.f32 %v16434_v19, %v12157_v0 }
 0x366   : > { %16533 = vst [vmem:[#allocation112_spill] sm:$0xff] %v12551_v7  ;;  %v3986_v1 = vadd.f32 %v16537_v40, %v16536_v57  ;;  %v12560_v46 = vpop.eup %6475  ;;  %6495 = vpow2.f32 %v3858_v34  ;;  %v16541_v17 = vld [vmem:[#allocation126_spill] sm:$0xff]  ;;  %v16543_v57 = vsub.f32 %v16431_v37, %v12157_v0  ;;  %v12585_v40 = vpop.xlane.xlu1 %1921  ;;  %v4028_v33 = vadd.f32 %v12405_v45, %v12398_v14 }
 0x367   : > { %16538 = vst [vmem:[#allocation89_spill] sm:$0xff] %v12560_v46  ;;  %v3864_v56 = vmul.f32 1.442695, %v16539_v44  ;;  %v12567_v62 = vpop.eup %6477  ;;  %6497 = vpow2.f32 %v3860_v58  ;;  %v3854_v59 = vmul.f32 1.442695, %v16547_v49  ;;  %16548 = vst [vmem:[#allocation79_spill] sm:$0xff] %v12585_v40  ;;  %v12587_v11 = vpop.xlane.xlu0 %1919  ;;  %v16551_v58 = vsub.f32 %v16435_v27, %v12157_v0 }
 0x368   : > { %16540 = vst [vmem:[#allocation63_spill] sm:$0xff] %v12567_v62  ;;  %v3852_v4 = vmul.f32 1.442695, %v16543_v57  ;;  %v12576_v34 = vpop.eup %6479  ;;  %6499 = vpow2.f32 %v3862_v10  ;;  %16549 = vst [vmem:[#allocation43_spill] sm:$0xff] %v12587_v11  ;;  %v3987_v23 = vadd.f32 %v16552_v15, %v3986_v1  ;;  %v3598_v49 = vrot.slane %v3597_v25, 2  ;;  %v16556_v0 = vld [vmem:[#allocation109_spill] sm:$0xff] }
 0x369   : > { %16544 = vst [vmem:[#allocation181_spill] sm:$0xff] %v12576_v34  ;;  %v12589_v37 = vpop.eup %6481  ;;  %6501 = vpow2.f32 %v3850_v48  ;;  %v3856_v57 = vmul.f32 1.442695, %v16551_v58  ;;  %v16554_v19 = vsub.f32 %v16451_v61, %v12299_v60  ;;  %v4008_v11 = vadd.f32 %v12276_v29, %v4007_v63  ;;  %v16557_v1 = vld [vmem:[#allocation88_spill] sm:$0xff]  ;;  %v16560_v61 = vld [vmem:[#allocation53_spill] sm:$0xff] }
 0x36a   : > { %16550 = vst [vmem:[#allocation175_spill] sm:$0xff] %v12589_v37  ;;  %v12597_v44 = vpop.eup %6483  ;;  %6503 = vpow2.f32 %v3864_v56  ;;  %v16558_v14 = vsub.f32 %v16454_v18, %v12299_v60  ;;  %v16561_v63 = vsub.f32 %v16457_v28, %v12299_v60  ;;  %v4049_v27 = vadd.f32 %v12551_v7, %v12538_v24  ;;  %v12621_v15 = vpop.xlane.xlu1 %1925 }
 0x36b   : > { %16553 = vst [vmem:[#allocation184_spill] sm:$0xff] %v12597_v44  ;;  %v3866_v10 = vmul.f32 1.442695, %v16554_v19  ;;  %v12603_v48 = vpop.eup %6485  ;;  %6505 = vpow2.f32 %v3852_v4  ;;  %16562 = vst [vmem:[#allocation21_spill] sm:$0xff] %v12621_v15  ;;  %v12623_v4 = vpop.xlane.xlu0 %1923  ;;  %v16565_v18 = vsub.f32 %v16464_v50, %v12299_v60  ;;  %v16566_v19 = vld [vmem:[#allocation166_spill] sm:$0xff]  ;;  %v4029_v40 = vadd.f32 %v12414_v42, %v4028_v33  ;;  %v16579_v42 = vld [vmem:[#allocation97_spill] sm:$0xff] }
 0x36c   : > { %16555 = vst [vmem:[#allocation185_spill] sm:$0xff] %v12603_v48  ;;  %v3868_v45 = vmul.f32 1.442695, %v16558_v14  ;;  %v12612_v56 = vpop.eup %6487  ;;  %6507 = vpow2.f32 %v3854_v59  ;;  %v3870_v29 = vmul.f32 1.442695, %v16561_v63  ;;  %16563 = vst [vmem:[#allocation136_spill] sm:$0xff] %v12623_v4  ;;  %v3988_v59 = vadd.f32 %v16566_v19, %v3987_v23 }
 0x36d   : > { %16559 = vst [vmem:[#allocation55_spill] sm:$0xff] %v12612_v56  ;;  %v12625_v58 = vpop.eup %6489  ;;  %6509 = vpow2.f32 %v3856_v57  ;;  %v3872_v14 = vmul.f32 1.442695, %v16565_v18  ;;  %v3599_v63 = vmax.f32 %v3597_v25, %v3598_v49  ;;  %v16568_v24 = vsub.f32 %v16467_v32, %v12299_v60  ;;  %v16570_v57 = vld [vmem:[#allocation111_spill] sm:$0xff] }
 0x36e   : > { %16564 = vst [vmem:[#allocation176_spill] sm:$0xff] %v12625_v58  ;;  %v12632_v28 = vpop.eup %6491  ;;  %6511 = vpow2.f32 %v3866_v10  ;;  %v4009_v4 = vadd.f32 %v12288_v31, %v4008_v11  ;;  %v16571_v18 = vld [vmem:[#allocation131_spill] sm:$0xff]  ;;  %v16572_v33 = vsub.f32 %v16468_v43, %v12299_v60  ;;  %v4050_v10 = vadd.f32 %v12560_v46, %v4049_v27  ;;  %v12655_v50 = vpop.xlane.xlu1 %1865  ;;  %v16582_v46 = vld [vmem:[#allocation118_spill] sm:$0xff] }
 0x36f   : > { %16567 = vst [vmem:[#allocation101_spill] sm:$0xff] %v12632_v28  ;;  %v3874_v7 = vmul.f32 1.442695, %v16568_v24  ;;  %v12638_v15 = vpop.eup %6493  ;;  %6513 = vpow2.f32 %v3868_v45  ;;  %v16574_v24 = vsub.f32 %v16471_v2, %v12299_v60  ;;  %16575 = vst [vmem:[#allocation187_spill] sm:$0xff] %v12655_v50  ;;  %v12657_v23 = vpop.xlane.xlu0 %1863  ;;  %v16578_v43 = vsub.f32 %v16474_v38, %v12299_v60 }
 0x370   : > { %16569 = vst [vmem:[#allocation116_spill] sm:$0xff] %v12638_v15  ;;  %v3876_v25 = vmul.f32 1.442695, %v16572_v33  ;;  %v12647_v49 = vpop.eup %6495  ;;  %6515 = vpow2.f32 %v3870_v29  ;;  %16576 = vst [vmem:[#allocation117_spill] sm:$0xff] %v12657_v23  ;;  %v3989_v32 = vadd.f32 %v16579_v42, %v3988_v59  ;;  %v4030_v29 = vadd.f32 %v12422_v6, %v4029_v40 }
 0x371   : > { %16573 = vst [vmem:[#allocation35_spill] sm:$0xff] %v12647_v49  ;;  %v3878_v11 = vmul.f32 1.442695, %v16574_v24  ;;  %v12659_v45 = vpop.eup %6497  ;;  %6517 = vpow2.f32 %v3872_v14  ;;  %v3880_v33 = vmul.f32 1.442695, %v16578_v43  ;;  %v3600_v2 = vrot.slane %v3599_v63, 1 }
 0x372   : > { %16577 = vst [vmem:[#allocation72_spill] sm:$0xff] %v12659_v45  ;;  %v12666_v31 = vpop.eup %6499  ;;  %6519 = vpow2.f32 %v3874_v7  ;;  %v16581_v27 = vsub.f32 %v16369_v36, %v12407_v35  ;;  %v4010_v19 = vadd.f32 %v16582_v46, %v4009_v4  ;;  %v16584_v14 = vld [vmem:[#allocation132_spill] sm:$0xff]  ;;  %v16585_v59 = vsub.f32 %v16368_v3, %v12407_v35  ;;  %v12690_v38 = vpop.xlane.xlu1 %1869 }
 0x373   : > { %16580 = vst [vmem:[#allocation44_spill] sm:$0xff] %v12666_v31  ;;  %v12672_v23 = vpop.eup %6501  ;;  %6521 = vpow2.f32 %v3876_v25  ;;  %v4070_v43 = vadd.f32 %v12659_v45, %v12647_v49  ;;  %v16587_v36 = vsub.f32 %v16497_v39, %v12407_v35  ;;  %v4051_v25 = vadd.f32 %v12567_v62, %v4050_v10  ;;  %16589 = vst [vmem:[#allocation188_spill] sm:$0xff] %v12690_v38  ;;  %v12692_v3 = vpop.xlane.xlu0 %1867  ;;  %v16592_v49 = vld [vmem:[#allocation158_spill] sm:$0xff] }
 0x374   : > { %v3890_v24 = vmul.f32 1.442695, %v16581_v27  ;;  %16583 = vst [vmem:[#allocation102_spill] sm:$0xff] %v12672_v23  ;;  %v3892_v40 = vmul.f32 1.442695, %v16585_v59  ;;  %v12681_v7 = vpop.eup %6503  ;;  %6523 = vpow2.f32 %v3878_v11  ;;  %v16588_v27 = vsub.f32 %v16498_v53, %v12407_v35  ;;  %16590 = vst [vmem:[#allocation20_spill] sm:$0xff] %v12692_v3 }
 0x375   : > { %16586 = vst [vmem:[#allocation42_spill] sm:$0xff] %v12681_v7  ;;  %v3894_v4 = vmul.f32 1.442695, %v16587_v36  ;;  %v12694_v59 = vpop.eup %6505  ;;  %6525 = vpow2.f32 %v3880_v33  ;;  %v3990_v45 = vadd.f32 %v16592_v49, %v3989_v32  ;;  %v4031_v11 = vadd.f32 %v12431_v20, %v4030_v29  ;;  %v16597_v33 = vld [vmem:[#allocation133_spill] sm:$0xff] }
 0x376   : > { %v3896_v6 = vmul.f32 1.442695, %v16588_v27  ;;  %16591 = vst [vmem:[#allocation179_spill] sm:$0xff] %v12694_v59  ;;  %v4071_v39 = vadd.f32 %v12666_v31, %v4070_v43  ;;  %v12699_v36 = vpop.eup %6507  ;;  %v12701_v46 = vmax.f32 %v3599_v63, %v3600_v2  ;;  %v16594_v53 = vsub.f32 %v16482_v41, %v12299_v60  ;;  %v16595_v27 = vld [vmem:[#allocation85_spill] sm:$0xff]  ;;  %v16600_v41 = vld [vmem:[#allocation27_spill] sm:$0xff]  ;;  %v12723_v32 = vpop.xlane.xlu1 %1873 }
 0x377   : > { %16593 = vst [vmem:[#allocation46_spill] sm:$0xff] %v12699_v36  ;;  %6527 = vpow2.f32 %v3890_v24  ;;  %v4011_v62 = vadd.f32 %v16595_v27, %v4010_v19  ;;  %v12707_v42 = vpop.eup %6509  ;;  %v16598_v29 = vsub.f32 %v16501_v47, %v12407_v35  ;;  %v16601_v24 = vld [vmem:[#allocation93_spill] sm:$0xff]  ;;  %v4052_v20 = vadd.f32 %v12576_v34, %v4051_v25  ;;  %16603 = vst [vmem:[#allocation75_spill] sm:$0xff] %v12723_v32  ;;  %v16612_v32 = vld [vmem:[#allocation155_spill] sm:$0xff] }
 0x378   : > { %v3882_v10 = vmul.f32 1.442695, %v16594_v53  ;;  %16596 = vst [vmem:[#allocation121_spill] sm:$0xff] %v12707_v42  ;;  %6529 = vpow2.f32 %v3892_v40  ;;  %v4072_v63 = vadd.f32 %v12681_v7, %v4071_v39  ;;  %v12715_v2 = vpop.eup %6511  ;;  %v16602_v19 = vsub.f32 %v16601_v24, %v12299_v60  ;;  %v12725_v40 = vpop.xlane.xlu0 %1871  ;;  %v16607_v7 = vld [vmem:[#allocation161_spill] sm:$0xff] }
 0x379   : > { %v3898_v43 = vmul.f32 1.442695, %v16598_v29  ;;  %16599 = vst [vmem:[#allocation11_spill] sm:$0xff] %v12715_v2  ;;  %6531 = vpow2.f32 %v3894_v4  ;;  %16604 = vst [vmem:[#allocation68_spill] sm:$0xff] %v12725_v40  ;;  %v12727_v47 = vpop.eup %6513  ;;  %v16606_v39 = vsub.f32 %v16504_v13, %v12407_v35  ;;  %v3991_v53 = vadd.f32 %v16607_v7, %v3990_v45  ;;  %v16609_v4 = vld [vmem:[#allocation26_spill] sm:$0xff]  ;;  %v16615_v45 = vld [vmem:[#allocation60_spill] sm:$0xff] }
 0x37a   : > { %v3884_v31 = vmul.f32 1.442695, %v16602_v19  ;;  %16605 = vst [vmem:[#allocation15_spill] sm:$0xff] %v12727_v47  ;;  %6533 = vpow2.f32 %v3896_v6  ;;  %v4032_v27 = vadd.f32 %v12442_v55, %v4031_v11  ;;  %v12734_v24 = vpop.eup %6515  ;;  %v16610_v19 = vld [vmem:[#allocation16_spill] sm:$0xff]  ;;  %v4012_v6 = vadd.f32 %v16612_v32, %v4011_v62  ;;  %v16614_v13 = vld [vmem:[#allocation138_spill] sm:$0xff] }
 0x37b   : > { %v3900_v29 = vmul.f32 1.442695, %v16606_v39  ;;  %16608 = vst [vmem:[#allocation64_spill] sm:$0xff] %v12734_v24  ;;  %6535 = vpow2.f32 %v3882_v10  ;;  %v16611_v34 = vsub.f32 %v16610_v19, %v12299_v60  ;;  %v12742_v40 = vpop.eup %6517  ;;  %v16616_v11 = vsub.f32 %v16615_v45, %v12407_v35  ;;  %v16618_v10 = vld [vmem:[#allocation69_spill] sm:$0xff]  ;;  %v12758_v39 = vpop.xlane.xlu1 %1877 }
 0x37c   : > { %16613 = vst [vmem:[#allocation76_spill] sm:$0xff] %v12742_v40  ;;  %6537 = vpow2.f32 %v3898_v43  ;;  %v4073_v7 = vadd.f32 %v12715_v2, %v4072_v63  ;;  %v12750_v25 = vpop.eup %6519  ;;  %v4053_v38 = vadd.f32 %v12589_v37, %v4052_v20  ;;  %16621 = vst [vmem:[#allocation19_spill] sm:$0xff] %v12758_v39  ;;  %v12760_v43 = vpop.xlane.xlu0 %1875  ;;  %v16624_v63 = vsub.f32 %v16510_v5, %v12407_v35  ;;  %v16625_v2 = vld [vmem:[#allocation165_spill] sm:$0xff]  ;;  %v16630_v37 = vld [vmem:[#allocation156_spill] sm:$0xff] }
 0x37d   : > { %v3886_v49 = vmul.f32 1.442695, %v16611_v34  ;;  %v3902_v55 = vmul.f32 1.442695, %v16616_v11  ;;  %16617 = vst [vmem:[#allocation45_spill] sm:$0xff] %v12750_v25  ;;  %6539 = vpow2.f32 %v3884_v31  ;;  %v16619_v34 = vld [vmem:[#allocation83_spill] sm:$0xff]  ;;  %v12762_v45 = vpop.eup %6521  ;;  %v3992_v19 = vadd.f32 %v16625_v2, %v3991_v53 }
 0x37e   : > { %v16620_v62 = vsub.f32 %v16619_v34, %v12299_v60  ;;  %16622 = vst [vmem:[#allocation86_spill] sm:$0xff] %v12760_v43  ;;  %16623 = vst [vmem:[#allocation122_spill] sm:$0xff] %v12762_v45  ;;  %6541 = vpow2.f32 %v3900_v29  ;;  %v3904_v11 = vmul.f32 1.442695, %v16624_v63  ;;  %v16626_v31 = vld [vmem:[#allocation57_spill] sm:$0xff]  ;;  %v12769_v50 = vpop.eup %6523  ;;  %v16628_v60 = vld [vmem:[#allocation139_spill] sm:$0xff]  ;;  %v16629_v34 = vsub.f32 %v16513_v22, %v12407_v35 }
 0x37f   : > { %v4033_v3 = vadd.f32 %v16626_v31, %v4032_v27  ;;  %16627 = vst [vmem:[#allocation59_spill] sm:$0xff] %v12769_v50  ;;  %6543 = vpow2.f32 %v3886_v49  ;;  %v4013_v29 = vadd.f32 %v16630_v37, %v4012_v6  ;;  %v12777_v39 = vpop.eup %6525  ;;  %v16632_v5 = vld [vmem:[#allocation168_spill] sm:$0xff]  ;;  %v16633_v27 = vsub.f32 %v16514_v21, %v12407_v35  ;;  %v16635_v49 = vld [vmem:[#allocation142_spill] sm:$0xff]  ;;  %v12793_v63 = vpop.xlane.xlu1 %1881 }
 0x380   : > { %v3888_v32 = vmul.f32 1.442695, %v16620_v62  ;;  %v3906_v62 = vmul.f32 1.442695, %v16629_v34  ;;  %16631 = vst [vmem:[#allocation61_spill] sm:$0xff] %v12777_v39  ;;  %6545 = vpow2.f32 %v3902_v55  ;;  %v4074_v31 = vadd.f32 %v12727_v47, %v4073_v7  ;;  %16637 = vst [vmem:[#allocation123_spill] sm:$0xff] %v12793_v63  ;;  %v12795_v55 = vpop.xlane.xlu0 %1879 }
 0x381   : > { %v3908_v53 = vmul.f32 1.442695, %v16633_v27  ;;  %v12785_v20 = vpop.eup %6527  ;;  %v16636_v6 = vsub.f32 %v16517_v26, %v12407_v35  ;;  %v4054_v37 = vadd.f32 %v12597_v44, %v4053_v38  ;;  %v16639_v7 = vsub.f32 %v16520_v16, %v12407_v35  ;;  %v16640_v47 = vld [vmem:[#allocation94_spill] sm:$0xff]  ;;  %v16646_v16 = vld [vmem:[#allocation143_spill] sm:$0xff] }
 0x382   : > { %16634 = vst [vmem:[#allocation58_spill] sm:$0xff] %v12785_v20  ;;  %6547 = vpow2.f32 %v3888_v32  ;;  %v12797_v21 = vpop.eup %6529  ;;  %v3993_v22 = vadd.f32 %v16640_v47, %v3992_v19  ;;  %v16641_v32 = vld [vmem:[#allocation81_spill] sm:$0xff]  ;;  %v16643_v26 = vsub.f32 %v16408_v12, %v12506_v30  ;;  %v16649_v12 = vsub.f32 %v16534_v8, %v12506_v30 }
 0x383   : > { %v3910_v34 = vmul.f32 1.442695, %v16636_v6  ;;  %16638 = vst [vmem:[#allocation25_spill] sm:$0xff] %v12797_v21  ;;  %6549 = vpow2.f32 %v3904_v11  ;;  %v3912_v27 = vmul.f32 1.442695, %v16639_v7  ;;  %v4034_v2 = vadd.f32 %v16641_v32, %v4033_v3  ;;  %v12804_v43 = vpop.eup %6531  ;;  %v16644_v6 = vld [vmem:[#allocation159_spill] sm:$0xff] }
 0x384   : > { %16642 = vst [vmem:[#allocation124_spill] sm:$0xff] %v12804_v43  ;;  %6551 = vpow2.f32 %v3906_v62  ;;  %v3922_v38 = vmul.f32 1.442695, %v16643_v26  ;;  %v4014_v44 = vadd.f32 %v16644_v6, %v4013_v29  ;;  %v4091_v11 = vadd.f32 %v12797_v21, %v12785_v20  ;;  %v12812_v63 = vpop.eup %6533  ;;  %v12827_v21 = vpop.xlane.xlu1 %1885 }
 0x385   : > { %16645 = vst [vmem:[#allocation106_spill] sm:$0xff] %v12812_v63  ;;  %6553 = vpow2.f32 %v3908_v53  ;;  %v16647_v3 = vsub.f32 %v16407_v9, %v12506_v30  ;;  %v4075_v62 = vadd.f32 %v12734_v24, %v4074_v31  ;;  %v12820_v32 = vpop.eup %6535  ;;  %v3926_v29 = vmul.f32 1.442695, %v16649_v12  ;;  %v12829_v53 = vpop.xlane.xlu0 %1883  ;;  %v16653_v24 = vld [vmem:[#allocation41_spill] sm:$0xff] }
 0x386   : > { %16648 = vst [vmem:[#allocation125_spill] sm:$0xff] %v12820_v32  ;;  %6555 = vpow2.f32 %v3910_v34  ;;  %v4055_v26 = vadd.f32 %v12603_v48, %v4054_v37  ;;  %v4092_v20 = vadd.f32 %v12804_v43, %v4091_v11  ;;  %v12831_v7 = vpop.eup %6537  ;;  %v16651_v9 = vsub.f32 %v16541_v17, %v12506_v30  ;;  %v16652_v34 = vld [vmem:[#allocation56_spill] sm:$0xff]  ;;  %v16656_v43 = vld [vmem:[#allocation71_spill] sm:$0xff]  ;;  %v16658_v17 = vld [vmem:[#allocation50_spill] sm:$0xff] }
 0x387   : > { %v3924_v19 = vmul.f32 1.442695, %v16647_v3  ;;  %16650 = vst [vmem:[#allocation129_spill] sm:$0xff] %v12831_v7  ;;  %6557 = vpow2.f32 %v3912_v27  ;;  %v3994_v3 = vadd.f32 %v16652_v34, %v3993_v22  ;;  %v4035_v8 = vadd.f32 %v16653_v24, %v4034_v2  ;;  %v12838_v12 = vpop.eup %6539 }
 0x388   : > { %v3928_v31 = vmul.f32 1.442695, %v16651_v9  ;;  %16654 = vst [vmem:[#allocation22_spill] sm:$0xff] %v12838_v12  ;;  %v16655_v37 = vsub.f32 %v16521_v54, %v12407_v35  ;;  %6559 = vpow2.f32 %v3922_v38  ;;  %v4015_v48 = vadd.f32 %v16656_v43, %v4014_v44  ;;  %v12845_v27 = vpop.eup %6541  ;;  %v16661_v54 = vld [vmem:[#allocation49_spill] sm:$0xff] }
 0x389   : > { %v4093_v6 = vadd.f32 %v12812_v63, %v4092_v20  ;;  %16657 = vst [vmem:[#allocation126_spill] sm:$0xff] %v12845_v27  ;;  %6561 = vpow2.f32 %v3924_v19  ;;  %v16659_v2 = vsub.f32 %v16542_v51, %v12506_v30  ;;  %v4076_v24 = vadd.f32 %v12742_v40, %v4075_v62  ;;  %v12853_v47 = vpop.eup %6543  ;;  %v12860_v63 = vpop.xlane.xlu1 %1889  ;;  %v16665_v51 = vld [vmem:[#allocation137_spill] sm:$0xff]  ;;  %v16667_v40 = vld [vmem:[#allocation99_spill] sm:$0xff] }
 0x38a   : > { %v3914_v11 = vmul.f32 1.442695, %v16655_v37  ;;  %16660 = vst [vmem:[#allocation47_spill] sm:$0xff] %v12853_v47  ;;  %v16662_v38 = vsub.f32 %v16661_v54, %v12407_v35  ;;  %6563 = vpow2.f32 %v3926_v29  ;;  %v4056_v20 = vadd.f32 %v12612_v56, %v4055_v26  ;;  %16663 = vst [vmem:[#allocation109_spill] sm:$0xff] %v12860_v63  ;;  %v12862_v19 = vpop.xlane.xlu0 %1887  ;;  %v12864_v9 = vpop.eup %6545  ;;  %v16668_v54 = vld [vmem:[#allocation77_spill] sm:$0xff]  ;;  %v16670_v26 = vld [vmem:[#allocation108_spill] sm:$0xff] }
 0x38b   : > { %v3930_v22 = vmul.f32 1.442695, %v16659_v2  ;;  %v4094_v37 = vadd.f32 %v12831_v7, %v4093_v6  ;;  %16664 = vst [vmem:[#allocation88_spill] sm:$0xff] %v12864_v9  ;;  %6565 = vpow2.f32 %v3928_v31  ;;  %v16666_v62 = vsub.f32 %v16665_v51, %v12506_v30  ;;  %v16672_v56 = vld [vmem:[#allocation163_spill] sm:$0xff]  ;;  %v16674_v51 = vld [vmem:[#allocation17_spill] sm:$0xff] }
 0x38c   : > { %v3916_v44 = vmul.f32 1.442695, %v16662_v38  ;;  %v3995_v43 = vadd.f32 %v16667_v40, %v3994_v3  ;;  %v4036_v38 = vadd.f32 %v16668_v54, %v4035_v8  ;;  %v12871_v29 = vpop.eup %6547  ;;  %6567 = vpow2.f32 %v3914_v11  ;;  %v16675_v3 = vld [vmem:[#allocation110_spill] sm:$0xff] }
 0x38d   : > { %v3932_v2 = vmul.f32 1.442695, %v16666_v62  ;;  %16669 = vst [vmem:[#allocation53_spill] sm:$0xff] %v12871_v29  ;;  %v16671_v6 = vsub.f32 %v16670_v26, %v12407_v35  ;;  %v4016_v34 = vadd.f32 %v16672_v56, %v4015_v48  ;;  %v4095_v63 = vadd.f32 %v12845_v27, %v4094_v37  ;;  %v12878_v31 = vpop.eup %6549  ;;  %v16678_v26 = vld [vmem:[#allocation18_spill] sm:$0xff]  ;;  %v12893_v56 = vpop.xlane.xlu1 %1893 }
 0x38e   : > { %16673 = vst [vmem:[#allocation111_spill] sm:$0xff] %v12878_v31  ;;  %6569 = vpow2.f32 %v3930_v22  ;;  %v16676_v8 = vsub.f32 %v16675_v3, %v12506_v30  ;;  %v4077_v11 = vadd.f32 %v12750_v25, %v4076_v24  ;;  %v12886_v40 = vpop.eup %6551  ;;  %v16679_v48 = vsub.f32 %v16678_v26, %v12407_v35  ;;  %v12895_v22 = vpop.xlane.xlu0 %1891  ;;  %v16683_v25 = vld [vmem:[#allocation52_spill] sm:$0xff] }
 0x38f   : > { %v3918_v7 = vmul.f32 1.442695, %v16671_v6  ;;  %16677 = vst [vmem:[#allocation131_spill] sm:$0xff] %v12886_v40  ;;  %6571 = vpow2.f32 %v3916_v44  ;;  %v4057_v37 = vadd.f32 %v12625_v58, %v4056_v20  ;;  %v4096_v27 = vadd.f32 %v12864_v9, %v4095_v63  ;;  %v12897_v62 = vpop.eup %6553  ;;  %v16682_v44 = vld [vmem:[#allocation170_spill] sm:$0xff] }
 0x390   : > { %v3934_v54 = vmul.f32 1.442695, %v16676_v8  ;;  %v3920_v6 = vmul.f32 1.442695, %v16679_v48  ;;  %16680 = vst [vmem:[#allocation132_spill] sm:$0xff] %v12897_v62  ;;  %6573 = vpow2.f32 %v3932_v2  ;;  %v16681_v24 = vsub.f32 %v16556_v0, %v12506_v30  ;;  %v12904_v26 = vpop.eup %6555  ;;  %v16686_v48 = vld [vmem:[#allocation164_spill] sm:$0xff] }
 0x391   : > { %v3996_v8 = vadd.f32 %v16682_v44, %v3995_v43  ;;  %v4037_v35 = vadd.f32 %v16683_v25, %v4036_v38  ;;  %16684 = vst [vmem:[#allocation133_spill] sm:$0xff] %v12904_v26  ;;  %6575 = vpow2.f32 %v3918_v7  ;;  %v16685_v63 = vsub.f32 %v16557_v1, %v12506_v30  ;;  %v12911_v2 = vpop.eup %6557 }
 0x392   : > { %v3936_v3 = vmul.f32 1.442695, %v16681_v24  ;;  %v4017_v9 = vadd.f32 %v16686_v48, %v4016_v34  ;;  %v4097_v58 = vadd.f32 %v12878_v31, %v4096_v27  ;;  %16687 = vst [vmem:[#allocation27_spill] sm:$0xff] %v12911_v2  ;;  %6577 = vpow2.f32 %v3934_v54  ;;  %v12920_v25 = vpop.eup %6559  ;;  %v16695_v31 = vld [vmem:[#allocation36_spill] sm:$0xff] }
 0x393   : > { %v3938_v20 = vmul.f32 1.442695, %v16685_v63  ;;  %v16688_v0 = vsub.f32 %v16560_v61, %v12506_v30  ;;  %v16689_v38 = vsub.f32 %v16570_v57, %v12506_v30  ;;  %v4078_v7 = vadd.f32 %v12762_v45, %v4077_v11  ;;  %16690 = vst [vmem:[#allocation93_spill] sm:$0xff] %v12920_v25  ;;  %v12927_v63 = vpop.xlane.xlu1 %1929  ;;  %v12929_v61 = vpop.xlane.xlu0 %1927 }
 0x394   : > { %6579 = vpow2.f32 %v3920_v6  ;;  %v16691_v1 = vsub.f32 %v16571_v18, %v12506_v30  ;;  %v4058_v27 = vadd.f32 %v12632_v28, %v4057_v37  ;;  %v4098_v54 = vadd.f32 %v12886_v40, %v4097_v58  ;;  %v16694_v6 = vld [vmem:[#allocation65_spill] sm:$0xff] }
 0x395   : > { %v3940_v43 = vmul.f32 1.442695, %v16688_v0  ;;  %v3942_v24 = vmul.f32 1.442695, %v16689_v38  ;;  %v12931_v0 = vpop.eup %6561  ;;  %6581 = vpow2.f32 %v3936_v3  ;;  %v16693_v57 = vsub.f32 %v16609_v4, %v12701_v46  ;;  %v16697_v37 = vld [vmem:[#allocation29_spill] sm:$0xff] }
 0x396   : > { %v3944_v34 = vmul.f32 1.442695, %v16691_v1  ;;  %16692 = vst [vmem:[#allocation26_spill] sm:$0xff] %v12931_v0  ;;  %v3997_v38 = vadd.f32 %v16694_v6, %v3996_v8  ;;  %v4038_v18 = vadd.f32 %v16695_v31, %v4037_v35  ;;  %v12938_v1 = vpop.eup %6563  ;;  %6583 = vpow2.f32 %v3938_v20 }
 0x397   : > { %v3954_v11 = vmul.f32 1.442695, %v16693_v57  ;;  %16696 = vst [vmem:[#allocation16_spill] sm:$0xff] %v12938_v1  ;;  %v4018_v58 = vadd.f32 %v16697_v37, %v4017_v9  ;;  %v4099_v40 = vadd.f32 %v12897_v62, %v4098_v54  ;;  %v4112_v45 = vadd.f32 %v12931_v0, %v12920_v25  ;;  %v12944_v28 = vpop.eup %6565  ;;  %v12960_v0 = vpop.xlane.xlu1 %1933  ;;  %v16706_v25 = vld [vmem:[#allocation113_spill] sm:$0xff] }
 0x398   : > { %16698 = vst [vmem:[#allocation138_spill] sm:$0xff] %v12944_v28  ;;  %6585 = vpow2.f32 %v3940_v43  ;;  %v16699_v4 = vsub.f32 %v11965_v52, %v12506_v30  ;;  %v16700_v8 = vsub.f32 %v16614_v13, %v12701_v46  ;;  %v4079_v20 = vadd.f32 %v12769_v50, %v4078_v7  ;;  %v12953_v57 = vpop.eup %6567  ;;  %v12962_v52 = vpop.xlane.xlu0 %1931 }
 0x399   : > { %16701 = vst [vmem:[#allocation60_spill] sm:$0xff] %v12953_v57  ;;  %6587 = vpow2.f32 %v3942_v24  ;;  %v16702_v9 = vsub.f32 %v16618_v10, %v12701_v46  ;;  %v4059_v62 = vadd.f32 %v12638_v15, %v4058_v27  ;;  %v4113_v43 = vadd.f32 %v12938_v1, %v4112_v45  ;;  %v16705_v24 = vld [vmem:[#allocation38_spill] sm:$0xff] }
 0x39a   : > { %v3946_v3 = vmul.f32 1.442695, %v16699_v4  ;;  %v3956_v35 = vmul.f32 1.442695, %v16700_v8  ;;  %v12964_v4 = vpop.eup %6569  ;;  %6589 = vpow2.f32 %v3944_v34  ;;  %v16704_v13 = vsub.f32 %v16628_v60, %v12701_v46  ;;  %v16708_v27 = vld [vmem:[#allocation98_spill] sm:$0xff] }
 0x39b   : > { %v3958_v54 = vmul.f32 1.442695, %v16702_v9  ;;  %16703 = vst [vmem:[#allocation69_spill] sm:$0xff] %v12964_v4  ;;  %v3998_v8 = vadd.f32 %v16705_v24, %v3997_v38  ;;  %v4039_v10 = vadd.f32 %v16706_v25, %v4038_v18  ;;  %v12971_v9 = vpop.eup %6571  ;;  %6591 = vpow2.f32 %v3954_v11 }
 0x39c   : > { %v3960_v7 = vmul.f32 1.442695, %v16704_v13  ;;  %16707 = vst [vmem:[#allocation83_spill] sm:$0xff] %v12971_v9  ;;  %v4019_v45 = vadd.f32 %v16708_v27, %v4018_v58  ;;  %v4100_v1 = vadd.f32 %v12904_v26, %v4099_v40  ;;  %v4114_v50 = vadd.f32 %v12944_v28, %v4113_v43  ;;  %v12976_v15 = vpop.eup %6573 }
 0x39d   : > { %16709 = vst [vmem:[#allocation139_spill] sm:$0xff] %v12976_v15  ;;  %v16710_v34 = vsub.f32 %v16584_v14, %v12506_v30  ;;  %6593 = vpow2.f32 %v3956_v35  ;;  %v16711_v38 = vsub.f32 %v16632_v5, %v12701_v46  ;;  %v4080_v13 = vadd.f32 %v12777_v39, %v4079_v20  ;;  %v12985_v11 = vpop.eup %6575  ;;  %v12992_v14 = vpop.xlane.xlu1 %1937 }
 0x39e   : > { %16712 = vst [vmem:[#allocation168_spill] sm:$0xff] %v12985_v11  ;;  %v16713_v40 = vsub.f32 %v16597_v33, %v12506_v30  ;;  %6595 = vpow2.f32 %v3958_v54  ;;  %v4060_v43 = vadd.f32 %v12672_v23, %v4059_v62  ;;  %v4115_v26 = vadd.f32 %v12964_v4, %v4114_v50  ;;  %v12994_v35 = vpop.xlane.xlu0 %1935  ;;  %v16717_v33 = vld [vmem:[#allocation114_spill] sm:$0xff]  ;;  %v16719_v62 = vld [vmem:[#allocation183_spill] sm:$0xff] }
 0x39f   : > { %v3948_v60 = vmul.f32 1.442695, %v16710_v34  ;;  %v3962_v18 = vmul.f32 1.442695, %v16711_v38  ;;  %v12996_v34 = vpop.eup %6577  ;;  %6597 = vpow2.f32 %v3960_v7  ;;  %v16715_v5 = vsub.f32 %v16635_v49, %v12701_v46  ;;  %v16716_v38 = vld [vmem:[#allocation115_spill] sm:$0xff]  ;;  %v16721_v7 = vld [vmem:[#allocation144_spill] sm:$0xff] }
 0x3a0   : > { %v3950_v58 = vmul.f32 1.442695, %v16713_v40  ;;  %16714 = vst [vmem:[#allocation142_spill] sm:$0xff] %v12996_v34  ;;  %v3999_v28 = vadd.f32 %v16716_v38, %v3998_v8  ;;  %v4040_v40 = vadd.f32 %v16717_v33, %v4039_v10  ;;  %v13003_v54 = vpop.eup %6579  ;;  %6599 = vpow2.f32 %v3946_v3 }
 0x3a1   : > { %v3964_v20 = vmul.f32 1.442695, %v16715_v5  ;;  %16718 = vst [vmem:[#allocation143_spill] sm:$0xff] %v13003_v54  ;;  %v4020_v50 = vadd.f32 %v16719_v62, %v4019_v45  ;;  %v4101_v4 = vadd.f32 %v12911_v2, %v4100_v1  ;;  %v4116_v39 = vadd.f32 %v12976_v15, %v4115_v26  ;;  %v13008_v23 = vpop.eup %6581  ;;  %v13023_v2 = vpop.xlane.xlu1 %1941  ;;  %v16728_v15 = vld [vmem:[#allocation178_spill] sm:$0xff] }
 0x3a2   : > { %16720 = vst [vmem:[#allocation50_spill] sm:$0xff] %v13008_v23  ;;  %v3723_v25 = vsub.f32 %v16721_v7, %v12701_v46  ;;  %6601 = vpow2.f32 %v3962_v18  ;;  %v16722_v49 = vsub.f32 %v16646_v16, %v12701_v46  ;;  %v4081_v10 = vadd.f32 %v12820_v32, %v4080_v13  ;;  %v13016_v5 = vpop.eup %6583  ;;  %v13025_v18 = vpop.xlane.xlu0 %1939 }
 0x3a3   : > { %16723 = vst [vmem:[#allocation49_spill] sm:$0xff] %v13016_v5  ;;  %6603 = vpow2.f32 %v3948_v60  ;;  %v16724_v1 = vsub.f32 %v16600_v41, %v12506_v30  ;;  %v4061_v26 = vadd.f32 %v12694_v59, %v4060_v43  ;;  %v4117_v45 = vadd.f32 %v12996_v34, %v4116_v39  ;;  %v13027_v7 = vpop.eup %6585  ;;  %v16727_v60 = vld [vmem:[#allocation186_spill] sm:$0xff]  ;;  %v16730_v43 = vld [vmem:[#allocation167_spill] sm:$0xff] }
 0x3a4   : > { %v3966_v8 = vmul.f32 1.442695, %v16722_v49  ;;  %16725 = vst [vmem:[#allocation137_spill] sm:$0xff] %v13027_v7  ;;  %6605 = vpow2.f32 %v3964_v20  ;;  %v16726_v16 = vsub.f32 %v16658_v17, %v12701_v46  ;;  %v4000_v49 = vadd.f32 %v16727_v60, %v3999_v28  ;;  %v13034_v41 = vpop.eup %6587  ;;  %v16732_v20 = vld [vmem:[#allocation28_spill] sm:$0xff] }
 0x3a5   : > { %v3952_v3 = vmul.f32 1.442695, %v16724_v1  ;;  %v4041_v30 = vadd.f32 %v16728_v15, %v4040_v40  ;;  %16729 = vst [vmem:[#allocation108_spill] sm:$0xff] %v13034_v41  ;;  %6607 = vpow2.f32 %v3950_v58  ;;  %v4021_v39 = vadd.f32 %v16730_v43, %v4020_v50  ;;  %v13039_v32 = vpop.eup %6589  ;;  %v16735_v58 = vld [vmem:[#allocation40_spill] sm:$0xff] }
 0x3a6   : > { %v3968_v13 = vmul.f32 1.442695, %v16726_v16  ;;  %v4102_v1 = vadd.f32 %v12953_v57, %v4101_v4  ;;  %v4118_v34 = vadd.f32 %v13008_v23, %v4117_v45  ;;  %16731 = vst [vmem:[#allocation17_spill] sm:$0xff] %v13039_v32  ;;  %v3724_v59 = vsub.f32 %v16732_v20, %v12701_v46  ;;  %v13047_v16 = vpop.eup %6591  ;;  %v13053_v57 = vpop.xlane.xlu1 %1945 }
 0x3a7   : > { %6609 = vpow2.f32 %v3966_v8  ;;  %v16733_v28 = vsub.f32 %v16674_v51, %v12701_v46  ;;  %v4082_v40 = vadd.f32 %v12838_v12, %v4081_v10  ;;  %16734 = vst [vmem:[#allocation110_spill] sm:$0xff] %v13047_v16  ;;  %v3725_v50 = vsub.f32 %v16735_v58, %v12701_v46  ;;  %v13055_v20 = vpop.xlane.xlu0 %1943  ;;  %v13057_v8 = vpop.eup %6593  ;;  %v16737_v10 = vld [vmem:[#allocation32_spill] sm:$0xff] }
 0x3a8   : > { %6611 = vpow2.f32 %v3952_v3  ;;  %v4062_v4 = vadd.f32 %v12699_v36, %v4061_v26  ;;  %v4119_v45 = vadd.f32 %v13016_v5, %v4118_v34  ;;  %16736 = vst [vmem:[#allocation18_spill] sm:$0xff] %v13057_v8  ;;  %v3972_v51 = vmul.f32 1.442695, %v3723_v25  ;;  %v13060_v12 = vpop.eup %6595  ;;  %v16740_v5 = vld [vmem:[#allocation147_spill] sm:$0xff] }
 0x3a9   : > { %v3970_v17 = vmul.f32 1.442695, %v16733_v28  ;;  %6613 = vpow2.f32 %v3968_v13  ;;  %v4001_v28 = vrot.slane %v4000_v49, 4  ;;  %v4042_v23 = vadd.f32 %v16737_v10, %v4041_v30  ;;  %16738 = vst [vmem:[#allocation144_spill] sm:$0xff] %v13060_v12  ;;  %v13066_v58 = vpop.eup %6597  ;;  %v16742_v10 = vld [vmem:[#allocation148_spill] sm:$0xff] }
 0x3aa   : > { %v4022_v15 = vrot.slane %v4021_v39, 4  ;;  %v4103_v3 = vadd.f32 %v12971_v9, %v4102_v1  ;;  %v4120_v26 = vadd.f32 %v13027_v7, %v4119_v45  ;;  %v4133_v34 = vadd.f32 %v13057_v8, %v13047_v16  ;;  %16739 = vst [vmem:[#allocation28_spill] sm:$0xff] %v13066_v58  ;;  %v13071_v30 = vpop.eup %6599  ;;  %v13078_v7 = vpop.xlane.xlu1 %1949 }
 0x3ab   : > { %v3726_v36 = vsub.f32 %v16740_v5, %v12701_v46  ;;  %6615 = vpow2.f32 %v3970_v17  ;;  %v3974_v25 = vmul.f32 1.442695, %v3724_v59  ;;  %v4083_v13 = vadd.f32 %v12853_v47, %v4082_v40  ;;  %16741 = vst [vmem:[#allocation40_spill] sm:$0xff] %v13071_v30  ;;  %16743 = vst [vmem:[#allocation147_spill] sm:$0xff] %v13078_v7  ;;  %v13080_v8 = vpop.xlane.xlu0 %1947 }
 0x3ac   : > { %v3727_v33 = vsub.f32 %v16742_v10, %v12701_v46  ;;  %v4063_v1 = vadd.f32 %v12707_v42, %v4062_v4  ;;  %v4121_v45 = vadd.f32 %v13034_v41, %v4120_v26  ;;  %v4134_v9 = vadd.f32 %v13060_v12, %v4133_v34  ;;  %v13082_v5 = vpop.eup %6601  ;;  %v16747_v41 = vld [vmem:[#allocation149_spill] sm:$0xff] }
 0x3ad   : > { %16744 = vst [vmem:[#allocation148_spill] sm:$0xff] %v13082_v5  ;;  %6617 = vpow2.f32 %v3972_v51  ;;  %v3976_v59 = vmul.f32 1.442695, %v3725_v50  ;;  %v4002_v17 = vadd.f32 %v4001_v28, %v4000_v49  ;;  %v4043_v40 = vrot.slane %v4042_v23, 4  ;;  %v13084_v16 = vpop.eup %6603  ;;  %v16749_v51 = vld [vmem:[#allocation151_spill] sm:$0xff] }
 0x3ae   : > { %16745 = vst [vmem:[#allocation189_spill] sm:$0xff] %v13084_v16  ;;  %v4023_v47 = vadd.f32 %v4022_v15, %v4021_v39  ;;  %v4104_v10 = vadd.f32 %v12985_v11, %v4103_v3  ;;  %v4122_v4 = vadd.f32 %v13039_v32, %v4121_v45  ;;  %v4135_v26 = vadd.f32 %v13066_v58, %v4134_v9  ;;  %v13089_v34 = vpop.eup %6605  ;;  %v13100_v9 = vpop.xlane.xlu1 %1953 }
 0x3af   : > { %16746 = vst [vmem:[#allocation190_spill] sm:$0xff] %v13089_v34  ;;  %v3728_v12 = vsub.f32 %v16747_v41, %v12701_v46  ;;  %6619 = vpow2.f32 %v3974_v25  ;;  %v3978_v42 = vmul.f32 1.442695, %v3726_v36  ;;  %v4084_v50 = vadd.f32 %v12871_v29, %v4083_v13  ;;  %v13094_v49 = vpop.eup %6607  ;;  %16750 = vst [vmem:[#allocation151_spill] sm:$0xff] %v13100_v9  ;;  %v13102_v45 = vpop.xlane.xlu0 %1951 }
 0x3b0   : > { %16748 = vst [vmem:[#allocation149_spill] sm:$0xff] %v13094_v49  ;;  %v3729_v15 = vsub.f32 %v16749_v51, %v12701_v46  ;;  %v4064_v39 = vrot.slane %v4063_v1, 4  ;;  %v4123_v28 = vadd.f32 %v13071_v30, %v4122_v4  ;;  %v4136_v3 = vadd.f32 %v13082_v5, %v4135_v26  ;;  %16751 = vst [vmem:[#allocation191_spill] sm:$0xff] %v13102_v45  ;;  %v16798_v45 = vld [vmem:[#allocation119_spill] sm:$0xff] }
 0x3b1   : > { %v13104_v11 = vpop.eup %6609  ;;  %6621 = vpow2.f32 %v3976_v59  ;;  %v3980_v36 = vmul.f32 1.442695, %v3727_v33  ;;  %v4003_v41 = vrot.slane %v4002_v17, 2  ;;  %v4044_v25 = vadd.f32 %v4043_v40, %v4042_v23 }
 0x3b2   : > { %16752 = vst [vmem:[#allocation192_spill] sm:$0xff] %v13104_v11  ;;  %v13106_v13 = vpop.eup %6611  ;;  %v4024_v32 = vrot.slane %v4023_v47, 2  ;;  %v4105_v46 = vadd.f32 %v13003_v54, %v4104_v10  ;;  %v4124_v51 = vadd.f32 %v13084_v16, %v4123_v28  ;;  %v4137_v4 = vadd.f32 %v13089_v34, %v4136_v3  ;;  %v13115_v23 = vpop.xlane.xlu1 %1957 }
 0x3b3   : > { %16753 = vst [vmem:[#allocation193_spill] sm:$0xff] %v13106_v13  ;;  %v13111_v26 = vpop.eup %6613  ;;  %6623 = vpow2.f32 %v3978_v42  ;;  %v3982_v30 = vmul.f32 1.442695, %v3728_v12  ;;  %v4085_v5 = vrot.slane %v4084_v50, 4  ;;  %v4065_v58 = vadd.f32 %v4064_v39, %v4063_v1  ;;  %16755 = vst [vmem:[#allocation195_spill] sm:$0xff] %v13115_v23  ;;  %v13117_v40 = vpop.xlane.xlu0 %1955 }
 0x3b4   : > { %16754 = vst [vmem:[#allocation194_spill] sm:$0xff] %v13111_v26  ;;  %v4125_v59 = vadd.f32 %v13094_v49, %v4124_v51  ;;  %v4138_v33 = vadd.f32 %v13104_v11, %v4137_v4  ;;  %16756 = vst [vmem:[#allocation196_spill] sm:$0xff] %v13117_v40  ;;  %6625 = vpow2.f32 %v3980_v36  ;;  %v3984_v10 = vmul.f32 1.442695, %v3729_v15 }
 0x3b5   : > { %v13119_v29 = vpop.eup %6615  ;;  %v4004_v28 = vadd.f32 %v4003_v41, %v4002_v17  ;;  %v4045_v3 = vrot.slane %v4044_v25, 2  ;;  %v4025_v54 = vadd.f32 %v4024_v32, %v4023_v47  ;;  %v4106_v16 = vrot.slane %v4105_v46, 4 }
 0x3b6   : > { %16757 = vst [vmem:[#allocation197_spill] sm:$0xff] %v13119_v29  ;;  %v4126_v42 = vadd.f32 %v13106_v13, %v4125_v59  ;;  %v4139_v12 = vadd.f32 %v13111_v26, %v4138_v33  ;;  %6627 = vpow2.f32 %v3982_v30  ;;  %v4086_v39 = vadd.f32 %v4085_v5, %v4084_v50  ;;  %v13126_v49 = vpop.xlane.xlu1 %1961  ;;  %v16761_v5 = vld [vmem:[#allocation103_spill] sm:$0xff]  ;;  %v16763_v13 = vld [vmem:[#allocation84_spill] sm:$0xff] }
 0x3b7   : > { %v13123_v1 = vpop.eup %6617  ;;  %v4066_v51 = vrot.slane %v4065_v58, 2  ;;  %v13128_v11 = vpop.xlane.xlu0 %1959  ;;  %6629 = vpow2.f32 %v3984_v10  ;;  %v4046_v47 = vadd.f32 %v4045_v3, %v4044_v25  ;;  %v4005_v17 = vrot.slane %v4004_v28, 1  ;;  %v16762_v50 = vld [vmem:[#allocation107_spill] sm:$0xff] }
 0x3b8   : > { %16758 = vst [vmem:[#allocation198_spill] sm:$0xff] %v13123_v1  ;;  %v4140_v4 = vadd.f32 %v13119_v29, %v4139_v12  ;;  %v4127_v32 = vrot.slane %v4126_v42, 4  ;;  %v4026_v36 = vrot.slane %v4025_v54, 1  ;;  %v4107_v41 = vadd.f32 %v4106_v16, %v4105_v46  ;;  %v16764_v29 = vld [vmem:[#allocation130_spill] sm:$0xff]  ;;  %v16767_v46 = vld [vmem:[#allocation51_spill] sm:$0xff] }
 0x3b9   : > { %v13130_v15 = vpop.eup %6619  ;;  %v4087_v30 = vrot.slane %v4086_v39, 2  ;;  %v2348_v12 = vrot.slane %v16762_v50, %v16761_v5  ;;  %v2344_v26 = vrot.slane %v16764_v29, %v16763_v13  ;;  %v4067_v34 = vadd.f32 %v4066_v51, %v4065_v58  ;;  %v16766_v16 = vld [vmem:[#allocation70_spill] sm:$0xff] }
 0x3ba   : > { %16759 = vst [vmem:[#allocation199_spill] sm:$0xff] %v13130_v15  ;;  %v4141_v59 = vadd.f32 %v13123_v1, %v4140_v4  ;;  %v13140_v10 = vpop.xlane.xlu1 %1965  ;;  %v2353_v4 = vrot.slane %v16767_v46, %v16766_v16  ;;  %v4047_v1 = vrot.slane %v4046_v47, 1  ;;  %v4128_v62 = vadd.f32 %v4127_v32, %v4126_v42  ;;  %v16770_v42 = vld [vmem:[#allocation34_spill] sm:$0xff] }
 0x3bb   : > { %v13133_v33 = vpop.eup %6621  ;;  %v13142_v25 = vpop.xlane.xlu0 %1963  ;;  %v4006_v43 = vadd.f32 %v4005_v17, %v4004_v28  ;;  %v4027_v37 = vadd.f32 %v4026_v36, %v4025_v54  ;;  %v4108_v50 = vrot.slane %v4107_v41, 2  ;;  %v4088_v58 = vadd.f32 %v4087_v30, %v4086_v39  ;;  %v16771_v28 = vld [vmem:[#allocation31_spill] sm:$0xff]  ;;  %v16772_v36 = vld [vmem:[#allocation105_spill] sm:$0xff]  ;;  %v16773_v39 = vld [vmem:[#allocation80_spill] sm:$0xff] }
 0x3bc   : > { %16760 = vst [vmem:[#allocation200_spill] sm:$0xff] %v13133_v33  ;;  %v4142_v31 = vadd.f32 %v13130_v15, %v4141_v59  ;;  %v2349_v51 = vsel %vm2162_vm7, %v2348_v12, %v2344_v26  ;;  %v4068_v59 = vrot.slane %v4067_v34, 1  ;;  %v2358_v54 = vrot.slane %v16771_v28, %v16770_v42 }
 0x3bd   : > { %v13144_v3 = vpop.eup %6623  ;;  %v2354_v32 = vsel %vm2169_vm8, %v2353_v4, %v2349_v51  ;;  %v4129_v17 = vrot.slane %v4128_v62, 2  ;;  %v2363_v30 = vrot.slane %v16773_v39, %v16772_v36  ;;  %v4109_v26 = vadd.f32 %v4108_v50, %v4107_v41  ;;  %v16779_v50 = vld [vmem:[#allocation141_spill] sm:$0xff] }
 0x3be   : > { %16765 = vst [vmem:[#allocation103_spill] sm:$0xff] %v13144_v3  ;;  %v4143_v27 = vadd.f32 %v13133_v33, %v4142_v31  ;;  %v13149_v29 = vpop.eup %6625  ;;  %v13153_v48 = vpop.xlane.xlu1 %1969  ;;  %v4048_v31 = vadd.f32 %v4047_v1, %v4046_v47  ;;  %v4089_v33 = vrot.slane %v4088_v58, 1  ;;  %v4069_v60 = vadd.f32 %v4068_v59, %v4067_v34  ;;  %v16775_v1 = vld [vmem:[#allocation30_spill] sm:$0xff]  ;;  %v16776_v47 = vld [vmem:[#allocation73_spill] sm:$0xff] }
 0x3bf   : > { %16768 = vst [vmem:[#allocation107_spill] sm:$0xff] %v13149_v29  ;;  %v13155_v38 = vpop.xlane.xlu0 %1967  ;;  %v2368_v4 = vrot.slane %v16776_v47, %v16775_v1  ;;  %v2359_v51 = vsel %vm2176_vm9, %v2358_v54, %v2354_v32  ;;  %v4130_v41 = vadd.f32 %v4129_v17, %v4128_v62  ;;  %v4110_v34 = vrot.slane %v4109_v26, 1  ;;  %v16782_v54 = vld [vmem:[#allocation87_spill] sm:$0xff]  ;;  %v16783_v62 = vld [vmem:[#allocation140_spill] sm:$0xff] }
 0x3c0   : > { %v4144_v15 = vadd.f32 %v13144_v3, %v4143_v27  ;;  %v13157_v46 = vpop.eup %6627  ;;  %v4162_v27 = vsel %vm14776_vm0, %v4027_v37, %v4006_v43  ;;  %v2364_v37 = vsel %vm2183_vm10, %v2363_v30, %v2359_v51  ;;  %v16778_v43 = vld [vmem:[#allocation96_spill] sm:$0xff]  ;;  %vm16780_vm0 = vcmask 1043459  }
 0x3c1   : > { %16769 = vst [vmem:[#allocation84_spill] sm:$0xff] %v13157_v46  ;;  %v13166_v3 = vpop.eup %6629  ;;  %v2373_v39 = vrot.slane %v16779_v50, %v16778_v43  ;;  %v2378_v32 = vrot.slane %v16783_v62, %v16782_v54  ;;  %v4131_v17 = vrot.slane %v4130_v41, 1  ;;  %v16784_v50 = vld [vmem:[#allocation14_spill] sm:$0xff] }
 0x3c2   : > { %v4145_v12 = vadd.f32 %v13149_v29, %v4144_v15  ;;  %16774 = vst [vmem:[#allocation130_spill] sm:$0xff] %v13166_v3  ;;  %v13169_v24 = vpop.xlane.xlu1 %1973  ;;  %v4163_v15 = vsel %vm16777_vm1, %v4048_v31, %v4162_v27  ;;  %v2369_v31 = vsel %vm2190_vm11, %v2368_v4, %v2364_v37  ;;  %v4111_v27 = vadd.f32 %v4110_v34, %v4109_v26 }
 0x3c3   : > { %v13171_v28 = vpop.xlane.xlu0 %1971  ;;  %v4164_v29 = vsel %vm16780_vm0, %v4069_v60, %v4163_v15  ;;  %v2374_v30 = vsel %vm2197_vm12, %v2373_v39, %v2369_v31  ;;  %vm16786_vm1 = vcmask 1044484   ;;  %v16787_v60 = vld [vmem:[#allocation152_spill] sm:$0xff]  ;;  %v4132_v39 = vadd.f32 %v4131_v17, %v4130_v41  ;;  %v16794_v31 = vld [vmem:[#allocation117_spill] sm:$0xff] }
 0x3c4   : > { %v4146_v6 = vadd.f32 %v13157_v46, %v4145_v12  ;;  %v4090_v12 = vadd.f32 %v4089_v33, %v4088_v58  ;;  %v2506_v15 = vrot.slane %v16787_v60, %v16761_v5  ;;  %v2379_v37 = vsel %vm2204_vm13, %v2378_v32, %v2374_v30  ;;  %v16796_v60 = vld [vmem:[#allocation145_spill] sm:$0xff]  ;;  %v16797_v32 = vld [vmem:[#allocation20_spill] sm:$0xff] }
 0x3c5   : > { %vm16792_vm0 = vcmask 1045509   ;;  %v2432_v30 = vrot.slane %v16797_v32, %v16766_v16  ;;  %v16800_v17 = vld [vmem:[#allocation160_spill] sm:$0xff] }
 0x3c6   : > { %v4147_v59 = vadd.f32 %v13166_v3, %v4146_v6  ;;  %v13182_v44 = vpop.xlane.xlu1 %1977  ;;  %v16785_v6 = vld [vmem:[#allocation146_spill] sm:$0xff]  ;;  %v4165_v58 = vsel %vm16786_vm1, %v4090_v12, %v4164_v29  ;;  %vm16804_vm1 = vcmask 1046534  }
 0x3c7   : > { %16781 = vst [vmem:[#allocation70_spill] sm:$0xff] %v13182_v44  ;;  %v13184_v47 = vpop.xlane.xlu0 %1975  ;;  %v2383_v33 = vrot.slane %v16785_v6, %v16784_v50  ;;  %v16788_v3 = vld [vmem:[#allocation78_spill] sm:$0xff]  ;;  %v4166_v29 = vsel %vm16792_vm0, %v4111_v27, %v4165_v58  ;;  %v16795_v6 = vld [vmem:[#allocation24_spill] sm:$0xff]  ;;  %v2516_v27 = vrot.slane %v16800_v17, %v16770_v42  ;;  %vm16810_vm0 = vcmask 1047559  }
 0x3c8   : > { %v4148_v46 = vrot.slane %v4147_v59, 4  ;;  %v2502_v23 = vrot.slane %v16788_v3, %v16763_v13  ;;  %v2423_v3 = vrot.slane %v16794_v31, %v16763_v13  ;;  %v2388_v9 = vrot.slane %v16796_v60, %v16795_v6  ;;  %v16807_v17 = vld [vmem:[#allocation154_spill] sm:$0xff] }
 0x3c9   : > { %v4167_v60 = vsel %vm16804_vm1, %v4132_v39, %v4166_v29  ;;  %v16809_v39 = vld [vmem:[#allocation182_spill] sm:$0xff]  ;;  %vm16831_vm1 = vcmask 1048512  }
 0x3ca   : > { %v4149_v51 = vadd.f32 %v4148_v46, %v4147_v59  ;;  %v13197_v62 = vpop.xlane.xlu1 %1981  ;;  %v16791_v46 = vld [vmem:[#allocation33_spill] sm:$0xff]  ;;  %v16793_v59 = vld [vmem:[#allocation187_spill] sm:$0xff] }
 0x3cb   : > { %16789 = vst [vmem:[#allocation51_spill] sm:$0xff] %v13197_v62  ;;  %v13199_v4 = vpop.xlane.xlu0 %1979  ;;  %v2511_v26 = vrot.slane %v16791_v46, %v16766_v16  ;;  %v2427_v12 = vrot.slane %v16793_v59, %v16761_v5  ;;  %v2384_v62 = vsel %vm14780_vm14, %v2383_v33, %v2379_v37  ;;  %v16799_v46 = vld [vmem:[#allocation54_spill] sm:$0xff]  ;;  %v16803_v33 = vld [vmem:[#allocation92_spill] sm:$0xff] }
 0x3cc   : > { %v4150_v40 = vrot.slane %v4149_v51, 2  ;;  %16790 = vst [vmem:[#allocation34_spill] sm:$0xff] %v13199_v4  ;;  %v2393_v41 = vrot.slane %v16799_v46, %v16798_v45  ;;  %v2521_v37 = vrot.slane %v16803_v33, %v16772_v36  ;;  %v16806_v4 = vld [vmem:[#allocation120_spill] sm:$0xff] }
 0x3cd   : > { %v2428_v46 = vsel %vm2162_vm7, %v2427_v12, %v2423_v3  ;;  %v2398_v44 = vrot.slane %v16807_v17, %v16806_v4 }
 0x3ce   : > { %v4151_v34 = vadd.f32 %v4150_v40, %v4149_v51  ;;  %v2507_v40 = vsel %vm2162_vm7, %v2506_v15, %v2502_v23  ;;  %v13219_v58 = vpop.xlane.xlu1 %1985  ;;  %v16805_v23 = vld [vmem:[#allocation188_spill] sm:$0xff] }
 0x3cf   : > { %16801 = vst [vmem:[#allocation31_spill] sm:$0xff] %v13219_v58  ;;  %v13221_v59 = vpop.xlane.xlu0 %1983  ;;  %v2512_v31 = vsel %vm2169_vm8, %v2511_v26, %v2507_v40  ;;  %v2437_v15 = vrot.slane %v16805_v23, %v16770_v42  ;;  %v2389_v58 = vsel %vm14779_vm15, %v2388_v9, %v2384_v62  ;;  %v16808_v26 = vld [vmem:[#allocation68_spill] sm:$0xff] }
 0x3d0   : > { %v4152_v51 = vrot.slane %v4151_v34, 1  ;;  %16802 = vst [vmem:[#allocation105_spill] sm:$0xff] %v13221_v59  ;;  %v2433_v59 = vsel %vm2169_vm8, %v2432_v30, %v2428_v46  ;;  %v2442_v40 = vrot.slane %v16808_v26, %v16772_v36  ;;  %v2394_v33 = vsel %vm2225_vm6, %v2393_v41, %v2389_v58  ;;  %v16813_v23 = vld [vmem:[#allocation128_spill] sm:$0xff]  ;;  %v16815_v46 = vld [vmem:[#allocation74_spill] sm:$0xff]  ;;  %v16816_v41 = vld [vmem:[#allocation75_spill] sm:$0xff] }
 0x3d1   : > { %v2517_v29 = vsel %vm2176_vm9, %v2516_v27, %v2512_v31  ;;  %v16814_v9 = vld [vmem:[#allocation104_spill] sm:$0xff]  ;;  %v2531_v17 = vrot.slane %v16815_v46, %v16778_v43  ;;  %v2447_v58 = vrot.slane %v16816_v41, %v16775_v1  ;;  %v2438_v27 = vsel %vm2176_vm9, %v2437_v15, %v2433_v59  ;;  %v16818_v26 = vld [vmem:[#allocation127_spill] sm:$0xff] }
 0x3d2   : > { %v4153_v32 = vadd.f32 %v4152_v51, %v4151_v34  ;;  %v2526_v34 = vrot.slane %v16809_v39, %v16775_v1  ;;  %v13241_v3 = vpop.xlane.xlu1 %1989  ;;  %v2403_v62 = vrot.slane %v16814_v9, %v16813_v23  ;;  %v2522_v30 = vsel %vm2183_vm10, %v2521_v37, %v2517_v29  ;;  %v16819_v39 = vld [vmem:[#allocation162_spill] sm:$0xff]  ;;  %v16820_v37 = vld [vmem:[#allocation91_spill] sm:$0xff] }
 0x3d3   : > { %16811 = vst [vmem:[#allocation80_spill] sm:$0xff] %v13241_v3  ;;  %v13243_v51 = vpop.xlane.xlu0 %1987  ;;  %v2443_v31 = vsel %vm2183_vm10, %v2442_v40, %v2438_v27  ;;  %v2408_v3 = vrot.slane %v16819_v39, %v16818_v26  ;;  %v2399_v9 = vsel %vm2232_vm5, %v2398_v44, %v2394_v33  ;;  %v2536_v29 = vrot.slane %v16820_v37, %v16782_v54  ;;  %v16821_v15 = vld [vmem:[#allocation135_spill] sm:$0xff]  ;;  %v16822_v40 = vld [vmem:[#allocation172_spill] sm:$0xff] }
 0x3d4   : > { %v4168_v12 = vsel %vm16810_vm0, %v4153_v32, %v4167_v60  ;;  %16812 = vst [vmem:[#allocation30_spill] sm:$0xff] %v13243_v51  ;;  %v16817_v60 = vld [vmem:[#allocation86_spill] sm:$0xff]  ;;  %v2404_v59 = vsel %vm2239_vm4, %v2403_v62, %v2399_v9  ;;  %v2413_v27 = vrot.slane %v16822_v40, %v16821_v15  ;;  %v16823_v39 = vld [vmem:[#allocation39_spill] sm:$0xff]  ;;  %v2448_v37 = vsel %vm2190_vm11, %v2447_v58, %v2443_v31 }
 0x3d5   : > { %6631 = vrcp.f32 %v4168_v12  ;;  %v2452_v32 = vrot.slane %v16817_v60, %v16778_v43  ;;  %v2527_v12 = vsel %vm2190_vm11, %v2526_v34, %v2522_v30  ;;  %v2541_v51 = vrot.slane %v16823_v39, %v16784_v50  ;;  %v16824_v44 = vld [vmem:[#allocation19_spill] sm:$0xff]  ;;  %v16825_v40 = vld [vmem:[#allocation174_spill] sm:$0xff] }
 0x3d6   : > { %v13262_v46 = vpop.xlane.xlu1 %1993  ;;  %v2532_v60 = vsel %vm2197_vm12, %v2531_v17, %v2527_v12  ;;  %v2457_v33 = vrot.slane %v16824_v44, %v16782_v54  ;;  %v2585_v34 = vrot.slane %v12927_v63, %v16761_v5  ;;  %v2581_v30 = vrot.slane %v12929_v61, %v16763_v13  ;;  %v16827_v61 = vld [vmem:[#allocation134_spill] sm:$0xff] }
 0x3d7   : > { %v13264_v41 = vpop.xlane.xlu0 %1991  ;;  %v2453_v62 = vsel %vm2197_vm12, %v2452_v32, %v2448_v37  ;;  %v2462_v9 = vrot.slane %v12795_v55, %v16784_v50  ;;  %v2590_v17 = vrot.slane %v12962_v52, %v16766_v16  ;;  %v2409_v12 = vsel %vm2246_vm3, %v2408_v3, %v2404_v59  ;;  %v16828_v32 = vld [vmem:[#allocation67_spill] sm:$0xff]  ;;  %v16829_v52 = vld [vmem:[#allocation48_spill] sm:$0xff] }
 0x3d8   : > { %v2546_v39 = vrot.slane %v16825_v40, %v16795_v6  ;;  %v2537_v58 = vsel %vm2204_vm13, %v2536_v29, %v2532_v60  ;;  %v2418_v44 = vrot.slane %v16828_v32, %v16827_v61  ;;  %v2414_v55 = vsel %vm2253_vm2, %v2413_v27, %v2409_v12  ;;  %v16830_v59 = vld [vmem:[#allocation123_spill] sm:$0xff] }
 0x3d9   : > { %v2542_v37 = vsel %vm14780_vm14, %v2541_v51, %v2537_v58  ;;  %v2551_v3 = vrot.slane %v16829_v52, %v16798_v45  ;;  %v2467_v40 = vrot.slane %v16830_v59, %v16795_v6  ;;  %v2458_v29 = vsel %vm2204_vm13, %v2457_v33, %v2453_v62  ;;  %v6650_v58 = vld [vmem:[%s6955_s23 + $0x8] sm:$0xff] }
 0x3da   : > { %v13288_v63 = vpop.xlane.xlu1 %1997  ;;  %v2586_v60 = vsel %vm2162_vm7, %v2585_v34, %v2581_v30  ;;  %v2463_v32 = vsel %vm14780_vm14, %v2462_v9, %v2458_v29  ;;  %v2472_v27 = vrot.slane %v12829_v53, %v16798_v45  ;;  %v2600_v12 = vrot.slane %v12994_v35, %v16772_v36  ;;  %v16832_v9 = vld [vmem:[#allocation62_spill] sm:$0xff] }
 0x3db   : > { %16826 = vst [vmem:[#allocation73_spill] sm:$0xff] %v13288_v63  ;;  %v13290_v31 = vpop.xlane.xlu0 %1995  ;;  %v2595_v63 = vrot.slane %v12960_v0, %v16770_v42  ;;  %v2591_v51 = vsel %vm2169_vm8, %v2590_v17, %v2586_v60  ;;  %v2547_v33 = vsel %vm14779_vm15, %v2546_v39, %v2542_v37  ;;  %v2664_v34 = vrot.slane %v13126_v49, %v16761_v5  ;;  %v16833_v39 = vld [vmem:[#allocation12_spill] sm:$0xff]  ;;  %v16834_v60 = vld [vmem:[#allocation66_spill] sm:$0xff] }
 0x3dc   : > { %v2660_v0 = vrot.slane %v13128_v11, %v16763_v13  ;;  %v2419_v53 = vsel %vm16831_vm1, %v2418_v44, %v2414_v55  ;;  %v2556_v35 = vrot.slane %v16832_v9, %v16806_v4  ;;  %v2669_v17 = vrot.slane %v13142_v25, %v16766_v16  ;;  %v16839_v9 = vld [vmem:[#allocation13_spill] sm:$0xff] }
 0x3dd   : > { %v2477_v11 = vrot.slane %v12827_v21, %v16806_v4  ;;  %v2468_v37 = vsel %vm14779_vm15, %v2467_v40, %v2463_v32  ;;  %v2596_v59 = vsel %vm2176_vm9, %v2595_v63, %v2591_v51  ;;  %v2482_v55 = vrot.slane %v12862_v19, %v16813_v23 }
 0x3de   : > { %v13318_v30 = vpop.xlane.xlu1 %2001  ;;  %v2473_v44 = vsel %vm2225_vm6, %v2472_v27, %v2468_v37  ;;  %v2601_v25 = vsel %vm2183_vm10, %v2600_v12, %v2596_v59  ;;  %v2610_v21 = vrot.slane %v13025_v18, %v16778_v43  ;;  %v2665_v40 = vsel %vm2162_vm7, %v2664_v34, %v2660_v0 }
 0x3df   : > { %v6632_v7 = vpop.eup %6631  ;;  %v13320_v62 = vpop.xlane.xlu0 %1999  ;;  %v2674_v63 = vrot.slane %v13140_v10, %v16770_v42  ;;  %vm16835_vm0 = vcmask 1042434   ;;  %v2670_v27 = vsel %vm2169_vm8, %v2669_v17, %v2665_v40  ;;  %v2679_v51 = vrot.slane %v13155_v38, %v16772_v36  ;;  %v16838_v10 = vld [vmem:[#allocation109_spill] sm:$0xff]  ;;  %v16840_v40 = vld [vmem:[#allocation90_spill] sm:$0xff] }
 0x3e0   : > { %v13311_v52 = vmul.f32 %v6650_v58, %v6632_v7  ;;  %v2552_v7 = vsel %vm2225_vm6, %v2551_v3, %v2547_v33  ;;  %v2605_v3 = vrot.slane %v12992_v14, %v16775_v1  ;;  %v13353_v19 = vsel %vm16835_vm0, %v2419_v53, %v16834_v60  ;;  %v16836_v14 = vld [vmem:[#allocation79_spill] sm:$0xff] }
 0x3e1   : > { %v2566_v32 = vrot.slane %v16836_v14, %v16818_v26  ;;  %v2557_v18 = vsel %vm2232_vm5, %v2556_v35, %v2552_v7  ;;  %v16837_v58 = vld [vmem:[#allocation43_spill] sm:$0xff]  ;;  %v2487_v34 = vrot.slane %v16838_v10, %v16818_v26  ;;  %v2478_v0 = vsel %vm2232_vm5, %v2477_v11, %v2473_v44 }
 0x3e2   : > { %v13330_v49 = vrot.slane %v13311_v52, %v16833_v39  ;;  %v2561_v33 = vrot.slane %v16837_v58, %v16813_v23  ;;  %v13368_v53 = vpop.xlane.xlu1 %2005  ;;  %v2483_v38 = vsel %vm2239_vm4, %v2482_v55, %v2478_v0  ;;  %v2615_v37 = vrot.slane %v13023_v2, %v16782_v54  ;;  %v16841_v55 = vld [vmem:[#allocation153_spill] sm:$0xff] }
 0x3e3   : > { %v13360_v12 = vpop.xlane.xlu0 %2003  ;;  %v2606_v35 = vsel %vm2190_vm11, %v2605_v3, %v2601_v25  ;;  %v2620_v59 = vrot.slane %v13055_v20, %v16784_v50  ;;  %v2684_v11 = vrot.slane %v13153_v48, %v16775_v1  ;;  %v2675_v44 = vsel %vm2176_vm9, %v2674_v63, %v2670_v27  ;;  %v16842_v63 = vld [vmem:[#allocation166_spill] sm:$0xff] }
 0x3e4   : > { %v13344_v29 = vrot.slane %v13330_v49, %v16833_v39  ;;  %v2611_v7 = vsel %vm2197_vm12, %v2610_v21, %v2606_v35  ;;  %v2680_v2 = vsel %vm2183_vm10, %v2679_v51, %v2675_v44  ;;  %v2689_v3 = vrot.slane %v13171_v28, %v16778_v43  ;;  %v16843_v51 = vld [vmem:[#allocation157_spill] sm:$0xff] }
 0x3e5   : > { %v2562_v25 = vsel %vm2239_vm4, %v2561_v33, %v2557_v18  ;;  %v2488_v20 = vsel %vm2246_vm3, %v2487_v34, %v2483_v38  ;;  %v2492_v48 = vrot.slane %v12895_v22, %v16821_v15  ;;  %v2625_v21 = vrot.slane %v13053_v57, %v16795_v6 }
 0x3e6   : > { %v13372_v17 = vrot.slane %v13344_v29, %v16839_v9  ;;  %v2616_v28 = vsel %vm2204_vm13, %v2615_v37, %v2611_v7  ;;  %v2630_v22 = vrot.slane %v13080_v8, %v16798_v45  ;;  %v2694_v57 = vrot.slane %v13169_v24, %v16782_v54  ;;  %v13410_v34 = vpop.xlane.xlu1 %2009  ;;  %v16844_v8 = vld [vmem:[#allocation21_spill] sm:$0xff] }
 0x3e7   : > { %v13402_v10 = vpop.xlane.xlu0 %2007  ;;  %v2621_v18 = vsel %vm14780_vm14, %v2620_v59, %v2616_v28  ;;  %v2685_v33 = vsel %vm2190_vm11, %v2684_v11, %v2680_v2  ;;  %v2699_v38 = vrot.slane %v13184_v47, %v16784_v50  ;;  %v2743_v37 = vrot.slane %v13262_v46, %v16761_v5  ;;  %v16845_v47 = vld [vmem:[#allocation158_spill] sm:$0xff]  ;;  %v16846_v46 = vld [vmem:[#allocation97_spill] sm:$0xff]  ;;  %v16851_v28 = vld [vmem:[#allocation191_spill] sm:$0xff] }
 0x3e8   : > { %v4263_v60 = vmul.f32 %v16840_v40, %v13372_v17  ;;  %v4262_v14 = vmul.f32 %v16841_v55, %v13372_v17  ;;  %v4265_v27 = vmul.f32 %v16842_v63, %v13372_v17  ;;  %v4264_v58 = vmul.f32 %v16843_v51, %v13372_v17 }
 0x3e9   : > { %v2690_v0 = vsel %vm2197_vm12, %v2689_v3, %v2685_v33  ;;  %v2739_v35 = vrot.slane %v13264_v41, %v16763_v13  ;;  %v2576_v7 = vrot.slane %v16844_v8, %v16827_v61  ;;  %v2497_v24 = vrot.slane %v12893_v56, %v16827_v61  ;;  %v16873_v8 = vld [vmem:[#allocation186_spill] sm:$0xff] }
 0x3ea   : > { %4392 = vadd.xlane.f32.xlu1 %v4263_v60  ;;  %4390 = vadd.xlane.f32.xlu0 %v4262_v14  ;;  %v2493_v59 = vsel %vm2253_vm2, %v2492_v48, %v2488_v20  ;;  %v2748_v11 = vrot.slane %v13290_v31, %v16766_v16  ;;  %v4267_v44 = vmul.f32 %v16845_v47, %v13372_v17  ;;  %v16847_v60 = vld [vmem:[#allocation147_spill] sm:$0xff]  ;;  %v16848_v14 = vld [vmem:[#allocation70_spill] sm:$0xff]  ;;  %v13451_v33 = vpop.xlane.xlu1 %2013  ;;  %vm16861_vm0 = vcmask 1043459  }
 0x3eb   : > { %v4266_v40 = vmul.f32 %v16846_v46, %v13372_v17  ;;  %v2626_v41 = vsel %vm14779_vm15, %v2625_v21, %v2621_v18  ;;  %v2635_v55 = vrot.slane %v16847_v60, %v16806_v4  ;;  %v2704_v2 = vrot.slane %v16848_v14, %v16795_v6  ;;  %v16849_v20 = vld [vmem:[#allocation34_spill] sm:$0xff]  ;;  %v13443_v51 = vpop.xlane.xlu0 %2011  ;;  %v16855_v46 = vld [vmem:[#allocation51_spill] sm:$0xff] }
 0x3ec   : > { %v2631_v56 = vsel %vm2225_vm6, %v2630_v22, %v2626_v41  ;;  %v2695_v31 = vsel %vm2204_vm13, %v2694_v57, %v2690_v0  ;;  %v2709_v48 = vrot.slane %v16849_v20, %v16798_v45  ;;  %v2744_v63 = vsel %vm2162_vm7, %v2743_v37, %v2739_v35  ;;  %v16852_v0 = vld [vmem:[#allocation136_spill] sm:$0xff]  ;;  %v16853_v37 = vld [vmem:[#allocation165_spill] sm:$0xff]  ;;  %v16857_v20 = vld [vmem:[#allocation151_spill] sm:$0xff] }
 0x3ed   : > { %v2700_v3 = vsel %vm14780_vm14, %v2699_v38, %v2695_v31  ;;  %v2640_v18 = vrot.slane %v16851_v28, %v16813_v23  ;;  %v2749_v22 = vsel %vm2169_vm8, %v2748_v11, %v2744_v63  ;;  %v2758_v57 = vrot.slane %v13320_v62, %v16772_v36  ;;  %v16860_v63 = vld [vmem:[#allocation196_spill] sm:$0xff] }
 0x3ee   : > { %4396 = vadd.xlane.f32.xlu1 %v4265_v27  ;;  %4394 = vadd.xlane.f32.xlu0 %v4264_v58  ;;  %v16850_v27 = vld [vmem:[#allocation73_spill] sm:$0xff]  ;;  %v2567_v58 = vsel %vm2246_vm3, %v2566_v32, %v2562_v25  ;;  %v2571_v38 = vrot.slane %v16852_v0, %v16821_v15  ;;  %v4269_v35 = vmul.f32 %v16853_v37, %v13372_v17  ;;  %v2018_v0 = vpop.xlane.xlu1 %2017 }
 0x3ef   : > { %v2753_v21 = vrot.slane %v16850_v27, %v16770_v42  ;;  %v16854_v32 = vld [vmem:[#allocation161_spill] sm:$0xff]  ;;  %v2498_v47 = vsel %vm16831_vm1, %v2497_v24, %v2493_v59  ;;  %v2636_v11 = vsel %vm2232_vm5, %v2635_v55, %v2631_v56  ;;  %v2714_v62 = vrot.slane %v16855_v46, %v16806_v4 }
 0x3f0   : > { %v4268_v25 = vmul.f32 %v16854_v32, %v13372_v17  ;;  %v2705_v41 = vsel %vm14779_vm15, %v2704_v2, %v2700_v3  ;;  %v2763_v14 = vrot.slane %v13318_v30, %v16775_v1  ;;  %v2645_v24 = vrot.slane %v16857_v20, %v16818_v26  ;;  %v16858_v2 = vld [vmem:[#allocation56_spill] sm:$0xff] }
 0x3f1   : > { %v2754_v31 = vsel %vm2176_vm9, %v2753_v21, %v2749_v22  ;;  %v2641_v59 = vsel %vm2239_vm4, %v2640_v18, %v2636_v11  ;;  %v2768_v56 = vrot.slane %v13360_v12, %v16778_v43  ;;  %v4271_v3 = vmul.f32 %v16858_v2, %v13372_v17  ;;  %v2016_v21 = vpop.xlane.xlu0 %2015  ;;  %v16862_v22 = vld [vmem:[#allocation31_spill] sm:$0xff] }
 0x3f2   : > { %4400 = vadd.xlane.f32.xlu1 %v4267_v44  ;;  %4398 = vadd.xlane.f32.xlu0 %v4266_v40  ;;  %v2710_v44 = vsel %vm2225_vm6, %v2709_v48, %v2705_v41  ;;  %v16856_v40 = vld [vmem:[#allocation105_spill] sm:$0xff]  ;;  %v2759_v55 = vsel %vm2183_vm10, %v2758_v57, %v2754_v31  ;;  %v16859_v48 = vld [vmem:[#allocation94_spill] sm:$0xff]  ;;  %v2650_v27 = vrot.slane %v16860_v63, %v16821_v15  ;;  %v2022_v63 = vpop.xlane.xlu1 %2021 }
 0x3f3   : > { %v2719_v60 = vrot.slane %v16856_v40, %v16813_v23  ;;  %v4270_v30 = vmul.f32 %v16859_v48, %v13372_v17  ;;  %v2572_v28 = vsel %vm2253_vm2, %v2571_v38, %v2567_v58  ;;  %v2817_v18 = vsel %vm16861_vm0, %v2498_v47, %v13353_v19  ;;  %v16864_v19 = vld [vmem:[#allocation195_spill] sm:$0xff]  ;;  %v16868_v48 = vld [vmem:[#allocation38_spill] sm:$0xff]  ;;  %vm16870_vm0 = vmmov %vm16831_vm1 }
 0x3f4   : > { %v2724_v12 = vrot.slane %v16862_v22, %v16818_v26  ;;  %v2715_v57 = vsel %vm2232_vm5, %v2714_v62, %v2710_v44  ;;  %v2764_v11 = vsel %vm2190_vm11, %v2763_v14, %v2759_v55  ;;  %v4188_v58 = vcombine.high %v13330_v49, %v13330_v49  ;;  %v16865_v62 = vld [vmem:[#allocation170_spill] sm:$0xff]  ;;  %v16866_v44 = vld [vmem:[#allocation99_spill] sm:$0xff] }
 0x3f5   : > { %v2720_v37 = vsel %vm2239_vm4, %v2719_v60, %v2715_v57  ;;  %v2655_v38 = vrot.slane %v16864_v19, %v16827_v61  ;;  %v2646_v47 = vsel %vm2246_vm3, %v2645_v24, %v2641_v59  ;;  %v2769_v46 = vsel %vm2197_vm12, %v2768_v56, %v2764_v11  ;;  %v16867_v60 = vld [vmem:[#allocation80_spill] sm:$0xff]  ;;  %v2020_v2 = vpop.xlane.xlu0 %2019 }
 0x3f6   : > { %4404 = vadd.xlane.f32.xlu1 %v4269_v35  ;;  %4402 = vadd.xlane.f32.xlu0 %v4268_v25  ;;  %v16863_v35 = vld [vmem:[#allocation30_spill] sm:$0xff]  ;;  %v2773_v25 = vrot.slane %v13368_v53, %v16782_v54  ;;  %v4273_v41 = vmul.f32 %v16865_v62, %v13372_v17  ;;  %v4272_v53 = vmul.f32 %v16866_v44, %v13372_v17  ;;  %v16879_v44 = vld [vmem:[#allocation37_spill] sm:$0xff] }
 0x3f7   : > { %v2729_v32 = vrot.slane %v16863_v35, %v16821_v15  ;;  %v2651_v40 = vsel %vm2253_vm2, %v2650_v27, %v2646_v47  ;;  %v2734_v49 = vrot.slane %v16867_v60, %v16827_v61  ;;  %v2725_v14 = vsel %vm2246_vm3, %v2724_v12, %v2720_v37  ;;  %v16869_v27 = vld [vmem:[#allocation65_spill] sm:$0xff] }
 0x3f8   : > { %v2783_v31 = vrot.slane %v13410_v34, %v16795_v6  ;;  %v2778_v20 = vrot.slane %v13402_v10, %v16784_v50  ;;  %v2774_v59 = vsel %vm2204_vm13, %v2773_v25, %v2769_v46  ;;  %v2793_v55 = vrot.slane %v13451_v33, %v16806_v4 }
 0x3f9   : > { %v2730_v24 = vsel %vm2253_vm2, %v2729_v32, %v2725_v14  ;;  %v2788_v56 = vrot.slane %v13443_v51, %v16798_v45  ;;  %v4275_v34 = vmul.f32 %v16868_v48, %v13372_v17  ;;  %v2798_v10 = vrot.slane %v2016_v21, %v16813_v23  ;;  %v16882_v14 = vld [vmem:[#allocation150_spill] sm:$0xff]  ;;  %v16886_v48 = vld [vmem:[#allocation155_spill] sm:$0xff] }
 0x3fa   : > { %4408 = vadd.xlane.f32.xlu1 %v4271_v3  ;;  %4406 = vadd.xlane.f32.xlu0 %v4270_v30  ;;  %v13519_v3 = vrot.slane %v4188_v58, %v16833_v39  ;;  %v2779_v30 = vsel %vm14780_vm14, %v2778_v20, %v2774_v59  ;;  %v4274_v33 = vmul.f32 %v16869_v27, %v13372_v17  ;;  %vm16872_vm14 = vmmov %vm16870_vm0  ;;  %v16883_v20 = vld [vmem:[#allocation85_spill] sm:$0xff]  ;;  %v16884_v59 = vld [vmem:[#allocation118_spill] sm:$0xff] }
 0x3fb   : > { %v2784_v22 = vsel %vm14779_vm15, %v2783_v31, %v2779_v30  ;;  %v2803_v51 = vrot.slane %v2018_v0, %v16818_v26  ;;  %v2808_v57 = vrot.slane %v2020_v2, %v16821_v15  ;;  %v2577_v37 = vsel %vm16831_vm1, %v2576_v7, %v2572_v28  ;;  %v16874_v28 = vld [vmem:[#allocation115_spill] sm:$0xff] }
 0x3fc   : > { %v2789_v12 = vsel %vm2225_vm6, %v2788_v56, %v2784_v22  ;;  %v2656_v21 = vsel %vm16870_vm0, %v2655_v38, %v2651_v40  ;;  %v2813_v32 = vrot.slane %v2022_v63, %v16827_v61  ;;  %v4229_v25 = vrot.slane %v13519_v3, %v16839_v9  ;;  %v16880_v40 = vld [vmem:[#allocation177_spill] sm:$0xff]  ;;  %v16885_v56 = vld [vmem:[#allocation156_spill] sm:$0xff]  ;;  %v16887_v30 = vld [vmem:[#allocation71_spill] sm:$0xff] }
 0x3fd   : > { %v2794_v35 = vsel %vm2232_vm5, %v2793_v55, %v2789_v12  ;;  %vm16871_vm15 = vcmask 1044484   ;;  %v2735_v11 = vsel %vm16872_vm14, %v2734_v49, %v2730_v24  ;;  %v4277_v7 = vmul.f32 %v16873_v8, %v13372_v17  ;;  %vm16877_vm14 = vmmov %vm16870_vm0  ;;  %v16888_v63 = vld [vmem:[#allocation159_spill] sm:$0xff] }
 0x3fe   : > { %4412 = vadd.xlane.f32.xlu1 %v4273_v41  ;;  %4410 = vadd.xlane.f32.xlu0 %v4272_v53  ;;  %v2818_v0 = vsel %vm16871_vm15, %v2577_v37, %v2817_v18  ;;  %v2799_v58 = vsel %vm2239_vm4, %v2798_v10, %v2794_v35  ;;  %v4276_v19 = vmul.f32 %v16874_v28, %v13372_v17  ;;  %vm16875_vm1 = vcmask 1045509   ;;  %v16881_v17 = vld [vmem:[#allocation82_spill] sm:$0xff]  ;;  %v16892_v35 = vld [vmem:[#allocation29_spill] sm:$0xff]  ;;  %v16894_v8 = vld [vmem:[#allocation183_spill] sm:$0xff] }
 0x3ff   : > { %v2804_v38 = vsel %vm2246_vm3, %v2803_v51, %v2799_v58  ;;  %v2819_v47 = vsel %vm16875_vm1, %v2656_v21, %v2818_v0  ;;  %vm16876_vm15 = vcmask 1046534   ;;  %vm16878_vm0 = vcmask 1047559   ;;  %v16890_v51 = vld [vmem:[#allocation163_spill] sm:$0xff]  ;;  %v16891_v37 = vld [vmem:[#allocation98_spill] sm:$0xff] }
 0x400   : > { %v2809_v46 = vsel %vm2253_vm2, %v2808_v57, %v2804_v38  ;;  %v2820_v18 = vsel %vm16876_vm15, %v2735_v11, %v2819_v47  ;;  %v4279_v53 = vmul.f32 %v16879_v44, %v4229_v25  ;;  %v4278_v60 = vmul.f32 %v16880_v40, %v4229_v25  ;;  %v16893_v11 = vld [vmem:[#allocation167_spill] sm:$0xff]  ;;  %v16896_v38 = vld [vmem:[#allocation169_spill] sm:$0xff]  ;;  %v16897_v47 = vld [vmem:[#allocation100_spill] sm:$0xff] }
 0x401   : > { %v2814_v62 = vsel %vm16877_vm14, %v2813_v32, %v2809_v46  ;;  %v4281_v49 = vmul.f32 %v16881_v17, %v4229_v25  ;;  %v4280_v31 = vmul.f32 %v16882_v14, %v4229_v25  ;;  %v4283_v24 = vmul.f32 %v16883_v20, %v4229_v25  ;;  %v16895_v28 = vld [vmem:[#allocation95_spill] sm:$0xff]  ;;  %v16902_v17 = vld [vmem:[#allocation57_spill] sm:$0xff] }
 0x402   : > { %4416 = vadd.xlane.f32.xlu1 %v4275_v34  ;;  %4414 = vadd.xlane.f32.xlu0 %v4274_v33  ;;  %v2821_v41 = vsel %vm16878_vm0, %v2814_v62, %v2820_v18  ;;  %v4282_v55 = vmul.f32 %v16884_v59, %v4229_v25  ;;  %v4285_v2 = vmul.f32 %v16885_v56, %v4229_v25  ;;  %v16889_v33 = vld [vmem:[#allocation164_spill] sm:$0xff]  ;;  %v16898_v18 = vld [vmem:[#allocation171_spill] sm:$0xff]  ;;  %v16903_v14 = vld [vmem:[#allocation77_spill] sm:$0xff]  ;;  %vm16945_vm1 = vcmask 589312  }
 0x403   : > { %2823 = vst [vmem:[%s13557_s15] sm:$0xff] %v2821_v41  ;;  %v4284_v34 = vmul.f32 %v16886_v48, %v4229_v25  ;;  %v4287_v10 = vmul.f32 %v16887_v30, %v4229_v25  ;;  %v4286_v27 = vmul.f32 %v16888_v63, %v4229_v25  ;;  %v4289_v22 = vmul.f32 %v16889_v33, %v4229_v25  ;;  %v16899_v41 = vld [vmem:[#allocation23_spill] sm:$0xff]  ;;  %v16904_v20 = vld [vmem:[#allocation41_spill] sm:$0xff]  ;;  %v16905_v59 = vld [vmem:[#allocation36_spill] sm:$0xff] }
 0x404   : > { %v4288_v12 = vmul.f32 %v16890_v51, %v4229_v25  ;;  %v4218_v57 = vcombine.high %v13344_v29, %v13344_v29  ;;  %v4291_v21 = vmul.f32 %v16891_v37, %v4229_v25  ;;  %v4290_v32 = vmul.f32 %v16892_v35, %v4229_v25  ;;  %v16906_v56 = vld [vmem:[#allocation52_spill] sm:$0xff]  ;;  %v16910_v51 = vld [vmem:[#allocation178_spill] sm:$0xff]  ;;  %v16913_v35 = vld [vmem:[#allocation63_spill] sm:$0xff] }
 0x405   : > { %v4293_v58 = vmul.f32 %v16893_v11, %v4229_v25  ;;  %v4220_v48 = vcombine.high %v13519_v3, %v13519_v3  ;;  %v16909_v33 = vld [vmem:[#allocation32_spill] sm:$0xff]  ;;  %v16914_v11 = vld [vmem:[#allocation89_spill] sm:$0xff]  ;;  %vm16948_vm15 = vcmask 654912   ;;  %vm16963_vm0 = vmmov %vm16945_vm1 }
 0x406   : > { %4420 = vadd.xlane.f32.xlu1 %v4277_v7  ;;  %4418 = vadd.xlane.f32.xlu0 %v4276_v19  ;;  %v4233_v0 = vrot.slane %v4218_v57, %v16839_v9  ;;  %v4292_v7 = vmul.f32 %v16894_v8, %v4229_v25  ;;  %v16901_v25 = vld [vmem:[#allocation81_spill] sm:$0xff]  ;;  %v16911_v57 = vld [vmem:[#allocation112_spill] sm:$0xff]  ;;  %v16915_v8 = vld [vmem:[#allocation175_spill] sm:$0xff] }
 0x408   : > { %v4295_v19 = vmul.f32 %v16895_v28, %v4233_v0  ;;  %v4294_v29 = vmul.f32 %v16896_v38, %v4233_v0  ;;  %v4297_v46 = vmul.f32 %v16897_v47, %v4233_v0  ;;  %v4296_v62 = vmul.f32 %v16898_v18, %v4233_v0  ;;  %v16916_v28 = vld [vmem:[#allocation181_spill] sm:$0xff]  ;;  %v16919_v18 = vld [vmem:[#allocation176_spill] sm:$0xff] }
 0x409   : > { %v4299_v44 = vmul.f32 %v16899_v41, %v4233_v0  ;;  %v16920_v41 = vld [vmem:[#allocation55_spill] sm:$0xff] }
 0x40a   : > { %4424 = vadd.xlane.f32.xlu1 %v4279_v53  ;;  %4422 = vadd.xlane.f32.xlu0 %v4278_v60  ;;  %v16900_v53 = vld [vmem:[#allocation173_spill] sm:$0xff]  ;;  %v4301_v60 = vmul.f32 %v16901_v25, %v4233_v0 }
 0x40b   : > { %v4298_v40 = vmul.f32 %v16900_v53, %v4233_v0 }
 0x40e   : > { %4428 = vadd.xlane.f32.xlu1 %v4281_v49  ;;  %4426 = vadd.xlane.f32.xlu0 %v4280_v31  ;;  %v4300_v49 = vmul.f32 %v16902_v17, %v4233_v0  ;;  %v4303_v31 = vmul.f32 %v16903_v14, %v4233_v0 }
 0x412   : > { %4432 = vadd.xlane.f32.xlu1 %v4283_v24  ;;  %4430 = vadd.xlane.f32.xlu0 %v4282_v55  ;;  %v4302_v24 = vmul.f32 %v16904_v20, %v4233_v0  ;;  %v4305_v55 = vmul.f32 %v16905_v59, %v4233_v0  ;;  %v16925_v59 = vld [vmem:[#allocation121_spill] sm:$0xff] }
 0x416   : > { %4436 = vadd.xlane.f32.xlu1 %v4285_v2  ;;  %4434 = vadd.xlane.f32.xlu0 %v4284_v34  ;;  %v4304_v2 = vmul.f32 %v16906_v56, %v4233_v0  ;;  %v16907_v34 = vld [vmem:[#allocation114_spill] sm:$0xff] }
 0x417   : > { %v4307_v30 = vmul.f32 %v16907_v34, %v4233_v0  ;;  %v16926_v56 = vld [vmem:[#allocation46_spill] sm:$0xff] }
 0x41a   : > { %4440 = vadd.xlane.f32.xlu1 %v4287_v10  ;;  %4438 = vadd.xlane.f32.xlu0 %v4286_v27  ;;  %v16908_v10 = vld [vmem:[#allocation113_spill] sm:$0xff]  ;;  %v4237_v27 = vrot.slane %v4220_v48, %v16839_v9  ;;  %v16927_v48 = vld [vmem:[#allocation72_spill] sm:$0xff] }
 0x41b   : > { %v4306_v63 = vmul.f32 %v16908_v10, %v4233_v0 }
 0x41c   : > { %v4311_v37 = vmul.f32 %v16911_v57, %v4237_v27 }
 0x41e   : > { %4444 = vadd.xlane.f32.xlu1 %v4289_v22  ;;  %4442 = vadd.xlane.f32.xlu0 %v4288_v12  ;;  %v4309_v22 = vmul.f32 %v16909_v33, %v4233_v0  ;;  %v4308_v12 = vmul.f32 %v16910_v51, %v4233_v0  ;;  %v16917_v0 = vld [vmem:[#allocation185_spill] sm:$0xff] }
 0x41f   : > { %v4317_v38 = vmul.f32 %v16917_v0, %v4237_v27 }
 0x422   : > { %4448 = vadd.xlane.f32.xlu1 %v4291_v21  ;;  %4446 = vadd.xlane.f32.xlu0 %v4290_v32  ;;  %v16912_v21 = vld [vmem:[#allocation180_spill] sm:$0xff]  ;;  %v4313_v32 = vmul.f32 %v16913_v35, %v4237_v27 }
 0x423   : > { %v4310_v3 = vmul.f32 %v16912_v21, %v4237_v27  ;;  %v16934_v35 = vld [vmem:[#allocation64_spill] sm:$0xff] }
 0x426   : > { %4452 = vadd.xlane.f32.xlu1 %v4293_v58  ;;  %4450 = vadd.xlane.f32.xlu0 %v4292_v7  ;;  %v4312_v58 = vmul.f32 %v16914_v11, %v4237_v27  ;;  %v4315_v7 = vmul.f32 %v16915_v8, %v4237_v27  ;;  %v16935_v11 = vld [vmem:[#allocation122_spill] sm:$0xff]  ;;  %v16936_v8 = vld [vmem:[#allocation45_spill] sm:$0xff] }
 0x42a   : > { %4456 = vadd.xlane.f32.xlu1 %v4295_v19  ;;  %4454 = vadd.xlane.f32.xlu0 %v4294_v29  ;;  %v4314_v19 = vmul.f32 %v16916_v28, %v4237_v27  ;;  %v16918_v29 = vld [vmem:[#allocation184_spill] sm:$0xff] }
 0x42b   : > { %v4316_v47 = vmul.f32 %v16918_v29, %v4237_v27 }
 0x42e   : > { %4460 = vadd.xlane.f32.xlu1 %v4297_v46  ;;  %4458 = vadd.xlane.f32.xlu0 %v4296_v62  ;;  %v4173_v46 = vcombine.high %v13311_v52, %v13311_v52  ;;  %v4319_v62 = vmul.f32 %v16919_v18, %v4237_v27  ;;  %v16923_v52 = vld [vmem:[#allocation179_spill] sm:$0xff] }
 0x42f   : > { %v4323_v14 = vmul.f32 %v16923_v52, %v4237_v27 }
 0x430   : > { %v4187_v53 = vrot.slane %v4173_v46, %v16833_v39  ;;  %v16937_v46 = vld [vmem:[#allocation61_spill] sm:$0xff] }
 0x432   : > { %4464 = vadd.xlane.f32.xlu1 %v4299_v44  ;;  %4462 = vadd.xlane.f32.xlu0 %v4298_v40  ;;  %v4318_v44 = vmul.f32 %v16920_v41, %v4237_v27  ;;  %v16921_v40 = vld [vmem:[#allocation116_spill] sm:$0xff]  ;;  %v4189_v29 = vcombine.high %v4187_v53, %v4187_v53 }
 0x433   : > { %v4321_v25 = vmul.f32 %v16921_v40, %v4237_v27 }
 0x436   : > { %4468 = vadd.xlane.f32.xlu1 %v4301_v60  ;;  %4466 = vadd.xlane.f32.xlu0 %v4300_v49  ;;  %v16922_v60 = vld [vmem:[#allocation101_spill] sm:$0xff]  ;;  %v13612_v49 = vrot.slane %v4187_v53, %v16833_v39  ;;  %v16939_v53 = vld [vmem:[#allocation22_spill] sm:$0xff] }
 0x437   : > { %v4320_v17 = vmul.f32 %v16922_v60, %v4237_v27 }
 0x43a   : > { %4472 = vadd.xlane.f32.xlu1 %v4303_v31  ;;  %4470 = vadd.xlane.f32.xlu0 %v4302_v24  ;;  %v16924_v31 = vld [vmem:[#allocation102_spill] sm:$0xff]  ;;  %v4241_v24 = vrot.slane %v13612_v49, %v16839_v9 }
 0x43b   : > { %v4322_v20 = vmul.f32 %v16924_v31, %v4237_v27  ;;  %v16940_v31 = vld [vmem:[#allocation125_spill] sm:$0xff] }
 0x43c   : > { %v4327_v34 = vmul.f32 %v16927_v48, %v4241_v24  ;;  %v4337_v18 = vmul.f32 %v16937_v46, %v4241_v24 }
 0x43e   : > { %4476 = vadd.xlane.f32.xlu1 %v4305_v55  ;;  %4474 = vadd.xlane.f32.xlu0 %v4304_v2  ;;  %v4325_v55 = vmul.f32 %v16925_v59, %v4237_v27  ;;  %v4324_v2 = vmul.f32 %v16926_v56, %v4237_v27  ;;  %v16933_v27 = vld [vmem:[#allocation76_spill] sm:$0xff] }
 0x442   : > { %4480 = vadd.xlane.f32.xlu1 %v4307_v30  ;;  %4478 = vadd.xlane.f32.xlu0 %v4306_v63  ;;  %v16928_v30 = vld [vmem:[#allocation35_spill] sm:$0xff]  ;;  %v16929_v63 = vld [vmem:[#allocation42_spill] sm:$0xff] }
 0x443   : > { %v4326_v10 = vmul.f32 %v16928_v30, %v4241_v24  ;;  %v4329_v33 = vmul.f32 %v16929_v63, %v4241_v24 }
 0x446   : > { %4484 = vadd.xlane.f32.xlu1 %v4309_v22  ;;  %4482 = vadd.xlane.f32.xlu0 %v4308_v12  ;;  %v16930_v22 = vld [vmem:[#allocation44_spill] sm:$0xff]  ;;  %v16931_v12 = vld [vmem:[#allocation15_spill] sm:$0xff] }
 0x447   : > { %v4328_v51 = vmul.f32 %v16930_v22, %v4241_v24  ;;  %v4331_v57 = vmul.f32 %v16931_v12, %v4241_v24 }
 0x44a   : > { %4488 = vadd.xlane.f32.xlu1 %v4311_v37  ;;  %4486 = vadd.xlane.f32.xlu0 %v4310_v3  ;;  %v16932_v37 = vld [vmem:[#allocation11_spill] sm:$0xff]  ;;  %v4333_v3 = vmul.f32 %v16933_v27, %v4241_v24 }
 0x44b   : > { %v4330_v21 = vmul.f32 %v16932_v37, %v4241_v24 }
 0x44e   : > { %4492 = vadd.xlane.f32.xlu1 %v4313_v32  ;;  %4490 = vadd.xlane.f32.xlu0 %v4312_v58  ;;  %v4332_v32 = vmul.f32 %v16934_v35, %v4241_v24  ;;  %v4335_v58 = vmul.f32 %v16935_v11, %v4241_v24 }
 0x452   : > { %4496 = vadd.xlane.f32.xlu1 %v4315_v7  ;;  %4494 = vadd.xlane.f32.xlu0 %v4314_v19  ;;  %v4334_v7 = vmul.f32 %v16936_v8, %v4241_v24 }
 0x456   : > { %4500 = vadd.xlane.f32.xlu1 %v4317_v38  ;;  %4498 = vadd.xlane.f32.xlu0 %v4316_v47 }
 0x45a   : > { %4504 = vadd.xlane.f32.xlu1 %v4319_v62  ;;  %4502 = vadd.xlane.f32.xlu0 %v4318_v44  ;;  %v16938_v62 = vld [vmem:[#allocation59_spill] sm:$0xff] }
 0x45b   : > { %v4336_v41 = vmul.f32 %v16938_v62, %v4241_v24 }
 0x45e   : > { %4508 = vadd.xlane.f32.xlu1 %v4321_v25  ;;  %4506 = vadd.xlane.f32.xlu0 %v4320_v17  ;;  %v4217_v17 = vrot.slane %v4189_v29, %v16833_v39 }
 0x460   : > { %v13647_v39 = vrot.slane %v4217_v17, %v16839_v9 }
 0x462   : > { %4512 = vadd.xlane.f32.xlu1 %v4323_v14  ;;  %4510 = vadd.xlane.f32.xlu0 %v4322_v20  ;;  %v4339_v14 = vmul.f32 %v16939_v53, %v4241_v24  ;;  %v4338_v20 = vmul.f32 %v16940_v31, %v4241_v24  ;;  %v16950_v53 = vld [vmem:[#allocation26_spill] sm:$0xff] }
 0x466   : > { %4516 = vadd.xlane.f32.xlu1 %v4325_v55  ;;  %4514 = vadd.xlane.f32.xlu0 %v4324_v2 }
 0x46a   : > { %4520 = vadd.xlane.f32.xlu1 %v4327_v34  ;;  %4518 = vadd.xlane.f32.xlu0 %v4326_v10  ;;  %v4219_v34 = vcombine.high %v13612_v49, %v13612_v49  ;;  %v16941_v10 = vld [vmem:[#allocation53_spill] sm:$0xff] }
 0x46b   : > { %v4341_v63 = vmul.f32 %v16941_v10, %v4241_v24 }
 0x46c   : > { %v13656_v49 = vrot.slane %v4219_v34, %v16839_v9  ;;  %v16952_v34 = vld [vmem:[#allocation16_spill] sm:$0xff] }
 0x46e   : > { %4524 = vadd.xlane.f32.xlu1 %v4329_v33  ;;  %4522 = vadd.xlane.f32.xlu0 %v4328_v51  ;;  %v16942_v33 = vld [vmem:[#allocation47_spill] sm:$0xff] }
 0x46f   : > { %v4340_v22 = vmul.f32 %v16942_v33, %v4241_v24  ;;  %v16944_v24 = vld [vmem:[#allocation58_spill] sm:$0xff] }
 0x472   : > { %4528 = vadd.xlane.f32.xlu1 %v4331_v57  ;;  %4526 = vadd.xlane.f32.xlu0 %v4330_v21 }
 0x476   : > { %4532 = vadd.xlane.f32.xlu1 %v4333_v3  ;;  %4530 = vadd.xlane.f32.xlu0 %v4332_v32  ;;  %v16943_v3 = vld [vmem:[#allocation25_spill] sm:$0xff]  ;;  %v4342_v32 = vmul.f32 %v16944_v24, %v13647_v39 }
 0x477   : > { %v4393_v28 = vpop.xlane.xlu1 %4392  ;;  %v4391_v19 = vpop.xlane.xlu0 %4390  ;;  %v4343_v35 = vmul.f32 %v16943_v3, %v13647_v39 }
 0x478   : > { %v4781_v0 = vrot.slane %v4393_v28, %v16761_v5  ;;  %v4777_v38 = vrot.slane %v4391_v19, %v16763_v13  ;;  %v4221_v19 = vcombine.high %v4217_v17, %v4217_v17  ;;  %v16949_v17 = vld [vmem:[#allocation106_spill] sm:$0xff] }
 0x47a   : > { %v4782_v47 = vsel %vm2162_vm7, %v4781_v0, %v4777_v38  ;;  %4536 = vadd.xlane.f32.xlu1 %v4335_v58  ;;  %4534 = vadd.xlane.f32.xlu0 %v4334_v7  ;;  %v16946_v38 = vld [vmem:[#allocation93_spill] sm:$0xff] }
 0x47b   : > { %v4397_v44 = vpop.xlane.xlu1 %4396  ;;  %v4395_v40 = vpop.xlane.xlu0 %4394  ;;  %v4358_v29 = vmul.f32 %v16946_v38, %v13656_v49 }
 0x47c   : > { %v4791_v25 = vrot.slane %v4397_v44, %v16770_v42  ;;  %v4786_v60 = vrot.slane %v4395_v40, %v16766_v16 }
 0x47e   : > { %v4787_v52 = vsel %vm2169_vm8, %v4786_v60, %v4782_v47  ;;  %4540 = vadd.xlane.f32.xlu1 %v4337_v18  ;;  %4538 = vadd.xlane.f32.xlu0 %v4336_v41  ;;  %v16947_v47 = vld [vmem:[#allocation124_spill] sm:$0xff] }
 0x47f   : > { %v4401_v59 = vpop.xlane.xlu1 %4400  ;;  %v4792_v55 = vsel %vm2176_vm9, %v4791_v25, %v4787_v52  ;;  %v4399_v56 = vpop.xlane.xlu0 %4398  ;;  %v4344_v46 = vmul.f32 %v16947_v47, %v13647_v39  ;;  %v13675_v25 = vrot.slane %v4221_v19, %v16839_v9  ;;  %v4345_v52 = vmul.f32 %v16949_v17, %v13647_v39 }
 0x480   : > { %v4801_v2 = vrot.slane %v4401_v59, %v16775_v1  ;;  %v4796_v48 = vrot.slane %v4399_v56, %v16772_v36 }
 0x482   : > { %v4797_v30 = vsel %vm2183_vm10, %v4796_v48, %v4792_v55  ;;  %4544 = vadd.xlane.f32.xlu1 %v4339_v14  ;;  %4542 = vadd.xlane.f32.xlu0 %v4338_v20  ;;  %v4359_v14 = vmul.f32 %v16950_v53, %v13656_v49 }
 0x483   : > { %v4405_v51 = vpop.xlane.xlu1 %4404  ;;  %v4802_v12 = vsel %vm2190_vm11, %v4801_v2, %v4797_v30  ;;  %v4403_v57 = vpop.xlane.xlu0 %4402  ;;  %v16951_v2 = vld [vmem:[#allocation110_spill] sm:$0xff]  ;;  %v4360_v30 = vmul.f32 %v16952_v34, %v13656_v49 }
 0x484   : > { %v4811_v37 = vrot.slane %v4405_v51, %v16782_v54  ;;  %v4806_v21 = vrot.slane %v4403_v57, %v16778_v43  ;;  %v4374_v48 = vmul.f32 %v16951_v2, %v13675_v25  ;;  %v16953_v57 = vld [vmem:[#allocation129_spill] sm:$0xff] }
 0x486   : > { %v4807_v27 = vsel %vm2197_vm12, %v4806_v21, %v4802_v12  ;;  %4548 = vadd.xlane.f32.xlu1 %v4341_v63  ;;  %4546 = vadd.xlane.f32.xlu0 %v4340_v22  ;;  %v16954_v21 = vld [vmem:[#allocation18_spill] sm:$0xff] }
 0x487   : > { %v4409_v11 = vpop.xlane.xlu1 %4408  ;;  %v4812_v58 = vsel %vm2204_vm13, %v4811_v37, %v4807_v27  ;;  %v4407_v8 = vpop.xlane.xlu0 %4406  ;;  %v4346_v37 = vmul.f32 %v16953_v57, %v13647_v39  ;;  %v4375_v27 = vmul.f32 %v16954_v21, %v13675_v25 }
 0x488   : > { %v4821_v7 = vrot.slane %v4409_v11, %v16795_v6  ;;  %v4816_v28 = vrot.slane %v4407_v8, %v16784_v50  ;;  %v16955_v8 = vld [vmem:[#allocation144_spill] sm:$0xff] }
 0x48a   : > { %v4817_v0 = vsel %vm16945_vm1, %v4816_v28, %v4812_v58  ;;  %4552 = vadd.xlane.f32.xlu1 %v4343_v35  ;;  %4550 = vadd.xlane.f32.xlu0 %v4342_v32  ;;  %v16956_v28 = vld [vmem:[#allocation138_spill] sm:$0xff]  ;;  %vm16966_vm1 = vmmov %vm16948_vm15 }
 0x48b   : > { %v4413_v18 = vpop.xlane.xlu1 %4412  ;;  %v4822_v62 = vsel %vm16948_vm15, %v4821_v7, %v4817_v0  ;;  %v4411_v41 = vpop.xlane.xlu0 %4410  ;;  %v4376_v7 = vmul.f32 %v16955_v8, %v13675_v25  ;;  %v4361_v19 = vmul.f32 %v16956_v28, %v13656_v49  ;;  %vm16973_vm15 = vmmov %vm16877_vm14 }
 0x48c   : > { %v4831_v44 = vrot.slane %v4413_v18, %v16806_v4  ;;  %v4826_v40 = vrot.slane %v4411_v41, %v16798_v45  ;;  %v16957_v18 = vld [vmem:[#allocation69_spill] sm:$0xff]  ;;  %v16958_v41 = vld [vmem:[#allocation126_spill] sm:$0xff] }
 0x48e   : > { %v4827_v60 = vsel %vm2225_vm6, %v4826_v40, %v4822_v62  ;;  %4582 = vadd.xlane.f32.xlu1 %v4358_v29  ;;  %4554 = vadd.xlane.f32.xlu0 %v4344_v46  ;;  %v4362_v62 = vmul.f32 %v16957_v18, %v13656_v49 }
 0x48f   : > { %v4417_v31 = vpop.xlane.xlu1 %4416  ;;  %v4832_v20 = vsel %vm2232_vm5, %v4831_v44, %v4827_v60  ;;  %v4415_v59 = vpop.xlane.xlu0 %4414  ;;  %v4347_v44 = vmul.f32 %v16958_v41, %v13647_v39 }
 0x490   : > { %v4841_v55 = vrot.slane %v4417_v31, %v16818_v26  ;;  %v4836_v56 = vrot.slane %v4415_v59, %v16813_v23  ;;  %v16959_v31 = vld [vmem:[#allocation88_spill] sm:$0xff] }
 0x491   : > { %v16960_v59 = vld [vmem:[#allocation28_spill] sm:$0xff] }
 0x492   : > { %v4837_v9 = vsel %vm2239_vm4, %v4836_v56, %v4832_v20  ;;  %4556 = vadd.xlane.f32.xlu1 %v4345_v52  ;;  %4584 = vadd.xlane.f32.xlu0 %v4359_v14  ;;  %v4348_v20 = vmul.f32 %v16959_v31, %v13647_v39 }
 0x493   : > { %v4421_v10 = vpop.xlane.xlu1 %4420  ;;  %v4842_v63 = vsel %vm2246_vm3, %v4841_v55, %v4837_v9  ;;  %v4419_v33 = vpop.xlane.xlu0 %4418  ;;  %v4377_v55 = vmul.f32 %v16960_v59, %v13675_v25 }
 0x494   : > { %v4851_v22 = vrot.slane %v4421_v10, %v16827_v61  ;;  %v4846_v51 = vrot.slane %v4419_v33, %v16821_v15  ;;  %v16961_v10 = vld [vmem:[#allocation148_spill] sm:$0xff]  ;;  %v16962_v33 = vld [vmem:[#allocation139_spill] sm:$0xff] }
 0x496   : > { %v4847_v12 = vsel %vm2253_vm2, %v4846_v51, %v4842_v63  ;;  %4614 = vadd.xlane.f32.xlu1 %v4374_v48  ;;  %4586 = vadd.xlane.f32.xlu0 %v4360_v30  ;;  %v4378_v63 = vmul.f32 %v16961_v10, %v13675_v25 }
 0x497   : > { %v13699_v3 = vsel %vm16877_vm14, %v4851_v22, %v4847_v12  ;;  %v4425_v35 = vpop.xlane.xlu1 %4424  ;;  %v4423_v24 = vpop.xlane.xlu0 %4422  ;;  %v4363_v22 = vmul.f32 %v16962_v33, %v13656_v49  ;;  %vm16974_vm14 = vcmask 1041409  }
 0x498   : > { %v4860_v32 = vrot.slane %v4425_v35, %v16761_v5  ;;  %v4856_v11 = vrot.slane %v4423_v24, %v16763_v13  ;;  %v16964_v35 = vld [vmem:[#allocation142_spill] sm:$0xff] }
 0x499   : > { %v4364_v24 = vmul.f32 %v16964_v35, %v13656_v49 }
 0x49a   : > { %v4861_v58 = vsel %vm2162_vm7, %v4860_v32, %v4856_v11  ;;  %4558 = vadd.xlane.f32.xlu1 %v4346_v37  ;;  %4616 = vadd.xlane.f32.xlu0 %v4375_v27  ;;  %v16965_v32 = vld [vmem:[#allocation111_spill] sm:$0xff] }
 0x49b   : > { %v4429_v0 = vpop.xlane.xlu1 %4428  ;;  %v4427_v38 = vpop.xlane.xlu0 %4426  ;;  %v4349_v11 = vmul.f32 %v16965_v32, %v13647_v39 }
 0x49c   : > { %v4870_v29 = vrot.slane %v4429_v0, %v16770_v42  ;;  %v4865_v47 = vrot.slane %v4427_v38, %v16766_v16  ;;  %v16967_v38 = vld [vmem:[#allocation131_spill] sm:$0xff] }
 0x49e   : > { %v4866_v46 = vsel %vm2169_vm8, %v4865_v47, %v4861_v58  ;;  %4618 = vadd.xlane.f32.xlu1 %v4376_v7  ;;  %4588 = vadd.xlane.f32.xlu0 %v4361_v19  ;;  %v16968_v47 = vld [vmem:[#allocation190_spill] sm:$0xff] }
 0x49f   : > { %v4433_v40 = vpop.xlane.xlu1 %4432  ;;  %v4871_v60 = vsel %vm2176_vm9, %v4870_v29, %v4866_v46  ;;  %v4431_v17 = vpop.xlane.xlu0 %4430  ;;  %v4350_v29 = vmul.f32 %v16967_v38, %v13647_v39  ;;  %v4379_v46 = vmul.f32 %v16968_v47, %v13675_v25 }
 0x4a0   : > { %v4880_v52 = vrot.slane %v4433_v40, %v16775_v1  ;;  %v4875_v53 = vrot.slane %v4431_v17, %v16772_v36  ;;  %v16969_v17 = vld [vmem:[#allocation192_spill] sm:$0xff] }
 0x4a2   : > { %v4876_v14 = vsel %vm2183_vm10, %v4875_v53, %v4871_v60  ;;  %4590 = vadd.xlane.f32.xlu1 %v4362_v62  ;;  %4560 = vadd.xlane.f32.xlu0 %v4347_v44  ;;  %v16970_v53 = vld [vmem:[#allocation50_spill] sm:$0xff] }
 0x4a3   : > { %v4437_v56 = vpop.xlane.xlu1 %4436  ;;  %v4881_v9 = vsel %vm2190_vm11, %v4880_v52, %v4876_v14  ;;  %v4435_v2 = vpop.xlane.xlu0 %4434  ;;  %v4380_v52 = vmul.f32 %v16969_v17, %v13675_v25  ;;  %v4365_v14 = vmul.f32 %v16970_v53, %v13656_v49 }
 0x4a4   : > { %v4890_v48 = vrot.slane %v4437_v56, %v16782_v54  ;;  %v4885_v34 = vrot.slane %v4435_v2, %v16778_v43  ;;  %v16971_v2 = vld [vmem:[#allocation49_spill] sm:$0xff] }
 0x4a6   : > { %v4886_v30 = vsel %vm2197_vm12, %v4885_v34, %v4881_v9  ;;  %4562 = vadd.xlane.f32.xlu1 %v4348_v20  ;;  %4620 = vadd.xlane.f32.xlu0 %v4377_v55  ;;  %v16972_v34 = vld [vmem:[#allocation132_spill] sm:$0xff] }
 0x4a7   : > { %v4441_v51 = vpop.xlane.xlu1 %4440  ;;  %v4891_v12 = vsel %vm2204_vm13, %v4890_v48, %v4886_v30  ;;  %v4439_v57 = vpop.xlane.xlu0 %4438  ;;  %v4366_v48 = vmul.f32 %v16971_v2, %v13656_v49  ;;  %v4351_v30 = vmul.f32 %v16972_v34, %v13647_v39 }
 0x4a8   : > { %v4900_v37 = vrot.slane %v4441_v51, %v16795_v6  ;;  %v4895_v21 = vrot.slane %v4439_v57, %v16784_v50 }
 0x4aa   : > { %v4896_v27 = vsel %vm16963_vm0, %v4895_v21, %v4891_v12  ;;  %4622 = vadd.xlane.f32.xlu1 %v4378_v63  ;;  %4592 = vadd.xlane.f32.xlu0 %v4363_v22 }
 0x4ab   : > { %v4445_v58 = vpop.xlane.xlu1 %4444  ;;  %v4901_v8 = vsel %vm16966_vm1, %v4900_v37, %v4896_v27  ;;  %v4443_v7 = vpop.xlane.xlu0 %4442  ;;  %v16975_v37 = vld [vmem:[#allocation133_spill] sm:$0xff]  ;;  %v16976_v27 = vld [vmem:[#allocation194_spill] sm:$0xff] }
 0x4ac   : > { %v4910_v28 = vrot.slane %v4445_v58, %v16806_v4  ;;  %v4905_v19 = vrot.slane %v4443_v7, %v16798_v45  ;;  %v4352_v21 = vmul.f32 %v16975_v37, %v13647_v39  ;;  %v4381_v35 = vmul.f32 %v16976_v27, %v13675_v25 }
 0x4ae   : > { %v4906_v0 = vsel %vm2225_vm6, %v4905_v19, %v4901_v8  ;;  %4594 = vadd.xlane.f32.xlu1 %v4364_v24  ;;  %4564 = vadd.xlane.f32.xlu0 %v4349_v11  ;;  %v16977_v8 = vld [vmem:[#allocation197_spill] sm:$0xff] }
 0x4af   : > { %v4449_v18 = vpop.xlane.xlu1 %4448  ;;  %v4911_v62 = vsel %vm2232_vm5, %v4910_v28, %v4906_v0  ;;  %v4447_v41 = vpop.xlane.xlu0 %4446  ;;  %v4382_v7 = vmul.f32 %v16977_v8, %v13675_v25  ;;  %v16978_v28 = vld [vmem:[#allocation137_spill] sm:$0xff] }
 0x4b0   : > { %v4920_v44 = vrot.slane %v4449_v18, %v16818_v26  ;;  %v4915_v40 = vrot.slane %v4447_v41, %v16813_v23  ;;  %v4367_v19 = vmul.f32 %v16978_v28, %v13656_v49 }
 0x4b2   : > { %v4916_v60 = vsel %vm2239_vm4, %v4915_v40, %v4911_v62  ;;  %4566 = vadd.xlane.f32.xlu1 %v4350_v29  ;;  %4624 = vadd.xlane.f32.xlu0 %v4379_v46  ;;  %v16979_v62 = vld [vmem:[#allocation108_spill] sm:$0xff] }
 0x4b3   : > { %v4453_v31 = vpop.xlane.xlu1 %4452  ;;  %v4921_v20 = vsel %vm2246_vm3, %v4920_v44, %v4916_v60  ;;  %v4451_v59 = vpop.xlane.xlu0 %4450  ;;  %v4368_v41 = vmul.f32 %v16979_v62, %v13656_v49  ;;  %v16980_v44 = vld [vmem:[#allocation27_spill] sm:$0xff] }
 0x4b4   : > { %v4930_v55 = vrot.slane %v4453_v31, %v16827_v61  ;;  %v4925_v56 = vrot.slane %v4451_v59, %v16821_v15  ;;  %v4353_v40 = vmul.f32 %v16980_v44, %v13647_v39 }
 0x4b6   : > { %v4926_v9 = vsel %vm2253_vm2, %v4925_v56, %v4921_v20  ;;  %4626 = vadd.xlane.f32.xlu1 %v4380_v52  ;;  %4596 = vadd.xlane.f32.xlu0 %v4365_v14  ;;  %v16981_v20 = vld [vmem:[#allocation60_spill] sm:$0xff] }
 0x4b7   : > { %v4931_v10 = vsel %vm16973_vm15, %v4930_v55, %v4926_v9  ;;  %v4457_v63 = vpop.xlane.xlu1 %4456  ;;  %v4455_v33 = vpop.xlane.xlu0 %4454  ;;  %v4354_v59 = vmul.f32 %v16981_v20, %v13647_v39  ;;  %v16982_v55 = vld [vmem:[#allocation198_spill] sm:$0xff] }
 0x4b8   : > { %v13766_v22 = vsel %vm16974_vm14, %v4931_v10, %v13699_v3  ;;  %v4939_v51 = vrot.slane %v4457_v63, %v16761_v5  ;;  %v4935_v12 = vrot.slane %v4455_v33, %v16763_v13  ;;  %v4383_v56 = vmul.f32 %v16982_v55, %v13675_v25  ;;  %v16983_v63 = vld [vmem:[#allocation199_spill] sm:$0xff] }
 0x4b9   : > { %v4384_v33 = vmul.f32 %v16983_v63, %v13675_v25  ;;  %vm16991_vm14 = vcmask 1042434  }
 0x4ba   : > { %v4940_v57 = vsel %vm2162_vm7, %v4939_v51, %v4935_v12  ;;  %4598 = vadd.xlane.f32.xlu1 %v4366_v48  ;;  %4568 = vadd.xlane.f32.xlu0 %v4351_v30  ;;  %v16984_v51 = vld [vmem:[#allocation17_spill] sm:$0xff] }
 0x4bb   : > { %v4461_v24 = vpop.xlane.xlu1 %4460  ;;  %v4459_v32 = vpop.xlane.xlu0 %4458  ;;  %v4369_v12 = vmul.f32 %v16984_v51, %v13656_v49 }
 0x4bc   : > { %v4949_v11 = vrot.slane %v4461_v24, %v16770_v42  ;;  %v4944_v3 = vrot.slane %v4459_v32, %v16766_v16  ;;  %v16985_v32 = vld [vmem:[#allocation40_spill] sm:$0xff] }
 0x4be   : > { %v4945_v58 = vsel %vm2169_vm8, %v4944_v3, %v4940_v57  ;;  %4570 = vadd.xlane.f32.xlu1 %v4352_v21  ;;  %4628 = vadd.xlane.f32.xlu0 %v4381_v35  ;;  %v16986_v3 = vld [vmem:[#allocation83_spill] sm:$0xff] }
 0x4bf   : > { %v4465_v0 = vpop.xlane.xlu1 %4464  ;;  %v4950_v38 = vsel %vm2176_vm9, %v4949_v11, %v4945_v58  ;;  %v4463_v29 = vpop.xlane.xlu0 %4462  ;;  %v4370_v11 = vmul.f32 %v16985_v32, %v13656_v49  ;;  %v4355_v58 = vmul.f32 %v16986_v3, %v13647_v39 }
 0x4c0   : > { %v4959_v47 = vrot.slane %v4465_v0, %v16775_v1  ;;  %v4954_v46 = vrot.slane %v4463_v29, %v16772_v36  ;;  %v16987_v29 = vld [vmem:[#allocation168_spill] sm:$0xff] }
 0x4c2   : > { %v4955_v18 = vsel %vm2183_vm10, %v4954_v46, %v4950_v38  ;;  %4630 = vadd.xlane.f32.xlu1 %v4382_v7  ;;  %4600 = vadd.xlane.f32.xlu0 %v4367_v19  ;;  %v16988_v46 = vld [vmem:[#allocation200_spill] sm:$0xff] }
 0x4c3   : > { %v4469_v60 = vpop.xlane.xlu1 %4468  ;;  %v4960_v17 = vsel %vm2190_vm11, %v4959_v47, %v4955_v18  ;;  %v4467_v52 = vpop.xlane.xlu0 %4466  ;;  %v4356_v47 = vmul.f32 %v16987_v29, %v13647_v39  ;;  %v4385_v18 = vmul.f32 %v16988_v46, %v13675_v25 }
 0x4c4   : > { %v4969_v53 = vrot.slane %v4469_v60, %v16782_v54  ;;  %v4964_v14 = vrot.slane %v4467_v52, %v16778_v43  ;;  %v16989_v52 = vld [vmem:[#allocation103_spill] sm:$0xff] }
 0x4c6   : > { %v4965_v31 = vsel %vm2197_vm12, %v4964_v14, %v4960_v17  ;;  %4602 = vadd.xlane.f32.xlu1 %v4368_v41  ;;  %4572 = vadd.xlane.f32.xlu0 %v4353_v40  ;;  %v16990_v14 = vld [vmem:[#allocation189_spill] sm:$0xff] }
 0x4c7   : > { %v4473_v9 = vpop.xlane.xlu1 %4472  ;;  %v4970_v2 = vsel %vm2204_vm13, %v4969_v53, %v4965_v31  ;;  %v4471_v48 = vpop.xlane.xlu0 %4470  ;;  %v4386_v53 = vmul.f32 %v16989_v52, %v13675_v25  ;;  %v4371_v31 = vmul.f32 %v16990_v14, %v13656_v49 }
 0x4c8   : > { %v4979_v34 = vrot.slane %v4473_v9, %v16795_v6  ;;  %v4974_v30 = vrot.slane %v4471_v48, %v16784_v50 }
 0x4ca   : > { %v4975_v10 = vsel %vm16963_vm0, %v4974_v30, %v4970_v2  ;;  %4574 = vadd.xlane.f32.xlu1 %v4354_v59  ;;  %4632 = vadd.xlane.f32.xlu0 %v4383_v56 }
 0x4cb   : > { %v4477_v57 = vpop.xlane.xlu1 %4476  ;;  %v4980_v37 = vsel %vm16966_vm1, %v4979_v34, %v4975_v10  ;;  %v4475_v21 = vpop.xlane.xlu0 %4474  ;;  %v16992_v34 = vld [vmem:[#allocation149_spill] sm:$0xff]  ;;  %v16993_v10 = vld [vmem:[#allocation143_spill] sm:$0xff] }
 0x4cc   : > { %v4989_v27 = vrot.slane %v4477_v57, %v16806_v4  ;;  %v4984_v35 = vrot.slane %v4475_v21, %v16798_v45  ;;  %v4372_v30 = vmul.f32 %v16992_v34, %v13656_v49  ;;  %v4357_v63 = vmul.f32 %v16993_v10, %v13647_v39 }
 0x4ce   : > { %v4985_v24 = vsel %vm2225_vm6, %v4984_v35, %v4980_v37  ;;  %4634 = vadd.xlane.f32.xlu1 %v4384_v33  ;;  %4604 = vadd.xlane.f32.xlu0 %v4369_v12  ;;  %v16994_v37 = vld [vmem:[#allocation193_spill] sm:$0xff] }
 0x4cf   : > { %v4481_v8 = vpop.xlane.xlu1 %4480  ;;  %v4990_v7 = vsel %vm2232_vm5, %v4989_v27, %v4985_v24  ;;  %v4479_v28 = vpop.xlane.xlu0 %4478  ;;  %v4373_v21 = vmul.f32 %v16994_v37, %v13656_v49  ;;  %v16995_v27 = vld [vmem:[#allocation107_spill] sm:$0xff]  ;;  %v16997_v49 = vld [vmem:[#allocation130_spill] sm:$0xff] }
 0x4d0   : > { %v4999_v19 = vrot.slane %v4481_v8, %v16818_v26  ;;  %v4994_v0 = vrot.slane %v4479_v28, %v16813_v23  ;;  %v4387_v35 = vmul.f32 %v16995_v27, %v13675_v25  ;;  %v16996_v8 = vld [vmem:[#allocation84_spill] sm:$0xff]  ;;  %v4389_v28 = vmul.f32 %v16997_v49, %v13675_v25 }
 0x4d2   : > { %v4995_v38 = vsel %vm2239_vm4, %v4994_v0, %v4990_v7  ;;  %4606 = vadd.xlane.f32.xlu1 %v4370_v11  ;;  %4576 = vadd.xlane.f32.xlu0 %v4355_v58  ;;  %v4388_v7 = vmul.f32 %v16996_v8, %v13675_v25 }
 0x4d3   : > { %v4485_v62 = vpop.xlane.xlu1 %4484  ;;  %v5000_v41 = vsel %vm2246_vm3, %v4999_v19, %v4995_v38  ;;  %v4483_v44 = vpop.xlane.xlu0 %4482 }
 0x4d4   : > { %v5009_v40 = vrot.slane %v4485_v62, %v16827_v61  ;;  %v5004_v60 = vrot.slane %v4483_v44, %v16821_v15 }
 0x4d6   : > { %v5005_v17 = vsel %vm2253_vm2, %v5004_v60, %v5000_v41  ;;  %4578 = vadd.xlane.f32.xlu1 %v4356_v47  ;;  %4636 = vadd.xlane.f32.xlu0 %v4385_v18 }
 0x4d7   : > { %v5010_v20 = vsel %vm16973_vm15, %v5009_v40, %v5005_v17  ;;  %v4489_v59 = vpop.xlane.xlu1 %4488  ;;  %v4487_v55 = vpop.xlane.xlu0 %4486 }
 0x4d8   : > { %v13833_v56 = vsel %vm16991_vm14, %v5010_v20, %v13766_v22  ;;  %v5018_v9 = vrot.slane %v4489_v59, %v16761_v5  ;;  %v5014_v2 = vrot.slane %v4487_v55, %v16763_v13  ;;  %vm16998_vm14 = vcmask 1043459  }
 0x4da   : > { %v5019_v48 = vsel %vm2162_vm7, %v5018_v9, %v5014_v2  ;;  %4638 = vadd.xlane.f32.xlu1 %v4386_v53  ;;  %4608 = vadd.xlane.f32.xlu0 %v4371_v31 }
 0x4db   : > { %v4493_v33 = vpop.xlane.xlu1 %4492  ;;  %v4491_v51 = vpop.xlane.xlu0 %4490 }
 0x4dc   : > { %v5028_v12 = vrot.slane %v4493_v33, %v16770_v42  ;;  %v5023_v22 = vrot.slane %v4491_v51, %v16766_v16 }
 0x4de   : > { %v5024_v57 = vsel %vm2169_vm8, %v5023_v22, %v5019_v48  ;;  %4610 = vadd.xlane.f32.xlu1 %v4372_v30  ;;  %4580 = vadd.xlane.f32.xlu0 %v4357_v63 }
 0x4df   : > { %v4497_v24 = vpop.xlane.xlu1 %4496  ;;  %v5029_v32 = vsel %vm2176_vm9, %v5028_v12, %v5024_v57  ;;  %v4495_v39 = vpop.xlane.xlu0 %4494 }
 0x4e0   : > { %v5038_v11 = vrot.slane %v4497_v24, %v16775_v1  ;;  %v5033_v3 = vrot.slane %v4495_v39, %v16772_v36 }
 0x4e2   : > { %v5034_v58 = vsel %vm2183_vm10, %v5033_v3, %v5029_v32  ;;  %4612 = vadd.xlane.f32.xlu1 %v4373_v21  ;;  %4640 = vadd.xlane.f32.xlu0 %v4387_v35 }
 0x4e3   : > { %v4501_v19 = vpop.xlane.xlu1 %4500  ;;  %v5039_v0 = vsel %vm2190_vm11, %v5038_v11, %v5034_v58  ;;  %v4499_v38 = vpop.xlane.xlu0 %4498 }
 0x4e4   : > { %v5048_v29 = vrot.slane %v4501_v19, %v16782_v54  ;;  %v5043_v47 = vrot.slane %v4499_v38, %v16778_v43 }
 0x4e6   : > { %v5044_v46 = vsel %vm2197_vm12, %v5043_v47, %v5039_v0  ;;  %4642 = vadd.xlane.f32.xlu0 %v4388_v7  ;;  %4644 = vadd.xlane.f32.xlu1 %v4389_v28 }
 0x4e7   : > { %v4505_v18 = vpop.xlane.xlu1 %4504  ;;  %v5049_v62 = vsel %vm2204_vm13, %v5048_v29, %v5044_v46  ;;  %v4503_v41 = vpop.xlane.xlu0 %4502 }
 0x4e8   : > { %v5058_v44 = vrot.slane %v4505_v18, %v16795_v6  ;;  %v5053_v25 = vrot.slane %v4503_v41, %v16784_v50 }
 0x4ea   : > { %v5054_v40 = vsel %vm16963_vm0, %v5053_v25, %v5049_v62 }
 0x4eb   : > { %v4509_v60 = vpop.xlane.xlu1 %4508  ;;  %v5059_v17 = vsel %vm16966_vm1, %v5058_v44, %v5054_v40  ;;  %v4507_v52 = vpop.xlane.xlu0 %4506 }
 0x4ec   : > { %v5068_v53 = vrot.slane %v4509_v60, %v16806_v4  ;;  %v5063_v14 = vrot.slane %v4507_v52, %v16798_v45 }
 0x4ee   : > { %v5064_v31 = vsel %vm2225_vm6, %v5063_v14, %v5059_v17 }
 0x4ef   : > { %v4513_v20 = vpop.xlane.xlu1 %4512  ;;  %v5069_v59 = vsel %vm2232_vm5, %v5068_v53, %v5064_v31  ;;  %v4511_v55 = vpop.xlane.xlu0 %4510 }
 0x4f0   : > { %v5078_v9 = vrot.slane %v4513_v20, %v16818_v26  ;;  %v5073_v2 = vrot.slane %v4511_v55, %v16813_v23 }
 0x4f2   : > { %v5074_v48 = vsel %vm2239_vm4, %v5073_v2, %v5069_v59 }
 0x4f3   : > { %v4517_v34 = vpop.xlane.xlu1 %4516  ;;  %v5079_v30 = vsel %vm2246_vm3, %v5078_v9, %v5074_v48  ;;  %v4515_v10 = vpop.xlane.xlu0 %4514 }
 0x4f4   : > { %v5088_v63 = vrot.slane %v4517_v34, %v16827_v61  ;;  %v5083_v33 = vrot.slane %v4515_v10, %v16821_v15 }
 0x4f6   : > { %v5084_v51 = vsel %vm2253_vm2, %v5083_v33, %v5079_v30 }
 0x4f7   : > { %v5089_v12 = vsel %vm16973_vm15, %v5088_v63, %v5084_v51  ;;  %v4521_v22 = vpop.xlane.xlu1 %4520  ;;  %v4519_v57 = vpop.xlane.xlu0 %4518 }
 0x4f8   : > { %v5408_v37 = vsel %vm16998_vm14, %v5089_v12, %v13833_v56  ;;  %v5097_v21 = vrot.slane %v4521_v22, %v16761_v5  ;;  %v5093_v27 = vrot.slane %v4519_v57, %v16763_v13  ;;  %vm16999_vm14 = vcmask 1044484  }
 0x4fa   : > { %v5098_v35 = vsel %vm2162_vm7, %v5097_v21, %v5093_v27 }
 0x4fb   : > { %v4525_v24 = vpop.xlane.xlu1 %4524  ;;  %v4523_v32 = vpop.xlane.xlu0 %4522 }
 0x4fc   : > { %v5107_v39 = vrot.slane %v4525_v24, %v16770_v42  ;;  %v5102_v11 = vrot.slane %v4523_v32, %v16766_v16 }
 0x4fe   : > { %v5103_v3 = vsel %vm2169_vm8, %v5102_v11, %v5098_v35 }
 0x4ff   : > { %v4529_v58 = vpop.xlane.xlu1 %4528  ;;  %v5108_v8 = vsel %vm2176_vm9, %v5107_v39, %v5103_v3  ;;  %v4527_v7 = vpop.xlane.xlu0 %4526 }
 0x500   : > { %v5117_v56 = vrot.slane %v4529_v58, %v16775_v1  ;;  %v5112_v49 = vrot.slane %v4527_v7, %v16772_v36 }
 0x502   : > { %v5113_v28 = vsel %vm2183_vm10, %v5112_v49, %v5108_v8 }
 0x503   : > { %v4533_v19 = vpop.xlane.xlu1 %4532  ;;  %v5118_v0 = vsel %vm2190_vm11, %v5117_v56, %v5113_v28  ;;  %v4531_v38 = vpop.xlane.xlu0 %4530 }
 0x504   : > { %v5127_v29 = vrot.slane %v4533_v19, %v16782_v54  ;;  %v5122_v47 = vrot.slane %v4531_v38, %v16778_v43 }
 0x506   : > { %v5123_v46 = vsel %vm2197_vm12, %v5122_v47, %v5118_v0 }
 0x507   : > { %v4537_v18 = vpop.xlane.xlu1 %4536  ;;  %v5128_v62 = vsel %vm2204_vm13, %v5127_v29, %v5123_v46  ;;  %v4535_v41 = vpop.xlane.xlu0 %4534 }
 0x508   : > { %v5137_v44 = vrot.slane %v4537_v18, %v16795_v6  ;;  %v5132_v25 = vrot.slane %v4535_v41, %v16784_v50 }
 0x50a   : > { %v5133_v40 = vsel %vm16963_vm0, %v5132_v25, %v5128_v62 }
 0x50b   : > { %v4541_v60 = vpop.xlane.xlu1 %4540  ;;  %v5138_v17 = vsel %vm16966_vm1, %v5137_v44, %v5133_v40  ;;  %v4539_v52 = vpop.xlane.xlu0 %4538 }
 0x50c   : > { %v5147_v53 = vrot.slane %v4541_v60, %v16806_v4  ;;  %v5142_v14 = vrot.slane %v4539_v52, %v16798_v45 }
 0x50e   : > { %v5143_v31 = vsel %vm2225_vm6, %v5142_v14, %v5138_v17 }
 0x50f   : > { %v4545_v20 = vpop.xlane.xlu1 %4544  ;;  %v5148_v59 = vsel %vm2232_vm5, %v5147_v53, %v5143_v31  ;;  %v4543_v55 = vpop.xlane.xlu0 %4542 }
 0x510   : > { %v5157_v9 = vrot.slane %v4545_v20, %v16818_v26  ;;  %v5152_v2 = vrot.slane %v4543_v55, %v16813_v23 }
 0x512   : > { %v5153_v48 = vsel %vm2239_vm4, %v5152_v2, %v5148_v59 }
 0x513   : > { %v4549_v34 = vpop.xlane.xlu1 %4548  ;;  %v5158_v30 = vsel %vm2246_vm3, %v5157_v9, %v5153_v48  ;;  %v4547_v10 = vpop.xlane.xlu0 %4546 }
 0x514   : > { %v5167_v63 = vrot.slane %v4549_v34, %v16827_v61  ;;  %v5162_v33 = vrot.slane %v4547_v10, %v16821_v15 }
 0x516   : > { %v5163_v51 = vsel %vm2253_vm2, %v5162_v33, %v5158_v30 }
 0x517   : > { %v5168_v12 = vsel %vm16973_vm15, %v5167_v63, %v5163_v51  ;;  %v4553_v22 = vpop.xlane.xlu1 %4552  ;;  %v4551_v57 = vpop.xlane.xlu0 %4550 }
 0x518   : > { %v5176_v21 = vrot.slane %v4553_v22, %v16761_v5  ;;  %v5172_v27 = vrot.slane %v4551_v57, %v16763_v13  ;;  %v13914_v35 = vsel %vm16999_vm14, %v5168_v12, %v5408_v37 }
 0x51a   : > { %v5177_v24 = vsel %vm2162_vm7, %v5176_v21, %v5172_v27 }
 0x51b   : > { %v4583_v32 = vpop.xlane.xlu1 %4582  ;;  %v4555_v39 = vpop.xlane.xlu0 %4554 }
 0x51c   : > { %v5181_v11 = vrot.slane %v4555_v39, %v16766_v16  ;;  %v5251_v7 = vrot.slane %v4583_v32, %v16763_v13 }
 0x51e   : > { %v5182_v3 = vsel %vm2169_vm8, %v5181_v11, %v5177_v24 }
 0x51f   : > { %v4557_v58 = vpop.xlane.xlu1 %4556  ;;  %v4585_v8 = vpop.xlane.xlu0 %4584 }
 0x520   : > { %v5186_v56 = vrot.slane %v4557_v58, %v16770_v42  ;;  %v5255_v49 = vrot.slane %v4585_v8, %v16761_v5 }
 0x522   : > { %v5187_v28 = vsel %vm2176_vm9, %v5186_v56, %v5182_v3  ;;  %v5256_v37 = vsel %vm2162_vm7, %v5255_v49, %v5251_v7 }
 0x523   : > { %v4615_v19 = vpop.xlane.xlu1 %4614  ;;  %v4587_v0 = vpop.xlane.xlu0 %4586 }
 0x524   : > { %v5260_v38 = vrot.slane %v4587_v0, %v16766_v16  ;;  %v5330_v24 = vrot.slane %v4615_v19, %v16763_v13 }
 0x526   : > { %v5261_v29 = vsel %vm2169_vm8, %v5260_v38, %v5256_v37 }
 0x527   : > { %v4559_v47 = vpop.xlane.xlu1 %4558  ;;  %v4617_v46 = vpop.xlane.xlu0 %4616 }
 0x528   : > { %v5334_v57 = vrot.slane %v4617_v46, %v16761_v5  ;;  %v5191_v21 = vrot.slane %v4559_v47, %v16772_v36 }
 0x52a   : > { %v5335_v8 = vsel %vm2162_vm7, %v5334_v57, %v5330_v24  ;;  %v5192_v56 = vsel %vm2183_vm10, %v5191_v21, %v5187_v28  ;;  %vm17000_vm7 = vmmov %vm16963_vm0 }
 0x52b   : > { %v4619_v18 = vpop.xlane.xlu1 %4618  ;;  %v4589_v62 = vpop.xlane.xlu0 %4588 }
 0x52c   : > { %v5339_v27 = vrot.slane %v4619_v18, %v16766_v16  ;;  %v5265_v32 = vrot.slane %v4589_v62, %v16770_v42 }
 0x52e   : > { %v5340_v16 = vsel %vm2169_vm8, %v5339_v27, %v5335_v8  ;;  %v5266_v37 = vsel %vm2176_vm9, %v5265_v32, %v5261_v29  ;;  %vm17001_vm8 = vmmov %vm16966_vm1 }
 0x52f   : > { %v4591_v41 = vpop.xlane.xlu1 %4590  ;;  %v4561_v44 = vpop.xlane.xlu0 %4560 }
 0x530   : > { %v5270_v3 = vrot.slane %v4591_v41, %v16772_v36  ;;  %v5196_v58 = vrot.slane %v4561_v44, %v16775_v1 }
 0x532   : > { %v5197_v28 = vsel %vm2190_vm11, %v5196_v58, %v5192_v56 }
 0x533   : > { %v4563_v25 = vpop.xlane.xlu1 %4562  ;;  %v4621_v40 = vpop.xlane.xlu0 %4620 }
 0x534   : > { %v5201_v7 = vrot.slane %v4563_v25, %v16778_v43  ;;  %v5344_v5 = vrot.slane %v4621_v40, %v16770_v42  ;;  %v5271_v42 = vsel %vm2183_vm10, %v5270_v3, %v5266_v37 }
 0x536   : > { %v5202_v41 = vsel %vm2197_vm12, %v5201_v7, %v5197_v28  ;;  %v5345_v29 = vsel %vm2176_vm9, %v5344_v5, %v5340_v16  ;;  %vm17002_vm9 = vmmov %vm16963_vm0  ;;  %vm17005_vm0 = vcmask 1045509  }
 0x537   : > { %v4623_v60 = vpop.xlane.xlu1 %4622  ;;  %v4593_v17 = vpop.xlane.xlu0 %4592 }
 0x538   : > { %v5275_v13 = vrot.slane %v4593_v17, %v16775_v1  ;;  %v5349_v19 = vrot.slane %v4623_v60, %v16772_v36 }
 0x53a   : > { %v5276_v25 = vsel %vm2190_vm11, %v5275_v13, %v5271_v42 }
 0x53b   : > { %v4595_v52 = vpop.xlane.xlu1 %4594  ;;  %v4565_v53 = vpop.xlane.xlu0 %4564 }
 0x53c   : > { %v5206_v49 = vrot.slane %v4565_v53, %v16782_v54  ;;  %v5280_v0 = vrot.slane %v4595_v52, %v16778_v43 }
 0x53e   : > { %v5207_v40 = vsel %vm2204_vm13, %v5206_v49, %v5202_v41  ;;  %v5281_v52 = vsel %vm2197_vm12, %v5280_v0, %v5276_v25 }
 0x53f   : > { %v4567_v14 = vpop.xlane.xlu1 %4566  ;;  %v4625_v31 = vpop.xlane.xlu0 %4624 }
 0x540   : > { %v5211_v38 = vrot.slane %v4567_v14, %v16784_v50  ;;  %v5354_v18 = vrot.slane %v4625_v31, %v16775_v1  ;;  %v5350_v1 = vsel %vm2183_vm10, %v5349_v19, %v5345_v29  ;;  %vm17003_vm10 = vmmov %vm16966_vm1 }
 0x542   : > { %v5212_v53 = vsel %vm17000_vm7, %v5211_v38, %v5207_v40 }
 0x543   : > { %v13926_v20 = vpop.xlane.xlu1 %4626  ;;  %v4597_v59 = vpop.xlane.xlu0 %4596 }
 0x544   : > { %v5285_v36 = vrot.slane %v4597_v59, %v16782_v54  ;;  %v5359_v24 = vrot.slane %v13926_v20, %v16778_v43 }
 0x547   : > { %v13928_v55 = vpop.xlane.xlu1 %4598  ;;  %v4569_v9 = vpop.xlane.xlu0 %4568 }
 0x548   : > { %v5216_v62 = vrot.slane %v4569_v9, %v16795_v6  ;;  %v5290_v60 = vrot.slane %v13928_v55, %v16784_v50  ;;  %v5355_v9 = vsel %vm2190_vm11, %v5354_v18, %v5350_v1  ;;  %vm17004_vm11 = vmmov %vm16973_vm15  ;;  %vm17009_vm15 = vcmask 1046534  }
 0x54b   : > { %v4571_v2 = vpop.xlane.xlu1 %4570  ;;  %v13930_v48 = vpop.xlane.xlu0 %4628 }
 0x54c   : > { %v5221_v44 = vrot.slane %v4571_v2, %v16798_v45  ;;  %v5217_v2 = vsel %vm17001_vm8, %v5216_v62, %v5212_v53 }
 0x54e   : > { %v5222_v21 = vsel %vm2225_vm6, %v5221_v44, %v5217_v2 }
 0x54f   : > { %v13932_v34 = vpop.xlane.xlu1 %4630  ;;  %v13934_v30 = vpop.xlane.xlu0 %4600 }
 0x550   : > { %v5295_v57 = vrot.slane %v13934_v30, %v16795_v6  ;;  %v5369_v58 = vrot.slane %v13932_v34, %v16784_v50 }
 0x553   : > { %v13936_v10 = vpop.xlane.xlu1 %4602  ;;  %v4573_v63 = vpop.xlane.xlu0 %4572 }
 0x554   : > { %v5226_v17 = vrot.slane %v4573_v63, %v16806_v4  ;;  %v5286_v63 = vsel %vm2204_vm13, %v5285_v36, %v5281_v52  ;;  %v5300_v27 = vrot.slane %v13936_v10, %v16798_v45 }
 0x555   : > { %v5291_v32 = vsel %vm17002_vm9, %v5290_v60, %v5286_v63 }
 0x556   : > { %v5227_v3 = vsel %vm2232_vm5, %v5226_v17, %v5222_v21  ;;  %v5296_v20 = vsel %vm17003_vm10, %v5295_v57, %v5291_v32 }
 0x557   : > { %v4575_v33 = vpop.xlane.xlu1 %4574  ;;  %v13938_v51 = vpop.xlane.xlu0 %4632 }
 0x558   : > { %v5231_v14 = vrot.slane %v4575_v33, %v16813_v23  ;;  %v5374_v50 = vrot.slane %v13938_v51, %v16795_v6 }
 0x55a   : > { %v5232_v10 = vsel %vm2239_vm4, %v5231_v14, %v5227_v3 }
 0x55b   : > { %v13940_v12 = vpop.xlane.xlu1 %4634  ;;  %v13942_v22 = vpop.xlane.xlu0 %4604 }
 0x55c   : > { %v5305_v30 = vrot.slane %v13942_v22, %v16806_v4  ;;  %v5379_v16 = vrot.slane %v13940_v12, %v16798_v45 }
 0x55f   : > { %v13949_v39 = vpop.xlane.xlu1 %4606  ;;  %v4577_v11 = vpop.xlane.xlu0 %4576 }
 0x560   : > { %v5236_v55 = vrot.slane %v4577_v11, %v16818_v26  ;;  %v5364_v11 = vrot.slane %v13930_v48, %v16782_v54  ;;  %v5310_v8 = vrot.slane %v13949_v39, %v16813_v23  ;;  %v5301_v54 = vsel %vm2225_vm6, %v5300_v27, %v5296_v20 }
 0x561   : > { %v5360_v39 = vsel %vm2197_vm12, %v5359_v24, %v5355_v9  ;;  %v5306_v13 = vsel %vm2232_vm5, %v5305_v30, %v5301_v54  ;;  %vm17006_vm12 = vmmov %vm17000_vm7 }
 0x562   : > { %v5237_v5 = vsel %vm2246_vm3, %v5236_v55, %v5232_v10  ;;  %v5365_v37 = vsel %vm2204_vm13, %v5364_v11, %v5360_v39  ;;  %v5311_v19 = vsel %vm2239_vm4, %v5310_v8, %v5306_v13  ;;  %vm17007_vm13 = vmmov %vm16966_vm1 }
 0x563   : > { %v4579_v47 = vpop.xlane.xlu1 %4578  ;;  %v13964_v46 = vpop.xlane.xlu0 %4636  ;;  %v5370_v45 = vsel %vm17006_vm12, %v5369_v58, %v5365_v37  ;;  %vm17008_vm1 = vmmov %vm17004_vm11 }
 0x564   : > { %v5241_v33 = vrot.slane %v4579_v47, %v16821_v15  ;;  %v5384_v6 = vrot.slane %v13964_v46, %v16806_v4  ;;  %v5375_v28 = vsel %vm17007_vm13, %v5374_v50, %v5370_v45 }
 0x565   : > { %v5380_v46 = vsel %vm2225_vm6, %v5379_v16, %v5375_v28 }
 0x566   : > { %v5242_v48 = vsel %vm2253_vm2, %v5241_v33, %v5237_v5  ;;  %v5385_v62 = vsel %vm2232_vm5, %v5384_v6, %v5380_v46  ;;  %vm17010_vm5 = vmmov %vm17008_vm1 }
 0x567   : > { %v4639_v31 = vpop.xlane.xlu1 %4638  ;;  %v4609_v59 = vpop.xlane.xlu0 %4608 }
 0x568   : > { %v5315_v56 = vrot.slane %v4609_v59, %v16818_v26  ;;  %v5389_v12 = vrot.slane %v4639_v31, %v16813_v23 }
 0x56a   : > { %v5316_v47 = vsel %vm2246_vm3, %v5315_v56, %v5311_v19  ;;  %v5390_v36 = vsel %vm2239_vm4, %v5389_v12, %v5385_v62  ;;  %vm17011_vm4 = vcmask 1047559  }
 0x56b   : > { %v4611_v7 = vpop.xlane.xlu1 %4610  ;;  %v4581_v43 = vpop.xlane.xlu0 %4580 }
 0x56c   : > { %v5246_v22 = vrot.slane %v4581_v43, %v16827_v61  ;;  %v5320_v34 = vrot.slane %v4611_v7, %v16821_v15 }
 0x56e   : > { %v5247_v49 = vsel %vm17004_vm11, %v5246_v22, %v5242_v48  ;;  %v5321_v18 = vsel %vm2253_vm2, %v5320_v34, %v5316_v47 }
 0x56f   : > { %v5410_v51 = vsel %vm17005_vm0, %v5247_v49, %v13914_v35  ;;  %v4613_v0 = vpop.xlane.xlu1 %4612  ;;  %v4641_v38 = vpop.xlane.xlu0 %4640 }
 0x570   : > { %v5325_v42 = vrot.slane %v4613_v0, %v16827_v61  ;;  %v5394_v4 = vrot.slane %v4641_v38, %v16818_v26 }
 0x572   : > { %v5326_v35 = vsel %vm17008_vm1, %v5325_v42, %v5321_v18  ;;  %v5395_v25 = vsel %vm2246_vm3, %v5394_v4, %v5390_v36 }
 0x573   : > { %v5411_v23 = vsel %vm17009_vm15, %v5326_v35, %v5410_v51  ;;  %v4643_v41 = vpop.xlane.xlu0 %4642  ;;  %v4645_v29 = vpop.xlane.xlu1 %4644 }
 0x574   : > { %v5399_v44 = vrot.slane %v4643_v41, %v16821_v15  ;;  %v5404_v26 = vrot.slane %v4645_v29, %v16827_v61 }
 0x576   : > { %v5400_v40 = vsel %vm2253_vm2, %v5399_v44, %v5395_v25 }
 0x577   : > { %v5405_v60 = vsel %vm17010_vm5, %v5404_v26, %v5400_v40 }
 0x578   : > { %v5412_v15 = vsel %vm17011_vm4, %v5405_v60, %v5411_v23 }
 0x579   : > { %5527 = vst [vmem:[%s13557_s15 + $0x8] sm:$0xff] %v5412_v15 }
 0x57a   : > { %6722 = shalt.err (!%p6719_p7)
}
 0x57b   : > { %s6723_s20 = scalar_lea.hbm %s14049_s22, 256  ;;  %s6727_s25 = scalar_lea.hbm %s14098_s2, 512 }
 0x57c   : > { %p6724_p9 = scmp.ne.s32.totalorder %s14049_s22, %s6723_s20  ;;  %p6728_p5 = scmp.lt.u32.totalorder %s14049_s22, %s14098_s2 }
 0x57d   : > { %p6729_p11 = scmp.lt.u32.totalorder %s6727_s25, %s6723_s20  ;;  %p6731_p4 = scmp.lt.u32.totalorder %s6723_s20, %s14049_s22 }
 0x57e   : > { %p6725_p1 = pnand %p6724_p9, %p6898_p12 }
 0x57f   : > { %p6730_p2 = por %p6729_p11, %p6728_p5 }
 0x580   : > { %p6726_p0 = pneg %p6725_p1 }
 0x581   : > { %p6732_p6 = por %p6731_p4, %p6730_p2 }
 0x583   : > { %p6733_p8 = pnand %p6732_p6, %p6726_p0 }
 0x585   : > { %6736 = shalt.err (!%p6733_p8)
}
 0x586   : > { %s6787_s30 = smov 128   ;;  %s6788_s23 = smov 8  }
 0x587   : > { %5541 = dma.vmem_to_hbm [thread:$0]  (%p6898_p12), %s14043_s17, 256, %s14049_s22, %s5417_s13, %s6787_s30, %s6787_s30, %s6788_s23  }
 0x588 PF: > { %s5445_s15 = sand.u32 1, %s6767_s9   ;;  %p17012_p10 = scmp.ne.s32.totalorder %s14782_s16, 0 }
 0x589   : > { %p17013_p13 = scmp.ge.s32.totalorder %s6779_s12, 2  ;;  %s5446_s4 = scalar_lea.sflag [#allocation4], %s5445_s15 }
 0x58b   : > { %p5552_p3 = pnand %p17013_p13, %p17012_p10 }
 0x58d   : > { %6762 = dma.done.wait (!%p5552_p3), %s5446_s4, 256  }
 0x58e   : > { %6764 = vsyncadd (!%p5552_p3), %s5446_s4, 4294967040  ;;  %p16_p7 = scmp.ge.s32.totalorder %s6860_s21, 4   ;;  %s17014_s9 = smov %s6771_s10 }
 0x58f   : > { %s17015_s10 = smov %s6775_s11  ;;  %s17016_s11 = smov %s6894_s8 }
 0x590   : > { %s17017_s12 = smov %s6860_s21  ;;  %18 = sbr.rel (!%p16_p7) target bundleno = 6 (0x6), region = 79 }
 0x597   :  { %5451 = vsyncpa [#allocation3], 1 }
 0x598   :  { %5453 = vsyncpa [#allocation3 + $0x1], 1 }
 0x599   :  { %5454 = vsyncpa [#allocation6], 1 }
 0x59a   :  { %5455 = vsyncpa [#allocation4], 1 }
 0x59b   :  { %5457 = vsyncpa [#allocation4 + $0x1], 1 }

</bundles_post_ra>
